<compile_context>
chip_gen: v7x
topology: tpu7x:2x2x1
jax: 0.10.0
libtpu: 0.0.40
codegen_flags: <defaults>
</compile_context>

<pallas_src>
import functools

import jax
import jax.numpy as jnp
import numpy as np
from jax.experimental import pallas as pl
from jax.experimental.pallas import tpu as pltpu


def _round_up(x, m):
    return ((x + m - 1) // m) * m


# ---------------------------------------------------------------------------
# Fused kernel: whole INR forward on one (tn, :) tile of points.
# ---------------------------------------------------------------------------
def _inr_fused_kernel(x_ref, w0_ref, b0_ref, wh_ref, bh_ref, wo_ref, bo_ref, o_ref,
                      *, omega_first, omega_hidden, n_hidden, din):
    x = x_ref[...]                                     # (tn, din) f32

    # ---- first FinerLayer ------------------------------------------------
    if din <= 8:
        # Tiny contraction dim: VPU broadcast-FMA, keeps the MXU free and avoids
        # a lane-sparse (tn, din) matmul operand.
        z = b0_ref[...]                                # (1, HP)
        for k in range(din):
            z = z + x[:, k:k + 1] * w0_ref[k:k + 1, :]  # -> (tn, HP)
    else:
        z = jnp.dot(x, w0_ref[...], preferred_element_type=jnp.float32) + b0_ref[...]
    h = jnp.sin(omega_first * (jnp.abs(z) + 1.0) * z)

    # ---- hidden FinerLayers (weights resident in VMEM) --------------------
    for l in range(n_hidden):
        z = jnp.dot(h, wh_ref[l], preferred_element_type=jnp.float32) + bh_ref[l]
        h = jnp.sin(omega_hidden * (jnp.abs(z) + 1.0) * z)

    # ---- outermost linear --------------------------------------------------
    o_ref[...] = (jnp.dot(h, wo_ref[...], preferred_element_type=jnp.float32)
                  + bo_ref[...]).astype(o_ref.dtype)


# ---------------------------------------------------------------------------
# Parameter init (matches the PyTorch init distributions, deterministic JAX RNG)
# ---------------------------------------------------------------------------
def init_inr_params(key, in_features, hidden_features, hidden_layers, out_features,
                    first_omega_0=30.0, hidden_omega_0=30.0, first_bias_scale=None):
    def uniform(k, shape, bound):
        return jax.random.uniform(k, shape, jnp.float32, -bound, bound)

    key, kw, kb = jax.random.split(key, 3)
    w_first = uniform(kw, (in_features, hidden_features), 1.0 / in_features)
    b_bound = (first_bias_scale if first_bias_scale is not None
               else 1.0 / np.sqrt(in_features))
    b_first = uniform(kb, (1, hidden_features), b_bound)

    w_hidden, b_hidden = [], []
    for _ in range(hidden_layers):
        key, kw, kb = jax.random.split(key, 3)
        bound = np.sqrt(6.0 / hidden_features) / hidden_omega_0
        w_hidden.append(uniform(kw, (hidden_features, hidden_features), bound))
        b_hidden.append(uniform(kb, (1, hidden_features),
                                1.0 / np.sqrt(hidden_features)))

    key, kw, kb = jax.random.split(key, 3)
    bound = np.sqrt(6.0 / hidden_features) / max(hidden_omega_0, 1e-12)
    w_out = uniform(kw, (hidden_features, out_features), bound)
    b_out = uniform(kb, (1, out_features), 1.0 / np.sqrt(hidden_features))

    return dict(w_first=w_first, b_first=b_first,
                w_hidden=w_hidden, b_hidden=b_hidden,
                w_out=w_out, b_out=b_out,
                first_omega_0=float(first_omega_0),
                hidden_omega_0=float(hidden_omega_0))


# ---------------------------------------------------------------------------
# Pack params: zero-pad feature dims to 128 lanes and stack hidden layers.
# Exact: padded activations are sin(0)=0 and padded weight rows/cols are 0.
# ---------------------------------------------------------------------------
def pack_inr_params(raw, lane=128):
    hid = raw["w_first"].shape[1]
    out_f = raw["w_out"].shape[1]
    hp = _round_up(hid, lane)
    op = _round_up(out_f, lane)
    n_hidden = len(raw["w_hidden"])

    def pad2(a, rows, cols):
        return jnp.pad(a, ((0, rows - a.shape[0]), (0, cols - a.shape[1])))

    w0 = pad2(raw["w_first"], raw["w_first"].shape[0], hp)
    b0 = pad2(raw["b_first"], 1, hp)

    if n_hidden > 0:
        wh = jnp.stack([pad2(w, hp, hp) for w in raw["w_hidden"]])
        bh = jnp.stack([pad2(b, 1, hp) for b in raw["b_hidden"]])
    else:  # dummy (never read: kernel loops range(n_hidden))
        wh = jnp.zeros((1, hp, hp), jnp.float32)
        bh = jnp.zeros((1, 1, hp), jnp.float32)

    wo = pad2(raw["w_out"], hp, op)
    bo = pad2(raw["b_out"], 1, op)

    return dict(w0=w0, b0=b0, wh=wh, bh=bh, wo=wo, bo=bo,
                n_hidden=n_hidden, out_features=out_f,
                first_omega_0=raw["first_omega_0"],
                hidden_omega_0=raw["hidden_omega_0"])


# ---------------------------------------------------------------------------
# Fused forward pass
# ---------------------------------------------------------------------------
def inr_forward(coords, packed, tn=512):
    n, din = coords.shape
    hp = packed["w0"].shape[1]
    op = packed["wo"].shape[1]
    lh = packed["wh"].shape[0]
    n_hidden = packed["n_hidden"]

    # Row tile: multiple of 8 (sublane); pad N on host so every tile is full.
    tn = max(8, (int(tn) // 8) * 8)
    n_pad = _round_up(n, 8)
    tn_eff = min(tn, n_pad)
    n_pad = _round_up(n_pad, tn_eff)
    if n_pad != n:
        coords = jnp.pad(coords, ((0, n_pad - n), (0, 0)))

    grid = (n_pad // tn_eff,)

    # Advisory cost estimate (the sin count matters: with tiny matmuls the EUP,
    # not the MXU, is likely the binding unit).
    flops = 2 * n_pad * (din * hp + n_hidden * hp * hp + hp * op)
    transcendentals = n_pad * hp * (n_hidden + 1)
    bytes_accessed = 4 * (n_pad * din + n_pad * op + din * hp + hp
                          + lh * (hp * hp + hp) + hp * op + op)
    cost = pl.CostEstimate(flops=int(flops),
                           transcendentals=int(transcendentals),
                           bytes_accessed=int(bytes_accessed))

    # Explicit VMEM budget: double-buffered coord/out tiles + resident weights,
    # kept well below the v7x 64 MiB per-core capacity.
    weight_bytes = 4 * (din * hp + hp + lh * (hp * hp + hp) + hp * op + op)
    vmem_bytes = int(min(2 * 4 * tn_eff * (din + op) + 2 * weight_bytes + (8 << 20),
                         48 << 20))

    kernel = functools.partial(
        _inr_fused_kernel,
        omega_first=packed["first_omega_0"],
        omega_hidden=packed["hidden_omega_0"],
        n_hidden=n_hidden, din=din)

    out = pl.pallas_call(
        kernel,
        out_shape=jax.ShapeDtypeStruct((n_pad, op), jnp.float32),
        grid=grid,
        in_specs=[
            pl.BlockSpec((tn_eff, din), lambda i: (i, 0)),    # coords tile (streamed)
            pl.BlockSpec((din, hp), lambda i: (0, 0)),        # first-layer W (resident)
            pl.BlockSpec((1, hp), lambda i: (0, 0)),          # first-layer b
            pl.BlockSpec((lh, hp, hp), lambda i: (0, 0, 0)),  # hidden Ws (stacked)
            pl.BlockSpec((lh, 1, hp), lambda i: (0, 0, 0)),   # hidden bs (stacked)
            pl.BlockSpec((hp, op), lambda i: (0, 0)),         # final W
            pl.BlockSpec((1, op), lambda i: (0, 0)),          # final b
        ],
        out_specs=pl.BlockSpec((tn_eff, op), lambda i: (i, 0)),
        compiler_params=pltpu.CompilerParams(
            dimension_semantics=("parallel",),
            vmem_limit_bytes=vmem_bytes),
        cost_estimate=cost,
    )(coords, packed["w0"], packed["b0"], packed["wh"], packed["bh"],
      packed["wo"], packed["bo"])

    # Strip row padding and lane padding of the output.
    return out[:n, :packed["out_features"]]


# ---------------------------------------------------------------------------
# Pure-JAX reference (unpadded params)
# ---------------------------------------------------------------------------
def inr_reference(coords, raw):
    z = coords @ raw["w_first"] + raw["b_first"]
    x = jnp.sin(raw["first_omega_0"] * (jnp.abs(z) + 1.0) * z)
    for w, b in zip(raw["w_hidden"], raw["b_hidden"]):
        z = x @ w + b
        x = jnp.sin(raw["hidden_omega_0"] * (jnp.abs(z) + 1.0) * z)
    return x @ raw["w_out"] + raw["b_out"]


if __name__ == "__main__":
    key = jax.random.PRNGKey(0)
    key, kc, kp = jax.random.split(key, 3)

    # Small, module-consistent shapes: 300 coordinate points (deliberately NOT a
    # multiple of the tile), 2-D coords, hidden=32, 2 hidden layers, 3 outputs.
    N, IN_F, HID, N_HID, OUT_F = 300, 2, 32, 2, 3
    coords = jax.random.uniform(kc, (N, IN_F), jnp.float32, -1.0, 1.0)

    raw = init_inr_params(kp, IN_F, HID, N_HID, OUT_F,
                          first_omega_0=30.0, hidden_omega_0=30.0)
    packed = pack_inr_params(raw)

    # tn=128 here so the small test exercises a multi-step grid + row padding.
    out = inr_forward(coords, packed, tn=128)
    out = jax.block_until_ready(out)

    ref = inr_reference(coords, raw)
    # omega=30 sine chains amplify f32 rounding of the matmuls; 1e-4 is tight for
    # this network while remaining a meaningful semantic check.
    np.testing.assert_allclose(np.asarray(out), np.asarray(ref),
                               rtol=1e-4, atol=1e-4)
    assert out.shape == (N, OUT_F)
    print("KERNEL_OK")
</pallas_src>

<mosaic_0001>
module attributes {stable_mosaic.version = 11 : i64} {
  func.func @_inr_fused_kernel(%arg0: i32, %arg1: memref<128x2xf32, #tpu.memory_space<vmem>>, %arg2: memref<2x128xf32, #tpu.memory_space<vmem>>, %arg3: memref<1x128xf32, #tpu.memory_space<vmem>>, %arg4: memref<2x128x128xf32, #tpu.memory_space<vmem>>, %arg5: memref<2x1x128xf32, #tpu.memory_space<vmem>>, %arg6: memref<128x128xf32, #tpu.memory_space<vmem>>, %arg7: memref<1x128xf32, #tpu.memory_space<vmem>>, %arg8: memref<128x128xf32, #tpu.memory_space<vmem>>) attributes {dimension_semantics = [#tpu.dimension_semantics<parallel>], iteration_bounds = array<i64: 3>, scalar_prefetch = 0 : i64, scratch_operands = 0 : i64, tpu.core_type = #tpu.core_type<tc>, window_params = [{transform_indices = @transform_0, window_bounds = array<i64: 128, 2>}, {pipeline_mode = #tpu.pipeline_mode<synchronous>, transform_indices = @transform_1, window_bounds = array<i64: 2, 128>}, {pipeline_mode = #tpu.pipeline_mode<synchronous>, transform_indices = @transform_2, window_bounds = array<i64: 1, 128>}, {pipeline_mode = #tpu.pipeline_mode<synchronous>, transform_indices = @transform_3, window_bounds = array<i64: 2, 128, 128>}, {pipeline_mode = #tpu.pipeline_mode<synchronous>, transform_indices = @transform_4, window_bounds = array<i64: 2, 1, 128>}, {pipeline_mode = #tpu.pipeline_mode<synchronous>, transform_indices = @transform_5, window_bounds = array<i64: 128, 128>}, {pipeline_mode = #tpu.pipeline_mode<synchronous>, transform_indices = @transform_6, window_bounds = array<i64: 1, 128>}, {transform_indices = @transform_7, window_bounds = array<i64: 128, 128>}]} {
    %c0 = arith.constant 0 : index
    %c0_0 = arith.constant 0 : index
    %0 = vector.load %arg1[%c0, %c0_0] : memref<128x2xf32, #tpu.memory_space<vmem>>, vector<128x2xf32>
    %c0_1 = arith.constant 0 : index
    %c0_2 = arith.constant 0 : index
    %1 = vector.load %arg3[%c0_1, %c0_2] : memref<1x128xf32, #tpu.memory_space<vmem>>, vector<1x128xf32>
    %2 = vector.extract_strided_slice %0 {offsets = [0, 0], sizes = [128, 1], strides = [1, 1]} : vector<128x2xf32> to vector<128x1xf32>
    %c0_3 = arith.constant 0 : index
    %c0_4 = arith.constant 0 : index
    %3 = vector.load %arg2[%c0_3, %c0_4] : memref<2x128xf32, #tpu.memory_space<vmem>>, vector<1x128xf32>
    %4 = vector.broadcast %2 : vector<128x1xf32> to vector<128x128xf32>
    %5 = vector.broadcast %3 : vector<1x128xf32> to vector<128x128xf32>
    %6 = arith.mulf %4, %5 : vector<128x128xf32>
    %7 = vector.broadcast %1 : vector<1x128xf32> to vector<128x128xf32>
    %8 = arith.addf %7, %6 : vector<128x128xf32>
    %9 = vector.extract_strided_slice %0 {offsets = [0, 1], sizes = [128, 1], strides = [1, 1]} : vector<128x2xf32> to vector<128x1xf32>
    %c1 = arith.constant 1 : index
    %c0_5 = arith.constant 0 : index
    %10 = vector.load %arg2[%c1, %c0_5] : memref<2x128xf32, #tpu.memory_space<vmem>>, vector<1x128xf32>
    %11 = vector.broadcast %9 : vector<128x1xf32> to vector<128x128xf32>
    %12 = vector.broadcast %10 : vector<1x128xf32> to vector<128x128xf32>
    %13 = arith.mulf %11, %12 : vector<128x128xf32>
    %14 = arith.addf %8, %13 : vector<128x128xf32>
    %15 = math.absf %14 : vector<128x128xf32>
    %cst = arith.constant 1.000000e+00 : f32
    %16 = vector.broadcast %cst : f32 to vector<128x128xf32>
    %17 = arith.addf %15, %16 : vector<128x128xf32>
    %cst_6 = arith.constant 3.000000e+01 : f32
    %18 = vector.broadcast %cst_6 : f32 to vector<128x128xf32>
    %19 = arith.mulf %18, %17 : vector<128x128xf32>
    %20 = arith.mulf %19, %14 : vector<128x128xf32>
    %21 = math.sin %20 : vector<128x128xf32>
    %c0_7 = arith.constant 0 : index
    %c0_8 = arith.constant 0 : index
    %c0_9 = arith.constant 0 : index
    %22 = vector.load %arg4[%c0_7, %c0_8, %c0_9] : memref<2x128x128xf32, #tpu.memory_space<vmem>>, vector<1x128x128xf32>
    %23 = vector.shape_cast %22 : vector<1x128x128xf32> to vector<128x128xf32>
    %cst_10 = arith.constant dense<0.000000e+00> : vector<128x128xf32>
    %24 = tpu.matmul %21, %23, %cst_10 {dimension_numbers = #tpu.dot_dimension_numbers<[1], [0], [0], [1], [0, 0, 1, 1], [], []>} : vector<128x128xf32>, vector<128x128xf32>, vector<128x128xf32> -> vector<128x128xf32>
    %c0_11 = arith.constant 0 : index
    %c0_12 = arith.constant 0 : index
    %c0_13 = arith.constant 0 : index
    %25 = vector.load %arg5[%c0_11, %c0_12, %c0_13] : memref<2x1x128xf32, #tpu.memory_space<vmem>>, vector<1x1x128xf32>
    %26 = vector.shape_cast %25 : vector<1x1x128xf32> to vector<1x128xf32>
    %27 = vector.broadcast %26 : vector<1x128xf32> to vector<128x128xf32>
    %28 = arith.addf %24, %27 : vector<128x128xf32>
    %29 = math.absf %28 : vector<128x128xf32>
    %cst_14 = arith.constant 1.000000e+00 : f32
    %30 = vector.broadcast %cst_14 : f32 to vector<128x128xf32>
    %31 = arith.addf %29, %30 : vector<128x128xf32>
    %cst_15 = arith.constant 3.000000e+01 : f32
    %32 = vector.broadcast %cst_15 : f32 to vector<128x128xf32>
    %33 = arith.mulf %32, %31 : vector<128x128xf32>
    %34 = arith.mulf %33, %28 : vector<128x128xf32>
    %35 = math.sin %34 : vector<128x128xf32>
    %c1_16 = arith.constant 1 : index
    %c0_17 = arith.constant 0 : index
    %c0_18 = arith.constant 0 : index
    %36 = vector.load %arg4[%c1_16, %c0_17, %c0_18] : memref<2x128x128xf32, #tpu.memory_space<vmem>>, vector<1x128x128xf32>
    %37 = vector.shape_cast %36 : vector<1x128x128xf32> to vector<128x128xf32>
    %cst_19 = arith.constant dense<0.000000e+00> : vector<128x128xf32>
    %38 = tpu.matmul %35, %37, %cst_19 {dimension_numbers = #tpu.dot_dimension_numbers<[1], [0], [0], [1], [0, 0, 1, 1], [], []>} : vector<128x128xf32>, vector<128x128xf32>, vector<128x128xf32> -> vector<128x128xf32>
    %c1_20 = arith.constant 1 : index
    %c0_21 = arith.constant 0 : index
    %c0_22 = arith.constant 0 : index
    %39 = vector.load %arg5[%c1_20, %c0_21, %c0_22] : memref<2x1x128xf32, #tpu.memory_space<vmem>>, vector<1x1x128xf32>
    %40 = vector.shape_cast %39 : vector<1x1x128xf32> to vector<1x128xf32>
    %41 = vector.broadcast %40 : vector<1x128xf32> to vector<128x128xf32>
    %42 = arith.addf %38, %41 : vector<128x128xf32>
    %43 = math.absf %42 : vector<128x128xf32>
    %cst_23 = arith.constant 1.000000e+00 : f32
    %44 = vector.broadcast %cst_23 : f32 to vector<128x128xf32>
    %45 = arith.addf %43, %44 : vector<128x128xf32>
    %cst_24 = arith.constant 3.000000e+01 : f32
    %46 = vector.broadcast %cst_24 : f32 to vector<128x128xf32>
    %47 = arith.mulf %46, %45 : vector<128x128xf32>
    %48 = arith.mulf %47, %42 : vector<128x128xf32>
    %49 = math.sin %48 : vector<128x128xf32>
    %c0_25 = arith.constant 0 : index
    %c0_26 = arith.constant 0 : index
    %50 = vector.load %arg6[%c0_25, %c0_26] : memref<128x128xf32, #tpu.memory_space<vmem>>, vector<128x128xf32>
    %cst_27 = arith.constant dense<0.000000e+00> : vector<128x128xf32>
    %51 = tpu.matmul %49, %50, %cst_27 {dimension_numbers = #tpu.dot_dimension_numbers<[1], [0], [0], [1], [0, 0, 1, 1], [], []>} : vector<128x128xf32>, vector<128x128xf32>, vector<128x128xf32> -> vector<128x128xf32>
    %c0_28 = arith.constant 0 : index
    %c0_29 = arith.constant 0 : index
    %52 = vector.load %arg7[%c0_28, %c0_29] : memref<1x128xf32, #tpu.memory_space<vmem>>, vector<1x128xf32>
    %53 = vector.broadcast %52 : vector<1x128xf32> to vector<128x128xf32>
    %54 = arith.addf %51, %53 : vector<128x128xf32>
    %c0_30 = arith.constant 0 : index
    %c0_31 = arith.constant 0 : index
    %55 = vector.load %arg8[%c0_30, %c0_31] : memref<128x128xf32, #tpu.memory_space<vmem>>, vector<128x128xf32>
    tpu.vector_store %arg8[%c0_30, %c0_31], %54 {strides = array<i32>} : memref<128x128xf32, #tpu.memory_space<vmem>>, vector<128x128xf32>,
    return
  }
  func.func @transform_0(%arg0: i32) -> (i32, i32) {
    %c0_i32 = arith.constant 0 : i32
    %c0_i32_0 = arith.constant 0 : i32
    return %arg0, %c0_i32 : i32, i32
  }
  func.func @transform_1(%arg0: i32) -> (i32, i32) {
    %c0_i32 = arith.constant 0 : i32
    %c0_i32_0 = arith.constant 0 : i32
    %c0_i32_1 = arith.constant 0 : i32
    return %c0_i32, %c0_i32_0 : i32, i32
  }
  func.func @transform_2(%arg0: i32) -> (i32, i32) {
    %c0_i32 = arith.constant 0 : i32
    %c0_i32_0 = arith.constant 0 : i32
    %c0_i32_1 = arith.constant 0 : i32
    return %c0_i32, %c0_i32_0 : i32, i32
  }
  func.func @transform_3(%arg0: i32) -> (i32, i32, i32) {
    %c0_i32 = arith.constant 0 : i32
    %c0_i32_0 = arith.constant 0 : i32
    %c0_i32_1 = arith.constant 0 : i32
    %c0_i32_2 = arith.constant 0 : i32
    return %c0_i32, %c0_i32_0, %c0_i32_1 : i32, i32, i32
  }
  func.func @transform_4(%arg0: i32) -> (i32, i32, i32) {
    %c0_i32 = arith.constant 0 : i32
    %c0_i32_0 = arith.constant 0 : i32
    %c0_i32_1 = arith.constant 0 : i32
    %c0_i32_2 = arith.constant 0 : i32
    return %c0_i32, %c0_i32_0, %c0_i32_1 : i32, i32, i32
  }
  func.func @transform_5(%arg0: i32) -> (i32, i32) {
    %c0_i32 = arith.constant 0 : i32
    %c0_i32_0 = arith.constant 0 : i32
    %c0_i32_1 = arith.constant 0 : i32
    return %c0_i32, %c0_i32_0 : i32, i32
  }
  func.func @transform_6(%arg0: i32) -> (i32, i32) {
    %c0_i32 = arith.constant 0 : i32
    %c0_i32_0 = arith.constant 0 : i32
    %c0_i32_1 = arith.constant 0 : i32
    return %c0_i32, %c0_i32_0 : i32, i32
  }
  func.func @transform_7(%arg0: i32) -> (i32, i32) {
    %c0_i32 = arith.constant 0 : i32
    %c0_i32_0 = arith.constant 0 : i32
    return %arg0, %c0_i32 : i32, i32
  }
}

</mosaic_0001>

<bundles_post_ra>
// kernel: tpu_custom_call.1
= control target key start
LH: loop header
LB: loop body
LE: loop exit
PB: predicated region body
PF: predicated region fallthrough
CT: control target
= control target key end

     0   :  { %12 = vsyncpa [#allocation3], 0  ;;  %s13659_s0 = inlined_call_operand.vmem [shape: f32[384,2], index: 0, kind: input, shape index: {}]   ;;  %s13660_s1 = inlined_call_operand.vmem [shape: f32[2,128], index: 1, kind: input, shape index: {}]   ;;  %s13661_s2 = inlined_call_operand.vmem [shape: f32[1,128], index: 2, kind: input, shape index: {}]   ;;  %s13662_s3 = inlined_call_operand.vmem [shape: f32[2,128,128], index: 3, kind: input, shape index: {}]   ;;  %s13663_s4 = inlined_call_operand.vmem [shape: f32[2,1,128], index: 4, kind: input, shape index: {}]   ;;  %s13664_s5 = inlined_call_operand.vmem [shape: f32[128,128], index: 5, kind: input, shape index: {}]   ;;  %s13665_s6 = inlined_call_operand.vmem [shape: f32[1,128], index: 6, kind: input, shape index: {}]   ;;  %s13666_s7 = inlined_call_operand.hbm [shape: f32[384,128], index: 7, kind: output, shape index: {}]  }
   0x1   :  { %14 = vsyncpa [#allocation3 + $0x1], 0  ;;  %s7477_s24 = smov 0   ;;  %s7479_s25 = smov 0  }
   0x2   :  { %s7481_s26 = smov 0   ;;  %s7483_s27 = smov 0  }
   0x3 LB: > { %s7498_s28 = sadd.s32 4294967295, %s7424_s27   ;;  %s6303_s29 = sadd.s32 4294967294, %s7424_s27   ;;  %s7424_s27 = sphi %s7483_s27, %s14228_s27   ;;  %s7420_s26 = sphi %s7481_s26, %s14227_s26   ;;  %s7416_s25 = sphi %s7479_s25, %s14226_s25   ;;  %s7412_s24 = sphi %s7477_s24, %s14225_s24  }
   0x4   : > { %s7502_s30 = sadd.s32 1, %s7424_s27   ;;  %s179_s8 = sadd.s32 1, %s7420_s26 }
   0x5   : > { %s176_s9 = ssub.s32 %s7424_s27, %s7502_s30  ;;  %p189_p0 = scmp.ne.s32.totalorder %s7420_s26, %s7416_s25 }
   0x6   : > { %p177_p1 = scmp.eq.s32.totalorder %s176_s9, 0  ;;  %p190_p2 = scmp.eq.s32.totalorder %s7498_s28, 2 }
   0x7   : > { %p195_p3 = scmp.ne.s32.totalorder %s7416_s25, %s7412_s24  ;;  %p196_p4 = scmp.eq.s32.totalorder %s6303_s29, 2 }
   0x8   : > { %s7513_s10 = scalar_select %p177_p1, %s7420_s26, %s179_s8  }
   0x9   : > { %p7515_p5 = por %p190_p2, %p189_p0  ;;  %p7519_p6 = por %p196_p4, %p195_p3 }
   0xa   : > { %p6306_p7 = scmp.ge.s32.totalorder %s7424_s27, 1  ;;  %p241_p8 = scmp.lt.s32.totalorder %s7424_s27, 4 }
   0xc   : > { %p242_p9 = pnand %p6306_p7, %p241_p8 }
   0xe   : > { %245 = sbr.rel (%p242_p9) target bundleno = 1800 (0x708), region = 48 }
  0x15   : > { %s6308_s13 = sshll.u32 %s7498_s28, 4  ;;  %v7426_v0 = vmov 1   ;;  %v7427_v7 = vmov 0   ;;  %v2249_v18 = vld [vmem:[%s13662_s3] sm:$0xff]  ;;  %v2250_v19 = vld [vmem:[%s13662_s3 + $0x8] sm:$0xff]  ;;  %v2251_v21 = vld [vmem:[%s13662_s3 + $0x10] sm:$0xff] }
  0x16   : > { %7150 = vset.pattern.permute.xlu0 %v7426_v0  ;;  %7148 = vset.pattern.permute.xlu1 %v7426_v0  ;;  %p274_p10 = scmp.lt.s32.totalorder %s6308_s13, 47  ;;  %v6795_v20 = vpack.c.bf16 %v2250_v19, %v2249_v18  ;;  %v2252_v22 = vld [vmem:[%s13662_s3 + $0x18] sm:$0xff]  ;;  %v2253_v24 = vld [vmem:[%s13662_s3 + $0x20] sm:$0xff]  ;;  %v2254_v25 = vld [vmem:[%s13662_s3 + $0x28] sm:$0xff]  ;;  %s270_s20 = sand.u32 1, %s7416_s25  }
  0x17   : > { %v6799_v23 = vpack.c.bf16 %v2252_v22, %v2251_v21  ;;  %v6803_v26 = vpack.c.bf16 %v2254_v25, %v2253_v24  ;;  %v2255_v27 = vld [vmem:[%s13662_s3 + $0x30] sm:$0xff]  ;;  %v2256_v28 = vld [vmem:[%s13662_s3 + $0x38] sm:$0xff]  ;;  %v2257_v30 = vld [vmem:[%s13662_s3 + $0x40] sm:$0xff]  ;;  %s6307_s21 = sshll.u32 %s270_s20, 7  ;;  %s6530_s8 = sshll.u32 %s7498_s28, 11 }
  0x18   : > { %s14230_s13 = smov (!%p274_p10, %s6308_s13), 47  ;;  %6796 = vmatprep.subr.bf16.mxu0 %v6795_v20  ;;  %v6807_v29 = vpack.c.bf16 %v2256_v28, %v2255_v27  ;;  %v2258_v31 = vld [vmem:[%s13662_s3 + $0x48] sm:$0xff]  ;;  %v2259_v33 = vld [vmem:[%s13662_s3 + $0x50] sm:$0xff]  ;;  %v2260_v34 = vld [vmem:[%s13662_s3 + $0x58] sm:$0xff]  ;;  %s13539_s29 = scalar_lea.vmem [#allocation2], %s6307_s21 }
  0x19   : > { %s6309_s14 = sshll.u32 %s14230_s13, 3  ;;  %6798 = vmatpush3.bf16.msra.mxu0 %v6795_v20  ;;  %v6811_v32 = vpack.c.bf16 %v2258_v31, %v2257_v30  ;;  %v6815_v35 = vpack.c.bf16 %v2260_v34, %v2259_v33  ;;  %v2261_v36 = vld [vmem:[%s13662_s3 + $0x60] sm:$0xff]  ;;  %v2262_v37 = vld [vmem:[%s13662_s3 + $0x68] sm:$0xff]  ;;  %v2263_v39 = vld [vmem:[%s13662_s3 + $0x70] sm:$0xff]  ;;  %s6241_s9 = sshll.u32 %s13539_s29, 4  ;;  %s13611_s9 = int_to_ptr.vmem [resolvable:$true] %s6241_s9 }
  0x1a   : > { %s7531_s17 = scalar_lea.vmem %s13659_s0, %s6309_s14  ;;  %6800 = vmatprep.subr.bf16.mxu0 %v6799_v23  ;;  %v6819_v38 = vpack.c.bf16 %v2262_v37, %v2261_v36  ;;  %v2264_v40 = vld [vmem:[%s13662_s3 + $0x78] sm:$0xff]  ;;  %v7610_v48 = vld [vmem:[%s13660_s1] ss:$0 sm:$0xff]  ;;  %v7617_v53 = vld [vmem:[%s13660_s1 + $0x1] ss:$0 sm:$0xff]  ;;  %s13609_s15 = scalar_lea.hbm %s13666_s7, %s6530_s8 }
  0x1b   : > { %v282_v1 = vld [vmem:[%s7531_s17 + $0x10] sm:$0xff]  ;;  %v280_v2 = vld [vmem:[%s7531_s17] sm:$0xff]  ;;  %v281_v4 = vld [vmem:[%s7531_s17 + $0x8] sm:$0xff]  ;;  %v6823_v41 = vpack.c.bf16 %v2264_v40, %v2263_v39  ;;  %s13618_s28 = scalar_lea.sflag [#allocation3], %s270_s20  ;;  %s7362_s16 = scalar_lea.vmem %s13611_s9, 2048 }
  0x1c   : > { %430 = vperm.xlu0 %7150, %v282_v1   ;;  %422 = vperm.xlu1 %7148, %v280_v2   ;;  %v286_v3 = vld [vmem:[%s7531_s17 + $0x30] sm:$0xff]  ;;  %v283_v6 = vld [vmem:[%s7531_s17 + $0x18] sm:$0xff]  ;;  %v284_v8 = vld [vmem:[%s7531_s17 + $0x20] sm:$0xff]  ;;  %p7363_p11 = scmp.ne.s32.totalorder %s13611_s9, %s7362_s16 }
  0x1d   : > { %v290_v5 = vld [vmem:[%s7531_s17 + $0x50] sm:$0xff]  ;;  %v285_v9 = vld [vmem:[%s7531_s17 + $0x28] sm:$0xff]  ;;  %v287_v11 = vld [vmem:[%s7531_s17 + $0x38] sm:$0xff]  ;;  %6802 = vmatpush3.bf16.msra.mxu0 %v6799_v23 }
  0x1e   : > { %v289_v10 = vld [vmem:[%s7531_s17 + $0x48] sm:$0xff]  ;;  %v288_v13 = vld [vmem:[%s7531_s17 + $0x40] sm:$0xff]  ;;  %v294_v14 = vld [vmem:[%s7531_s17 + $0x70] sm:$0xff]  ;;  %6804 = vmatprep.subr.bf16.mxu0 %v6803_v26  ;;  %p7364_p12 = pnand %p7363_p11, %p7515_p5 }
  0x1f   : > { %v293_v12 = vld [vmem:[%s7531_s17 + $0x68] sm:$0xff]  ;;  %v291_v15 = vld [vmem:[%s7531_s17 + $0x58] sm:$0xff]  ;;  %v292_v16 = vld [vmem:[%s7531_s17 + $0x60] sm:$0xff] }
  0x20   : > { %446 = vperm.xlu0 %7150, %v286_v3   ;;  %426 = vperm.xlu1 %7148, %v281_v4   ;;  %v295_v17 = vld [vmem:[%s7531_s17 + $0x78] sm:$0xff]  ;;  %v7622_v54 = vld [vmem:[%s13661_s2] ss:$0 sm:$0xff]  ;;  %p7365_p13 = pneg %p7364_p12  ;;  %s7434_s17 = smov [#allocation2]  }
  0x21   : > { %6806 = vmatpush3.bf16.msra.mxu0 %v6803_v26  ;;  %s7366_s18 = sshll.u32 %s7434_s17, 4  ;;  %s7367_s18 = int_to_ptr.vmem [resolvable:$false] %s7366_s18 }
  0x22   : > { %6808 = vmatprep.subr.bf16.mxu0 %v6807_v29  ;;  %s7368_s19 = scalar_lea.vmem %s7367_s18, 4096  ;;  %p7369_p0 = scmp.lt.s32.totalorder %s13611_s9, %s7367_s18 }
  0x23   : > { %p7370_p1 = scmp.lt.s32.totalorder %s7368_s19, %s7362_s16 }
  0x24   : > { %462 = vperm.xlu0 %7150, %v290_v5   ;;  %7149 = vset.pattern.permute.xlu1 %v7427_v7 }
  0x25   : > { %315 = vperm.xlu1 %7149, %v283_v6   ;;  %6810 = vmatpush3.bf16.msra.mxu0 %v6807_v29  ;;  %p7371_p2 = por %p7370_p1, %p7369_p0 }
  0x26   : > { %6812 = vmatprep.subr.bf16.mxu0 %v6811_v32 }
  0x27   : > { %p7372_p3 = pnand %p7371_p2, %p7365_p13 }
  0x28   : > { %7159 = vset.pattern.permute.xlu0 %v7427_v7 }
  0x29   : > { %300 = vperm.xlu0 %7159, %v280_v2   ;;  %7151 = vset.pattern.permute.xlu1 %v7426_v0 }
  0x2a   : > { %434 = vperm.xlu1 %7151, %v283_v6   ;;  %6814 = vmatpush3.bf16.msra.mxu0 %v6811_v32 }
  0x2b   : > { %6816 = vmatprep.subr.bf16.mxu0 %v6815_v35 }
  0x2d   : > { %305 = vperm.xlu0 %7159, %v281_v4  }
  0x2e   : > { %7152 = vset.pattern.permute.xlu1 %v7427_v7  ;;  %6818 = vmatpush3.bf16.msra.mxu0 %v6815_v35 }
  0x2f   : > { %320 = vperm.xlu1 %7152, %v284_v8   ;;  %6820 = vmatprep.subr.bf16.mxu0 %v6819_v38 }
  0x31   : > { %310 = vperm.xlu0 %7159, %v282_v1  }
  0x32   : > { %6822 = vmatpush3.bf16.msra.mxu0 %v6819_v38 }
  0x33   : > { %7153 = vset.pattern.permute.xlu1 %v7426_v0  ;;  %6824 = vmatprep.subr.bf16.mxu0 %v6823_v41 }
  0x34   : > { %438 = vperm.xlu1 %7153, %v284_v8  }
  0x35   : > { %325 = vperm.xlu0 %7159, %v285_v9  }
  0x36   : > { %6826 = vmatpush3.bf16.msra.mxu0 %v6823_v41 }
  0x38   : > { %442 = vperm.xlu1 %7153, %v285_v9  }
  0x39   : > { %330 = vperm.xlu0 %7159, %v286_v3  }
  0x3c   : > { %7154 = vset.pattern.permute.xlu1 %v7427_v7 }
  0x3d   : > { %345 = vperm.xlu0 %7159, %v289_v10   ;;  %335 = vperm.xlu1 %7154, %v287_v11  }
  0x41   : > { %350 = vperm.xlu0 %7159, %v290_v5   ;;  %7155 = vset.pattern.permute.xlu1 %v7426_v0 }
  0x42   : > { %450 = vperm.xlu1 %7155, %v287_v11  }
  0x45   : > { %365 = vperm.xlu0 %7159, %v293_v12  }
  0x46   : > { %7156 = vset.pattern.permute.xlu1 %v7427_v7 }
  0x47   : > { %340 = vperm.xlu1 %7156, %v288_v13  }
  0x49   : > { %370 = vperm.xlu0 %7159, %v294_v14  }
  0x4b   : > { %7157 = vset.pattern.permute.xlu1 %v7426_v0 }
  0x4c   : > { %454 = vperm.xlu1 %7157, %v288_v13  }
  0x4d   : > { %7164 = vset.pattern.permute.xlu0 %v7426_v0 }
  0x4e   : > { %478 = vperm.xlu0 %7164, %v294_v14  }
  0x50   : > { %458 = vperm.xlu1 %7157, %v289_v10  }
  0x54   : > { %7158 = vset.pattern.permute.xlu1 %v7427_v7 }
  0x55   : > { %355 = vperm.xlu1 %7158, %v291_v15  }
  0x59   : > { %7160 = vset.pattern.permute.xlu1 %v7426_v0 }
  0x5a   : > { %466 = vperm.xlu1 %7160, %v291_v15  }
  0x5e   : > { %7161 = vset.pattern.permute.xlu1 %v7427_v7 }
  0x5f   : > { %360 = vperm.xlu1 %7161, %v292_v16  }
  0x63   : > { %7162 = vset.pattern.permute.xlu1 %v7426_v0 }
  0x64   : > { %470 = vperm.xlu1 %7162, %v292_v16  }
  0x68   : > { %474 = vperm.xlu1 %7162, %v293_v12  }
  0x6c   : > { %7163 = vset.pattern.permute.xlu1 %v7427_v7 }
  0x6d   : > { %375 = vperm.xlu1 %7163, %v295_v17  }
  0x71   : > { %7165 = vset.pattern.permute.xlu1 %v7426_v0 }
  0x72   : > { %482 = vperm.xlu1 %7165, %v295_v17  }
  0x9b   : > { %v423_v42 = vpop.permute.xlu1 %422  ;;  %v431_v43 = vpop.permute.xlu0 %430 }
  0x9c   : > { %v489_v60 = vmul.f32 %v7617_v53, %v423_v42  ;;  %v491_v3 = vmul.f32 %v7617_v53, %v431_v43 }
  0x9f   : > { %v427_v44 = vpop.permute.xlu1 %426  ;;  %v447_v45 = vpop.permute.xlu0 %446 }
  0xa0   : > { %v490_v4 = vmul.f32 %v7617_v53, %v427_v44  ;;  %v495_v37 = vmul.f32 %v7617_v53, %v447_v45 }
  0xa3   : > { %v7605_v46 = vpop.permute.xlu0 %462 }
  0xa4   : > { %v316_v47 = vpop.permute.xlu1 %315 }
  0xa5   : > { %v385_v52 = vmul.f32 %v7610_v48, %v316_v47 }
  0xa7   : > { %v407_v61 = vadd.f32 %v7622_v54, %v385_v52 }
  0xa8   : > { %v301_v49 = vpop.permute.xlu0 %300 }
  0xa9   : > { %v382_v50 = vmul.f32 %v7610_v48, %v301_v49  ;;  %v435_v51 = vpop.permute.xlu1 %434 }
  0xaa   : > { %v492_v57 = vmul.f32 %v7617_v53, %v435_v51 }
  0xab   : > { %v404_v56 = vadd.f32 %v7622_v54, %v382_v50 }
  0xac   : > { %v306_v55 = vpop.permute.xlu0 %305  ;;  %v508_v0 = vadd.f32 %v492_v57, %v407_v61 }
  0xad   : > { %v383_v58 = vmul.f32 %v7610_v48, %v306_v55  ;;  %v505_v63 = vadd.f32 %v489_v60, %v404_v56 }
  0xae   : > { %v321_v59 = vpop.permute.xlu1 %320  ;;  %v524_v10 = vand.u32 2147483647, %v508_v0 }
  0xaf   : > { %v405_v1 = vadd.f32 %v7622_v54, %v383_v58  ;;  %v386_v7 = vmul.f32 %v7610_v48, %v321_v59  ;;  %v521_v9 = vand.u32 2147483647, %v505_v63 }
  0xb0   : > { %v311_v62 = vpop.permute.xlu0 %310  ;;  %v540_v19 = vadd.f32 1.0, %v524_v10 }
  0xb1   : > { %v384_v2 = vmul.f32 %v7610_v48, %v311_v62  ;;  %v506_v11 = vadd.f32 %v490_v4, %v405_v1  ;;  %v408_v16 = vadd.f32 %v7622_v54, %v386_v7  ;;  %v537_v18 = vadd.f32 1.0, %v521_v9 }
  0xb2   : > { %v556_v27 = vmul.f32 30.0, %v540_v19  ;;  %v499_v1 = vmul.f32 %v7617_v53, %v7605_v46 }
  0xb3   : > { %v406_v5 = vadd.f32 %v7622_v54, %v384_v2  ;;  %v439_v6 = vpop.permute.xlu1 %438  ;;  %v522_v20 = vand.u32 2147483647, %v506_v11  ;;  %v553_v26 = vmul.f32 30.0, %v537_v18 }
  0xb4   : > { %v326_v8 = vpop.permute.xlu0 %325  ;;  %v493_v13 = vmul.f32 %v7617_v53, %v439_v6  ;;  %v7645_v35 = vmul.f32 %v556_v27, %v508_v0 }
  0xb5   : > { %v507_v12 = vadd.f32 %v491_v3, %v406_v5  ;;  %v387_v14 = vmul.f32 %v7610_v48, %v326_v8  ;;  %v538_v28 = vadd.f32 1.0, %v522_v20  ;;  %v7643_v34 = vmul.f32 %v553_v26, %v505_v63 }
  0xb6   : > { %v509_v22 = vadd.f32 %v493_v13, %v408_v16  ;;  %v900_v47 = vand.u32 2139095040, %v7645_v35 }
  0xb7   : > { %v443_v15 = vpop.permute.xlu1 %442  ;;  %v523_v21 = vand.u32 2147483647, %v507_v12  ;;  %v409_v23 = vadd.f32 %v7622_v54, %v387_v14  ;;  %v554_v36 = vmul.f32 30.0, %v538_v28  ;;  %v588_v44 = vand.u32 2139095040, %v7643_v34 }
  0xb8   : > { %v331_v17 = vpop.permute.xlu0 %330  ;;  %v494_v24 = vmul.f32 %v7617_v53, %v443_v15  ;;  %v525_v31 = vand.u32 2147483647, %v509_v22  ;;  %v901_v58 = vshrl.u32 %v900_v47, 23  ;;  %vm587_vm15 = vcmp.lt.s32.totalorder %v7643_v34, 0 }
  0xb9   : > { %v539_v30 = vadd.f32 1.0, %v523_v21  ;;  %v388_v32 = vmul.f32 %v7610_v48, %v331_v17  ;;  %v7651_v49 = vmul.f32 %v554_v36, %v506_v11  ;;  %v589_v57 = vshrl.u32 %v588_v44, 23 }
  0xba   : > { %v510_v33 = vadd.f32 %v494_v24, %v409_v23  ;;  %v541_v39 = vadd.f32 1.0, %v525_v31  ;;  %v6325_v6 = vadd.s32 4294967169, %v901_v58 }
  0xbb   : > { %v555_v38 = vmul.f32 30.0, %v539_v30  ;;  %v410_v40 = vadd.f32 %v7622_v54, %v388_v32  ;;  %v692_v61 = vand.u32 2139095040, %v7651_v49  ;;  %v6313_v5 = vadd.s32 4294967169, %v589_v57 }
  0xbc   : > { %v336_v25 = vpop.permute.xlu1 %335  ;;  %v7640_v29 = vpop.permute.xlu0 %345  ;;  %v526_v42 = vand.u32 2147483647, %v510_v33  ;;  %v557_v51 = vmul.f32 30.0, %v541_v39  ;;  %v907_v17 = vadd.s32 1, %v6325_v6 }
  0xbd   : > { %v7653_v50 = vmul.f32 %v555_v38, %v507_v12  ;;  %v511_v52 = vadd.f32 %v495_v37, %v410_v40  ;;  %v389_v59 = vmul.f32 %v7610_v48, %v336_v25  ;;  %v693_v9 = vshrl.u32 %v692_v61, 23 }
  0xbe   : > { %v542_v45 = vadd.f32 1.0, %v526_v42  ;;  %v7660_v63 = vmul.f32 %v557_v51, %v509_v22  ;;  %v595_v16 = vadd.s32 1, %v6313_v5  ;;  %vm908_vm1 = vcmp.gt.s32.totalorder %v907_v17, 0 }
  0xbf   : > { %v796_v62 = vand.u32 2139095040, %v7653_v50  ;;  %v527_v0 = vand.u32 2147483647, %v511_v52  ;;  %v411_v7 = vadd.f32 %v7622_v54, %v389_v59  ;;  %v6317_v20 = vadd.s32 4294967169, %v693_v9 }
  0xc0   : > { %v351_v43 = vpop.permute.xlu0 %350  ;;  %v558_v2 = vmul.f32 30.0, %v542_v45  ;;  %v1004_v11 = vand.u32 2139095040, %v7660_v63  ;;  %vm596_vm0 = vcmp.gt.s32.totalorder %v595_v16, 0  ;;  %v391_v40 = vmul.f32 %v7610_v48, %v7640_v29 }
  0xc1   : > { %v451_v41 = vpop.permute.xlu1 %450  ;;  %v392_v55 = vmul.f32 %v7610_v48, %v351_v43  ;;  %v797_v10 = vshrl.u32 %v796_v62, 23  ;;  %v543_v12 = vadd.f32 1.0, %v527_v0  ;;  %v699_v31 = vadd.s32 1, %v6317_v20 }
  0xc2   : > { %v496_v3 = vmul.f32 %v7617_v53, %v451_v41  ;;  %v7669_v14 = vmul.f32 %v558_v2, %v510_v33  ;;  %v1005_v22 = vshrl.u32 %v1004_v11, 23  ;;  %v597_v42 = vsel %vm596_vm0, %v595_v16, 0 }
  0xc3   : > { %v414_v60 = vadd.f32 %v7622_v54, %v392_v55  ;;  %v6321_v21 = vadd.s32 4294967169, %v797_v10  ;;  %v559_v23 = vmul.f32 30.0, %v543_v12  ;;  %v909_v43 = vsel %vm908_vm1, %v907_v17, 0 }
  0xc4   : > { %v7665_v4 = vpop.permute.xlu0 %365  ;;  %v512_v15 = vadd.f32 %v496_v3, %v411_v7  ;;  %v1108_v25 = vand.u32 2139095040, %v7669_v14  ;;  %v6329_v33 = vadd.s32 4294967169, %v1005_v22  ;;  %vm700_vm2 = vcmp.gt.s32.totalorder %v699_v31, 0 }
  0xc5   : > { %v515_v8 = vadd.f32 %v499_v1, %v414_v60  ;;  %v803_v32 = vadd.s32 1, %v6321_v21  ;;  %v7675_v36 = vmul.f32 %v559_v23, %v511_v52  ;;  %v7683_v59 = vand.u32 31, %v909_v43 }
  0xc6   : > { %v341_v56 = vpop.permute.xlu1 %340  ;;  %v528_v26 = vand.u32 2147483647, %v512_v15  ;;  %v1109_v37 = vshrl.u32 %v1108_v25, 23  ;;  %v1011_v55 = vadd.s32 1, %v6329_v33  ;;  %v599_v60 = vand.u32 31, %v597_v42 }
  0xc7   : > { %v390_v46 = vmul.f32 %v7610_v48, %v341_v56  ;;  %v531_v18 = vand.u32 2147483647, %v515_v8  ;;  %vm804_vm3 = vcmp.gt.s32.totalorder %v803_v32, 0  ;;  %v1212_v45 = vand.u32 2139095040, %v7675_v36 }
  0xc8   : > { %v371_v24 = vpop.permute.xlu0 %370  ;;  %v544_v38 = vadd.f32 1.0, %v528_v26  ;;  %v6333_v52 = vadd.s32 4294967169, %v1109_v37  ;;  %v701_v61 = vsel %vm700_vm2, %v699_v31, 0  ;;  %v805_v1 = vsel %vm804_vm3, %v803_v32, 0 }
  0xc9   : > { %v412_v27 = vadd.f32 %v7622_v54, %v390_v46  ;;  %v547_v28 = vadd.f32 1.0, %v531_v18  ;;  %v396_v39 = vmul.f32 %v7610_v48, %v371_v24  ;;  %vm1012_vm4 = vcmp.gt.s32.totalorder %v1011_v55, 0 }
  0xca   : > { %v560_v56 = vmul.f32 30.0, %v544_v38  ;;  %v1213_v2 = vshrl.u32 %v1212_v45, 23  ;;  %v413_v3 = vadd.f32 %v7622_v54, %v391_v40  ;;  %v1115_v5 = vadd.s32 1, %v6333_v52 }
  0xcb   : > { %v455_v13 = vpop.permute.xlu1 %454  ;;  %v563_v44 = vmul.f32 30.0, %v547_v28  ;;  %v418_v57 = vadd.f32 %v7622_v54, %v396_v39  ;;  %v7694_v10 = vshrl.u32 %v909_v43, 5  ;;  %v7696_v11 = vand.u32 31, %v701_v61 }
  0xcc   : > { %v497_v19 = vmul.f32 %v7617_v53, %v455_v13  ;;  %v7689_v6 = vmul.f32 %v560_v56, %v512_v15  ;;  %v7701_v13 = vand.u32 31, %v805_v1  ;;  %v1013_v46 = vsel %vm1012_vm4, %v1011_v55, 0 }
  0xcd   : > { %v479_v41 = vpop.permute.xlu0 %478  ;;  %v7686_v62 = vmul.f32 %v563_v44, %v515_v8  ;;  %v13667_v8 = vand.u32 2147483647, %v7643_v34  ;;  %v7704_v15 = vshrl.u32 %v597_v42, 5  ;;  %v600_v18 = vsub.s32 32, %v599_v60 }
  0xce   : > { %v513_v30 = vadd.f32 %v497_v19, %v412_v27  ;;  %v503_v58 = vmul.f32 %v7617_v53, %v479_v41  ;;  %13866 = vst [vmem:[#allocation6_spill] sm:$0xff] %v7689_v6  ;;  %v7707_v19 = vsub.s32 32, %v7683_v59  ;;  %v6337_v20 = vadd.s32 4294967169, %v1213_v2 }
  0xcf   : > { %v459_v51 = vpop.permute.xlu1 %458  ;;  %13865 = vst [vmem:[#allocation5_spill] sm:$0xff] %v7686_v62  ;;  %v1628_v16 = vand.u32 2139095040, %v7686_v62  ;;  %v7709_v21 = vshrl.u32 %v701_v61, 5  ;;  %vm1116_vm5 = vcmp.gt.s32.totalorder %v1115_v5, 0  ;;  %v1316_v22 = vand.u32 2139095040, %v7689_v6 }
  0xd0   : > { %v529_v47 = vand.u32 2147483647, %v513_v30  ;;  %v498_v29 = vmul.f32 %v7617_v53, %v459_v51  ;;  %v7691_v7 = vadd.f32 %v503_v58, %v418_v57  ;;  %v7714_v24 = vsub.s32 32, %v7696_v11 }
  0xd1   : > { %v7716_v25 = vshrl.u32 %v805_v1, 5  ;;  %v7718_v26 = vshrl.u32 %v1013_v46, 5  ;;  %v7722_v28 = vsub.s32 32, %v7701_v13  ;;  %v7724_v31 = vand.u32 31, %v1013_v46 }
  0xd2   : > { %v545_v0 = vadd.f32 1.0, %v529_v47  ;;  %v7698_v12 = vadd.f32 %v498_v29, %v413_v3  ;;  %v535_v23 = vand.u32 2147483647, %v7691_v7  ;;  %v1629_v32 = vshrl.u32 %v1628_v16, 23 }
  0xd3   : > { %v7728_v37 = vsel %vm1116_vm5, %v1115_v5, 0  ;;  %v7730_v38 = vadd.s32 1, %v6337_v20  ;;  %v7734_v39 = vmul.f32 %v7610_v48, %v7665_v4  ;;  %v13676_v40 = vmov 920167782  }
  0xd4   : > { %v561_v17 = vmul.f32 30.0, %v545_v0  ;;  %v530_v27 = vand.u32 2147483647, %v7698_v12  ;;  %v612_v41 = vshrl.u32 %v13676_v40, %v600_v18  ;;  %v1317_v42 = vshrl.u32 %v1316_v22, 23  ;;  %v356_v44 = vpop.permute.xlu1 %355 }
  0xd5   : > { %v551_v43 = vadd.f32 1.0, %v535_v23  ;;  %v13670_v47 = vmov 2475754826   ;;  %v13672_v55 = vmov 2131351028   ;;  %v6353_v58 = vadd.s32 4294967169, %v1629_v32 }
  0xd6   : > { %v7726_v33 = vmul.f32 %v561_v17, %v513_v30  ;;  %v603_v51 = vshrl.u32 %v13670_v47, %v600_v18  ;;  %v606_v30 = vshrl.u32 %v13672_v55, %v600_v18  ;;  %v546_v45 = vadd.f32 1.0, %v530_v27 }
  0xd7   : > { %v592_v52 = vand.u32 8388607, %v13667_v8  ;;  %v13668_v56 = vmov 2102212464   ;;  %v13688_v61 = vmov 683565275   ;;  %v605_v1 = vshll.u32 %v13670_v47, %v599_v60 }
  0xd8   : > { %13867 = vst [vmem:[#allocation7_spill] sm:$0xff] %v7726_v33  ;;  %v609_v4 = vshrl.u32 %v13668_v56, %v600_v18  ;;  %v611_v57 = vshll.u32 %v13668_v56, %v599_v60  ;;  %v1420_v29 = vand.u32 2139095040, %v7726_v33  ;;  %v602_v0 = vshll.u32 %v13688_v61, %v599_v60 }
  0xd9   : > { %v608_v2 = vshll.u32 %v13672_v55, %v599_v60  ;;  %v614_v5 = vshll.u32 %v13676_v40, %v599_v60  ;;  %v13674_v46 = vmov 1326507024   ;;  %v6341_v17 = vadd.s32 4294967169, %v1317_v42  ;;  %v467_v47 = vpop.permute.xlu1 %466 }
  0xda   : > { %v613_v3 = vor.u32 %v612_v41, %v611_v57  ;;  %v615_v16 = vshrl.u32 %v13674_v46, %v600_v18  ;;  %v567_v20 = vmul.f32 30.0, %v551_v43  ;;  %v604_v22 = vor.u32 %v603_v51, %v602_v0 }
  0xdb   : > { %v607_v23 = vor.u32 %v606_v30, %v605_v1  ;;  %vm1220_vm6 = vcmp.gt.s32.totalorder %v7730_v38, 0  ;;  %v562_v27 = vmul.f32 30.0, %v546_v45  ;;  %v610_v32 = vor.u32 %v609_v4, %v608_v2 }
  0xdc   : > { %v616_v9 = vor.u32 %v615_v16, %v614_v5  ;;  %v1421_v8 = vshrl.u32 %v1420_v29, 23  ;;  %v393_v56 = vmul.f32 %v7610_v48, %v356_v44  ;;  %v593_v55 = vor.u32 8388608, %v592_v52 }
  0xdd   : > { %vm620_vm7 = vcmp.lt.s32.totalorder %v7704_v15, 4  ;;  %v1635_v60 = vadd.s32 1, %v6353_v58  ;;  %v601_v41 = vshrl.u32 %v13688_v61, %v600_v18  ;;  %vm617_vm8 = vcmp.lt.s32.totalorder %v7704_v15, 1 }
  0xde   : > { %v626_v42 = vsel %vm620_vm7, %v613_v3, 920167782  ;;  %v1323_v43 = vadd.s32 1, %v6341_v17  ;;  %v7755_v51 = vmul.f32 %v567_v20, %v7691_v7  ;;  %vm619_vm9 = vcmp.lt.s32.totalorder %v7704_v15, 3 }
  0xdf   : > { %v625_v30 = vsel %vm617_vm8, %v604_v22, %v607_v23  ;;  %v7761_v44 = vmul.f32 %v562_v27, %v7698_v12  ;;  %v500_v45 = vmul.f32 %v7617_v53, %v467_v47  ;;  %v627_v18 = vsel %vm619_vm9, %v610_v32, %v626_v42 }
  0xe0   : > { %13868 = vst [vmem:[#allocation8_spill] sm:$0xff] %v7755_v51  ;;  %v630_v52 = vsel %vm620_vm7, %v616_v9, 1326507024  ;;  %v6345_v4 = vadd.s32 4294967169, %v1421_v8  ;;  %vm618_vm10 = vcmp.lt.s32.totalorder %v7704_v15, 2  ;;  %v629_v7 = vsel %vm617_vm8, %v607_v23, %v610_v32 }
  0xe1   : > { %13869 = vst [vmem:[#allocation9_spill] sm:$0xff] %v7761_v44  ;;  %v622_v57 = vsel %vm620_vm7, %v610_v32, 2102212464  ;;  %v415_v58 = vadd.f32 %v7622_v54, %v393_v56  ;;  %v628_v29 = vsel %vm618_vm10, %v625_v30, %v627_v18  ;;  %v631_v12 = vsel %vm619_vm9, %v613_v3, %v630_v52 }
  0xe2   : > { %v633_v47 = vshll.u32 %v593_v55, 8  ;;  %vm1636_vm11 = vcmp.gt.s32.totalorder %v1635_v60, 0  ;;  %vm1324_vm12 = vcmp.gt.s32.totalorder %v1323_v43, 0  ;;  %v2044_v9 = vand.u32 2139095040, %v7755_v51 }
  0xe3   : > { %v621_v8 = vsel %vm617_vm8, %v601_v41, %v604_v22  ;;  %v623_v0 = vsel %vm619_vm9, %v607_v23, %v622_v57  ;;  %v632_v56 = vsel %vm618_vm10, %v629_v7, %v631_v12  ;;  %v1221_v55 = vsel %vm1220_vm6, %v7730_v38, 0  ;;  %v361_v22 = vpop.permute.xlu1 %360 }
  0xe4   : > { %v7781_v1 = vmul.u32.u64.low %v633_v47, %v628_v29  ;;  %v7782_v2 = vmul.u32.u64.high %v633_v47, %v628_v29, %v7781_v1  ;;  %v1427_v3 = vadd.s32 1, %v6345_v4  ;;  %v1524_v5 = vand.u32 2139095040, %v7761_v44 }
  0xe5   : > { %v7789_v16 = vadd.f32 %v500_v45, %v415_v58  ;;  %v1637_v17 = vsel %vm1636_vm11, %v1635_v60, 0  ;;  %v1325_v20 = vsel %vm1324_vm12, %v1323_v43, 0  ;;  %v7795_v32 = vsub.s32 32, %v7724_v31 }
  0xe6   : > { %v7791_v23 = vmul.u32.u64.low %v633_v47, %v632_v56  ;;  %v7792_v27 = vmul.u32.u64.high %v633_v47, %v632_v56, %v7791_v23  ;;  %v7798_v41 = vand.u32 31, %v7728_v37  ;;  %v2045_v42 = vshrl.u32 %v2044_v9, 23 }
  0xe7   : > { %v624_v38 = vsel %vm618_vm10, %v621_v8, %v623_v0  ;;  %v7803_v30 = vshrl.u32 %v7728_v37, 5  ;;  %v7805_v45 = vand.u32 31, %v1221_v55  ;;  %v7809_v60 = vadd.f32 %v7622_v54, %v7734_v39  ;;  %v471_v0 = vpop.permute.xlu1 %470 }
  0xe8   : > { %v643_v43 = vadd.s32 1, %v7782_v2  ;;  %v7812_v18 = vand.u32 31, %v1637_v17  ;;  %v7814_v52 = vand.u32 31, %v1325_v20  ;;  %vm1428_vm13 = vcmp.gt.s32.totalorder %v1427_v3, 0 }
  0xe9   : > { %13870 = vst [vmem:[#allocation10_spill] sm:$0xff] %v7805_v45  ;;  %v1525_v4 = vshrl.u32 %v1524_v5, 23  ;;  %v532_v15 = vand.u32 2147483647, %v7789_v16  ;;  %v394_v57 = vmul.f32 %v7610_v48, %v361_v22  ;;  %v640_v37 = vmul.u32 %v633_v47, %v624_v38 }
  0xea   : > { %13871 = vst [vmem:[#allocation11_spill] sm:$0xff] %v7812_v18  ;;  %13872 = vst [vmem:[#allocation12_spill] sm:$0xff] %v7814_v52  ;;  %vm642_vm14 = vc.u32 %v7792_v27, %v7781_v1  ;;  %v7821_v7 = vsub.s32 32, %v7798_v41  ;;  %v7823_v39 = vshrl.u32 %v1221_v55, 5  ;;  %v6369_v58 = vadd.s32 4294967169, %v2045_v42 }
  0xeb   : > { %v644_v29 = vsel %vm642_vm14, %v643_v43, %v7782_v2  ;;  %v7827_v12 = vsub.s32 32, %v7805_v45  ;;  %v7829_v9 = vshrl.u32 %v1637_v17, 5  ;;  %v1429_v8 = vsel %vm1428_vm13, %v1427_v3, 0 }
  0xec   : > { %13873 = vst [vmem:[#allocation13_spill] sm:$0xff] %v7823_v39  ;;  %v645_v56 = vadd.s32 %v644_v29, %v640_v37  ;;  %v7832_v47 = vsub.s32 32, %v7812_v18  ;;  %v7834_v5 = vshrl.u32 %v1325_v20, 5  ;;  %v7837_v22 = vsub.s32 32, %v7814_v52 }
  0xed   : > { %13874 = vst [vmem:[#allocation14_spill] sm:$0xff] %v7827_v12  ;;  %13875 = vst [vmem:[#allocation15_spill] sm:$0xff] %v7829_v9  ;;  %v6349_v55 = vadd.s32 4294967169, %v1525_v4  ;;  %v548_v23 = vadd.f32 1.0, %v532_v15  ;;  %v416_v2 = vadd.f32 %v7622_v54, %v394_v57  ;;  %v7841_v17 = vshrl.u32 %v1429_v8, 5 }
  0xee   : > { %13876 = vst [vmem:[#allocation16_spill] sm:$0xff] %v7832_v47  ;;  %13877 = vst [vmem:[#allocation17_spill] sm:$0xff] %v7834_v5  ;;  %v646_v42 = vadd.s32 536870912, %v645_v56  ;;  %v2051_v3 = vadd.s32 1, %v6369_v58  ;;  %v501_v43 = vmul.f32 %v7617_v53, %v471_v0  ;;  %v13880_v37 = vmov 2475754826  }
  0xef   : > { %13878 = vst [vmem:[#allocation18_spill] sm:$0xff] %v7837_v22  ;;  %13879 = vst [vmem:[#allocation19_spill] sm:$0xff] %v7841_v17  ;;  %v707_v29 = vshrl.u32 %v13880_v37, %v7714_v24  ;;  %v13881_v46 = vmov 2131351028   ;;  %v13882_v54 = vmov 2102212464   ;;  %v706_v57 = vshll.u32 %v13688_v61, %v7696_v11 }
  0xf0   : > { %v647_v20 = vshrl.u32 %v646_v42, 30  ;;  %v710_v40 = vshrl.u32 %v13881_v46, %v7714_v24  ;;  %v712_v4 = vshll.u32 %v13881_v46, %v7696_v11  ;;  %v713_v15 = vshrl.u32 %v13882_v54, %v7714_v24 }
  0xf1   : > { %v715_v58 = vshll.u32 %v13882_v54, %v7696_v11  ;;  %v13883_v0 = vmov 920167782   ;;  %v13884_v42 = vmov 1326507024   ;;  %v13885_v18 = vand.u32 2147483647, %v7651_v49 }
  0xf2   : > { %v716_v38 = vshrl.u32 %v13883_v0, %v7714_v24  ;;  %v719_v51 = vshrl.u32 %v13884_v42, %v7714_v24  ;;  %v648_v9 = vshll.u32 %v647_v20, 30  ;;  %v709_v62 = vshll.u32 %v13880_v37, %v7696_v11 }
  0xf3   : > { %v696_v47 = vand.u32 8388607, %v13885_v18  ;;  %v714_v44 = vor.u32 %v713_v15, %v712_v4  ;;  %v7865_v61 = vand.u32 31, %v1429_v8  ;;  %v7867_v17 = vadd.s32 1, %v6349_v55 }
  0xf4   : > { %v717_v33 = vor.u32 %v716_v38, %v715_v58  ;;  %v718_v5 = vshll.u32 %v13883_v0, %v7696_v11  ;;  %v564_v52 = vmul.f32 30.0, %v548_v23  ;;  %v7871_v22 = vsub.s32 %v645_v56, %v648_v9 }
  0xf5   : > { %v708_v6 = vor.u32 %v707_v29, %v706_v57  ;;  %v711_v39 = vor.u32 %v710_v40, %v709_v62  ;;  %vm2052_vm0 = vcmp.gt.s32.totalorder %v2051_v3, 0  ;;  %v7873_v45 = vadd.f32 %v501_v43, %v416_v2  ;;  %v475_v40 = vpop.permute.xlu1 %474 }
  0xf6   : > { %v720_v18 = vor.u32 %v719_v51, %v718_v5  ;;  %vm724_vm1 = vcmp.lt.s32.totalorder %v7709_v21, 4  ;;  %v13886_v8 = vand.u32 2147483647, %v7643_v34  ;;  %v651_v38 = vsub.s32 0, %v7871_v22 }
  0xf7   : > { %v697_v11 = vor.u32 8388608, %v696_v47  ;;  %v13889_v9 = vmov 683565275   ;;  %v726_v62 = vsel %vm724_vm1, %v714_v44, 2102212464  ;;  %v671_v23 = vsub.s32 4, %v647_v20 }
  0xf8   : > { %vm7878_vm2 = vcmp.le.f32.partialorder %v13886_v8, 0.7853982  ;;  %v705_v56 = vshrl.u32 %v13889_v9, %v7714_v24  ;;  %vm721_vm3 = vcmp.lt.s32.totalorder %v7709_v21, 1  ;;  %vm723_vm4 = vcmp.lt.s32.totalorder %v7709_v21, 3 }
  0xf9   : > { %v730_v51 = vsel %vm724_vm1, %v717_v33, 920167782  ;;  %v6314_v5 = vmin.u32 %v651_v38, %v7871_v22  ;;  %v727_v47 = vsel %vm723_vm4, %v711_v39, %v726_v62  ;;  %v729_v43 = vsel %vm721_vm3, %v708_v6, %v711_v39 }
  0xfa   : > { %v725_v2 = vsel %vm721_vm3, %v705_v56, %v708_v6  ;;  %v533_v24 = vand.u32 2147483647, %v7873_v45  ;;  %v731_v29 = vsel %vm723_vm4, %v714_v44, %v730_v51  ;;  %v733_v4 = vsel %vm721_vm3, %v711_v39, %v714_v44 }
  0xfb   : > { %v734_v15 = vsel %vm724_vm1, %v720_v18, 1326507024  ;;  %v502_v57 = vmul.f32 %v7617_v53, %v475_v40  ;;  %v653_v58 = vclz %v6314_v5  ;;  %vm722_vm5 = vcmp.lt.s32.totalorder %v7709_v21, 2 }
  0xfc   : > { %v737_v8 = vshll.u32 %v697_v11, 8  ;;  %v672_v38 = vsel %vm587_vm15, %v671_v23, %v647_v20  ;;  %v728_v56 = vsel %vm722_vm5, %v725_v2, %v727_v47  ;;  %v732_v6 = vsel %vm722_vm5, %v729_v43, %v731_v29 }
  0xfd   : > { %v735_v62 = vsel %vm723_vm4, %v717_v33, %v734_v15  ;;  %v6315_v12 = vadd.s32 4294967294, %v653_v58  ;;  %v7910_v53 = vsub.s32 32, %v7865_v61  ;;  %v7913_v18 = vsel %vm2052_vm0, %v2051_v3, 0 }
  0xfe   : > { %v736_v51 = vsel %vm722_vm5, %v733_v4, %v735_v62  ;;  %v7905_v44 = vmul.u32.u64.low %v737_v8, %v732_v6  ;;  %v7906_v39 = vmul.u32.u64.high %v737_v8, %v732_v6, %v7905_v44  ;;  %13890 = vst [vmem:[#allocation20_spill] sm:$0xff] %v7913_v18  ;;  %v7919_v20 = vmul.f32 %v564_v52, %v7789_v16 }
  0xff   : > { %v7915_v11 = vmul.u32.u64.low %v737_v8, %v736_v51  ;;  %v7916_v40 = vmul.u32.u64.high %v737_v8, %v736_v51, %v7915_v11  ;;  %v7921_v21 = vadd.f32 1.0, %v533_v24  ;;  %v7924_v33 = vadd.f32 %v502_v57, %v7809_v60 }
 0x100   : > { %vm6316_vm6 = vcmp.lt.s32.totalorder %v6315_v12, 0  ;;  %v641_v23 = vadd.s32 %v7781_v1, %v7792_v27  ;;  %v674_v3 = vsel %vm7878_vm2, 0, %v672_v38  ;;  %v744_v2 = vmul.u32 %v737_v8, %v728_v56 }
 0x101   : > { %v656_v5 = vsel %vm6316_vm6, 0, %v6315_v12  ;;  %v747_v29 = vadd.s32 1, %v7906_v39  ;;  %v13703_v16 = vand.u32 2147483647, %v7653_v50  ;;  %vm746_vm7 = vc.u32 %v7916_v40, %v7905_v44 }
 0x102   : > { %v657_v47 = vsub.s32 32, %v656_v5  ;;  %v661_v43 = vsub.s32 4294967266, %v656_v5  ;;  %v658_v52 = vshll.u32 %v7871_v22, %v656_v5  ;;  %v810_v60 = vshll.u32 %v13889_v9, %v7701_v13 }
 0x103   : > { %v811_v1 = vshrl.u32 %v13880_v37, %v7722_v28  ;;  %v748_v24 = vsel %vm746_vm7, %v747_v29, %v7906_v39  ;;  %v813_v4 = vshll.u32 %v13880_v37, %v7701_v13  ;;  %vm691_vm8 = vcmp.lt.s32.totalorder %v7651_v49, 0 }
 0x104   : > { %v659_v27 = vshrl.u32 %v641_v23, %v657_v47  ;;  %v662_v12 = vadd.s32 127, %v661_v43  ;;  %v749_v15 = vadd.s32 %v748_v24, %v744_v2  ;;  %v814_v22 = vshrl.u32 %v13881_v46, %v7722_v28 }
 0x105   : > { %v816_v57 = vshll.u32 %v13881_v46, %v7701_v13  ;;  %v817_v58 = vshrl.u32 %v13882_v54, %v7722_v28  ;;  %v819_v56 = vshll.u32 %v13882_v54, %v7701_v13  ;;  %v820_v6 = vshrl.u32 %v13883_v0, %v7722_v28 }
 0x106   : > { %v660_v8 = vor.u32 %v659_v27, %v658_v52  ;;  %v663_v38 = vshll.u32 %v662_v12, 23  ;;  %v678_v62 = vadd.s32 3, %v674_v3  ;;  %v750_v51 = vadd.s32 536870912, %v749_v15 }
 0x107   : > { %v800_v39 = vand.u32 8388607, %v13703_v16  ;;  %v822_v11 = vshll.u32 %v13883_v0, %v7701_v13  ;;  %v13891_v5 = vand.u32 2147483647, %v7651_v49  ;;  %v812_v47 = vor.u32 %v811_v1, %v810_v60 }
 0x108   : > { %v664_v23 = vor.u32 4788187, %v663_v38  ;;  %v821_v43 = vor.u32 %v820_v6, %v819_v56  ;;  %v823_v29 = vshrl.u32 %v13884_v42, %v7722_v28  ;;  %v667_v3 = vcvt.s32.f32 %v660_v8 }
 0x109   : > { %vm7959_vm9 = vcmp.le.f32.partialorder %v13891_v5, 0.7853982  ;;  %v751_v52 = vshrl.u32 %v750_v51, 30  ;;  %v815_v27 = vor.u32 %v814_v22, %v813_v4  ;;  %v818_v12 = vor.u32 %v817_v58, %v816_v57 }
 0x10a   : > { %v665_v24 = vand.u32 2147483647, %v664_v23  ;;  %v824_v16 = vor.u32 %v823_v29, %v822_v11  ;;  %vm825_vm10 = vcmp.lt.s32.totalorder %v7716_v25, 1  ;;  %vm828_vm11 = vcmp.lt.s32.totalorder %v7716_v25, 4 }
 0x10b   : > { %v752_v13 = vshll.u32 %v751_v52, 30  ;;  %v775_v38 = vsub.s32 4, %v751_v52  ;;  %v809_v5 = vshrl.u32 %v13889_v9, %v7722_v28  ;;  %vm827_vm12 = vcmp.lt.s32.totalorder %v7716_v25, 3 }
 0x10c   : > { %v668_v60 = vmul.f32 %v667_v3, %v665_v24  ;;  %v7970_v1 = vand.u32 3, %v678_v62  ;;  %v801_v8 = vor.u32 8388608, %v800_v39  ;;  %v834_v4 = vsel %vm828_vm11, %v821_v43, 920167782 }
 0x10d   : > { %v7974_v22 = vsub.s32 %v749_v15, %v752_v13  ;;  %v830_v57 = vsel %vm828_vm11, %v818_v12, 2102212464  ;;  %v833_v58 = vsel %vm825_vm10, %v812_v47, %v815_v27  ;;  %v837_v28 = vsel %vm825_vm10, %v815_v27, %v818_v12 }
 0x10e   : > { %v669_v56 = vxor.u32 2147483648, %v668_v60  ;;  %v776_v6 = vsel %vm691_vm8, %v775_v38, %v751_v52  ;;  %v835_v62 = vsel %vm827_vm12, %v818_v12, %v834_v4  ;;  %v838_v15 = vsel %vm828_vm11, %v824_v16, 1326507024 }
 0x10f   : > { %v755_v51 = vsub.s32 0, %v7974_v22  ;;  %vm826_vm13 = vcmp.lt.s32.totalorder %v7716_v25, 2  ;;  %v829_v39 = vsel %vm825_vm10, %v809_v5, %v812_v47  ;;  %v839_v11 = vsel %vm827_vm12, %v821_v43, %v838_v15 }
 0x110   : > { %v670_v23 = vsel %vm587_vm15, %v669_v56, %v668_v60  ;;  %v831_v29 = vsel %vm827_vm12, %v815_v27, %v830_v57  ;;  %v840_v3 = vsel %vm826_vm13, %v837_v28, %v839_v11  ;;  %v841_v16 = vshll.u32 %v801_v8, 8 }
 0x111   : > { %v673_v52 = vsel %vm7878_vm2, %v7643_v34, %v670_v23  ;;  %v6318_v12 = vmin.u32 %v755_v51, %v7974_v22  ;;  %v778_v47 = vsel %vm7959_vm9, 0, %v776_v6  ;;  %v836_v43 = vsel %vm826_vm13, %v833_v58, %v835_v62 }
 0x112   : > { %7166 = vcosq.f32 %v673_v52  ;;  %v8008_v24 = vmul.u32.u64.low %v841_v16, %v840_v3  ;;  %v8009_v13 = vmul.u32.u64.high %v841_v16, %v840_v3, %v8008_v24  ;;  %v13894_v27 = vand.u32 2147483647, %v7645_v35 }
 0x113   : > { %7168 = vsinq.f32 %v673_v52  ;;  %v757_v55 = vclz %v6318_v12  ;;  %v832_v60 = vsel %vm826_vm13, %v829_v39, %v831_v29  ;;  %v8019_v8 = vmul.f32 30.0, %v7921_v21 }
 0x114   : > { %v8013_v38 = vand.u32 8388607, %v13894_v27  ;;  %v8022_v57 = vmul.u32.u64.low %v841_v16, %v836_v43  ;;  %v8023_v58 = vmul.u32.u64.high %v841_v16, %v836_v43, %v8022_v57  ;;  %v745_v28 = vadd.s32 %v7905_v44, %v7916_v40 }
 0x115   : > { %v6319_v56 = vadd.s32 4294967294, %v757_v55  ;;  %v8028_v6 = vadd.s32 3, %v778_v47  ;;  %v915_v62 = vshrl.u32 %v13880_v37, %v7707_v19  ;;  %vm684_vm14 = vcmp.eq.s32.totalorder %v7970_v1, 2 }
 0x116   : > { %v848_v25 = vmul.u32 %v841_v16, %v832_v60  ;;  %v914_v15 = vshll.u32 %v13889_v9, %v7683_v59  ;;  %v918_v51 = vshrl.u32 %v13881_v46, %v7707_v19  ;;  %vm681_vm15 = vcmp.eq.s32.totalorder %v7970_v1, 0 }
 0x117   : > { %vm6320_vm0 = vcmp.lt.s32.totalorder %v6319_v56, 0  ;;  %vm850_vm1 = vc.u32 %v8009_v13, %v8022_v57  ;;  %v913_v44 = vshrl.u32 %v13889_v9, %v7707_v19  ;;  %v917_v40 = vshll.u32 %v13880_v37, %v7683_v59 }
 0x118   : > { %vm680_vm2 = vcmp.lt.s32.totalorder %v7970_v1, 2  ;;  %v760_v39 = vsel %vm6320_vm0, 0, %v6319_v56  ;;  %v851_v11 = vadd.s32 1, %v8023_v58  ;;  %v916_v23 = vor.u32 %v915_v62, %v914_v15 }
 0x119   : > { %v921_v29 = vshrl.u32 %v13882_v54, %v7707_v19  ;;  %vm677_vm3 = vweird.f32 %v7643_v34  ;;  %v761_v3 = vsub.s32 32, %v760_v39  ;;  %v765_v16 = vsub.s32 4294967266, %v760_v39 }
 0x11a   : > { %v919_v52 = vor.u32 %v918_v51, %v917_v40  ;;  %v920_v12 = vshll.u32 %v13881_v46, %v7683_v59  ;;  %v852_v47 = vsel %vm850_vm1, %v851_v11, %v8023_v58  ;;  %v923_v43 = vshll.u32 %v13882_v54, %v7683_v59 }
 0x11b   : > { %v924_v24 = vshrl.u32 %v13883_v0, %v7707_v19  ;;  %v927_v27 = vshrl.u32 %v13884_v42, %v7707_v19  ;;  %v762_v55 = vshll.u32 %v7974_v22, %v760_v39  ;;  %v763_v60 = vshrl.u32 %v745_v28, %v761_v3 }
 0x11c   : > { %v766_v56 = vadd.s32 127, %v765_v16  ;;  %v853_v62 = vadd.s32 %v852_v47, %v848_v25  ;;  %v7167_v15 = vpop.eup %7166  ;;  %vm795_vm4 = vcmp.lt.s32.totalorder %v7653_v50, 0  ;;  %v922_v51 = vor.u32 %v921_v29, %v920_v12 }
 0x11d   : > { %v925_v40 = vor.u32 %v924_v24, %v923_v43  ;;  %v926_v58 = vshll.u32 %v13883_v0, %v7683_v59  ;;  %vm929_vm5 = vcmp.lt.s32.totalorder %v7694_v10, 1  ;;  %v7169_v11 = vpop.eup %7168  ;;  %v685_v4 = vxor.u32 2147483648, %v7167_v15 }
 0x11e   : > { %v764_v5 = vor.u32 %v763_v60, %v762_v55  ;;  %v767_v21 = vshll.u32 %v766_v56, 23  ;;  %v854_v19 = vadd.s32 536870912, %v853_v62  ;;  %v682_v18 = vxor.u32 2147483648, %v7169_v11  ;;  %v376_v55 = vpop.permute.xlu1 %375 }
 0x11f   : > { %v928_v22 = vor.u32 %v927_v27, %v926_v58  ;;  %vm931_vm6 = vcmp.lt.s32.totalorder %v7694_v10, 3  ;;  %vm932_vm7 = vcmp.lt.s32.totalorder %v7694_v10, 4  ;;  %vm1532_vm10 = vcmp.gt.s32.totalorder %v7867_v17, 0 }
 0x120   : > { %v686_v28 = vsel %vm684_vm14, %v685_v4, %v7169_v11  ;;  %v768_v25 = vor.u32 4788187, %v767_v21  ;;  %v855_v59 = vshrl.u32 %v854_v19, 30  ;;  %v937_v39 = vsel %vm929_vm5, %v916_v23, %v919_v52 }
 0x121   : > { %v683_v29 = vsel %vm681_vm15, %v7167_v15, %v682_v18  ;;  %v771_v3 = vcvt.s32.f32 %v764_v5  ;;  %v934_v16 = vsel %vm932_vm7, %v922_v51, 2102212464  ;;  %v938_v12 = vsel %vm932_vm7, %v925_v40, 920167782 }
 0x122   : > { %v687_v47 = vsel %vm680_vm2, %v683_v29, %v686_v28  ;;  %v769_v43 = vand.u32 2147483647, %v768_v25  ;;  %v856_v4 = vshll.u32 %v855_v59, 30  ;;  %v879_v21 = vsub.s32 4, %v855_v59 }
 0x123   : > { %v688_v24 = vsel %vm677_vm3, nan, %v687_v47  ;;  %v939_v27 = vsel %vm931_vm6, %v922_v51, %v938_v12  ;;  %v941_v18 = vsel %vm929_vm5, %v919_v52, %v922_v51  ;;  %v942_v5 = vsel %vm932_vm7, %v928_v22, 1326507024  ;;  %v483_v47 = vpop.permute.xlu1 %482 }
 0x124   : > { %6659 = vmatprep.mubr.f32.mxu0 %v688_v24  ;;  %v772_v60 = vmul.f32 %v771_v3, %v769_v43  ;;  %v8087_v1 = vsub.s32 %v853_v62, %v856_v4  ;;  %vm930_vm11 = vcmp.lt.s32.totalorder %v7694_v10, 2  ;;  %v933_v34 = vsel %vm929_vm5, %v913_v44, %v916_v23 }
 0x125   : > { %v935_v56 = vsel %vm931_vm6, %v919_v52, %v934_v16  ;;  %v940_v15 = vsel %vm930_vm11, %v937_v39, %v939_v27  ;;  %v943_v51 = vsel %vm931_vm6, %v925_v40, %v942_v5  ;;  %v13895_v58 = vor.u32 8388608, %v8013_v38 }
 0x126   : > { %v773_v19 = vxor.u32 2147483648, %v772_v60  ;;  %v859_v62 = vsub.s32 0, %v8087_v1  ;;  %v880_v22 = vsel %vm795_vm4, %v879_v21, %v855_v59  ;;  %v944_v44 = vsel %vm930_vm11, %v941_v18, %v943_v51 }
 0x127   : > { %v945_v11 = vshll.u32 %v13895_v58, 8  ;;  %v397_v40 = vmul.f32 %v7610_v48, %v376_v55  ;;  %v13896_v39 = vand.u32 2147483647, %v7653_v50  ;;  %v8124_v3 = vmul.f32 %v8019_v8, %v7873_v45 }
 0x128   : > { %v774_v38 = vsel %vm691_vm8, %v773_v19, %v772_v60  ;;  %v6322_v59 = vmin.u32 %v859_v62, %v8087_v1  ;;  %v8130_v48 = vand.u32 3, %v8028_v6  ;;  %v936_v4 = vsel %vm930_vm11, %v933_v34, %v935_v56  ;;  %v7359_v60 = vld [vmem:[%s13660_s1 + $0x1] ss:$0 sm:$0xff] }
 0x129   : > { %v8105_v23 = vmul.u32.u64.low %v945_v11, %v944_v44  ;;  %v8106_v52 = vmul.u32.u64.high %v945_v11, %v944_v44, %v8105_v23  ;;  %v8108_v28 = vmul.u32.u64.low %v945_v11, %v940_v15  ;;  %v8109_v25 = vmul.u32.u64.high %v945_v11, %v940_v15, %v8108_v28 }
 0x12a   : > { %vm8117_vm12 = vcmp.le.f32.partialorder %v13896_v39, 0.7853982  ;;  %v777_v16 = vsel %vm7959_vm9, %v7651_v49, %v774_v38  ;;  %v861_v43 = vclz %v6322_v59  ;;  %v13705_v21 = vand.u32 2147483647, %v7660_v63 }
 0x12b   : > { %v882_v12 = vsel %vm8117_vm12, 0, %v880_v22  ;;  %7170 = vcosq.f32 %v777_v16  ;;  %v8140_v45 = vsel %vm1532_vm10, %v7867_v17, 0  ;;  %v13899_v2 = vand.u32 2139095040, %v7919_v20  ;;  %v7358_v17 = vld [vmem:[%s13661_s2] ss:$0 sm:$0xff] }
 0x12c   : > { %7172 = vsinq.f32 %v777_v16  ;;  %vm954_vm8 = vc.u32 %v8106_v52, %v8108_v28  ;;  %v13900_v6 = vand.u32 2147483647, %v7924_v33  ;;  %v6323_v10 = vadd.s32 4294967294, %v861_v43 }
 0x12d   : > { %v8144_v8 = vshrl.u32 %v13899_v2, 23  ;;  %v886_v27 = vadd.s32 3, %v882_v12  ;;  %v955_v18 = vadd.s32 1, %v8109_v25  ;;  %v1836_v5 = vand.u32 2139095040, %v8124_v3 }
 0x12e   : > { %v8150_v24 = vadd.f32 1.0, %v13900_v6  ;;  %v8157_v55 = vadd.f32 %v7358_v17, %v397_v40  ;;  %v8162_v34 = vmul.f32 %v7359_v60, %v483_v47  ;;  %v952_v56 = vmul.u32 %v945_v11, %v936_v4 }
 0x12f   : > { %vm788_vm9 = vcmp.eq.s32.totalorder %v8130_v48, 2  ;;  %vm6324_vm13 = vcmp.lt.s32.totalorder %v6323_v10, 0  ;;  %v956_v15 = vsel %vm954_vm8, %v955_v18, %v8109_v25  ;;  %v8168_v51 = vand.u32 8388607, %v13705_v21 }
 0x130   : > { %vm785_vm14 = vcmp.eq.s32.totalorder %v8130_v48, 0  ;;  %v849_v58 = vadd.s32 %v8022_v57, %v8009_v13  ;;  %v864_v19 = vsel %vm6324_vm13, 0, %v6323_v10  ;;  %v957_v62 = vadd.s32 %v956_v15, %v952_v56 }
 0x131   : > { %v1019_v22 = vshrl.u32 %v13880_v37, %v7795_v32  ;;  %vm784_vm15 = vcmp.lt.s32.totalorder %v8130_v48, 2  ;;  %v865_v11 = vsub.s32 32, %v864_v19  ;;  %v869_v44 = vsub.s32 4294967266, %v864_v19 }
 0x132   : > { %v8176_v23 = vand.u32 3, %v886_v27  ;;  %v1017_v25 = vshrl.u32 %v13889_v9, %v7795_v32  ;;  %vm781_vm0 = vweird.f32 %v7651_v49  ;;  %vm899_vm1 = vcmp.lt.s32.totalorder %v7645_v35, 0 }
 0x133   : > { %v958_v40 = vadd.s32 536870912, %v957_v62  ;;  %v1018_v13 = vshll.u32 %v13889_v9, %v7724_v31  ;;  %v1021_v57 = vshll.u32 %v13880_v37, %v7724_v31  ;;  %v1022_v38 = vshrl.u32 %v13881_v46, %v7795_v32 }
 0x134   : > { %v866_v39 = vshll.u32 %v8087_v1, %v864_v19  ;;  %v867_v59 = vshrl.u32 %v849_v58, %v865_v11  ;;  %v870_v16 = vadd.s32 127, %v869_v44  ;;  %v1009_v12 = vor.u32 8388608, %v8168_v51 }
 0x135   : > { %v959_v47 = vshrl.u32 %v958_v40, 30  ;;  %v1020_v43 = vor.u32 %v1019_v22, %v1018_v13  ;;  %v1025_v4 = vshrl.u32 %v13882_v54, %v7795_v32  ;;  %v1028_v2 = vshrl.u32 %v13883_v0, %v7795_v32  ;;  %v7171_v6 = vpop.eup %7170 }
 0x136   : > { %v868_v10 = vor.u32 %v867_v59, %v866_v39  ;;  %v871_v27 = vshll.u32 %v870_v16, 23  ;;  %v13901_v18 = vand.u32 2147483647, %v7645_v35  ;;  %v1024_v1 = vshll.u32 %v13881_v46, %v7724_v31  ;;  %v7173_v56 = vpop.eup %7172 }
 0x137   : > { %v1031_v60 = vshrl.u32 %v13884_v42, %v7795_v32  ;;  %v789_v15 = vxor.u32 2147483648, %v7171_v6  ;;  %v960_v51 = vshll.u32 %v959_v47, 30  ;;  %v1023_v58 = vor.u32 %v1022_v38, %v1021_v57 }
 0x138   : > { %vm8196_vm2 = vcmp.le.f32.partialorder %v13901_v18, 0.7853982  ;;  %v1027_v19 = vshll.u32 %v13882_v54, %v7724_v31  ;;  %v786_v22 = vxor.u32 2147483648, %v7173_v56  ;;  %v872_v11 = vor.u32 4788187, %v871_v27 }
 0x139   : > { %v983_v44 = vsub.s32 4, %v959_v47  ;;  %v1030_v40 = vshll.u32 %v13883_v0, %v7724_v31  ;;  %v790_v13 = vsel %vm788_vm9, %v789_v15, %v7173_v56  ;;  %v8210_v39 = vsub.s32 %v957_v62, %v960_v51 }
 0x13a   : > { %v1026_v59 = vor.u32 %v1025_v4, %v1024_v1  ;;  %v1029_v32 = vor.u32 %v1028_v2, %v1027_v19  ;;  %v787_v16 = vsel %vm785_vm14, %v7171_v6, %v786_v22  ;;  %v873_v57 = vand.u32 2147483647, %v872_v11 }
 0x13b   : > { %v875_v38 = vcvt.s32.f32 %v868_v10  ;;  %v1032_v18 = vor.u32 %v1031_v60, %v1030_v40  ;;  %v791_v27 = vsel %vm784_vm15, %v787_v16, %v790_v13  ;;  %v963_v21 = vsub.s32 0, %v8210_v39 }
 0x13c   : > { %vm1033_vm3 = vcmp.lt.s32.totalorder %v7718_v26, 1  ;;  %vm1035_vm5 = vcmp.lt.s32.totalorder %v7718_v26, 3  ;;  %v792_v31 = vsel %vm781_vm0, nan, %v791_v27  ;;  %v984_v4 = vsel %vm899_vm1, %v983_v44, %v959_v47 }
 0x13d   : > { %v876_v62 = vmul.f32 %v875_v38, %v873_v57  ;;  %vm1036_vm6 = vcmp.lt.s32.totalorder %v7718_v26, 4  ;;  %6660 = vmatmul.mubr.f32.vlgmr.msra.gmra.mrb[0].mxu0 %v792_v31  ;;  %v6326_v2 = vmin.u32 %v963_v21, %v8210_v39  ;;  %v1041_v6 = vsel %vm1033_vm3, %v1020_v43, %v1023_v58 }
 0x13e   : > { %v1038_v48 = vsel %vm1036_vm6, %v1026_v59, 2102212464  ;;  %v1042_v10 = vsel %vm1036_vm6, %v1029_v32, 920167782  ;;  %v1045_v49 = vsel %vm1033_vm3, %v1023_v58, %v1026_v59  ;;  %v1046_v56 = vsel %vm1036_vm6, %v1032_v18, 1326507024 }
 0x13f   : > { %v877_v1 = vxor.u32 2147483648, %v876_v62  ;;  %v1043_v60 = vsel %vm1035_vm5, %v1026_v59, %v1042_v10  ;;  %v965_v15 = vclz %v6326_v2  ;;  %v986_v47 = vsel %vm8196_vm2, 0, %v984_v4 }
 0x140   : > { %vm1034_vm7 = vcmp.lt.s32.totalorder %v7718_v26, 2  ;;  %v1037_v21 = vsel %vm1033_vm3, %v1017_v25, %v1020_v43  ;;  %v1047_v22 = vsel %vm1035_vm5, %v1029_v32, %v1046_v56  ;;  %v1049_v11 = vshll.u32 %v1009_v12, 8 }
 0x141   : > { %v878_v51 = vsel %vm795_vm4, %v877_v1, %v876_v62  ;;  %v1044_v19 = vsel %vm1034_vm7, %v1041_v6, %v1043_v60  ;;  %v6327_v40 = vadd.s32 4294967294, %v965_v15  ;;  %v1039_v13 = vsel %vm1035_vm5, %v1023_v58, %v1038_v48 }
 0x142   : > { %v881_v44 = vsel %vm8117_vm12, %v7653_v50, %v878_v51  ;;  %v1048_v25 = vsel %vm1034_vm7, %v1045_v49, %v1047_v22  ;;  %v1105_v16 = vand.u32 2147483647, %v7669_v14  ;;  %v8259_v29 = vshrl.u32 %v1836_v5, 23 }
 0x143   : > { %7174 = vcosq.f32 %v881_v44  ;;  %v8249_v43 = vmul.u32.u64.low %v1049_v11, %v1048_v25  ;;  %v8250_v59 = vmul.u32.u64.high %v1049_v11, %v1048_v25, %v8249_v43  ;;  %vm6328_vm4 = vcmp.lt.s32.totalorder %v6327_v40, 0 }
 0x144   : > { %7176 = vsinq.f32 %v881_v44  ;;  %v8253_v12 = vmul.u32.u64.low %v1049_v11, %v1044_v19  ;;  %v8254_v32 = vmul.u32.u64.high %v1049_v11, %v1044_v19, %v8253_v12  ;;  %v8262_v58 = vmul.f32 30.0, %v8150_v24 }
 0x145   : > { %v968_v57 = vsel %vm6328_vm4, 0, %v6327_v40  ;;  %v990_v38 = vadd.s32 3, %v986_v47  ;;  %v953_v18 = vadd.s32 %v8108_v28, %v8106_v52  ;;  %v1040_v62 = vsel %vm1034_vm7, %v1037_v21, %v1039_v13 }
 0x146   : > { %v969_v27 = vsub.s32 32, %v968_v57  ;;  %v973_v31 = vsub.s32 4294967266, %v968_v57  ;;  %v8270_v4 = vadd.f32 %v8162_v34, %v8157_v55  ;;  %vm892_vm10 = vcmp.eq.s32.totalorder %v8176_v23, 2 }
 0x147   : > { %vm1058_vm11 = vc.u32 %v8250_v59, %v8253_v12  ;;  %v8277_v24 = vand.u32 8388607, %v1105_v16  ;;  %vm889_vm12 = vcmp.eq.s32.totalorder %v8176_v23, 0  ;;  %v970_v52 = vshll.u32 %v8210_v39, %v968_v57 }
 0x148   : > { %v971_v28 = vshrl.u32 %v953_v18, %v969_v27  ;;  %v974_v26 = vadd.s32 127, %v973_v31  ;;  %v1059_v5 = vadd.s32 1, %v8254_v32  ;;  %vm888_vm8 = vcmp.lt.s32.totalorder %v8176_v23, 2 }
 0x149   : > { %v8283_v55 = vand.u32 3, %v990_v38  ;;  %v1056_v34 = vmul.u32 %v1049_v11, %v1040_v62  ;;  %v1121_v2 = vshrl.u32 %v13889_v9, %v7821_v7  ;;  %v1123_v48 = vshrl.u32 %v13880_v37, %v7821_v7 }
 0x14a   : > { %vm885_vm9 = vweird.f32 %v7653_v50  ;;  %v972_v6 = vor.u32 %v971_v28, %v970_v52  ;;  %v975_v10 = vshll.u32 %v974_v26, 23  ;;  %v1060_v39 = vsel %vm1058_vm11, %v1059_v5, %v8254_v32 }
 0x14b   : > { %v1126_v1 = vshrl.u32 %v13881_v46, %v7821_v7  ;;  %v1061_v60 = vadd.s32 %v1060_v39, %v1056_v34  ;;  %v1113_v49 = vor.u32 8388608, %v8277_v24  ;;  %v1122_v56 = vshll.u32 %v13889_v9, %v7798_v41 }
 0x14c   : > { %v1125_v15 = vshll.u32 %v13880_v37, %v7798_v41  ;;  %v976_v47 = vor.u32 4788187, %v975_v10  ;;  %v1128_v21 = vshll.u32 %v13881_v46, %v7798_v41  ;;  %v1129_v51 = vshrl.u32 %v13882_v54, %v7821_v7 }
 0x14d   : > { %v1132_v19 = vshrl.u32 %v13883_v0, %v7821_v7  ;;  %v7175_v22 = vpop.eup %7174  ;;  %v1062_v11 = vadd.s32 536870912, %v1061_v60  ;;  %v1124_v44 = vor.u32 %v1123_v48, %v1122_v56  ;;  %v1131_v40 = vshll.u32 %v13882_v54, %v7798_v41 }
 0x14e   : > { %v1135_v13 = vshrl.u32 %v13884_v42, %v7821_v7  ;;  %v7177_v25 = vpop.eup %7176  ;;  %v893_v43 = vxor.u32 2147483648, %v7175_v22  ;;  %v977_v32 = vand.u32 2147483647, %v976_v47  ;;  %v979_v57 = vcvt.s32.f32 %v972_v6 }
 0x14f   : > { %vm1003_vm13 = vcmp.lt.s32.totalorder %v7660_v63, 0  ;;  %v1127_v38 = vor.u32 %v1126_v1, %v1125_v15  ;;  %v890_v18 = vxor.u32 2147483648, %v7177_v25  ;;  %v1063_v27 = vshrl.u32 %v1062_v11, 30 }
 0x150   : > { %v1133_v31 = vor.u32 %v1132_v19, %v1131_v40  ;;  %v1134_v62 = vshll.u32 %v13883_v0, %v7798_v41  ;;  %v894_v24 = vsel %vm892_vm10, %v893_v43, %v7177_v25  ;;  %v980_v52 = vmul.f32 %v979_v57, %v977_v32 }
 0x151   : > { %v1130_v28 = vor.u32 %v1129_v51, %v1128_v21  ;;  %vm1137_vm14 = vcmp.lt.s32.totalorder %v7803_v30, 1  ;;  %v891_v7 = vsel %vm889_vm12, %v7175_v22, %v890_v18  ;;  %v1064_v26 = vshll.u32 %v1063_v27, 30 }
 0x152   : > { %v1136_v5 = vor.u32 %v1135_v13, %v1134_v62  ;;  %vm1139_vm15 = vcmp.lt.s32.totalorder %v7803_v30, 3  ;;  %v895_v34 = vsel %vm888_vm8, %v891_v7, %v894_v24  ;;  %v981_v48 = vxor.u32 2147483648, %v980_v52 }
 0x153   : > { %vm1140_vm0 = vcmp.lt.s32.totalorder %v7803_v30, 4  ;;  %v1145_v41 = vsel %vm1137_vm14, %v1124_v44, %v1127_v38  ;;  %v896_v6 = vsel %vm885_vm9, nan, %v895_v34  ;;  %v8324_v10 = vsub.s32 %v1061_v60, %v1064_v26  ;;  %v13908_v34 = vld [vmem:[#allocation10_spill] sm:$0xff] }
 0x154   : > { %v1087_v39 = vsub.s32 4, %v1063_v27  ;;  %v1146_v1 = vsel %vm1140_vm0, %v1133_v31, 920167782  ;;  %6662 = vmatprep.mubr.f32.mxu0 %v896_v6  ;;  %v982_v23 = vsel %vm899_vm1, %v981_v48, %v980_v52  ;;  %vm1138_vm3 = vcmp.lt.s32.totalorder %v7803_v30, 2  ;;  %v13907_v52 = vld [vmem:[#allocation14_spill] sm:$0xff] }
 0x155   : > { %v1142_v56 = vsel %vm1140_vm0, %v1130_v28, 2102212464  ;;  %v1147_v15 = vsel %vm1139_vm15, %v1130_v28, %v1146_v1  ;;  %v985_v50 = vsel %vm8196_vm2, %v7645_v35, %v982_v23  ;;  %v1067_v60 = vsub.s32 0, %v8324_v10 }
 0x156   : > { %v1148_v47 = vsel %vm1138_vm3, %v1145_v41, %v1147_v15  ;;  %v1149_v21 = vsel %vm1137_vm14, %v1127_v38, %v1130_v28  ;;  %7178 = vcosq.f32 %v985_v50  ;;  %v1141_v51 = vsel %vm1137_vm14, %v1121_v2, %v1124_v44 }
 0x157   : > { %v1150_v19 = vsel %vm1140_vm0, %v1136_v5, 1326507024  ;;  %v1153_v22 = vshll.u32 %v1113_v49, 8  ;;  %7180 = vsinq.f32 %v985_v50  ;;  %v6330_v17 = vmin.u32 %v1067_v60, %v8324_v10 }
 0x158   : > { %v1088_v11 = vsel %vm1003_vm13, %v1087_v39, %v1063_v27  ;;  %v1151_v40 = vsel %vm1139_vm15, %v1133_v31, %v1150_v19  ;;  %v1143_v13 = vsel %vm1139_vm15, %v1127_v38, %v1142_v56  ;;  %v8361_v49 = vadd.s32 4294967169, %v8144_v8 }
 0x159   : > { %v1152_v25 = vsel %vm1138_vm3, %v1149_v21, %v1151_v40  ;;  %v8356_v2 = vmul.u32.u64.low %v1153_v22, %v1148_v47  ;;  %v8357_v44 = vmul.u32.u64.high %v1153_v22, %v1148_v47, %v8356_v2  ;;  %v8365_v43 = vmul.f32 %v8262_v58, %v7924_v33 }
 0x15a   : > { %v13904_v32 = vand.u32 2147483647, %v7660_v63  ;;  %v1069_v38 = vclz %v6330_v17  ;;  %v8374_v18 = vadd.s32 4294967169, %v8259_v29  ;;  %v536_v62 = vand.u32 2147483647, %v8270_v4 }
 0x15b   : > { %v8378_v31 = vmul.u32.u64.low %v1153_v22, %v1152_v25  ;;  %v8379_v8 = vmul.u32.u64.high %v1153_v22, %v1152_v25, %v8378_v31  ;;  %v1144_v58 = vsel %vm1138_vm3, %v1141_v51, %v1143_v13  ;;  %v1209_v24 = vand.u32 2147483647, %v7675_v36 }
 0x15c   : > { %vm8369_vm1 = vcmp.le.f32.partialorder %v13904_v32, 0.7853982  ;;  %v6331_v33 = vadd.s32 4294967294, %v1069_v38  ;;  %vm992_vm2 = vcmp.lt.s32.totalorder %v8283_v55, 2  ;;  %vm993_vm5 = vcmp.eq.s32.totalorder %v8283_v55, 0 }
 0x15d   : > { %v1090_v27 = vsel %vm8369_vm1, 0, %v1088_v11  ;;  %v1163_v29 = vadd.s32 1, %v8357_v44  ;;  %v1227_v28 = vshrl.u32 %v13880_v37, %v13907_v52  ;;  %vm989_vm6 = vweird.f32 %v7645_v35 }
 0x15e   : > { %vm996_vm7 = vcmp.eq.s32.totalorder %v8283_v55, 2  ;;  %v1057_v7 = vadd.s32 %v8253_v12, %v8250_v59  ;;  %vm6332_vm4 = vcmp.lt.s32.totalorder %v6331_v33, 0  ;;  %v1094_v30 = vadd.s32 3, %v1090_v27 }
 0x15f   : > { %v1072_v26 = vsel %vm6332_vm4, 0, %v6331_v33  ;;  %v1160_v5 = vmul.u32 %v1153_v22, %v1144_v58  ;;  %vm1162_vm10 = vc.u32 %v8379_v8, %v8356_v2  ;;  %v1226_v48 = vshll.u32 %v13889_v9, %v13908_v34 }
 0x160   : > { %v1073_v41 = vsub.s32 32, %v1072_v26  ;;  %v1077_v6 = vsub.s32 4294967266, %v1072_v26  ;;  %v1164_v39 = vsel %vm1162_vm10, %v1163_v29, %v8357_v44  ;;  %v1216_v1 = vand.u32 8388607, %v1209_v24  ;;  %v7179_v23 = vpop.eup %7178 }
 0x161   : > { %v1074_v59 = vshll.u32 %v8324_v10, %v1072_v26  ;;  %v1165_v12 = vadd.s32 %v1164_v39, %v1160_v5  ;;  %v1228_v56 = vor.u32 %v1227_v28, %v1226_v48  ;;  %v1229_v15 = vshll.u32 %v13880_v37, %v13908_v34  ;;  %v7181_v50 = vpop.eup %7180 }
 0x162   : > { %v997_v60 = vxor.u32 2147483648, %v7179_v23  ;;  %v1075_v47 = vshrl.u32 %v1057_v7, %v1073_v41  ;;  %v1078_v21 = vadd.s32 127, %v1077_v6  ;;  %v1236_v51 = vshrl.u32 %v13883_v0, %v13907_v52 }
 0x163   : > { %v994_v19 = vxor.u32 2147483648, %v7181_v50  ;;  %v1166_v22 = vadd.s32 536870912, %v1165_v12  ;;  %v1230_v17 = vshrl.u32 %v13881_v46, %v13907_v52  ;;  %v1233_v10 = vshrl.u32 %v13882_v54, %v13907_v52 }
 0x164   : > { %v998_v11 = vsel %vm996_vm7, %v997_v60, %v7181_v50  ;;  %v1076_v40 = vor.u32 %v1075_v47, %v1074_v59  ;;  %v1079_v13 = vshll.u32 %v1078_v21, 23  ;;  %v1235_v25 = vshll.u32 %v13882_v54, %v13908_v34  ;;  %v13911_v59 = vld [vmem:[#allocation13_spill] sm:$0xff] }
 0x165   : > { %v995_v44 = vsel %vm993_vm5, %v7179_v23, %v994_v19  ;;  %v1167_v32 = vshrl.u32 %v1166_v22, 30  ;;  %v1232_v38 = vshll.u32 %v13881_v46, %v13908_v34  ;;  %v1239_v27 = vshrl.u32 %v13884_v42, %v13907_v52 }
 0x166   : > { %v999_v31 = vsel %vm992_vm2, %v995_v44, %v998_v11  ;;  %v1080_v33 = vor.u32 4788187, %v1079_v13  ;;  %vm1107_vm11 = vcmp.lt.s32.totalorder %v7669_v14, 0  ;;  %v1237_v58 = vor.u32 %v1236_v51, %v1235_v25 }
 0x167   : > { %v1238_v29 = vshll.u32 %v13883_v0, %v13908_v34  ;;  %v1000_v28 = vsel %vm989_vm6, nan, %v999_v31  ;;  %v1168_v7 = vshll.u32 %v1167_v32, 30  ;;  %v1231_v26 = vor.u32 %v1230_v17, %v1229_v15  ;;  %v13912_v31 = vld [vmem:[#allocation6_spill] sm:$0xff] }
 0x168   : > { %v1234_v5 = vor.u32 %v1233_v10, %v1232_v38  ;;  %6663 = vmatmul.mubr.f32.gmra.mrb[2].mxu0 %v1000_v28  ;;  %v1081_v48 = vand.u32 2147483647, %v1080_v33  ;;  %v1083_v41 = vcvt.s32.f32 %v1076_v40  ;;  %v8427_v6 = vand.u32 3, %v1094_v30 }
 0x169   : > { %v1240_v55 = vor.u32 %v1239_v27, %v1238_v29  ;;  %vm8431_vm12 = vcmp.le.f32.partialorder %v1105_v16, 0.7853982  ;;  %v8435_v23 = vsub.s32 %v1165_v12, %v1168_v7  ;;  %v1217_v34 = vor.u32 8388608, %v1216_v1 }
 0x16a   : > { %v1225_v35 = vshrl.u32 %v13889_v9, %v13907_v52  ;;  %vm1244_vm8 = vcmp.lt.s32.totalorder %v13911_v59, 4  ;;  %v1084_v15 = vmul.f32 %v1083_v41, %v1081_v48  ;;  %vm1241_vm9 = vcmp.lt.s32.totalorder %v13911_v59, 1 }
 0x16b   : > { %vm1243_vm14 = vcmp.lt.s32.totalorder %v13911_v59, 3  ;;  %v1250_v30 = vsel %vm1244_vm8, %v1237_v58, 920167782  ;;  %v1171_v50 = vsub.s32 0, %v8435_v23  ;;  %v1191_v16 = vsub.s32 4, %v1167_v32 }
 0x16c   : > { %v1249_v60 = vsel %vm1241_vm9, %v1228_v56, %v1231_v26  ;;  %v1251_v12 = vsel %vm1243_vm14, %v1234_v5, %v1250_v30  ;;  %v1085_v47 = vxor.u32 2147483648, %v1084_v15  ;;  %v1246_v1 = vsel %vm1244_vm8, %v1234_v5, 2102212464 }
 0x16d   : > { %v1253_v21 = vsel %vm1241_vm9, %v1231_v26, %v1234_v5  ;;  %v1254_v51 = vsel %vm1244_vm8, %v1240_v55, 1326507024  ;;  %v6334_v52 = vmin.u32 %v1171_v50, %v8435_v23  ;;  %vm1242_vm15 = vcmp.lt.s32.totalorder %v13911_v59, 2 }
 0x16e   : > { %v1245_v19 = vsel %vm1241_vm9, %v1225_v35, %v1228_v56  ;;  %v1255_v22 = vsel %vm1243_vm14, %v1237_v58, %v1254_v51  ;;  %v1086_v17 = vsel %vm1003_vm13, %v1085_v47, %v1084_v15  ;;  %v1252_v10 = vsel %vm1242_vm15, %v1249_v60, %v1251_v12  ;;  %v13913_v15 = vld [vmem:[#allocation18_spill] sm:$0xff] }
 0x16f   : > { %v1256_v11 = vsel %vm1242_vm15, %v1253_v21, %v1255_v22  ;;  %v1257_v40 = vshll.u32 %v1217_v34, 8  ;;  %v1089_v13 = vsel %vm8369_vm1, %v7660_v63, %v1086_v17  ;;  %v1173_v25 = vclz %v6334_v52  ;;  %v13914_v21 = vld [vmem:[#allocation12_spill] sm:$0xff] }
 0x170   : > { %v1192_v56 = vsel %vm1107_vm11, %v1191_v16, %v1167_v32  ;;  %v1247_v44 = vsel %vm1243_vm14, %v1231_v26, %v1246_v1  ;;  %7182 = vcosq.f32 %v1089_v13  ;;  %v1313_v33 = vand.u32 2147483647, %v13912_v31 }
 0x171   : > { %v8462_v38 = vmul.u32.u64.low %v1257_v40, %v1256_v11  ;;  %v8463_v27 = vmul.u32.u64.high %v1257_v40, %v1256_v11, %v8462_v38  ;;  %7184 = vsinq.f32 %v1089_v13  ;;  %v6335_v58 = vadd.s32 4294967294, %v1173_v25 }
 0x172   : > { %v8466_v29 = vmul.u32.u64.low %v1257_v40, %v1252_v10  ;;  %v8467_v28 = vmul.u32.u64.high %v1257_v40, %v1252_v10, %v8466_v29  ;;  %v8471_v57 = vand.u32 31, %v8140_v45  ;;  %v8474_v32 = vadd.s32 1, %v8361_v49 }
 0x173   : > { %v1940_v7 = vand.u32 2139095040, %v8365_v43  ;;  %v1194_v26 = vsel %vm8431_vm12, 0, %v1192_v56  ;;  %v8480_v5 = vadd.s32 1, %v8374_v18  ;;  %v8484_v48 = vadd.f32 1.0, %v536_v62 }
 0x174   : > { %vm6336_vm13 = vcmp.lt.s32.totalorder %v6335_v58, 0  ;;  %v1248_v41 = vsel %vm1242_vm15, %v1245_v19, %v1247_v44  ;;  %vm1100_vm0 = vcmp.eq.s32.totalorder %v8427_v6, 2  ;;  %v1161_v49 = vadd.s32 %v8356_v2, %v8379_v8 }
 0x175   : > { %v1176_v55 = vsel %vm6336_vm13, 0, %v6335_v58  ;;  %vm1266_vm3 = vc.u32 %v8463_v27, %v8466_v29  ;;  %v8495_v18 = vand.u32 8388607, %v1313_v33  ;;  %vm1097_vm1 = vcmp.eq.s32.totalorder %v8427_v6, 0 }
 0x176   : > { %v1177_v62 = vsub.s32 32, %v1176_v55  ;;  %v1181_v34 = vsub.s32 4294967266, %v1176_v55  ;;  %v8498_v35 = vadd.s32 3, %v1194_v26  ;;  %v1267_v59 = vadd.s32 1, %v8467_v28 }
 0x177   : > { %vm1096_vm2 = vcmp.lt.s32.totalorder %v8427_v6, 2  ;;  %v1178_v2 = vshll.u32 %v8435_v23, %v1176_v55  ;;  %v1264_v8 = vmul.u32 %v1257_v40, %v1248_v41  ;;  %v8505_v30 = vshrl.u32 %v13889_v9, %v13913_v15 }
 0x178   : > { %v1331_v50 = vshrl.u32 %v13880_v37, %v13913_v15  ;;  %vm1093_vm5 = vweird.f32 %v7660_v63  ;;  %v1179_v16 = vshrl.u32 %v1161_v49, %v1177_v62  ;;  %v1182_v60 = vadd.s32 127, %v1181_v34 }
 0x179   : > { %v1268_v12 = vsel %vm1266_vm3, %v1267_v59, %v8467_v28  ;;  %v1334_v47 = vshrl.u32 %v13881_v46, %v13913_v15  ;;  %v1321_v23 = vor.u32 8388608, %v8495_v18  ;;  %v1330_v51 = vshll.u32 %v13889_v9, %v13914_v21 }
 0x17a   : > { %v1269_v1 = vadd.s32 %v1268_v12, %v1264_v8  ;;  %v1337_v52 = vshrl.u32 %v13882_v54, %v13913_v15  ;;  %v1180_v19 = vor.u32 %v1179_v16, %v1178_v2  ;;  %v1183_v22 = vshll.u32 %v1182_v60, 23  ;;  %v7183_v11 = vpop.eup %7182  ;;  %v13917_v60 = vld [vmem:[#allocation17_spill] sm:$0xff] }
 0x17b   : > { %v1333_v17 = vshll.u32 %v13880_v37, %v13914_v21  ;;  %v1340_v10 = vshrl.u32 %v13883_v0, %v13913_v15  ;;  %vm1211_vm6 = vcmp.lt.s32.totalorder %v7675_v36, 0  ;;  %v1332_v13 = vor.u32 %v1331_v50, %v1330_v51  ;;  %v7185_v44 = vpop.eup %7184 }
 0x17c   : > { %v1270_v40 = vadd.s32 536870912, %v1269_v1  ;;  %v1336_v25 = vshll.u32 %v13881_v46, %v13914_v21  ;;  %v1343_v56 = vshrl.u32 %v13884_v42, %v13913_v15  ;;  %v1101_v38 = vxor.u32 2147483648, %v7183_v11 }
 0x17d   : > { %v1184_v58 = vor.u32 4788187, %v1183_v22  ;;  %v1335_v28 = vor.u32 %v1334_v47, %v1333_v17  ;;  %v1339_v26 = vshll.u32 %v13882_v54, %v13914_v21  ;;  %vm1740_vm7 = vcmp.gt.s32.totalorder %v8474_v32, 0 }
 0x17e   : > { %v1098_v41 = vxor.u32 2147483648, %v7185_v44  ;;  %v1271_v49 = vshrl.u32 %v1270_v40, 30  ;;  %v1338_v55 = vor.u32 %v1337_v52, %v1336_v25  ;;  %v1342_v18 = vshll.u32 %v13883_v0, %v13914_v21 }
 0x17f   : > { %vm1844_vm4 = vcmp.gt.s32.totalorder %v8480_v5, 0  ;;  %v1102_v62 = vsel %vm1100_vm0, %v1101_v38, %v7185_v44  ;;  %v1185_v34 = vand.u32 2147483647, %v1184_v58  ;;  %v1187_v59 = vcvt.s32.f32 %v1180_v19 }
 0x180   : > { %v1341_v2 = vor.u32 %v1340_v10, %v1339_v26  ;;  %v1099_v8 = vsel %vm1097_vm1, %v7183_v11, %v1098_v41  ;;  %vm8539_vm10 = vcmp.le.f32.partialorder %v1209_v24, 0.7853982  ;;  %v1272_v50 = vshll.u32 %v1271_v49, 30 }
 0x181   : > { %v1344_v16 = vor.u32 %v1343_v56, %v1342_v18  ;;  %vm1345_vm8 = vcmp.lt.s32.totalorder %v13917_v60, 1  ;;  %v1103_v12 = vsel %vm1096_vm2, %v1099_v8, %v1102_v62  ;;  %v1188_v47 = vmul.f32 %v1187_v59, %v1185_v34 }
 0x182   : > { %v1295_v21 = vsub.s32 4, %v1271_v49  ;;  %vm1346_vm9 = vcmp.lt.s32.totalorder %v13917_v60, 2  ;;  %v1104_v51 = vsel %vm1093_vm5, nan, %v1103_v12  ;;  %v8549_v52 = vsub.s32 %v1269_v1, %v1272_v50 }
 0x183   : > { %vm1347_vm14 = vcmp.lt.s32.totalorder %v13917_v60, 3  ;;  %vm1348_vm15 = vcmp.lt.s32.totalorder %v13917_v60, 4  ;;  %6665 = vmatprep.mubr.f32.mxu0 %v1104_v51  ;;  %v1189_v24 = vxor.u32 2147483648, %v1188_v47  ;;  %v1353_v19 = vsel %vm1345_vm8, %v1332_v13, %v1335_v28 }
 0x184   : > { %v1354_v6 = vsel %vm1348_vm15, %v1341_v2, 920167782  ;;  %v1357_v22 = vsel %vm1345_vm8, %v1335_v28, %v1338_v55  ;;  %v1275_v17 = vsub.s32 0, %v8549_v52  ;;  %v1350_v10 = vsel %vm1348_vm15, %v1338_v55, 2102212464 }
 0x185   : > { %v1355_v63 = vsel %vm1347_vm14, %v1338_v55, %v1354_v6  ;;  %v1358_v1 = vsel %vm1348_vm15, %v1344_v16, 1326507024  ;;  %v1190_v11 = vsel %vm1107_vm11, %v1189_v24, %v1188_v47  ;;  %v1296_v40 = vsel %vm1211_vm6, %v1295_v21, %v1271_v49 }
 0x186   : > { %v1359_v25 = vsel %vm1347_vm14, %v1341_v2, %v1358_v1  ;;  %v1361_v56 = vshll.u32 %v1321_v23, 8  ;;  %v1193_v44 = vsel %vm8431_vm12, %v7669_v14, %v1190_v11  ;;  %v6338_v38 = vmin.u32 %v1275_v17, %v8549_v52 }
 0x187   : > { %v1356_v58 = vsel %vm1346_vm9, %v1353_v19, %v1355_v63  ;;  %v1360_v26 = vsel %vm1346_vm9, %v1357_v22, %v1359_v25  ;;  %7186 = vcosq.f32 %v1193_v44  ;;  %v8575_v41 = vand.u32 3, %v8498_v35 }
 0x188   : > { %v8577_v49 = vmul.u32.u64.low %v1361_v56, %v1360_v26  ;;  %v8578_v55 = vmul.u32.u64.high %v1361_v56, %v1360_v26, %v8577_v49  ;;  %7188 = vsinq.f32 %v1193_v44  ;;  %v1277_v23 = vclz %v6338_v38 }
 0x189   : > { %v1349_v39 = vsel %vm1345_vm8, %v8505_v30, %v1332_v13  ;;  %v1351_v18 = vsel %vm1347_vm14, %v1335_v28, %v1350_v10  ;;  %v8588_v62 = vsel %vm1740_vm7, %v8474_v32, 0  ;;  %v1298_v35 = vsel %vm8539_vm10, 0, %v1296_v40  ;;  %v13918_v28 = vld [vmem:[#allocation7_spill] sm:$0xff] }
 0x18a   : > { %v8592_v34 = vmul.u32.u64.low %v1361_v56, %v1356_v58  ;;  %v8593_v59 = vmul.u32.u64.high %v1361_v56, %v1356_v58, %v8592_v34  ;;  %v8599_v2 = vsel %vm1844_vm4, %v8480_v5, 0  ;;  %v8603_v30 = vshrl.u32 %v1940_v7, 23 }
 0x18b   : > { %v6339_v13 = vadd.s32 4294967294, %v1277_v23  ;;  %v1417_v32 = vand.u32 2147483647, %v13918_v28  ;;  %v8607_v8 = vmul.f32 30.0, %v8484_v48  ;;  %vm1204_vm11 = vcmp.eq.s32.totalorder %v8575_v41, 2 }
 0x18c   : > { %v1352_v50 = vsel %vm1346_vm9, %v1349_v39, %v1351_v18  ;;  %v1435_v16 = vshrl.u32 %v13880_v37, %v7910_v53  ;;  %vm1201_vm12 = vcmp.eq.s32.totalorder %v8575_v41, 0  ;;  %v1265_v7 = vadd.s32 %v8466_v29, %v8463_v27 }
 0x18d   : > { %vm6340_vm13 = vcmp.lt.s32.totalorder %v6339_v13, 0  ;;  %v8617_v5 = vadd.s32 3, %v1298_v35  ;;  %vm1370_vm0 = vc.u32 %v8578_v55, %v8592_v34  ;;  %vm1200_vm3 = vcmp.lt.s32.totalorder %v8575_v41, 2 }
 0x18e   : > { %v1280_v48 = vsel %vm6340_vm13, 0, %v6339_v13  ;;  %v1371_v60 = vadd.s32 1, %v8593_v59  ;;  %v8625_v12 = vand.u32 8388607, %v1417_v32  ;;  %v1434_v47 = vshll.u32 %v13889_v9, %v7865_v61 }
 0x18f   : > { %vm1197_vm1 = vweird.f32 %v7669_v14  ;;  %v1281_v27 = vsub.s32 32, %v1280_v48  ;;  %v1285_v29 = vsub.s32 4294967266, %v1280_v48  ;;  %v1368_v21 = vmul.u32 %v1361_v56, %v1352_v50 }
 0x190   : > { %v1433_v51 = vshrl.u32 %v13889_v9, %v7910_v53  ;;  %v1372_v24 = vsel %vm1370_vm0, %v1371_v60, %v8593_v59  ;;  %v1436_v19 = vor.u32 %v1435_v16, %v1434_v47  ;;  %v1437_v6 = vshll.u32 %v13880_v37, %v7865_v61 }
 0x191   : > { %v1438_v22 = vshrl.u32 %v13881_v46, %v7910_v53  ;;  %v1282_v17 = vshll.u32 %v8549_v52, %v1280_v48  ;;  %v1283_v10 = vshrl.u32 %v1265_v7, %v1281_v27  ;;  %v1286_v63 = vadd.s32 127, %v1285_v29  ;;  %v7187_v11 = vpop.eup %7186 }
 0x192   : > { %v1373_v1 = vadd.s32 %v1372_v24, %v1368_v21  ;;  %v1425_v40 = vor.u32 8388608, %v8625_v12  ;;  %v1441_v25 = vshrl.u32 %v13882_v54, %v7910_v53  ;;  %v1444_v56 = vshrl.u32 %v13883_v0, %v7910_v53  ;;  %v7189_v38 = vpop.eup %7188 }
 0x193   : > { %v1447_v44 = vshrl.u32 %v13884_v42, %v7910_v53  ;;  %v1205_v58 = vxor.u32 2147483648, %v7187_v11  ;;  %v1284_v26 = vor.u32 %v1283_v10, %v1282_v17  ;;  %v1287_v49 = vshll.u32 %v1286_v63, 23 }
 0x194   : > { %vm1315_vm2 = vcmp.lt.s32.totalorder %v13912_v31, 0  ;;  %v1374_v52 = vadd.s32 536870912, %v1373_v1  ;;  %v1202_v23 = vxor.u32 2147483648, %v7189_v38  ;;  %v1440_v39 = vshll.u32 %v13881_v46, %v7865_v61 }
 0x195   : > { %v1443_v18 = vshll.u32 %v13882_v54, %v7865_v61  ;;  %v1446_v35 = vshll.u32 %v13883_v0, %v7865_v61  ;;  %v1206_v53 = vsel %vm1204_vm11, %v1205_v58, %v7189_v38  ;;  %v1288_v59 = vor.u32 4788187, %v1287_v49 }
 0x196   : > { %v1375_v13 = vshrl.u32 %v1374_v52, 30  ;;  %v1439_v50 = vor.u32 %v1438_v22, %v1437_v6  ;;  %v1203_v16 = vsel %vm1201_vm12, %v7187_v11, %v1202_v23  ;;  %vm8658_vm5 = vcmp.le.f32.partialorder %v1313_v33, 0.7853982  ;;  %v13921_v6 = vld [vmem:[#allocation19_spill] sm:$0xff] }
 0x197   : > { %v1442_v48 = vor.u32 %v1441_v25, %v1440_v39  ;;  %v1445_v60 = vor.u32 %v1444_v56, %v1443_v18  ;;  %v1448_v12 = vor.u32 %v1447_v44, %v1446_v35  ;;  %v1207_v61 = vsel %vm1200_vm3, %v1203_v16, %v1206_v53 }
 0x198   : > { %v1289_v47 = vand.u32 2147483647, %v1288_v59  ;;  %v1291_v27 = vcvt.s32.f32 %v1284_v26  ;;  %v1376_v29 = vshll.u32 %v1375_v13, 30  ;;  %v1208_v21 = vsel %vm1197_vm1, nan, %v1207_v61 }
 0x199   : > { %v1399_v24 = vsub.s32 4, %v1375_v13  ;;  %vm1449_vm7 = vcmp.lt.s32.totalorder %v13921_v6, 1  ;;  %vm1450_vm4 = vcmp.lt.s32.totalorder %v13921_v6, 2  ;;  %6666 = vmatmul.mubr.f32.gmra.mrb[4].mxu0 %v1208_v21  ;;  %vm1452_vm8 = vcmp.lt.s32.totalorder %v13921_v6, 4 }
 0x19a   : > { %v1292_v33 = vmul.f32 %v1291_v27, %v1289_v47  ;;  %v8668_v22 = vsub.s32 %v1373_v1, %v1376_v29  ;;  %v1457_v17 = vsel %vm1449_vm7, %v1436_v19, %v1439_v50  ;;  %vm1451_vm9 = vcmp.lt.s32.totalorder %v13921_v6, 3 }
 0x19b   : > { %v1453_v41 = vsel %vm1449_vm7, %v1433_v51, %v1436_v19  ;;  %v1454_v10 = vsel %vm1452_vm8, %v1442_v48, 2102212464  ;;  %v1458_v63 = vsel %vm1452_vm8, %v1445_v60, 920167782  ;;  %v1461_v56 = vsel %vm1449_vm7, %v1439_v50, %v1442_v48 }
 0x19c   : > { %v1293_v11 = vxor.u32 2147483648, %v1292_v33  ;;  %v1379_v14 = vsub.s32 0, %v8668_v22  ;;  %v1459_v25 = vsel %vm1451_vm9, %v1442_v48, %v1458_v63  ;;  %v1400_v44 = vsel %vm1315_vm2, %v1399_v24, %v1375_v13 }
 0x19d   : > { %v1460_v1 = vsel %vm1450_vm4, %v1457_v17, %v1459_v25  ;;  %v1462_v38 = vsel %vm1452_vm8, %v1448_v12, 1326507024  ;;  %v1465_v58 = vshll.u32 %v1425_v40, 8  ;;  %v1455_v19 = vsel %vm1451_vm9, %v1439_v50, %v1454_v10 }
 0x19e   : > { %v1294_v26 = vsel %vm1211_vm6, %v1293_v11, %v1292_v33  ;;  %v6342_v51 = vmin.u32 %v1379_v14, %v8668_v22  ;;  %v1463_v49 = vsel %vm1451_vm9, %v1445_v60, %v1462_v38  ;;  %v8691_v40 = vmul.f32 %v8607_v8, %v8270_v4 }
 0x19f   : > { %v1297_v52 = vsel %vm8539_vm10, %v7675_v36, %v1294_v26  ;;  %v1464_v23 = vsel %vm1450_vm4, %v1461_v56, %v1463_v49  ;;  %v8685_v39 = vmul.u32.u64.low %v1465_v58, %v1460_v1  ;;  %v8686_v18 = vmul.u32.u64.high %v1465_v58, %v1460_v1, %v8685_v39 }
 0x1a0   : > { %7190 = vcosq.f32 %v1297_v52  ;;  %v1381_v35 = vclz %v6342_v51  ;;  %v1402_v53 = vsel %vm8658_vm5, 0, %v1400_v44  ;;  %v8696_v15 = vand.u32 3, %v8617_v5 }
 0x1a1   : > { %7192 = vsinq.f32 %v1297_v52  ;;  %v8698_v59 = vmul.u32.u64.low %v1465_v58, %v1464_v23  ;;  %v8699_v13 = vmul.u32.u64.high %v1465_v58, %v1464_v23, %v8698_v59  ;;  %v8702_v50 = vshrl.u32 %v8140_v45, 5 }
 0x1a2   : > { %v1536_v16 = vsub.s32 32, %v8471_v57  ;;  %v6343_v48 = vadd.s32 4294967294, %v1381_v35  ;;  %v1456_v4 = vsel %vm1450_vm4, %v1453_v41, %v1455_v19  ;;  %v8708_v8 = vand.u32 31, %v8588_v62 }
 0x1a3   : > { %v8711_v60 = vadd.s32 4294967169, %v8603_v30  ;;  %v1406_v5 = vadd.s32 3, %v1402_v53  ;;  %v1475_v12 = vadd.s32 1, %v8686_v18  ;;  %v8715_v61 = vand.u32 31, %v8599_v2  ;;  %v13922_v30 = vld [vmem:[#allocation9_spill] sm:$0xff] }
 0x1a4   : > { %v2148_v45 = vand.u32 2139095040, %v8691_v40  ;;  %v1369_v47 = vadd.s32 %v8592_v34, %v8578_v55  ;;  %vm6344_vm6 = vcmp.lt.s32.totalorder %v6343_v48, 0  ;;  %vm1305_vm10 = vcmp.eq.s32.totalorder %v8696_v15, 0 }
 0x1a5   : > { %v1384_v27 = vsel %vm6344_vm6, 0, %v6343_v48  ;;  %v1472_v29 = vmul.u32 %v1465_v58, %v1456_v4  ;;  %vm1474_vm14 = vc.u32 %v8699_v13, %v8685_v39  ;;  %v1521_v21 = vand.u32 2147483647, %v13922_v30 }
 0x1a6   : > { %vm1304_vm15 = vcmp.lt.s32.totalorder %v8696_v15, 2  ;;  %v1385_v24 = vsub.s32 32, %v1384_v27  ;;  %v1389_v6 = vsub.s32 4294967266, %v1384_v27  ;;  %v1476_v33 = vsel %vm1474_vm14, %v1475_v12, %v8686_v18 }
 0x1a7   : > { %v1539_v17 = vshrl.u32 %v13880_v37, %v1536_v16  ;;  %vm1301_vm11 = vweird.f32 %v7675_v36  ;;  %vm1308_vm12 = vcmp.eq.s32.totalorder %v8696_v15, 2  ;;  %v8729_v55 = vand.u32 3, %v1406_v5 }
 0x1a8   : > { %v1477_v34 = vadd.s32 %v1476_v33, %v1472_v29  ;;  %v1538_v41 = vshll.u32 %v13889_v9, %v8471_v57  ;;  %v1386_v10 = vshll.u32 %v8668_v22, %v1384_v27  ;;  %v1387_v63 = vshrl.u32 %v1369_v47, %v1385_v24 }
 0x1a9   : > { %v1390_v11 = vadd.s32 127, %v1389_v6  ;;  %v1542_v14 = vshrl.u32 %v13881_v46, %v1536_v16  ;;  %v1528_v56 = vand.u32 8388607, %v1521_v21  ;;  %v1541_v44 = vshll.u32 %v13880_v37, %v8471_v57 }
 0x1aa   : > { %v1478_v25 = vadd.s32 536870912, %v1477_v34  ;;  %v1545_v1 = vshrl.u32 %v13882_v54, %v1536_v16  ;;  %v7191_v38 = vpop.eup %7190  ;;  %v1388_v58 = vor.u32 %v1387_v63, %v1386_v10  ;;  %v1540_v51 = vor.u32 %v1539_v17, %v1538_v41 }
 0x1ab   : > { %v1391_v26 = vshll.u32 %v1390_v11, 23  ;;  %v1548_v19 = vshrl.u32 %v13883_v0, %v1536_v16  ;;  %v7193_v22 = vpop.eup %7192  ;;  %v1309_v49 = vxor.u32 2147483648, %v7191_v38  ;;  %vm1419_vm13 = vcmp.lt.s32.totalorder %v13918_v28, 0 }
 0x1ac   : > { %v1479_v52 = vshrl.u32 %v1478_v25, 30  ;;  %v1544_v23 = vshll.u32 %v13881_v46, %v8471_v57  ;;  %v1551_v18 = vshrl.u32 %v13884_v42, %v1536_v16  ;;  %v1306_v35 = vxor.u32 2147483648, %v7193_v22 }
 0x1ad   : > { %v1392_v53 = vor.u32 4788187, %v1391_v26  ;;  %v1543_v59 = vor.u32 %v1542_v14, %v1541_v44  ;;  %v1547_v48 = vshll.u32 %v13882_v54, %v8471_v57  ;;  %v1310_v4 = vsel %vm1308_vm12, %v1309_v49, %v7193_v22 }
 0x1ae   : > { %v1480_v5 = vshll.u32 %v1479_v52, 30  ;;  %v1546_v12 = vor.u32 %v1545_v1, %v1544_v23  ;;  %v1550_v47 = vshll.u32 %v13883_v0, %v8471_v57  ;;  %v1307_v27 = vsel %vm1305_vm10, %v7191_v38, %v1306_v35 }
 0x1af   : > { %v1393_v29 = vand.u32 2147483647, %v1392_v53  ;;  %v1395_v24 = vcvt.s32.f32 %v1388_v58  ;;  %v1549_v6 = vor.u32 %v1548_v19, %v1547_v48  ;;  %v1311_v33 = vsel %vm1304_vm15, %v1307_v27, %v1310_v4  ;;  %v13925_v27 = vld [vmem:[#allocation5_spill] sm:$0xff] }
 0x1b0   : > { %vm8757_vm0 = vcmp.le.f32.partialorder %v1417_v32, 0.7853982  ;;  %v8761_v41 = vsub.s32 %v1477_v34, %v1480_v5  ;;  %v1537_v10 = vshrl.u32 %v13889_v9, %v1536_v16  ;;  %v1552_v57 = vor.u32 %v1551_v18, %v1550_v47 }
 0x1b1   : > { %v1312_v63 = vsel %vm1301_vm11, nan, %v1311_v33  ;;  %v1396_v11 = vmul.f32 %v1395_v24, %v1393_v29  ;;  %v1503_v14 = vsub.s32 4, %v1479_v52  ;;  %v1529_v25 = vor.u32 8388608, %v1528_v56 }
 0x1b2   : > { %6668 = vmatprep.mubr.f32.mxu0 %v1312_v63  ;;  %v1483_v15 = vsub.s32 0, %v8761_v41  ;;  %vm1553_vm3 = vcmp.lt.s32.totalorder %v8702_v50, 1  ;;  %vm1555_vm1 = vcmp.lt.s32.totalorder %v8702_v50, 3  ;;  %vm1556_vm7 = vcmp.lt.s32.totalorder %v8702_v50, 4 }
 0x1b3   : > { %v1397_v32 = vxor.u32 2147483648, %v1396_v11  ;;  %v1558_v34 = vsel %vm1556_vm7, %v1546_v12, 2102212464  ;;  %v1561_v16 = vsel %vm1553_vm3, %v1540_v51, %v1543_v59  ;;  %v1562_v44 = vsel %vm1556_vm7, %v1549_v6, 920167782 }
 0x1b4   : > { %v6346_v36 = vmin.u32 %v1483_v15, %v8761_v41  ;;  %v1563_v56 = vsel %vm1555_vm1, %v1546_v12, %v1562_v44  ;;  %v1565_v1 = vsel %vm1553_vm3, %v1543_v59, %v1546_v12  ;;  %v1566_v38 = vsel %vm1556_vm7, %v1552_v57, 1326507024 }
 0x1b5   : > { %v1398_v58 = vsel %vm1315_vm2, %v1397_v32, %v1396_v11  ;;  %v1504_v26 = vsel %vm1419_vm13, %v1503_v14, %v1479_v52  ;;  %vm1554_vm4 = vcmp.lt.s32.totalorder %v8702_v50, 2  ;;  %v1567_v19 = vsel %vm1555_vm1, %v1549_v6, %v1566_v38 }
 0x1b6   : > { %v1401_v22 = vsel %vm8658_vm5, %v13912_v31, %v1398_v58  ;;  %v1485_v49 = vclz %v6346_v36  ;;  %v1564_v23 = vsel %vm1554_vm4, %v1561_v16, %v1563_v56  ;;  %v1569_v18 = vshll.u32 %v1529_v25, 8  ;;  %v13927_v25 = vld [vmem:[#allocation11_spill] sm:$0xff] }
 0x1b7   : > { %7194 = vcosq.f32 %v1401_v22  ;;  %v1557_v35 = vsel %vm1553_vm3, %v1537_v10, %v1540_v51  ;;  %v1559_v52 = vsel %vm1555_vm1, %v1543_v59, %v1558_v34  ;;  %v1568_v53 = vsel %vm1554_vm4, %v1565_v1, %v1567_v19  ;;  %v13926_v10 = vld [vmem:[#allocation16_spill] sm:$0xff] }
 0x1b8   : > { %7196 = vsinq.f32 %v1401_v22  ;;  %v6347_v48 = vadd.s32 4294967294, %v1485_v49  ;;  %v8795_v4 = vmul.u32.u64.low %v1569_v18, %v1568_v53  ;;  %v8796_v7 = vmul.u32.u64.high %v1569_v18, %v1568_v53, %v8795_v4 }
 0x1b9   : > { %v1506_v5 = vsel %vm8757_vm0, 0, %v1504_v26  ;;  %v8800_v12 = vmul.u32.u64.low %v1569_v18, %v1564_v23  ;;  %v8801_v47 = vmul.u32.u64.high %v1569_v18, %v1564_v23, %v8800_v12  ;;  %v1625_v51 = vand.u32 2147483647, %v13925_v27 }
 0x1ba   : > { %v8806_v29 = vadd.s32 1, %v8711_v60  ;;  %v8810_v59 = vshrl.u32 %v2148_v45, 23  ;;  %vm6348_vm2 = vcmp.lt.s32.totalorder %v6347_v48, 0  ;;  %v1560_v24 = vsel %vm1554_vm4, %v1557_v35, %v1559_v52 }
 0x1bb   : > { %vm1412_vm5 = vcmp.eq.s32.totalorder %v8729_v55, 2  ;;  %v1488_v6 = vsel %vm6348_vm2, 0, %v6347_v48  ;;  %v8817_v33 = vand.u32 8388607, %v1625_v51  ;;  %v1643_v57 = vshrl.u32 %v13880_v37, %v13926_v10 }
 0x1bc   : > { %vm1409_vm8 = vcmp.eq.s32.totalorder %v8729_v55, 0  ;;  %v1473_v60 = vadd.s32 %v8685_v39, %v8699_v13  ;;  %v1489_v45 = vsub.s32 32, %v1488_v6  ;;  %v1493_v63 = vsub.s32 4294967266, %v1488_v6 }
 0x1bd   : > { %v1510_v11 = vadd.s32 3, %v1506_v5  ;;  %vm1408_vm9 = vcmp.lt.s32.totalorder %v8729_v55, 2  ;;  %v1576_v50 = vmul.u32 %v1569_v18, %v1560_v24  ;;  %vm1578_vm6 = vc.u32 %v8796_v7, %v8800_v12 }
 0x1be   : > { %v1579_v14 = vadd.s32 1, %v8801_v47  ;;  %v1642_v15 = vshll.u32 %v13889_v9, %v13927_v25  ;;  %vm1405_vm10 = vweird.f32 %v13912_v31  ;;  %v1490_v32 = vshll.u32 %v8761_v41, %v1488_v6 }
 0x1bf   : > { %v1491_v34 = vshrl.u32 %v1473_v60, %v1489_v45  ;;  %v1494_v39 = vadd.s32 127, %v1493_v63  ;;  %v1641_v13 = vshrl.u32 %v13889_v9, %v13926_v10  ;;  %v1633_v44 = vor.u32 8388608, %v8817_v33 }
 0x1c0   : > { %v1580_v16 = vsel %vm1578_vm6, %v1579_v14, %v8801_v47  ;;  %v1644_v36 = vor.u32 %v1643_v57, %v1642_v15  ;;  %v1646_v56 = vshrl.u32 %v13881_v46, %v13926_v10  ;;  %v1645_v26 = vshll.u32 %v13880_v37, %v13927_v25 }
 0x1c1   : > { %v1492_v1 = vor.u32 %v1491_v34, %v1490_v32  ;;  %v1495_v38 = vshll.u32 %v1494_v39, 23  ;;  %v1581_v58 = vadd.s32 %v1580_v16, %v1576_v50  ;;  %v7195_v41 = vpop.eup %7194  ;;  %v1649_v19 = vshrl.u32 %v13882_v54, %v13926_v10  ;;  %v13928_v50 = vld [vmem:[#allocation15_spill] sm:$0xff] }
 0x1c2   : > { %v1651_v22 = vshll.u32 %v13882_v54, %v13927_v25  ;;  %v1652_v49 = vshrl.u32 %v13883_v0, %v13926_v10  ;;  %v1655_v23 = vshrl.u32 %v13884_v42, %v13926_v10  ;;  %v7197_v18 = vpop.eup %7196  ;;  %v1413_v35 = vxor.u32 2147483648, %v7195_v41 }
 0x1c3   : > { %v1496_v52 = vor.u32 4788187, %v1495_v38  ;;  %vm1523_vm14 = vcmp.lt.s32.totalorder %v13922_v30, 0  ;;  %v1582_v53 = vadd.s32 536870912, %v1581_v58  ;;  %v1648_v48 = vshll.u32 %v13881_v46, %v13927_v25 }
 0x1c4   : > { %v1410_v4 = vxor.u32 2147483648, %v7197_v18  ;;  %v1647_v5 = vor.u32 %v1646_v56, %v1645_v26  ;;  %v1653_v47 = vor.u32 %v1652_v49, %v1651_v22  ;;  %v1654_v24 = vshll.u32 %v13883_v0, %v13927_v25 }
 0x1c5   : > { %v1414_v6 = vsel %vm1412_vm5, %v1413_v35, %v7197_v18  ;;  %v1497_v33 = vand.u32 2147483647, %v1496_v52  ;;  %v1499_v10 = vcvt.s32.f32 %v1492_v1  ;;  %v1583_v57 = vshrl.u32 %v1582_v53, 30 }
 0x1c6   : > { %vm1948_vm15 = vcmp.gt.s32.totalorder %v8806_v29, 0  ;;  %v1411_v60 = vsel %vm1409_vm8, %v7195_v41, %v1410_v4  ;;  %v1650_v45 = vor.u32 %v1649_v19, %v1648_v48  ;;  %v1656_v63 = vor.u32 %v1655_v23, %v1654_v24  ;;  %v13933_v4 = vld [vmem:[#allocation20_spill] sm:$0xff] }
 0x1c7   : > { %vm1657_vm11 = vcmp.lt.s32.totalorder %v13928_v50, 1  ;;  %v1415_v14 = vsel %vm1408_vm9, %v1411_v60, %v1414_v6  ;;  %v1500_v15 = vmul.f32 %v1499_v10, %v1497_v33  ;;  %v1584_v25 = vshll.u32 %v1583_v57, 30 }
 0x1c8   : > { %vm1660_vm12 = vcmp.lt.s32.totalorder %v13928_v50, 4  ;;  %v1416_v32 = vsel %vm1405_vm10, nan, %v1415_v14  ;;  %v1607_v34 = vsub.s32 4, %v1583_v57  ;;  %v1665_v39 = vsel %vm1657_vm11, %v1644_v36, %v1647_v5 }
 0x1c9   : > { %v1666_v16 = vsel %vm1660_vm12, %v1653_v47, 920167782  ;;  %6669 = vmatmul.mubr.f32.gmra.mrb[6].mxu0 %v1416_v32  ;;  %v1501_v56 = vxor.u32 2147483648, %v1500_v15  ;;  %v8868_v1 = vand.u32 3, %v1510_v11  ;;  %v8870_v55 = vsub.s32 %v1581_v58, %v1584_v25 }
 0x1ca   : > { %vm1659_vm3 = vcmp.lt.s32.totalorder %v13928_v50, 3  ;;  %vm1658_vm1 = vcmp.lt.s32.totalorder %v13928_v50, 2  ;;  %v1661_v31 = vsel %vm1657_vm11, %v1641_v13, %v1644_v36  ;;  %v1662_v38 = vsel %vm1660_vm12, %v1650_v45, 2102212464 }
 0x1cb   : > { %v1667_v26 = vsel %vm1659_vm3, %v1650_v45, %v1666_v16  ;;  %v1502_v41 = vsel %vm1419_vm13, %v1501_v56, %v1500_v15  ;;  %v1587_v11 = vsub.s32 0, %v8870_v55  ;;  %v1669_v19 = vsel %vm1657_vm11, %v1647_v5, %v1650_v45 }
 0x1cc   : > { %v1668_v58 = vsel %vm1658_vm1, %v1665_v39, %v1667_v26  ;;  %v1505_v13 = vsel %vm8757_vm0, %v13918_v28, %v1502_v41  ;;  %v1608_v36 = vsel %vm1523_vm14, %v1607_v34, %v1583_v57  ;;  %v1670_v22 = vsel %vm1660_vm12, %v1656_v63, 1326507024 }
 0x1cd   : > { %v1673_v49 = vshll.u32 %v1633_v44, 8  ;;  %7198 = vcosq.f32 %v1505_v13  ;;  %v6350_v23 = vmin.u32 %v1587_v11, %v8870_v55  ;;  %v1663_v18 = vsel %vm1659_vm3, %v1647_v5, %v1662_v38 }
 0x1ce   : > { %v1671_v35 = vsel %vm1659_vm3, %v1653_v47, %v1670_v22  ;;  %7200 = vsinq.f32 %v1505_v13  ;;  %v8906_v48 = vshrl.u32 %v8588_v62, 5  ;;  %v8909_v44 = vsub.s32 32, %v8708_v8 }
 0x1cf   : > { %v1672_v17 = vsel %vm1658_vm1, %v1669_v19, %v1671_v35  ;;  %v8901_v52 = vmul.u32.u64.low %v1673_v49, %v1668_v58  ;;  %v8902_v53 = vmul.u32.u64.high %v1673_v49, %v1668_v58, %v8901_v52  ;;  %vm8913_vm13 = vcmp.le.f32.partialorder %v1521_v21, 0.7853982 }
 0x1d0   : > { %v1589_v5 = vclz %v6350_v23  ;;  %v1610_v47 = vsel %vm8913_vm13, 0, %v1608_v36  ;;  %v1664_v24 = vsel %vm1658_vm1, %v1661_v31, %v1663_v18  ;;  %v8925_v62 = vsub.s32 32, %v8715_v61 }
 0x1d1   : > { %v8921_v6 = vmul.u32.u64.low %v1673_v49, %v1672_v17  ;;  %v8922_v33 = vmul.u32.u64.high %v1673_v49, %v1672_v17, %v8921_v6  ;;  %v8930_v21 = vsel %vm1948_vm15, %v8806_v29, 0  ;;  %v8933_v10 = vadd.s32 4294967169, %v8810_v59 }
 0x1d2   : > { %v6351_v57 = vadd.s32 4294967294, %v1589_v5  ;;  %vm1513_vm0 = vcmp.eq.s32.totalorder %v8868_v1, 0  ;;  %vm1516_vm7 = vcmp.eq.s32.totalorder %v8868_v1, 2  ;;  %v1683_v60 = vadd.s32 1, %v8902_v53 }
 0x1d3   : > { %v1729_v45 = vand.u32 2147483647, %v7919_v20  ;;  %vm1512_vm4 = vcmp.lt.s32.totalorder %v8868_v1, 2  ;;  %v1577_v63 = vadd.s32 %v8800_v12, %v8796_v7  ;;  %v1614_v29 = vadd.s32 3, %v1610_v47 }
 0x1d4   : > { %vm6352_vm2 = vcmp.lt.s32.totalorder %v6351_v57, 0  ;;  %v1680_v50 = vmul.u32 %v1673_v49, %v1664_v24  ;;  %vm1509_vm5 = vweird.f32 %v13918_v28  ;;  %vm1682_vm8 = vc.u32 %v8922_v33, %v8901_v52 }
 0x1d5   : > { %v1592_v59 = vsel %vm6352_vm2, 0, %v6351_v57  ;;  %v1746_v14 = vshll.u32 %v13889_v9, %v8708_v8  ;;  %v1747_v15 = vshrl.u32 %v13880_v37, %v8909_v44  ;;  %v1684_v34 = vsel %vm1682_vm8, %v1683_v60, %v8902_v53 }
 0x1d6   : > { %v1593_v25 = vsub.s32 32, %v1592_v59  ;;  %v1597_v32 = vsub.s32 4294967266, %v1592_v59  ;;  %v1750_v7 = vshrl.u32 %v13881_v46, %v8909_v44  ;;  %v1685_v12 = vadd.s32 %v1684_v34, %v1680_v50 }
 0x1d7   : > { %v1736_v39 = vand.u32 8388607, %v1729_v45  ;;  %v1749_v16 = vshll.u32 %v13880_v37, %v8708_v8  ;;  %v1752_v56 = vshll.u32 %v13881_v46, %v8708_v8  ;;  %v7199_v31 = vpop.eup %7198  ;;  %v1594_v38 = vshll.u32 %v8870_v55, %v1592_v59 }
 0x1d8   : > { %v1595_v26 = vshrl.u32 %v1577_v63, %v1593_v25  ;;  %v1598_v41 = vadd.s32 127, %v1597_v32  ;;  %vm1627_vm9 = vcmp.lt.s32.totalorder %v13925_v27, 0  ;;  %v1753_v11 = vshrl.u32 %v13882_v54, %v8909_v44  ;;  %v7201_v58 = vpop.eup %7200 }
 0x1d9   : > { %v1517_v19 = vxor.u32 2147483648, %v7199_v31  ;;  %v1686_v13 = vadd.s32 536870912, %v1685_v12  ;;  %v1748_v36 = vor.u32 %v1747_v15, %v1746_v14  ;;  %v1756_v22 = vshrl.u32 %v13883_v0, %v8909_v44 }
 0x1da   : > { %v1514_v49 = vxor.u32 2147483648, %v7201_v58  ;;  %v1596_v23 = vor.u32 %v1595_v26, %v1594_v38  ;;  %v1599_v18 = vshll.u32 %v1598_v41, 23  ;;  %v1751_v35 = vor.u32 %v1750_v7, %v1749_v16 }
 0x1db   : > { %v1518_v55 = vsel %vm1516_vm7, %v1517_v19, %v7201_v58  ;;  %v1687_v17 = vshrl.u32 %v1686_v13, 30  ;;  %v1755_v53 = vshll.u32 %v13882_v54, %v8708_v8  ;;  %v1759_v5 = vshrl.u32 %v13884_v42, %v8909_v44 }
 0x1dc   : > { %v1515_v47 = vsel %vm1513_vm0, %v7199_v31, %v1514_v49  ;;  %v1600_v24 = vor.u32 4788187, %v1599_v18  ;;  %vm8974_vm6 = vcmp.le.f32.partialorder %v1625_v51, 0.7853982  ;;  %v1754_v57 = vor.u32 %v1753_v11, %v1752_v56 }
 0x1dd   : > { %v1758_v60 = vshll.u32 %v13883_v0, %v8708_v8  ;;  %v1519_v63 = vsel %vm1512_vm4, %v1515_v47, %v1518_v55  ;;  %v1688_v50 = vshll.u32 %v1687_v17, 30  ;;  %v1711_v59 = vsub.s32 4, %v1687_v17 }
 0x1de   : > { %v1757_v14 = vor.u32 %v1756_v22, %v1755_v53  ;;  %v1520_v15 = vsel %vm1509_vm5, nan, %v1519_v63  ;;  %v1601_v25 = vand.u32 2147483647, %v1600_v24  ;;  %v1603_v32 = vcvt.s32.f32 %v1596_v23 }
 0x1df   : > { %v1760_v34 = vor.u32 %v1759_v5, %v1758_v60  ;;  %6671 = vmatprep.mubr.f32.mxu0 %v1520_v15  ;;  %v8984_v51 = vand.u32 3, %v1614_v29  ;;  %v8986_v7 = vsub.s32 %v1685_v12, %v1688_v50  ;;  %v1737_v16 = vor.u32 8388608, %v1736_v39 }
 0x1e0   : > { %v1745_v8 = vshrl.u32 %v13889_v9, %v8909_v44  ;;  %v1604_v1 = vmul.f32 %v1603_v32, %v1601_v25  ;;  %vm1761_vm10 = vcmp.lt.s32.totalorder %v8906_v48, 1  ;;  %vm1763_vm15 = vcmp.lt.s32.totalorder %v8906_v48, 3 }
 0x1e1   : > { %vm1764_vm11 = vcmp.lt.s32.totalorder %v8906_v48, 4  ;;  %v1691_v28 = vsub.s32 0, %v8986_v7  ;;  %v1712_v56 = vsel %vm1627_vm9, %v1711_v59, %v1687_v17  ;;  %v1769_v29 = vsel %vm1761_vm10, %v1748_v36, %v1751_v35 }
 0x1e2   : > { %v1770_v12 = vsel %vm1764_vm11, %v1757_v14, 920167782  ;;  %v1605_v39 = vxor.u32 2147483648, %v1604_v1  ;;  %v1773_v31 = vsel %vm1761_vm10, %v1751_v35, %v1754_v57  ;;  %v1774_v38 = vsel %vm1764_vm11, %v1760_v34, 1326507024 }
 0x1e3   : > { %v1771_v44 = vsel %vm1763_vm15, %v1754_v57, %v1770_v12  ;;  %v6354_v26 = vmin.u32 %v1691_v28, %v8986_v7  ;;  %vm1762_vm12 = vcmp.lt.s32.totalorder %v8906_v48, 2  ;;  %v1766_v41 = vsel %vm1764_vm11, %v1754_v57, 2102212464 }
 0x1e4   : > { %v1775_v11 = vsel %vm1763_vm15, %v1757_v14, %v1774_v38  ;;  %v1606_v58 = vsel %vm1523_vm14, %v1605_v39, %v1604_v1  ;;  %v1772_v19 = vsel %vm1762_vm12, %v1769_v29, %v1771_v44  ;;  %v1777_v22 = vshll.u32 %v1737_v16, 8 }
 0x1e5   : > { %v1776_v13 = vsel %vm1762_vm12, %v1773_v31, %v1775_v11  ;;  %v1609_v49 = vsel %vm8913_vm13, %v13922_v30, %v1606_v58  ;;  %v1693_v23 = vclz %v6354_v26  ;;  %v1714_v18 = vsel %vm8974_vm6, 0, %v1712_v56 }
 0x1e6   : > { %v1765_v55 = vsel %vm1761_vm10, %v1745_v8, %v1748_v36  ;;  %7202 = vcosq.f32 %v1609_v49  ;;  %v1767_v17 = vsel %vm1763_vm15, %v1751_v35, %v1766_v41  ;;  %v9029_v60 = vand.u32 31, %v13933_v4 }
 0x1e7   : > { %v9021_v53 = vmul.u32.u64.low %v1777_v22, %v1776_v13  ;;  %v9022_v5 = vmul.u32.u64.high %v1777_v22, %v1776_v13, %v9021_v53  ;;  %7204 = vsinq.f32 %v1609_v49  ;;  %v6355_v47 = vadd.s32 4294967294, %v1693_v23 }
 0x1e8   : > { %v9024_v24 = vmul.u32.u64.low %v1777_v22, %v1772_v19  ;;  %v9025_v57 = vmul.u32.u64.high %v1777_v22, %v1772_v19, %v9024_v24  ;;  %v9032_v63 = vshrl.u32 %v8599_v2, 5  ;;  %v1833_v36 = vand.u32 2147483647, %v8124_v3 }
 0x1e9   : > { %v9036_v50 = vand.u32 31, %v8930_v21  ;;  %v9039_v35 = vadd.s32 1, %v8933_v10  ;;  %vm6356_vm14 = vcmp.lt.s32.totalorder %v6355_v47, 0  ;;  %v1768_v59 = vsel %vm1762_vm12, %v1765_v55, %v1767_v17 }
 0x1ea   : > { %vm1620_vm3 = vcmp.eq.s32.totalorder %v8984_v51, 2  ;;  %v1681_v14 = vadd.s32 %v8901_v52, %v8922_v33  ;;  %v1696_v15 = vsel %vm6356_vm14, 0, %v6355_v47  ;;  %v9046_v2 = vadd.s32 3, %v1714_v18 }
 0x1eb   : > { %vm1786_vm1 = vc.u32 %v9022_v5, %v9024_v24  ;;  %vm1617_vm13 = vcmp.eq.s32.totalorder %v8984_v51, 0  ;;  %v1697_v25 = vsub.s32 32, %v1696_v15  ;;  %v1701_v10 = vsub.s32 4294967266, %v1696_v15 }
 0x1ec   : > { %v1787_v32 = vadd.s32 1, %v9025_v57  ;;  %v1851_v48 = vshrl.u32 %v13880_v37, %v8925_v62  ;;  %vm1616_vm0 = vcmp.lt.s32.totalorder %v8984_v51, 2  ;;  %v1698_v34 = vshll.u32 %v8986_v7, %v1696_v15 }
 0x1ed   : > { %v1784_v52 = vmul.u32 %v1777_v22, %v1768_v59  ;;  %v1840_v33 = vand.u32 8388607, %v1833_v36  ;;  %v1850_v16 = vshll.u32 %v13889_v9, %v8715_v61  ;;  %vm1613_vm7 = vweird.f32 %v13922_v30 }
 0x1ee   : > { %v1699_v8 = vshrl.u32 %v1681_v14, %v1697_v25  ;;  %v1702_v1 = vadd.s32 127, %v1701_v10  ;;  %v1788_v28 = vsel %vm1786_vm1, %v1787_v32, %v9025_v57  ;;  %v1854_v56 = vshrl.u32 %v13881_v46, %v8925_v62 }
 0x1ef   : > { %v1789_v29 = vadd.s32 %v1788_v28, %v1784_v52  ;;  %v1849_v7 = vshrl.u32 %v13889_v9, %v8925_v62  ;;  %v1853_v12 = vshll.u32 %v13880_v37, %v8715_v61  ;;  %v1857_v39 = vshrl.u32 %v13882_v54, %v8925_v62 }
 0x1f0   : > { %v1700_v44 = vor.u32 %v1699_v8, %v1698_v34  ;;  %v1703_v31 = vshll.u32 %v1702_v1, 23  ;;  %v1852_v38 = vor.u32 %v1851_v48, %v1850_v16  ;;  %v1860_v26 = vshrl.u32 %v13883_v0, %v8925_v62  ;;  %v7203_v41 = vpop.eup %7202 }
 0x1f1   : > { %v1790_v11 = vadd.s32 536870912, %v1789_v29  ;;  %v1841_v58 = vor.u32 8388608, %v1840_v33  ;;  %v1856_v19 = vshll.u32 %v13881_v46, %v8715_v61  ;;  %v1863_v13 = vshrl.u32 %v13884_v42, %v8925_v62  ;;  %v7205_v22 = vpop.eup %7204 }
 0x1f2   : > { %v1621_v49 = vxor.u32 2147483648, %v7203_v41  ;;  %v1704_v23 = vor.u32 4788187, %v1703_v31  ;;  %v1855_v18 = vor.u32 %v1854_v56, %v1853_v12  ;;  %v1859_v55 = vshll.u32 %v13882_v54, %v8715_v61 }
 0x1f3   : > { %v1618_v17 = vxor.u32 2147483648, %v7205_v22  ;;  %v1791_v53 = vshrl.u32 %v1790_v11, 30  ;;  %v1858_v47 = vor.u32 %v1857_v39, %v1856_v19  ;;  %v1862_v57 = vshll.u32 %v13883_v0, %v8715_v61 }
 0x1f4   : > { %v1622_v59 = vsel %vm1620_vm3, %v1621_v49, %v7205_v22  ;;  %v1705_v14 = vand.u32 2147483647, %v1704_v23  ;;  %v1707_v15 = vcvt.s32.f32 %v1700_v44  ;;  %v1861_v25 = vor.u32 %v1860_v26, %v1859_v55 }
 0x1f5   : > { %vm2156_vm4 = vcmp.gt.s32.totalorder %v9039_v35, 0  ;;  %v1619_v62 = vsel %vm1617_vm13, %v7203_v41, %v1618_v17  ;;  %v1792_v10 = vshll.u32 %v1791_v53, 30  ;;  %v1864_v32 = vor.u32 %v1863_v13, %v1862_v57 }
 0x1f6   : > { %vm1865_vm2 = vcmp.lt.s32.totalorder %v9032_v63, 1  ;;  %v1623_v48 = vsel %vm1616_vm0, %v1619_v62, %v1622_v59  ;;  %v1708_v34 = vmul.f32 %v1707_v15, %v1705_v14  ;;  %vm1866_vm5 = vcmp.lt.s32.totalorder %v9032_v63, 2 }
 0x1f7   : > { %vm1867_vm8 = vcmp.lt.s32.totalorder %v9032_v63, 3  ;;  %v1624_v61 = vsel %vm1613_vm7, nan, %v1623_v48  ;;  %v9092_v52 = vsub.s32 %v1789_v29, %v1792_v10  ;;  %vm1868_vm10 = vcmp.lt.s32.totalorder %v9032_v63, 4 }
 0x1f8   : > { %v1873_v33 = vsel %vm1865_vm2, %v1852_v38, %v1855_v18  ;;  %6672 = vmatmul.mubr.f32.gmra.mrb[8].mxu0 %v1624_v61  ;;  %v1709_v16 = vxor.u32 2147483648, %v1708_v34  ;;  %v1815_v8 = vsub.s32 4, %v1791_v53  ;;  %v1870_v51 = vsel %vm1868_vm10, %v1858_v47, 2102212464 }
 0x1f9   : > { %v1874_v1 = vsel %vm1868_vm10, %v1861_v25, 920167782  ;;  %v1795_v28 = vsub.s32 0, %v9092_v52  ;;  %v1869_v56 = vsel %vm1865_vm2, %v1849_v7, %v1852_v38  ;;  %v1877_v29 = vsel %vm1865_vm2, %v1855_v18, %v1858_v47 }
 0x1fa   : > { %v1875_v30 = vsel %vm1867_vm8, %v1858_v47, %v1874_v1  ;;  %v1710_v12 = vsel %vm1627_vm9, %v1709_v16, %v1708_v34  ;;  %v1878_v44 = vsel %vm1868_vm10, %v1864_v32, 1326507024  ;;  %v1881_v31 = vshll.u32 %v1841_v58, 8 }
 0x1fb   : > { %v1876_v39 = vsel %vm1866_vm5, %v1873_v33, %v1875_v30  ;;  %v1713_v26 = vsel %vm8974_vm6, %v13925_v27, %v1710_v12  ;;  %v6358_v7 = vmin.u32 %v1795_v28, %v9092_v52  ;;  %v1871_v38 = vsel %vm1867_vm8, %v1855_v18, %v1870_v51 }
 0x1fc   : > { %v1879_v41 = vsel %vm1867_vm8, %v1861_v25, %v1878_v44  ;;  %7206 = vcosq.f32 %v1713_v26  ;;  %v9118_v19 = vmul.u32.u64.low %v1881_v31, %v1876_v39  ;;  %v9119_v13 = vmul.u32.u64.high %v1881_v31, %v1876_v39, %v9118_v19 }
 0x1fd   : > { %v1880_v11 = vsel %vm1866_vm5, %v1877_v29, %v1879_v41  ;;  %7208 = vsinq.f32 %v1713_v26  ;;  %v1719_v6 = vand.u32 3, %v9046_v2  ;;  %vm1731_vm9 = vcmp.lt.s32.totalorder %v7919_v20, 0 }
 0x1fe   : > { %v1797_v58 = vclz %v6358_v7  ;;  %v9125_v22 = vsub.s32 32, %v9036_v50  ;;  %v1816_v49 = vsel %vm1731_vm9, %v1815_v8, %v1791_v53  ;;  %v9133_v55 = vsub.s32 32, %v9029_v60 }
 0x1ff   : > { %v9129_v23 = vmul.u32.u64.low %v1881_v31, %v1880_v11  ;;  %v9130_v18 = vmul.u32.u64.high %v1881_v31, %v1880_v11, %v9129_v23  ;;  %v9136_v17 = vshrl.u32 %v8930_v21, 5  ;;  %v1872_v2 = vsel %vm1866_vm5, %v1869_v56, %v1871_v38 }
 0x200   : > { %v6359_v47 = vadd.s32 4294967294, %v1797_v58  ;;  %v9143_v57 = vsel %vm2156_vm4, %v9039_v35, 0  ;;  %vm9147_vm6 = vcmp.le.f32.partialorder %v1729_v45, 0.7853982  ;;  %v1891_v59 = vadd.s32 1, %v9119_v13 }
 0x201   : > { %v1937_v21 = vand.u32 2147483647, %v8365_v43  ;;  %vm1721_vm15 = vcmp.eq.s32.totalorder %v1719_v6, 0  ;;  %vm1724_vm11 = vcmp.eq.s32.totalorder %v1719_v6, 2  ;;  %v1818_v63 = vsel %vm9147_vm6, 0, %v1816_v49 }
 0x202   : > { %vm6360_vm12 = vcmp.lt.s32.totalorder %v6359_v47, 0  ;;  %vm1720_vm14 = vcmp.lt.s32.totalorder %v1719_v6, 2  ;;  %v1888_v35 = vmul.u32 %v1881_v31, %v1872_v2  ;;  %vm1890_vm3 = vc.u32 %v9130_v18, %v9118_v19 }
 0x203   : > { %v1800_v14 = vsel %vm6360_vm12, 0, %v6359_v47  ;;  %v1955_v45 = vshrl.u32 %v13880_v37, %v9125_v22  ;;  %vm1717_vm1 = vweird.f32 %v13925_v27  ;;  %v1785_v15 = vadd.s32 %v9024_v24, %v9022_v5 }
 0x204   : > { %v1801_v25 = vsub.s32 32, %v1800_v14  ;;  %v1805_v62 = vsub.s32 4294967266, %v1800_v14  ;;  %v1892_v10 = vsel %vm1890_vm3, %v1891_v59, %v9119_v13  ;;  %v1822_v32 = vadd.s32 3, %v1818_v63 }
 0x205   : > { %v1893_v48 = vadd.s32 %v1892_v10, %v1888_v35  ;;  %v1944_v34 = vand.u32 8388607, %v1937_v21  ;;  %v1954_v61 = vshll.u32 %v13889_v9, %v9036_v50  ;;  %v1802_v33 = vshll.u32 %v9092_v52, %v1800_v14 }
 0x206   : > { %v1803_v16 = vshrl.u32 %v1785_v15, %v1801_v25  ;;  %v1806_v8 = vadd.s32 127, %v1805_v62  ;;  %v1958_v51 = vshrl.u32 %v13881_v46, %v9125_v22  ;;  %v7207_v5 = vpop.eup %7206  ;;  %v1957_v28 = vshll.u32 %v13880_v37, %v9036_v50 }
 0x207   : > { %v1894_v24 = vadd.s32 536870912, %v1893_v48  ;;  %v1956_v1 = vor.u32 %v1955_v45, %v1954_v61  ;;  %v1961_v56 = vshrl.u32 %v13882_v54, %v9125_v22  ;;  %v7209_v30 = vpop.eup %7208  ;;  %v1725_v29 = vxor.u32 2147483648, %v7207_v5 }
 0x208   : > { %v1804_v12 = vor.u32 %v1803_v16, %v1802_v33  ;;  %v1807_v39 = vshll.u32 %v1806_v8, 23  ;;  %v1964_v52 = vshrl.u32 %v13883_v0, %v9125_v22  ;;  %v1722_v44 = vxor.u32 2147483648, %v7209_v30 }
 0x209   : > { %v1895_v31 = vshrl.u32 %v1894_v24, 30  ;;  %v1960_v26 = vshll.u32 %v13881_v46, %v9036_v50  ;;  %v1967_v7 = vshrl.u32 %v13884_v42, %v9125_v22  ;;  %v1726_v38 = vsel %vm1724_vm11, %v1725_v29, %v7209_v30 }
 0x20a   : > { %v1808_v41 = vor.u32 4788187, %v1807_v39  ;;  %v1959_v11 = vor.u32 %v1958_v51, %v1957_v28  ;;  %v1963_v13 = vshll.u32 %v13882_v54, %v9036_v50  ;;  %v1723_v58 = vsel %vm1721_vm15, %v7207_v5, %v1722_v44 }
 0x20b   : > { %v1896_v49 = vshll.u32 %v1895_v31, 30  ;;  %v1962_v23 = vor.u32 %v1961_v56, %v1960_v26  ;;  %v1966_v47 = vshll.u32 %v13883_v0, %v9036_v50  ;;  %v1727_v2 = vsel %vm1720_vm14, %v1723_v58, %v1726_v38 }
 0x20c   : > { %v1809_v59 = vand.u32 2147483647, %v1808_v41  ;;  %v1811_v63 = vcvt.s32.f32 %v1804_v12  ;;  %v1965_v14 = vor.u32 %v1964_v52, %v1963_v13  ;;  %v1728_v35 = vsel %vm1717_vm1, nan, %v1727_v2  ;;  %v13936_v41 = vld [vmem:[#allocation8_spill] sm:$0xff] }
 0x20d   : > { %vm1835_vm13 = vcmp.lt.s32.totalorder %v8124_v3, 0  ;;  %v9190_v45 = vsub.s32 %v1893_v48, %v1896_v49  ;;  %v1968_v15 = vor.u32 %v1967_v7, %v1966_v47  ;;  %6674 = vmatprep.mubr.f32.mxu0 %v1728_v35  ;;  %v9192_v62 = vand.u32 3, %v1822_v32 }
 0x20e   : > { %v1812_v25 = vmul.f32 %v1811_v63, %v1809_v59  ;;  %v1945_v10 = vor.u32 8388608, %v1944_v34  ;;  %v1953_v50 = vshrl.u32 %v13889_v9, %v9125_v22  ;;  %vm1969_vm0 = vcmp.lt.s32.totalorder %v9136_v17, 1 }
 0x20f   : > { %v1899_v6 = vsub.s32 0, %v9190_v45  ;;  %vm1971_vm7 = vcmp.lt.s32.totalorder %v9136_v17, 3  ;;  %vm1972_vm4 = vcmp.lt.s32.totalorder %v9136_v17, 4  ;;  %v1977_v61 = vsel %vm1969_vm0, %v1956_v1, %v1959_v11 }
 0x210   : > { %v1813_v27 = vxor.u32 2147483648, %v1812_v25  ;;  %v1974_v48 = vsel %vm1972_vm4, %v1962_v23, 2102212464  ;;  %v1978_v33 = vsel %vm1972_vm4, %v1965_v14, 920167782  ;;  %v1981_v22 = vsel %vm1969_vm0, %v1959_v11, %v1962_v23 }
 0x211   : > { %v6362_v32 = vmin.u32 %v1899_v6, %v9190_v45  ;;  %v1979_v34 = vsel %vm1971_vm7, %v1962_v23, %v1978_v33  ;;  %v1982_v16 = vsel %vm1972_vm4, %v1968_v15, 1326507024  ;;  %v1919_v51 = vsub.s32 4, %v1895_v31  ;;  %v9267_v15 = vpop.f32.mrb[0].mxu0 }
 0x212   : > { %v1814_v8 = vsel %vm1731_vm9, %v1813_v27, %v1812_v25  ;;  %vm1970_vm2 = vcmp.lt.s32.totalorder %v9136_v17, 2  ;;  %v1983_v5 = vsel %vm1971_vm7, %v1965_v14, %v1982_v16  ;;  %v1985_v30 = vshll.u32 %v1945_v10, 8  ;;  %v9273_v27 = vpop.f32.mrb[1].mxu0 }
 0x213   : > { %v1817_v24 = vsel %vm9147_vm6, %v7919_v20, %v1814_v8  ;;  %v1901_v28 = vclz %v6362_v32  ;;  %v1980_v56 = vsel %vm1970_vm2, %v1977_v61, %v1979_v34  ;;  %v1973_v29 = vsel %vm1969_vm0, %v1953_v50, %v1956_v1 }
 0x214   : > { %7210 = vcosq.f32 %v1817_v24  ;;  %v1975_v12 = vsel %vm1971_vm7, %v1959_v11, %v1974_v48  ;;  %v1984_v39 = vsel %vm1970_vm2, %v1981_v22, %v1983_v5  ;;  %v1920_v26 = vsel %vm1835_vm13, %v1919_v51, %v1895_v31 }
 0x215   : > { %7212 = vsinq.f32 %v1817_v24  ;;  %v6363_v52 = vadd.s32 4294967294, %v1901_v28  ;;  %v9223_v44 = vmul.u32.u64.low %v1985_v30, %v1984_v39  ;;  %v9224_v53 = vmul.u32.u64.high %v1985_v30, %v1984_v39, %v9223_v44 }
 0x216   : > { %v9228_v7 = vmul.u32.u64.low %v1985_v30, %v1980_v56  ;;  %v9229_v38 = vmul.u32.u64.high %v1985_v30, %v1980_v56, %v9228_v7  ;;  %v2041_v1 = vand.u32 2147483647, %v13936_v41  ;;  %v9234_v13 = vshrl.u32 %v13933_v4, 5 }
 0x217   : > { %v9237_v11 = vand.u32 31, %v9143_v57  ;;  %vm6364_vm5 = vcmp.lt.s32.totalorder %v6363_v52, 0  ;;  %v1976_v58 = vsel %vm1970_vm2, %v1973_v29, %v1975_v12  ;;  %vm9243_vm8 = vcmp.le.f32.partialorder %v1833_v36, 0.7853982 }
 0x218   : > { %v1889_v49 = vadd.s32 %v9118_v19, %v9130_v18  ;;  %v1904_v23 = vsel %vm6364_vm5, 0, %v6363_v52  ;;  %v9251_v4 = vand.u32 8388607, %v2041_v1  ;;  %vm1825_vm10 = vcmp.eq.s32.totalorder %v9192_v62, 0 }
 0x219   : > { %v1905_v47 = vsub.s32 32, %v1904_v23  ;;  %v1909_v2 = vsub.s32 4294967266, %v1904_v23  ;;  %v1922_v17 = vsel %vm9243_vm8, 0, %v1920_v26  ;;  %v2059_v36 = vshrl.u32 %v13880_v37, %v9133_v55 }
 0x21a   : > { %vm1824_vm9 = vcmp.lt.s32.totalorder %v9192_v62, 2  ;;  %vm1828_vm6 = vcmp.eq.s32.totalorder %v9192_v62, 2  ;;  %v1992_v19 = vmul.u32 %v1985_v30, %v1976_v58  ;;  %vm1994_vm15 = vc.u32 %v9224_v53, %v9228_v7 }
 0x21b   : > { %v1995_v18 = vadd.s32 1, %v9229_v38  ;;  %vm1821_vm11 = vweird.f32 %v7919_v20  ;;  %v1906_v59 = vshll.u32 %v9190_v45, %v1904_v23  ;;  %v1907_v63 = vshrl.u32 %v1889_v49, %v1905_v47 }
 0x21c   : > { %v1910_v14 = vadd.s32 127, %v1909_v2  ;;  %v2058_v35 = vshll.u32 %v13889_v9, %v9029_v60  ;;  %v1926_v25 = vadd.s32 3, %v1922_v17  ;;  %v2049_v50 = vor.u32 8388608, %v9251_v4 }
 0x21d   : > { %v1996_v10 = vsel %vm1994_vm15, %v1995_v18, %v9229_v38  ;;  %v2062_v6 = vshrl.u32 %v13881_v46, %v9133_v55  ;;  %v1908_v48 = vor.u32 %v1907_v63, %v1906_v59  ;;  %v2061_v34 = vshll.u32 %v13880_v37, %v9029_v60 }
 0x21e   : > { %v1911_v61 = vshll.u32 %v1910_v14, 23  ;;  %v1997_v45 = vadd.s32 %v1996_v10, %v1992_v19  ;;  %v2060_v33 = vor.u32 %v2059_v36, %v2058_v35  ;;  %v7211_v32 = vpop.eup %7210  ;;  %v2065_v22 = vshrl.u32 %v13882_v54, %v9133_v55 }
 0x21f   : > { %v2067_v16 = vshll.u32 %v13882_v54, %v9029_v60  ;;  %v2068_v8 = vshrl.u32 %v13883_v0, %v9133_v55  ;;  %v7213_v51 = vpop.eup %7212  ;;  %v1829_v5 = vxor.u32 2147483648, %v7211_v32  ;;  %v2064_v56 = vshll.u32 %v13881_v46, %v9029_v60 }
 0x220   : > { %v1912_v24 = vor.u32 4788187, %v1911_v61  ;;  %v1998_v28 = vadd.s32 536870912, %v1997_v45  ;;  %v1826_v30 = vxor.u32 2147483648, %v7213_v51  ;;  %v2063_v29 = vor.u32 %v2062_v6, %v2061_v34 }
 0x221   : > { %v2069_v12 = vor.u32 %v2068_v8, %v2067_v16  ;;  %v2071_v39 = vshrl.u32 %v13884_v42, %v9133_v55  ;;  %v1830_v52 = vsel %vm1828_vm6, %v1829_v5, %v7213_v51  ;;  %v1915_v26 = vcvt.s32.f32 %v1908_v48 }
 0x222   : > { %v1913_v44 = vand.u32 2147483647, %v1912_v24  ;;  %v9289_v38 = vshrl.u32 %v1998_v28, 30  ;;  %v1827_v58 = vsel %vm1825_vm10, %v7211_v32, %v1826_v30  ;;  %v2066_v49 = vor.u32 %v2065_v22, %v2064_v56 }
 0x223   : > { %v2070_v23 = vshll.u32 %v13883_v0, %v9029_v60  ;;  %vm2073_vm12 = vcmp.lt.s32.totalorder %v9234_v13, 1  ;;  %v1831_v4 = vsel %vm1824_vm9, %v1827_v58, %v1830_v52  ;;  %vm2076_vm14 = vcmp.lt.s32.totalorder %v9234_v13, 4 }
 0x224   : > { %v1916_v47 = vmul.f32 %v1915_v26, %v1913_v44  ;;  %v2000_v2 = vshll.u32 %v9289_v38, 30  ;;  %v1832_v17 = vsel %vm1821_vm11, nan, %v1831_v4  ;;  %v2081_v19 = vsel %vm2073_vm12, %v2060_v33, %v2063_v29 }
 0x225   : > { %v2072_v36 = vor.u32 %v2071_v39, %v2070_v23  ;;  %v2082_v60 = vsel %vm2076_vm14, %v2069_v12, 920167782  ;;  %6675 = vmatmul.mubr.f32.gmra.mrb[10].mxu0 %v1832_v17  ;;  %v9306_v59 = vand.u32 3, %v1926_v25  ;;  %vm2075_vm3 = vcmp.lt.s32.totalorder %v9234_v13, 3 }
 0x226   : > { %v1917_v18 = vxor.u32 2147483648, %v1916_v47  ;;  %v9308_v62 = vsub.s32 %v1997_v45, %v2000_v2  ;;  %v2057_v63 = vshrl.u32 %v13889_v9, %v9133_v55  ;;  %vm2074_vm1 = vcmp.lt.s32.totalorder %v9234_v13, 2 }
 0x227   : > { %v2078_v20 = vsel %vm2076_vm14, %v2066_v49, 2102212464  ;;  %v2083_v14 = vsel %vm2075_vm3, %v2066_v49, %v2082_v60  ;;  %v2085_v6 = vsel %vm2073_vm12, %v2063_v29, %v2066_v49  ;;  %v2086_v61 = vsel %vm2076_vm14, %v2072_v36, 1326507024 }
 0x228   : > { %v1918_v35 = vsel %vm1835_vm13, %v1917_v18, %v1916_v47  ;;  %v2003_v25 = vsub.s32 0, %v9308_v62  ;;  %v2084_v10 = vsel %vm2074_vm1, %v2081_v19, %v2083_v14  ;;  %v2077_v48 = vsel %vm2073_vm12, %v2057_v63, %v2060_v33 }
 0x229   : > { %v1921_v55 = vsel %vm9243_vm8, %v8124_v3, %v1918_v35  ;;  %v2089_v45 = vshll.u32 %v2049_v50, 8  ;;  %v2079_v34 = vsel %vm2075_vm3, %v2063_v29, %v2078_v20  ;;  %v2087_v22 = vsel %vm2075_vm3, %v2069_v12, %v2086_v61 }
 0x22a   : > { %7214 = vcosq.f32 %v1921_v55  ;;  %v6366_v32 = vmin.u32 %v2003_v25, %v9308_v62  ;;  %v2088_v31 = vsel %vm2074_vm1, %v2085_v6, %v2087_v22  ;;  %v2160_v5 = vsub.s32 32, %v9237_v11 }
 0x22b   : > { %7216 = vsinq.f32 %v1921_v55  ;;  %v9339_v16 = vmul.u32.u64.low %v2089_v45, %v2084_v10  ;;  %v9340_v8 = vmul.u32.u64.high %v2089_v45, %v2084_v10, %v9339_v16  ;;  %v2080_v28 = vsel %vm2074_vm1, %v2077_v48, %v2079_v34 }
 0x22c   : > { %v2005_v33 = vclz %v6366_v32  ;;  %v9343_v51 = vmul.u32.u64.low %v2089_v45, %v2088_v31  ;;  %v9344_v50 = vmul.u32.u64.high %v2089_v45, %v2088_v31, %v9343_v51  ;;  %v9350_v56 = vshrl.u32 %v9143_v57, 5 }
 0x22d   : > { %vm1929_vm13 = vcmp.eq.s32.totalorder %v9306_v59, 0  ;;  %v2099_v30 = vadd.s32 1, %v9340_v8  ;;  %v2145_v29 = vand.u32 2147483647, %v8691_v40  ;;  %vm1928_vm0 = vcmp.lt.s32.totalorder %v9306_v59, 2 }
 0x22e   : > { %v6367_v24 = vadd.s32 4294967294, %v2005_v33  ;;  %vm1932_vm7 = vcmp.eq.s32.totalorder %v9306_v59, 2  ;;  %v1993_v12 = vadd.s32 %v9228_v7, %v9224_v53  ;;  %v2023_v13 = vsub.s32 4, %v9289_v38 }
 0x22f   : > { %vm1925_vm2 = vweird.f32 %v8124_v3  ;;  %v2096_v39 = vmul.u32 %v2089_v45, %v2080_v28  ;;  %vm2098_vm5 = vc.u32 %v9344_v50, %v9339_v16  ;;  %v2162_v52 = vshll.u32 %v13889_v9, %v9237_v11 }
 0x230   : > { %vm6368_vm4 = vcmp.lt.s32.totalorder %v6367_v24, 0  ;;  %vm1939_vm8 = vcmp.lt.s32.totalorder %v8365_v43, 0  ;;  %v2100_v58 = vsel %vm2098_vm5, %v2099_v30, %v9340_v8  ;;  %v2163_v53 = vshrl.u32 %v13880_v37, %v2160_v5 }
 0x231   : > { %v2008_v57 = vsel %vm6368_vm4, 0, %v6367_v24  ;;  %v2101_v7 = vadd.s32 %v2100_v58, %v2096_v39  ;;  %v2152_v49 = vand.u32 8388607, %v2145_v29  ;;  %v2165_v23 = vshll.u32 %v13880_v37, %v9237_v11 }
 0x232   : > { %v2009_v44 = vsub.s32 32, %v2008_v57  ;;  %v2013_v26 = vsub.s32 4294967266, %v2008_v57  ;;  %v2166_v4 = vshrl.u32 %v13881_v46, %v2160_v5  ;;  %v2010_v2 = vshll.u32 %v9308_v62, %v2008_v57 }
 0x233   : > { %v2168_v19 = vshll.u32 %v13881_v46, %v9237_v11  ;;  %v2102_v63 = vadd.s32 536870912, %v2101_v7  ;;  %v2169_v20 = vshrl.u32 %v13882_v54, %v2160_v5  ;;  %v2172_v14 = vshrl.u32 %v13883_v0, %v2160_v5 }
 0x234   : > { %v7215_v47 = vpop.eup %7214  ;;  %v2011_v17 = vshrl.u32 %v1993_v12, %v2009_v44  ;;  %v2014_v36 = vadd.s32 127, %v2013_v26  ;;  %v2164_v6 = vor.u32 %v2163_v53, %v2162_v52  ;;  %v2171_v48 = vshll.u32 %v13882_v54, %v9237_v11 }
 0x235   : > { %v7217_v60 = vpop.eup %7216  ;;  %v1933_v18 = vxor.u32 2147483648, %v7215_v47  ;;  %v9380_v62 = vshrl.u32 %v2102_v63, 30  ;;  %v2175_v61 = vshrl.u32 %v13884_v42, %v2160_v5  ;;  %v2167_v34 = vor.u32 %v2166_v4, %v2165_v23 }
 0x236   : > { %v1930_v35 = vxor.u32 2147483648, %v7217_v60  ;;  %v2012_v25 = vor.u32 %v2011_v17, %v2010_v2  ;;  %v2015_v10 = vshll.u32 %v2014_v36, 23  ;;  %v2174_v22 = vshll.u32 %v13883_v0, %v9237_v11 }
 0x237   : > { %v1934_v55 = vsel %vm1932_vm7, %v1933_v18, %v7217_v60  ;;  %v2104_v8 = vshll.u32 %v9380_v62, 30  ;;  %v2170_v33 = vor.u32 %v2169_v20, %v2168_v19  ;;  %v2173_v51 = vor.u32 %v2172_v14, %v2171_v48 }
 0x238   : > { %v1931_v45 = vsel %vm1929_vm13, %v7215_v47, %v1930_v35  ;;  %v2016_v32 = vor.u32 4788187, %v2015_v10  ;;  %v2019_v30 = vcvt.s32.f32 %v2012_v25  ;;  %v2176_v12 = vor.u32 %v2175_v61, %v2174_v22 }
 0x239   : > { %v1935_v31 = vsel %vm1928_vm0, %v1931_v45, %v1934_v55  ;;  %vm9396_vm10 = vcmp.le.f32.partialorder %v1937_v21, 0.7853982  ;;  %v2024_v11 = vsel %vm1939_vm8, %v2023_v13, %v9289_v38  ;;  %v2105_v59 = vsub.s32 %v2101_v7, %v2104_v8 }
 0x23a   : > { %v1936_v24 = vsel %vm1925_vm2, nan, %v1935_v31  ;;  %v2017_v28 = vand.u32 2147483647, %v2016_v32  ;;  %v2161_v39 = vshrl.u32 %v13889_v9, %v2160_v5  ;;  %v2153_v3 = vor.u32 8388608, %v2152_v49 }
 0x23b   : > { %6677 = vmatprep.mubr.f32.mxu0 %v1936_v24  ;;  %vm2177_vm9 = vcmp.lt.s32.totalorder %v9350_v56, 1  ;;  %vm2180_vm6 = vcmp.lt.s32.totalorder %v9350_v56, 4  ;;  %v2107_v44 = vsub.s32 0, %v2105_v59  ;;  %vm2179_vm15 = vcmp.lt.s32.totalorder %v9350_v56, 3  ;;  %v9439_v55 = vpop.f32.mrb[2].mxu0 }
 0x23c   : > { %v2020_v52 = vmul.f32 %v2019_v30, %v2017_v28  ;;  %v2185_v21 = vsel %vm2177_vm9, %v2164_v6, %v2167_v34  ;;  %v2186_v26 = vsel %vm2180_vm6, %v2173_v51, 920167782  ;;  %v2189_v5 = vsel %vm2177_vm9, %v2167_v34, %v2170_v33  ;;  %v9442_v61 = vpop.f32.mrb[3].mxu0 }
 0x23d   : > { %v2187_v38 = vsel %vm2179_vm15, %v2170_v33, %v2186_v26  ;;  %v2190_v13 = vsel %vm2180_vm6, %v2176_v12, 1326507024  ;;  %v6370_v53 = vmin.u32 %v2107_v44, %v2105_v59  ;;  %vm2178_vm11 = vcmp.lt.s32.totalorder %v9350_v56, 2 }
 0x23e   : > { %v2021_v58 = vxor.u32 2147483648, %v2020_v52  ;;  %v2182_v7 = vsel %vm2180_vm6, %v2170_v33, 2102212464  ;;  %v2191_v49 = vsel %vm2179_vm15, %v2173_v51, %v2190_v13  ;;  %v2188_v4 = vsel %vm2178_vm11, %v2185_v21, %v2187_v38 }
 0x23f   : > { %v2192_v47 = vsel %vm2178_vm11, %v2189_v5, %v2191_v49  ;;  %v2193_v2 = vshll.u32 %v2153_v3, 8  ;;  %v2026_v36 = vsel %vm9396_vm10, 0, %v2024_v11  ;;  %v2109_v19 = vclz %v6370_v53 }
 0x240   : > { %v2022_v23 = vsel %vm1939_vm8, %v2021_v58, %v2020_v52  ;;  %v2181_v60 = vsel %vm2177_vm9, %v2161_v39, %v2164_v6  ;;  %v2183_v18 = vsel %vm2179_vm15, %v2167_v34, %v2182_v7  ;;  %v2030_v48 = vadd.s32 3, %v2026_v36 }
 0x241   : > { %v2025_v17 = vsel %vm9396_vm10, %v8365_v43, %v2022_v23  ;;  %v9431_v63 = vmul.u32.u64.low %v2193_v2, %v2192_v47  ;;  %v9432_v20 = vmul.u32.u64.high %v2193_v2, %v2192_v47, %v9431_v63  ;;  %v6371_v14 = vadd.s32 4294967294, %v2109_v19 }
 0x242   : > { %7218 = vcosq.f32 %v2025_v17  ;;  %v9434_v35 = vmul.u32.u64.low %v2193_v2, %v2188_v4  ;;  %v9435_v25 = vmul.u32.u64.high %v2193_v2, %v2188_v4, %v9434_v35  ;;  %v2184_v10 = vsel %vm2178_vm11, %v2181_v60, %v2183_v18 }
 0x243   : > { %7220 = vsinq.f32 %v2025_v17  ;;  %vm6372_vm12 = vcmp.lt.s32.totalorder %v6371_v14, 0  ;;  %v2097_v45 = vadd.s32 %v9339_v16, %v9344_v50  ;;  %v2200_v31 = vmul.u32 %v2193_v2, %v2184_v10 }
 0x244   : > { %v2112_v6 = vsel %vm6372_vm12, 0, %v6371_v14  ;;  %vm2202_vm14 = vc.u32 %v9432_v20, %v9434_v35  ;;  %v2203_v22 = vadd.s32 1, %v9435_v25  ;;  %v2031_v24 = vand.u32 3, %v2030_v48 }
 0x245   : > { %v2113_v32 = vsub.s32 32, %v2112_v6  ;;  %v2117_v34 = vsub.s32 4294967266, %v2112_v6  ;;  %v2114_v8 = vshll.u32 %v2105_v59, %v2112_v6  ;;  %vm2029_vm0 = vweird.f32 %v8365_v43 }
 0x246   : > { %v2204_v51 = vsel %vm2202_vm14, %v2203_v22, %v9435_v25  ;;  %vm2036_vm3 = vcmp.eq.s32.totalorder %v2031_v24, 2  ;;  %vm2033_vm1 = vcmp.eq.s32.totalorder %v2031_v24, 0  ;;  %vm2032_vm13 = vcmp.lt.s32.totalorder %v2031_v24, 2 }
 0x247   : > { %v2115_v33 = vshrl.u32 %v2097_v45, %v2113_v32  ;;  %v2118_v56 = vadd.s32 127, %v2117_v34  ;;  %v2205_v28 = vadd.s32 %v2204_v51, %v2200_v31  ;;  %v2127_v13 = vsub.s32 4, %v9380_v62 }
 0x248   : > { %vm2043_vm7 = vcmp.lt.s32.totalorder %v13936_v41, 0  ;;  %vm2042_vm4 = vcmp.le.f32.partialorder %v2041_v1, 0.7853982  ;;  %v2201_v63 = vadd.s32 %v9434_v35, %v9432_v20  ;;  %vm2133_vm9 = vweird.f32 %v13936_v41 }
 0x249   : > { %v2116_v30 = vor.u32 %v2115_v33, %v2114_v8  ;;  %v2119_v12 = vshll.u32 %v2118_v56, 23  ;;  %v2206_v11 = vadd.s32 536870912, %v2205_v28  ;;  %v2128_v47 = vsel %vm2043_vm7, %v2127_v13, %v9380_v62  ;;  %v9470_v13 = vld [vmem:[%s13663_s4] ss:$0 sm:$0xff] }
 0x24a   : > { %v2130_v17 = vsel %vm2042_vm4, 0, %v2128_v47  ;;  %vm2147_vm6 = vcmp.lt.s32.totalorder %v8691_v40, 0  ;;  %vm2146_vm15 = vcmp.le.f32.partialorder %v2145_v29, 0.7853982 }
 0x24b   : > { %v2120_v3 = vor.u32 4788187, %v2119_v12  ;;  %v9448_v50 = vshrl.u32 %v2206_v11, 30  ;;  %v2123_v21 = vcvt.s32.f32 %v2116_v30  ;;  %v2134_v60 = vadd.s32 3, %v2130_v17 }
 0x24c   : > { %v7219_v57 = vpop.eup %7218  ;;  %v2339_v17 = vadd.f32 %v9470_v13, %v9273_v27 }
 0x24d   : > { %v7221_v39 = vpop.eup %7220  ;;  %v2037_v52 = vxor.u32 2147483648, %v7219_v57  ;;  %v2121_v59 = vand.u32 2147483647, %v2120_v3  ;;  %v2208_v58 = vshll.u32 %v9448_v50, 30  ;;  %v2135_v10 = vand.u32 3, %v2134_v60 }
 0x24e   : > { %v2034_v16 = vxor.u32 2147483648, %v7221_v39  ;;  %v2231_v30 = vsub.s32 4, %v9448_v50 }
 0x24f   : > { %v2038_v44 = vsel %vm2036_vm3, %v2037_v52, %v7221_v39  ;;  %v2124_v5 = vmul.f32 %v2123_v21, %v2121_v59  ;;  %v2209_v7 = vsub.s32 %v2205_v28, %v2208_v58  ;;  %vm2140_vm5 = vcmp.eq.s32.totalorder %v2135_v10, 2 }
 0x250   : > { %v2035_v26 = vsel %vm2033_vm1, %v7219_v57, %v2034_v16  ;;  %vm2137_vm8 = vcmp.eq.s32.totalorder %v2135_v10, 0  ;;  %vm2136_vm10 = vcmp.lt.s32.totalorder %v2135_v10, 2  ;;  %v2232_v11 = vsel %vm2147_vm6, %v2231_v30, %v9448_v50 }
 0x251   : > { %v2039_v38 = vsel %vm2032_vm13, %v2035_v26, %v2038_v44  ;;  %v2125_v49 = vxor.u32 2147483648, %v2124_v5  ;;  %v2211_v23 = vsub.s32 0, %v2209_v7  ;;  %vm2237_vm3 = vweird.f32 %v8691_v40 }
 0x252   : > { %v2040_v53 = vsel %vm2029_vm0, nan, %v2039_v38 }
 0x253   : > { %6678 = vmatmul.mubr.f32.gmra.mrb[12].mxu0 %v2040_v53  ;;  %v2126_v4 = vsel %vm2043_vm7, %v2125_v49, %v2124_v5  ;;  %v6374_v43 = vmin.u32 %v2211_v23, %v2209_v7  ;;  %v2344_v53 = vadd.f32 %v9267_v15, %v9470_v13  ;;  %v2354_v49 = vadd.f32 %v9439_v55, %v9470_v13 }
 0x254   : > { %v2129_v2 = vsel %vm2042_vm4, %v13936_v41, %v2126_v4  ;;  %v2234_v41 = vsel %vm2146_vm15, 0, %v2232_v11  ;;  %v2349_v23 = vadd.f32 %v9470_v13, %v9442_v61 }
 0x255   : > { %7222 = vcosq.f32 %v2129_v2  ;;  %v2213_v36 = vclz %v6374_v43  ;;  %v2238_v52 = vadd.s32 3, %v2234_v41 }
 0x256   : > { %7224 = vsinq.f32 %v2129_v2  ;;  %v2419_v47 = vand.u32 2147483647, %v2349_v23 }
 0x257   : > { %v6375_v19 = vadd.s32 4294967294, %v2213_v36  ;;  %v2239_v44 = vand.u32 3, %v2238_v52 }
 0x258   : > { %v2435_v36 = vadd.f32 1.0, %v2419_v47 }
 0x259   : > { %vm6376_vm2 = vcmp.lt.s32.totalorder %v6375_v19, 0  ;;  %vm2244_vm11 = vcmp.eq.s32.totalorder %v2239_v44, 2  ;;  %vm2241_vm12 = vcmp.eq.s32.totalorder %v2239_v44, 0  ;;  %vm2240_vm14 = vcmp.lt.s32.totalorder %v2239_v44, 2 }
 0x25a   : > { %v2216_v18 = vsel %vm6376_vm2, 0, %v6375_v19 }
 0x25b   : > { %v2217_v14 = vsub.s32 32, %v2216_v18  ;;  %v2221_v25 = vsub.s32 4294967266, %v2216_v18  ;;  %v2218_v1 = vshll.u32 %v2209_v7, %v2216_v18  ;;  %v2418_v7 = vand.u32 2147483647, %v2344_v53 }
 0x25c   : > { %v2417_v18 = vand.u32 2147483647, %v2339_v17 }
 0x25d   : > { %v2219_v48 = vshrl.u32 %v2201_v63, %v2217_v14  ;;  %v2222_v6 = vadd.s32 127, %v2221_v25  ;;  %v2434_v4 = vadd.f32 1.0, %v2418_v7  ;;  %v2451_v63 = vmul.f32 30.0, %v2435_v36 }
 0x25e   : > { %v2433_v10 = vadd.f32 1.0, %v2417_v18 }
 0x25f   : > { %v7223_v62 = vpop.eup %7222  ;;  %v2220_v34 = vor.u32 %v2219_v48, %v2218_v1  ;;  %v2223_v22 = vshll.u32 %v2222_v6, 23  ;;  %v2450_v2 = vmul.f32 30.0, %v2434_v4  ;;  %v9487_v1 = vmul.f32 %v2451_v63, %v2349_v23 }
 0x260   : > { %v7225_v45 = vpop.eup %7224  ;;  %v2141_v32 = vxor.u32 2147483648, %v7223_v62 }
 0x261   : > { %v2138_v31 = vxor.u32 2147483648, %v7225_v45  ;;  %v2224_v33 = vor.u32 4788187, %v2223_v22  ;;  %v2227_v51 = vcvt.s32.f32 %v2220_v34  ;;  %v9480_v19 = vmul.f32 %v2450_v2, %v2344_v53 }
 0x262   : > { %v2142_v8 = vsel %vm2140_vm5, %v2141_v32, %v7225_v45  ;;  %v2449_v45 = vmul.f32 30.0, %v2433_v10  ;;  %v2692_v32 = vand.u32 2139095040, %v9487_v1 }
 0x263   : > { %v2139_v56 = vsel %vm2137_vm8, %v7223_v62, %v2138_v31  ;;  %v2225_v35 = vand.u32 2147483647, %v2224_v33  ;;  %v2588_v55 = vand.u32 2139095040, %v9480_v19 }
 0x264   : > { %v2143_v20 = vsel %vm2136_vm10, %v2139_v56, %v2142_v8  ;;  %v9491_v33 = vmul.f32 %v2449_v45, %v2339_v17  ;;  %v2693_v56 = vshrl.u32 %v2692_v32, 23 }
 0x265   : > { %v2144_v24 = vsel %vm2133_vm9, nan, %v2143_v20  ;;  %v2228_v28 = vmul.f32 %v2227_v51, %v2225_v35  ;;  %v2589_v48 = vshrl.u32 %v2588_v55, 23 }
 0x266   : > { %6680 = vmatprep.mubr.f32.mxu0 %v2144_v24  ;;  %v6386_v11 = vadd.s32 4294967169, %v2693_v56 }
 0x267   : > { %v2229_v12 = vxor.u32 2147483648, %v2228_v28  ;;  %v6382_v34 = vadd.s32 4294967169, %v2589_v48 }
 0x269   : > { %v2230_v57 = vsel %vm2147_vm6, %v2229_v12, %v2228_v28  ;;  %v2595_v35 = vadd.s32 1, %v6382_v34 }
 0x26a   : > { %v2233_v39 = vsel %vm2146_vm15, %v8691_v40, %v2230_v57  ;;  %v2420_v40 = vand.u32 2147483647, %v2354_v49  ;;  %v2484_v57 = vand.u32 2139095040, %v9491_v33 }
 0x26b   : > { %7226 = vcosq.f32 %v2233_v39  ;;  %vm2596_vm1 = vcmp.gt.s32.totalorder %v2595_v35, 0 }
 0x26c   : > { %7228 = vsinq.f32 %v2233_v39  ;;  %v6667_v3 = vpop.f32.mrb[4].mxu0  ;;  %v2436_v43 = vadd.f32 1.0, %v2420_v40  ;;  %v2597_v44 = vsel %vm2596_vm1, %v2595_v35, 0 }
 0x26d   : > { %v2358_v16 = vpop.f32.mrb[5].mxu0  ;;  %v2364_v15 = vadd.f32 %v6667_v3, %v9470_v13  ;;  %v9513_v63 = vshrl.u32 %v2597_v44, 5 }
 0x26e   : > { %v2452_v60 = vmul.f32 30.0, %v2436_v43  ;;  %v2359_v61 = vadd.f32 %v9470_v13, %v2358_v16 }
 0x26f   : > { %v2422_v14 = vand.u32 2147483647, %v2364_v15  ;;  %vm2620_vm2 = vcmp.lt.s32.totalorder %v9513_v63, 4  ;;  %vm2619_vm1 = vcmp.lt.s32.totalorder %v9513_v63, 3 }
 0x270   : > { %v9485_v25 = vmul.f32 %v2452_v60, %v2354_v49  ;;  %v2421_v6 = vand.u32 2147483647, %v2359_v61 }
 0x271   : > { %v2438_v27 = vadd.f32 1.0, %v2422_v14 }
 0x272   : > { %v2796_v62 = vand.u32 2139095040, %v9485_v25  ;;  %v2437_v31 = vadd.f32 1.0, %v2421_v6 }
 0x273   : > { %v2454_v22 = vmul.f32 30.0, %v2438_v27 }
 0x274   : > { %v2797_v8 = vshrl.u32 %v2796_v62, 23  ;;  %v2453_v24 = vmul.f32 30.0, %v2437_v31 }
 0x275   : > { %v7227_v59 = vpop.eup %7226  ;;  %v9493_v51 = vmul.f32 %v2454_v22, %v2364_v15 }
 0x276   : > { %v7229_v21 = vpop.eup %7228  ;;  %v2245_v26 = vxor.u32 2147483648, %v7227_v59  ;;  %v6390_v12 = vadd.s32 4294967169, %v2797_v8  ;;  %v9499_v52 = vmul.f32 %v2453_v24, %v2359_v61  ;;  %v13707_v24 = vand.u32 2147483647, %v9491_v33 }
 0x277   : > { %v2242_v58 = vxor.u32 2147483648, %v7229_v21  ;;  %13941 = vst [vmem:[#allocation14_spill] sm:$0xff] %v9493_v51  ;;  %v3004_v41 = vand.u32 2139095040, %v9493_v51 }
 0x278   : > { %v2246_v38 = vsel %vm2244_vm11, %v2245_v26, %v7229_v21  ;;  %v2803_v16 = vadd.s32 1, %v6390_v12  ;;  %v2699_v21 = vadd.s32 1, %v6386_v11 }
 0x279   : > { %v2243_v29 = vsel %vm2241_vm12, %v7227_v59, %v2242_v58  ;;  %v2485_v59 = vshrl.u32 %v2484_v57, 23  ;;  %v3005_v58 = vshrl.u32 %v3004_v41, 23 }
 0x27a   : > { %v2247_v50 = vsel %vm2240_vm14, %v2243_v29, %v2246_v38  ;;  %v2900_v38 = vand.u32 2139095040, %v9499_v52  ;;  %vm2804_vm13 = vcmp.gt.s32.totalorder %v2803_v16, 0  ;;  %vm2700_vm0 = vcmp.gt.s32.totalorder %v2699_v21, 0 }
 0x27b   : > { %v2248_v5 = vsel %vm2237_vm3, nan, %v2247_v50  ;;  %v9502_v50 = vand.u32 31, %v2597_v44  ;;  %v6398_v7 = vadd.s32 4294967169, %v3005_v58  ;;  %v2805_v23 = vsel %vm2804_vm13, %v2803_v16, 0 }
 0x27c   : > { %6681 = vmatmul.mubr.f32.gmra.mrb[14].mxu0 %v2248_v5  ;;  %v6378_v5 = vadd.s32 4294967169, %v2485_v59  ;;  %v2901_v49 = vshrl.u32 %v2900_v38, 23  ;;  %v2701_v47 = vsel %vm2700_vm0, %v2699_v21, 0  ;;  %v9507_v17 = vand.u32 31, %v2805_v23 }
 0x27d   : > { %v9505_v40 = vsub.s32 32, %v9502_v50  ;;  %v3011_v36 = vadd.s32 1, %v6398_v7  ;;  %v9509_v60 = vand.u32 31, %v2701_v47  ;;  %v2611_v10 = vshll.u32 %v13882_v54, %v9502_v50 }
 0x27e   : > { %v2491_v2 = vadd.s32 1, %v6378_v5  ;;  %13942 = vst [vmem:[#allocation10_spill] sm:$0xff] %v9507_v17  ;;  %v6394_v15 = vadd.s32 4294967169, %v2901_v49  ;;  %v9524_v48 = vsub.s32 32, %v9507_v17  ;;  %v2614_v6 = vshll.u32 %v13883_v0, %v9502_v50 }
 0x27f   : > { %v2612_v55 = vshrl.u32 %v13883_v0, %v9505_v40  ;;  %v2615_v14 = vshrl.u32 %v13884_v42, %v9505_v40  ;;  %vm3012_vm4 = vcmp.gt.s32.totalorder %v3011_v36, 0  ;;  %v9529_v62 = vsub.s32 32, %v9509_v60 }
 0x280   : > { %vm2492_vm7 = vcmp.gt.s32.totalorder %v2491_v2, 0  ;;  %13945 = vst [vmem:[#allocation18_spill] sm:$0xff] %v9524_v48  ;;  %v2907_v27 = vadd.s32 1, %v6394_v15  ;;  %v9535_v31 = vshrl.u32 %v2805_v23, 5  ;;  %v3013_v8 = vsel %vm3012_vm4, %v3011_v36, 0 }
 0x281   : > { %v9532_v32 = vor.u32 %v2612_v55, %v2611_v10  ;;  %v2493_v34 = vsel %vm2492_vm7, %v2491_v2, 0  ;;  %v2616_v22 = vor.u32 %v2615_v14, %v2614_v6  ;;  %v2823_v35 = vshrl.u32 %v13884_v42, %v9524_v48 }
 0x282   : > { %13946 = vst [vmem:[#allocation12_spill] sm:$0xff] %v9535_v31  ;;  %vm2908_vm5 = vcmp.gt.s32.totalorder %v2907_v27, 0  ;;  %v2719_v12 = vshrl.u32 %v13884_v42, %v9529_v62  ;;  %v2822_v11 = vshll.u32 %v13883_v0, %v9507_v17  ;;  %v2718_v41 = vshll.u32 %v13883_v0, %v9509_v60 }
 0x283   : > { %v2909_v16 = vsel %vm2908_vm5, %v2907_v27, 0  ;;  %v2488_v59 = vand.u32 8388607, %v13707_v24  ;;  %v13706_v21 = vand.u32 2147483647, %v9480_v19  ;;  %v9564_v5 = vshrl.u32 %v2493_v34, 5 }
 0x284   : > { %v2824_v38 = vor.u32 %v2823_v35, %v2822_v11  ;;  %v2720_v7 = vor.u32 %v2719_v12, %v2718_v41  ;;  %v9571_v23 = vsel %vm2620_vm2, %v9532_v32, 920167782  ;;  %vm2828_vm8 = vcmp.lt.s32.totalorder %v9535_v31, 4  ;;  %v6443_v12 = vld [vmem:[%s13662_s3 + $0x88] sm:$0xff] }
 0x285   : > { %v9578_v2 = vand.u32 31, %v2909_v16  ;;  %v2489_v36 = vor.u32 8388608, %v2488_v59  ;;  %v9585_v15 = vand.u32 8388607, %v13706_v21  ;;  %v2605_v59 = vshll.u32 %v13880_v37, %v9502_v50 }
 0x286   : > { %v9594_v10 = vsel %vm2828_vm8, %v2824_v38, 1326507024  ;;  %v2608_v38 = vshll.u32 %v13881_v46, %v9502_v50  ;;  %vm2513_vm6 = vcmp.lt.s32.totalorder %v9564_v5, 1  ;;  %vm2516_vm15 = vcmp.lt.s32.totalorder %v9564_v5, 4 }
 0x287   : > { %13950 = vst [vmem:[#allocation9_spill] sm:$0xff] %v9594_v10  ;;  %v9621_v35 = vsub.s32 32, %v9578_v2  ;;  %v9638_v11 = vshll.u32 %v2489_v36, 8  ;;  %vm2515_vm11 = vcmp.lt.s32.totalorder %v9564_v5, 3  ;;  %vm2514_vm12 = vcmp.lt.s32.totalorder %v9564_v5, 2 }
 0x288   : > { %vm2617_vm14 = vcmp.lt.s32.totalorder %v9513_v63, 1  ;;  %vm2618_vm0 = vcmp.lt.s32.totalorder %v9513_v63, 2 }
 0x29c   : > { %v6670_v20 = vpop.f32.mrb[6].mxu0 }
 0x29d   : > { %v2368_v28 = vpop.f32.mrb[7].mxu0  ;;  %v2374_v30 = vadd.f32 %v6670_v20, %v9470_v13  ;;  %v2820_v20 = vshrl.u32 %v13883_v0, %v9524_v48 }
 0x29e   : > { %v2369_v39 = vadd.f32 %v9470_v13, %v2368_v28  ;;  %v2819_v28 = vshll.u32 %v13882_v54, %v9507_v17 }
 0x29f   : > { %v2424_v3 = vand.u32 2147483647, %v2374_v30 }
 0x2a0   : > { %v2423_v26 = vand.u32 2147483647, %v2369_v39  ;;  %v9560_v58 = vor.u32 %v2820_v20, %v2819_v28  ;;  %v9618_v20 = vshrl.u32 %v2909_v16, 5  ;;  %v6445_v16 = vld [vmem:[%s13662_s3 + $0x98] sm:$0xff] }
 0x2a1   : > { %v2440_v29 = vadd.f32 1.0, %v2424_v3  ;;  %v9555_v3 = vand.u32 31, %v3013_v8 }
 0x2a2   : > { %v2439_v53 = vadd.f32 1.0, %v2423_v26  ;;  %v2495_v26 = vand.u32 31, %v2493_v34  ;;  %13948 = vst [vmem:[#allocation7_spill] sm:$0xff] %v9560_v58  ;;  %v9590_v14 = vsel %vm2828_vm8, %v9560_v58, 920167782 }
 0x2a3   : > { %v2456_v4 = vmul.f32 30.0, %v2440_v29  ;;  %13947 = vst [vmem:[#allocation17_spill] sm:$0xff] %v9555_v3  ;;  %v9562_v29 = vshrl.u32 %v2701_v47, 5  ;;  %v9581_v47 = vsub.s32 32, %v9555_v3  ;;  %13949 = vst [vmem:[#allocation19_spill] sm:$0xff] %v9590_v14 }
 0x2a4   : > { %v2455_v43 = vmul.f32 30.0, %v2439_v53  ;;  %v2496_v55 = vsub.s32 32, %v2495_v26  ;;  %v2504_v36 = vshll.u32 %v13881_v46, %v2495_v26  ;;  %v2507_v24 = vshll.u32 %v13882_v54, %v2495_v26 }
 0x2a5   : > { %v9511_v18 = vmul.f32 %v2456_v4, %v2374_v30  ;;  %v2716_v30 = vshrl.u32 %v13883_v0, %v9529_v62  ;;  %v9575_v4 = vsel %vm2620_vm2, %v2616_v22, 1326507024  ;;  %vm2724_vm10 = vcmp.lt.s32.totalorder %v9562_v29, 4 }
 0x2a6   : > { %v9519_v61 = vmul.f32 %v2455_v43, %v2369_v39  ;;  %v2715_v39 = vshll.u32 %v13882_v54, %v9509_v60  ;;  %v9604_v6 = vsel %vm2724_vm10, %v2720_v7, 1326507024  ;;  %v9612_v22 = vshll.u32 %v13882_v54, %v9555_v3 }
 0x2a7   : > { %13943 = vst [vmem:[#allocation13_spill] sm:$0xff] %v9511_v18  ;;  %v3212_v45 = vand.u32 2139095040, %v9511_v18  ;;  %v9625_v28 = vshrl.u32 %v13883_v0, %v9581_v47  ;;  %v2505_v21 = vshrl.u32 %v13882_v54, %v2496_v55 }
 0x2a8   : > { %13944 = vst [vmem:[#allocation6_spill] sm:$0xff] %v9519_v61  ;;  %v3108_v56 = vand.u32 2139095040, %v9519_v61  ;;  %v9566_v53 = vor.u32 %v2716_v30, %v2715_v39  ;;  %v6442_v30 = vld [vmem:[%s13662_s3 + $0x80] sm:$0xff]  ;;  %v2497_v39 = vshrl.u32 %v13889_v9, %v2496_v55 }
 0x2a9   : > { %v3213_v57 = vshrl.u32 %v3212_v45, 23  ;;  %v9606_v45 = vshrl.u32 %v3013_v8, 5  ;;  %v6827_v41 = vpack.c.bf16 %v6443_v12, %v6442_v30  ;;  %v2499_v30 = vshrl.u32 %v13880_v37, %v2496_v55 }
 0x2aa   : > { %v3109_v44 = vshrl.u32 %v3108_v56, 23  ;;  %v9600_v27 = vsel %vm2724_vm10, %v9566_v53, 920167782  ;;  %v9616_v56 = vshll.u32 %v13883_v0, %v9555_v3  ;;  %v2502_v12 = vshrl.u32 %v13881_v46, %v2496_v55 }
 0x2ab   : > { %v6406_v49 = vadd.s32 4294967169, %v3213_v57  ;;  %v6444_v57 = vld [vmem:[%s13662_s3 + $0x90] sm:$0xff]  ;;  %6828 = vmatprep.subr.bf16.mxu1 %v6827_v41  ;;  %v2506_v3 = vor.u32 %v2505_v21, %v2504_v36  ;;  %vm3036_vm4 = vcmp.lt.s32.totalorder %v9606_v45, 4 }
 0x2ac   : > { %v6402_v43 = vadd.s32 4294967169, %v3109_v44  ;;  %v2602_v44 = vshll.u32 %v13889_v9, %v9502_v50  ;;  %v6831_v7 = vpack.c.bf16 %v6445_v16, %v6444_v57  ;;  %6830 = vmatpush3.bf16.msra.mxu1 %v6827_v41  ;;  %v2508_v50 = vshrl.u32 %v13883_v0, %v2496_v55 }
 0x2ad   : > { %v9608_v34 = vadd.s32 1, %v6406_v49  ;;  %v2498_v49 = vshll.u32 %v13889_v9, %v2495_v26  ;;  %v2510_v57 = vshll.u32 %v13883_v0, %v2495_v26  ;;  %v2511_v16 = vshrl.u32 %v13884_v42, %v2496_v55 }
 0x2ae   : > { %v9627_v8 = vadd.s32 1, %v6402_v43  ;;  %v2501_v43 = vshll.u32 %v13880_v37, %v2495_v26  ;;  %6832 = vmatprep.subr.bf16.mxu1 %v6831_v7  ;;  %v2509_v58 = vor.u32 %v2508_v50, %v2507_v24  ;;  %v2603_v41 = vshrl.u32 %v13880_v37, %v9505_v40 }
 0x2af   : > { %vm3220_vm9 = vcmp.gt.s32.totalorder %v9608_v34, 0  ;;  %v2500_v18 = vor.u32 %v2499_v30, %v2498_v49  ;;  %v2512_v10 = vor.u32 %v2511_v16, %v2510_v57  ;;  %v2518_v26 = vsel %vm2516_vm15, %v2506_v3, 2102212464 }
 0x2b0   : > { %v2503_v61 = vor.u32 %v2502_v12, %v2501_v43  ;;  %6834 = vmatpush3.bf16.msra.mxu1 %v6831_v7  ;;  %v2522_v51 = vsel %vm2516_vm15, %v2509_v58, 920167782  ;;  %v2606_v43 = vshrl.u32 %v13881_v46, %v9505_v40  ;;  %v2604_v57 = vor.u32 %v2603_v41, %v2602_v44 }
 0x2b1   : > { %v2517_v17 = vsel %vm2513_vm6, %v2497_v39, %v2500_v18  ;;  %v2526_v55 = vsel %vm2516_vm15, %v2512_v10, 1326507024  ;;  %v2523_v24 = vsel %vm2515_vm11, %v2506_v3, %v2522_v51  ;;  %vm3116_vm3 = vcmp.gt.s32.totalorder %v9627_v8, 0 }
 0x2b2   : > { %v2521_v14 = vsel %vm2513_vm6, %v2500_v18, %v2503_v61  ;;  %v2525_v31 = vsel %vm2513_vm6, %v2503_v61, %v2506_v3  ;;  %v2519_v48 = vsel %vm2515_vm11, %v2503_v61, %v2518_v26  ;;  %v2527_v21 = vsel %vm2515_vm11, %v2509_v58, %v2526_v55 }
 0x2b3   : > { %v2524_v12 = vsel %vm2514_vm12, %v2521_v14, %v2523_v24  ;;  %v2528_v50 = vsel %vm2514_vm12, %v2525_v31, %v2527_v21  ;;  %v2520_v16 = vsel %vm2514_vm12, %v2517_v17, %v2519_v48  ;;  %v2607_v10 = vor.u32 %v2606_v43, %v2605_v59 }
 0x2b4   : > { %v9672_v18 = vmul.u32.u64.low %v9638_v11, %v2528_v50  ;;  %v9673_v61 = vmul.u32.u64.high %v9638_v11, %v2528_v50, %v9672_v18  ;;  %v9679_v51 = vmul.u32.u64.low %v9638_v11, %v2524_v12  ;;  %v9680_v3 = vmul.u32.u64.high %v9638_v11, %v2524_v12, %v9679_v51 }
 0x2b5   : > { %v2609_v58 = vshrl.u32 %v13882_v54, %v9505_v40  ;;  %v9687_v31 = vshrl.u32 %v13884_v42, %v9581_v47  ;;  %v3221_v17 = vsel %vm3220_vm9, %v9608_v34, 0  ;;  %v2625_v14 = vsel %vm2617_vm14, %v2604_v57, %v2607_v10 }
 0x2b6   : > { %v2536_v44 = vmul.u32 %v9638_v11, %v2520_v16  ;;  %vm2538_vm13 = vc.u32 %v9673_v61, %v9679_v51  ;;  %v2631_v34 = vsel %vm2619_vm1, %v9532_v32, %v9575_v4  ;;  %v13951_v59 = vor.u32 8388608, %v9585_v15 }
 0x2b7   : > { %v2610_v5 = vor.u32 %v2609_v58, %v2608_v38  ;;  %v2539_v41 = vadd.s32 1, %v9680_v3  ;;  %v9718_v15 = vand.u32 31, %v3221_v17  ;;  %v2601_v24 = vshrl.u32 %v13889_v9, %v9505_v40 }
 0x2b8   : > { %v2633_v7 = vshll.u32 %v13951_v59, 8  ;;  %v3117_v21 = vsel %vm3116_vm3, %v9627_v8, 0  ;;  %v2924_v40 = vshrl.u32 %v13883_v0, %v9621_v35  ;;  %vm2483_vm9 = vcmp.lt.s32.totalorder %v9491_v33, 0 }
 0x2b9   : > { %v2627_v11 = vsel %vm2619_vm1, %v2610_v5, %v9571_v23  ;;  %v2622_v55 = vsel %vm2620_vm2, %v2610_v5, 2102212464  ;;  %v2629_v4 = vsel %vm2617_vm14, %v2607_v10, %v2610_v5  ;;  %13952 = vst [vmem:[#allocation5_spill] sm:$0xff] %v9718_v15  ;;  %v2621_v50 = vsel %vm2617_vm14, %v2601_v24, %v2604_v57 }
 0x2ba   : > { %v2628_v32 = vsel %vm2618_vm0, %v2625_v14, %v2627_v11  ;;  %v2632_v23 = vsel %vm2618_vm0, %v2629_v4, %v2631_v34  ;;  %v2623_v16 = vsel %vm2619_vm1, %v2607_v10, %v2622_v55  ;;  %v9743_v5 = vor.u32 %v9625_v28, %v9612_v22 }
 0x2bb   : > { %v2923_v57 = vshll.u32 %v13882_v54, %v9578_v2  ;;  %v2927_v10 = vshrl.u32 %v13884_v42, %v9621_v35  ;;  %v9749_v14 = vand.u32 31, %v3117_v21  ;;  %v2624_v59 = vsel %vm2618_vm0, %v2621_v50, %v2623_v16 }
 0x2bc   : > { %13953 = vst [vmem:[#allocation16_spill] sm:$0xff] %v9743_v5  ;;  %v3032_v22 = vor.u32 %v9687_v31, %v9616_v56  ;;  %v2926_v28 = vshll.u32 %v13883_v0, %v9578_v2  ;;  %v2640_v4 = vmul.u32 %v2633_v7, %v2624_v59  ;;  %v9778_v31 = vsel %vm3036_vm4, %v9743_v5, 920167782 }
 0x2bd   : > { %13954 = vst [vmem:[#allocation11_spill] sm:$0xff] %v9749_v14  ;;  %13958 = vst [vmem:[#allocation21_spill] sm:$0xff] %v9778_v31  ;;  %vm2932_vm2 = vcmp.lt.s32.totalorder %v9618_v20, 4  ;;  %v3235_v50 = vshll.u32 %v13882_v54, %v9718_v15  ;;  %v9825_v59 = vshll.u32 %v13883_v0, %v9718_v15  ;;  %vm2721_vm11 = vcmp.lt.s32.totalorder %v9562_v29, 1 }
 0x2be   : > { %v2928_v55 = vor.u32 %v2927_v10, %v2926_v28  ;;  %v9787_v24 = vsel %vm3036_vm4, %v3032_v22, 1326507024  ;;  %v3131_v22 = vshll.u32 %v13882_v54, %v9749_v14  ;;  %vm2723_vm12 = vcmp.lt.s32.totalorder %v9562_v29, 3 }
 0x2bf   : > { %13959 = vst [vmem:[#allocation22_spill] sm:$0xff] %v9787_v24  ;;  %v2705_v24 = vshrl.u32 %v13889_v9, %v9529_v62  ;;  %vm2722_vm14 = vcmp.lt.s32.totalorder %v9562_v29, 2  ;;  %vm2587_vm3 = vcmp.lt.s32.totalorder %v9480_v19, 0 }
 0x2cb   : > { %v6673_v49 = vpop.f32.mrb[8].mxu0 }
 0x2cc   : > { %v2384_v36 = vadd.f32 %v6673_v49, %v9470_v13  ;;  %v2378_v30 = vpop.f32.mrb[9].mxu0  ;;  %v2540_v49 = vsel %vm2538_vm13, %v2539_v41, %v9680_v3  ;;  %v9735_v18 = vmul.u32.u64.low %v2633_v7, %v2628_v32  ;;  %v9736_v3 = vmul.u32.u64.high %v2633_v7, %v2628_v32, %v9735_v18 }
 0x2cd   : > { %v9676_v39 = vadd.f32 %v9470_v13, %v2378_v30  ;;  %v2541_v43 = vadd.s32 %v2540_v49, %v2536_v44  ;;  %v9728_v30 = vmul.u32.u64.low %v2633_v7, %v2632_v23  ;;  %v9729_v12 = vmul.u32.u64.high %v2633_v7, %v2632_v23, %v9728_v30 }
 0x2ce   : > { %v2426_v48 = vand.u32 2147483647, %v2384_v36  ;;  %v9752_v44 = vsub.s32 32, %v9718_v15  ;;  %v9766_v41 = vor.u32 %v2924_v40, %v2923_v57  ;;  %v9772_v32 = vsub.s32 32, %v9749_v14 }
 0x2cf   : > { %v2425_v38 = vand.u32 2147483647, %v9676_v39  ;;  %v2542_v8 = vadd.s32 536870912, %v2541_v43  ;;  %vm2642_vm7 = vc.u32 %v9729_v12, %v9735_v18  ;;  %v9789_v23 = vshrl.u32 %v3221_v17, 5 }
 0x2d0   : > { %v2442_v26 = vadd.f32 1.0, %v2426_v48  ;;  %13955 = vst [vmem:[#allocation15_spill] sm:$0xff] %v9752_v44  ;;  %13957 = vst [vmem:[#allocation8_spill] sm:$0xff] %v9772_v32  ;;  %v13723_v30 = vand.u32 2147483647, %v9487_v1  ;;  %v9820_v57 = vshrl.u32 %v13884_v42, %v9772_v32 }
 0x2d1   : > { %v2441_v48 = vadd.f32 1.0, %v2425_v38  ;;  %v9754_v34 = vshrl.u32 %v2542_v8, 30  ;;  %v2643_v38 = vadd.s32 1, %v9736_v3  ;;  %13960 = vst [vmem:[#allocation23_spill] sm:$0xff] %v9789_v23  ;;  %v9802_v40 = vsel %vm2932_vm2, %v9766_v41, 920167782 }
 0x2d2   : > { %v2458_v58 = vmul.f32 30.0, %v2442_v26  ;;  %v9806_v17 = vsel %vm2932_vm2, %v2928_v55, 1326507024  ;;  %v9816_v8 = vshrl.u32 %v3117_v21, 5  ;;  %vm3244_vm5 = vcmp.lt.s32.totalorder %v9789_v23, 4 }
 0x2d3   : > { %v2457_v26 = vmul.f32 30.0, %v2441_v48  ;;  %v2544_v63 = vshll.u32 %v9754_v34, 30  ;;  %v2644_v56 = vsel %vm2642_vm7, %v2643_v38, %v9736_v3  ;;  %v3132_v48 = vshrl.u32 %v13883_v0, %v9772_v32 }
 0x2d4   : > { %v9768_v11 = vmul.f32 %v2458_v58, %v2384_v36  ;;  %v3236_v36 = vshrl.u32 %v13883_v0, %v9752_v44  ;;  %v2645_v7 = vadd.s32 %v2644_v56, %v2640_v4  ;;  %v9810_v58 = vshrl.u32 %v13884_v42, %v9752_v44 }
 0x2d5   : > { %v9783_v49 = vsub.s32 %v2541_v43, %v2544_v63  ;;  %v9796_v3 = vmul.f32 %v2457_v26, %v9676_v39  ;;  %v9831_v38 = vand.u32 8388607, %v13723_v30  ;;  %v9836_v21 = vshll.u32 %v13883_v0, %v9749_v14 }
 0x2d6   : > { %13956 = vst [vmem:[#allocation20_spill] sm:$0xff] %v9768_v11  ;;  %v3420_v16 = vand.u32 2139095040, %v9768_v11  ;;  %v9814_v39 = vor.u32 %v3236_v36, %v3235_v50  ;;  %v2646_v28 = vadd.s32 536870912, %v2645_v7  ;;  %v9841_v4 = vor.u32 %v3132_v48, %v3131_v22 }
 0x2d7   : > { %13961 = vst [vmem:[#allocation24_spill] sm:$0xff] %v9796_v3  ;;  %v2547_v43 = vsub.s32 0, %v9783_v49  ;;  %v3316_v63 = vand.u32 2139095040, %v9796_v3  ;;  %v2707_v36 = vshrl.u32 %v13880_v37, %v9529_v62  ;;  %v2713_v48 = vshrl.u32 %v13882_v54, %v9529_v62 }
 0x2d8   : > { %13962 = vst [vmem:[#allocation25_spill] sm:$0xff] %v9814_v39  ;;  %v3421_v26 = vshrl.u32 %v3420_v16, 23  ;;  %13963 = vst [vmem:[#allocation26_spill] sm:$0xff] %v9841_v4  ;;  %v9849_v50 = vsel %vm3244_vm5, %v9814_v39, 920167782  ;;  %v9857_v30 = vshrl.u32 %v2646_v28, 30  ;;  %v2706_v55 = vshll.u32 %v13889_v9, %v9509_v60 }
 0x2d9   : > { %v6379_v10 = vmin.u32 %v2547_v43, %v9783_v49  ;;  %13964 = vst [vmem:[#allocation27_spill] sm:$0xff] %v9849_v50  ;;  %v2710_v43 = vshrl.u32 %v13881_v46, %v9529_v62  ;;  %v3317_v3 = vshrl.u32 %v3316_v63, 23  ;;  %v13965_v50 = vand.u32 2147483647, %v9491_v33  ;;  %v6447_v62 = vld [vmem:[%s13662_s3 + $0xa8] sm:$0xff]  ;;  %v6457_v16 = vld [vmem:[%s13662_s3 + $0xf8] sm:$0xff] }
 0x2da   : > { %v6414_v11 = vadd.s32 4294967169, %v3421_v26  ;;  %v2709_v39 = vshll.u32 %v13880_v37, %v9509_v60  ;;  %v2712_v28 = vshll.u32 %v13881_v46, %v9509_v60  ;;  %v2708_v26 = vor.u32 %v2707_v36, %v2706_v55  ;;  %v6449_v36 = vld [vmem:[%s13662_s3 + $0xb8] sm:$0xff] }
 0x2db   : > { %v2549_v56 = vclz %v6379_v10  ;;  %v2697_v10 = vor.u32 8388608, %v9831_v38  ;;  %vm9864_vm6 = vcmp.le.f32.partialorder %v13965_v50, 0.7853982  ;;  %v2537_v38 = vadd.s32 %v9679_v51, %v9673_v61 }
 0x2dc   : > { %v2567_v15 = vsub.s32 4, %v9754_v34  ;;  %v2711_v50 = vor.u32 %v2710_v43, %v2709_v39  ;;  %v2714_v44 = vor.u32 %v2713_v48, %v2712_v28  ;;  %v3427_v60 = vadd.s32 1, %v6414_v11  ;;  %v6451_v28 = vld [vmem:[%s13662_s3 + $0xc8] sm:$0xff] }
 0x2dd   : > { %v6380_v22 = vadd.s32 4294967294, %v2549_v56  ;;  %v2648_v56 = vshll.u32 %v9857_v30, 30  ;;  %v6410_v31 = vadd.s32 4294967169, %v3317_v3  ;;  %v6448_v3 = vld [vmem:[%s13662_s3 + $0xb0] sm:$0xff]  ;;  %vm3140_vm13 = vcmp.lt.s32.totalorder %v9816_v8, 4 }
 0x2de   : > { %v2568_v11 = vsel %vm2483_vm9, %v2567_v15, %v9754_v34  ;;  %vm3428_vm1 = vcmp.gt.s32.totalorder %v3427_v60, 0 }
 0x2df   : > { %vm6381_vm15 = vcmp.lt.s32.totalorder %v6380_v22, 0  ;;  %v9876_v5 = vsub.s32 %v2645_v7, %v2648_v56  ;;  %v6446_v7 = vld [vmem:[%s13662_s3 + $0xa0] sm:$0xff]  ;;  %v9906_v48 = vadd.s32 1, %v6410_v31  ;;  %v2735_v31 = vsel %vm2723_vm12, %v9566_v53, %v9604_v6 }
 0x2e0   : > { %v2552_v63 = vsel %vm6381_vm15, 0, %v6380_v22  ;;  %v6839_v22 = vpack.c.bf16 %v6449_v36, %v6448_v3 }
 0x2e1   : > { %v2553_v14 = vsub.s32 32, %v2552_v63  ;;  %v2557_v32 = vsub.s32 4294967266, %v2552_v63  ;;  %v2554_v61 = vshll.u32 %v9783_v49, %v2552_v63  ;;  %v2651_v39 = vsub.s32 0, %v9876_v5 }
 0x2e2   : > { %v6835_v49 = vpack.c.bf16 %v6447_v62, %v6446_v7  ;;  %v2570_v63 = vsel %vm9864_vm6, 0, %v2568_v11  ;;  %v2737_v7 = vshll.u32 %v2697_v10, 8  ;;  %v2671_v10 = vsub.s32 4, %v9857_v30 }
 0x2e3   : > { %v2555_v51 = vshrl.u32 %v2537_v38, %v2553_v14  ;;  %v2558_v55 = vadd.s32 127, %v2557_v32  ;;  %v2729_v14 = vsel %vm2721_vm11, %v2708_v26, %v2711_v50  ;;  %v2731_v32 = vsel %vm2723_vm12, %v2714_v44, %v9600_v27  ;;  %v6450_v27 = vld [vmem:[%s13662_s3 + $0xc0] sm:$0xff] }
 0x2e4   : > { %v6383_v34 = vmin.u32 %v2651_v39, %v9876_v5  ;;  %v2733_v38 = vsel %vm2721_vm11, %v2711_v50, %v2714_v44  ;;  %6836 = vmatprep.subr.bf16.mxu1 %v6835_v49  ;;  %v2732_v39 = vsel %vm2722_vm14, %v2729_v14, %v2731_v32  ;;  %v6843_v53 = vpack.c.bf16 %v6451_v28, %v6450_v27 }
 0x2e5   : > { %v2556_v43 = vor.u32 %v2555_v51, %v2554_v61  ;;  %v2559_v15 = vshll.u32 %v2558_v55, 23  ;;  %v2725_v61 = vsel %vm2721_vm11, %v2705_v24, %v2708_v26  ;;  %6838 = vmatpush3.bf16.msra.mxu1 %v6835_v49  ;;  %v2726_v55 = vsel %vm2724_vm10, %v2714_v44, 2102212464  ;;  %v6452_v24 = vld [vmem:[%s13662_s3 + $0xd0] sm:$0xff]  ;;  %v6453_v44 = vld [vmem:[%s13662_s3 + $0xd8] sm:$0xff] }
 0x2e6   : > { %v2653_v51 = vclz %v6383_v34  ;;  %6840 = vmatprep.subr.bf16.mxu1 %v6839_v22  ;;  %v2736_v3 = vsel %vm2722_vm14, %v2733_v38, %v2735_v31  ;;  %v13968_v49 = vand.u32 2147483647, %v9480_v19  ;;  %v3429_v27 = vsel %vm3428_vm1, %v3427_v60, 0  ;;  %v6455_v60 = vld [vmem:[%s13662_s3 + $0xe8] sm:$0xff] }
 0x2e7   : > { %v2560_v56 = vor.u32 4788187, %v2559_v15  ;;  %v2563_v62 = vcvt.s32.f32 %v2556_v43  ;;  %v9939_v11 = vmul.u32.u64.low %v2737_v7, %v2736_v3  ;;  %v9940_v14 = vmul.u32.u64.high %v2737_v7, %v2736_v3, %v9939_v11 }
 0x2e8   : > { %v6384_v26 = vadd.s32 4294967294, %v2653_v51  ;;  %vm9944_vm10 = vcmp.le.f32.partialorder %v13968_v49, 0.7853982  ;;  %v2727_v43 = vsel %vm2723_vm12, %v2711_v50, %v2726_v55  ;;  %v2641_v28 = vadd.s32 %v9735_v18, %v9729_v12  ;;  %v6454_v55 = vld [vmem:[%s13662_s3 + $0xe0] sm:$0xff] }
 0x2e9   : > { %v2561_v6 = vand.u32 2147483647, %v2560_v56  ;;  %v9950_v15 = vmul.u32.u64.low %v2737_v7, %v2732_v39  ;;  %v9951_v34 = vmul.u32.u64.high %v2737_v7, %v2732_v39, %v9950_v15  ;;  %6842 = vmatpush3.bf16.msra.mxu1 %v6839_v22  ;;  %v13738_v38 = vand.u32 2147483647, %v9485_v25 }
 0x2ea   : > { %vm6385_vm0 = vcmp.lt.s32.totalorder %v6384_v26, 0  ;;  %vm3324_vm7 = vcmp.gt.s32.totalorder %v9906_v48, 0  ;;  %6844 = vmatprep.subr.bf16.mxu1 %v6843_v53  ;;  %v6847_v31 = vpack.c.bf16 %v6453_v44, %v6452_v24  ;;  %v2574_v22 = vadd.s32 3, %v2570_v63 }
 0x2eb   : > { %v2564_v32 = vmul.f32 %v2563_v62, %v2561_v6  ;;  %v2656_v51 = vsel %vm6385_vm0, 0, %v6384_v26  ;;  %v2728_v39 = vsel %vm2722_vm14, %v2725_v61, %v2727_v43  ;;  %v2672_v3 = vsel %vm2587_vm3, %v2671_v10, %v9857_v30 }
 0x2ec   : > { %v2657_v12 = vsub.s32 32, %v2656_v51  ;;  %v2661_v18 = vsub.s32 4294967266, %v2656_v51  ;;  %vm2746_vm15 = vc.u32 %v9940_v14, %v9950_v15  ;;  %v2747_v24 = vadd.s32 1, %v9951_v34 }
 0x2ed   : > { %v2565_v56 = vxor.u32 2147483648, %v2564_v32  ;;  %6846 = vmatpush3.bf16.msra.mxu1 %v6843_v53  ;;  %v2658_v29 = vshll.u32 %v9876_v5, %v2656_v51  ;;  %v6851_v26 = vpack.c.bf16 %v6455_v60, %v6454_v55  ;;  %v2744_v11 = vmul.u32 %v2737_v7, %v2728_v39  ;;  %v6456_v53 = vld [vmem:[%s13662_s3 + $0xf0] sm:$0xff] }
 0x2ee   : > { %v2659_v61 = vshrl.u32 %v2641_v28, %v2657_v12  ;;  %v2662_v44 = vadd.s32 127, %v2661_v18  ;;  %6848 = vmatprep.subr.bf16.mxu1 %v6847_v31  ;;  %v2748_v30 = vsel %vm2746_vm15, %v2747_v24, %v9951_v34  ;;  %v13971_v49 = vor.u32 %v9810_v58, %v9825_v59 }
 0x2ef   : > { %v2566_v62 = vsel %vm2483_vm9, %v2565_v56, %v2564_v32  ;;  %v9999_v43 = vsel %vm3140_vm13, %v9841_v4, 920167782  ;;  %v13974_v34 = vor.u32 %v9820_v57, %v9836_v21  ;;  %v2749_v56 = vadd.s32 %v2748_v30, %v2744_v11 }
 0x2f0   : > { %v2569_v63 = vsel %vm9864_vm6, %v9491_v33, %v2566_v62  ;;  %v2660_v5 = vor.u32 %v2659_v61, %v2658_v29  ;;  %v2663_v32 = vshll.u32 %v2662_v44, 23  ;;  %v9994_v7 = vsel %vm3244_vm5, %v13971_v49, 1326507024  ;;  %13973 = vst [vmem:[#allocation29_spill] sm:$0xff] %v9999_v43 }
 0x2f1   : > { %7230 = vcosq.f32 %v2569_v63  ;;  %13972 = vst [vmem:[#allocation28_spill] sm:$0xff] %v9994_v7  ;;  %v10006_v28 = vsel %vm3140_vm13, %v13974_v34, 1326507024  ;;  %6850 = vmatpush3.bf16.msra.mxu1 %v6847_v31  ;;  %v2674_v59 = vsel %vm9944_vm10, 0, %v2672_v3  ;;  %v10017_v55 = vand.u32 31, %v3429_v27  ;;  %v13976_v3 = vld [vmem:[#allocation14_spill] sm:$0xff] }
 0x2f2   : > { %7232 = vsinq.f32 %v2569_v63  ;;  %v2664_v58 = vor.u32 4788187, %v2663_v32  ;;  %v3325_v57 = vsel %vm3324_vm7, %v9906_v48, 0  ;;  %6852 = vmatprep.subr.bf16.mxu1 %v6851_v26  ;;  %v6855_v21 = vpack.c.bf16 %v6457_v16, %v6456_v53  ;;  %v13979_v32 = vld [vmem:[#allocation18_spill] sm:$0xff] }
 0x2f3   : > { %13975 = vst [vmem:[#allocation30_spill] sm:$0xff] %v10017_v55  ;;  %v2750_v60 = vadd.s32 536870912, %v2749_v56  ;;  %v2575_v31 = vand.u32 3, %v2574_v22  ;;  %v2667_v18 = vcvt.s32.f32 %v2660_v5  ;;  %v2678_v39 = vadd.s32 3, %v2674_v59 }
 0x2f4   : > { %v2665_v12 = vand.u32 2147483647, %v2664_v58  ;;  %v10027_v63 = vshrl.u32 %v3429_v27, 5  ;;  %v10029_v29 = vshrl.u32 %v3325_v57, 5  ;;  %vm2573_vm9 = vweird.f32 %v9491_v33 }
 0x2f5   : > { %6854 = vmatpush3.bf16.msra.mxu1 %v6851_v26  ;;  %v10034_v22 = vsub.s32 32, %v10017_v55  ;;  %v10038_v44 = vshll.u32 %v13882_v54, %v10017_v55  ;;  %v10040_v11 = vand.u32 31, %v3325_v57  ;;  %vm2576_vm6 = vcmp.lt.s32.totalorder %v2575_v31, 2 }
 0x2f6   : > { %v2668_v61 = vmul.f32 %v2667_v18, %v2665_v12  ;;  %6856 = vmatprep.subr.bf16.mxu1 %v6855_v21  ;;  %vm2577_vm11 = vcmp.eq.s32.totalorder %v2575_v31, 0  ;;  %vm2580_vm12 = vcmp.eq.s32.totalorder %v2575_v31, 2  ;;  %v10043_v16 = vand.u32 3, %v2678_v39 }
 0x2f7   : > { %13977 = vst [vmem:[#allocation14_spill] sm:$0xff] %v10034_v22  ;;  %13978 = vst [vmem:[#allocation31_spill] sm:$0xff] %v10040_v11  ;;  %v2811_v49 = vshrl.u32 %v13880_v37, %v13979_v32  ;;  %v2814_v18 = vshrl.u32 %v13881_v46, %v13979_v32  ;;  %v10094_v33 = vshll.u32 %v13883_v0, %v10040_v11  ;;  %vm2691_vm14 = vcmp.lt.s32.totalorder %v9487_v1, 0 }
 0x2f8   : > { %v6676_v50 = vpop.f32.mrb[10].mxu0  ;;  %v2669_v53 = vxor.u32 2147483648, %v2668_v61  ;;  %vm2677_vm1 = vweird.f32 %v9480_v19 }
 0x2f9   : > { %v2388_v6 = vpop.f32.mrb[11].mxu0  ;;  %v9981_v10 = vadd.f32 %v6676_v50, %v9470_v13  ;;  %v10015_v50 = vand.u32 8388607, %v13738_v38  ;;  %6858 = vmatpush3.bf16.msra.mxu1 %v6855_v21  ;;  %v13980_v21 = vld [vmem:[#allocation10_spill] sm:$0xff] }
 0x2fa   : > { %v10009_v51 = vadd.f32 %v9470_v13, %v2388_v6  ;;  %v10023_v6 = vshrl.u32 %v2750_v60, 30  ;;  %v2670_v57 = vsel %vm2587_vm3, %v2669_v53, %v2668_v61  ;;  %v2817_v60 = vshrl.u32 %v13882_v54, %v13979_v32 }
 0x2fb   : > { %v2428_v13 = vand.u32 2147483647, %v9981_v10  ;;  %v7231_v26 = vpop.eup %7230  ;;  %v2673_v12 = vsel %vm9944_vm10, %v9480_v19, %v2670_v57  ;;  %v2810_v36 = vshll.u32 %v13889_v9, %v13980_v21  ;;  %v2813_v38 = vshll.u32 %v13880_v37, %v13980_v21 }
 0x2fc   : > { %v2427_v48 = vand.u32 2147483647, %v10009_v51  ;;  %v2752_v27 = vshll.u32 %v10023_v6, 30  ;;  %v7233_v34 = vpop.eup %7232  ;;  %v2581_v59 = vxor.u32 2147483648, %v7231_v26  ;;  %7234 = vcosq.f32 %v2673_v12 }
 0x2fd   : > { %v2444_v30 = vadd.f32 1.0, %v2428_v13  ;;  %v2578_v13 = vxor.u32 2147483648, %v7233_v34  ;;  %7236 = vsinq.f32 %v2673_v12  ;;  %v2815_v12 = vor.u32 %v2814_v18, %v2813_v38 }
 0x2fe   : > { %v10045_v5 = vsub.s32 %v2749_v56, %v2752_v27  ;;  %v2443_v58 = vadd.f32 1.0, %v2427_v48  ;;  %v2582_v48 = vsel %vm2580_vm12, %v2581_v59, %v7233_v34  ;;  %v2816_v27 = vshll.u32 %v13881_v46, %v13980_v21 }
 0x2ff   : > { %v2460_v39 = vmul.f32 30.0, %v2444_v30  ;;  %v2579_v61 = vsel %vm2577_vm11, %v7231_v26, %v2578_v13  ;;  %v10070_v34 = vshll.u32 %v13883_v0, %v10017_v55  ;;  %v10073_v59 = vsub.s32 32, %v10040_v11 }
 0x300   : > { %v2755_v56 = vsub.s32 0, %v10045_v5  ;;  %v2459_v57 = vmul.f32 30.0, %v2443_v58  ;;  %v2583_v24 = vsel %vm2576_vm6, %v2579_v61, %v2582_v48  ;;  %v2818_v30 = vor.u32 %v2817_v60, %v2816_v27 }
 0x301   : > { %v2584_v26 = vsel %vm2573_vm9, nan, %v2583_v24  ;;  %v10079_v58 = vshll.u32 %v13882_v54, %v10040_v11  ;;  %v10082_v31 = vmul.f32 %v2460_v39, %v9981_v10  ;;  %v2812_v60 = vor.u32 %v2811_v49, %v2810_v36  ;;  %v13983_v49 = vld [vmem:[#allocation12_spill] sm:$0xff] }
 0x302   : > { %v6387_v53 = vmin.u32 %v2755_v56, %v10045_v5  ;;  %6715 = vmatprep.mubr.f32.mxu1 %v2584_v26  ;;  %v10086_v56 = vshrl.u32 %v13883_v0, %v10034_v22  ;;  %v10090_v48 = vshrl.u32 %v13884_v42, %v10034_v22  ;;  %v10098_v10 = vmul.f32 %v2459_v57, %v10009_v51 }
 0x303   : > { %13981 = vst [vmem:[#allocation18_spill] sm:$0xff] %v10082_v31  ;;  %vm2680_vm3 = vcmp.lt.s32.totalorder %v10043_v16, 2  ;;  %v2809_v38 = vshrl.u32 %v13889_v9, %v13979_v32  ;;  %v2830_v18 = vsel %vm2828_vm8, %v2818_v30, 2102212464  ;;  %vm2681_vm10 = vcmp.eq.s32.totalorder %v10043_v16, 0 }
 0x304   : > { %v2757_v13 = vclz %v6387_v53  ;;  %13982 = vst [vmem:[#allocation10_spill] sm:$0xff] %v10098_v10  ;;  %v2801_v39 = vor.u32 8388608, %v10015_v50  ;;  %vm2825_vm0 = vcmp.lt.s32.totalorder %v13983_v49, 1  ;;  %vm2827_vm7 = vcmp.lt.s32.totalorder %v13983_v49, 3  ;;  %v13987_v53 = vld [vmem:[#allocation19_spill] sm:$0xff]  ;;  %v13988_v50 = vld [vmem:[#allocation9_spill] sm:$0xff] }
 0x305   : > { %v3628_v51 = vand.u32 2139095040, %v10082_v31  ;;  %v13984_v21 = vand.u32 2147483647, %v9487_v1  ;;  %v2829_v32 = vsel %vm2825_vm0, %v2809_v38, %v2812_v60  ;;  %v2833_v61 = vsel %vm2825_vm0, %v2812_v60, %v2815_v12 }
 0x306   : > { %v6388_v24 = vadd.s32 4294967294, %v2757_v13  ;;  %v2835_v36 = vsel %vm2827_vm7, %v2818_v30, %v13987_v53  ;;  %v2831_v57 = vsel %vm2827_vm7, %v2815_v12, %v2830_v18  ;;  %v2837_v26 = vsel %vm2825_vm0, %v2815_v12, %v2818_v30  ;;  %v13989_v13 = vld [vmem:[#allocation7_spill] sm:$0xff]  ;;  %v7235_v55 = vpop.eup %7234 }
 0x307   : > { %vm10113_vm15 = vcmp.le.f32.partialorder %v13984_v21, 0.7853982  ;;  %v2839_v62 = vsel %vm2827_vm7, %v13989_v13, %v13988_v50  ;;  %v3524_v22 = vand.u32 2139095040, %v10098_v10  ;;  %vm2684_vm9 = vcmp.eq.s32.totalorder %v10043_v16, 2  ;;  %v7237_v11 = vpop.eup %7236 }
 0x308   : > { %vm6389_vm8 = vcmp.lt.s32.totalorder %v6388_v24, 0  ;;  %v2775_v21 = vsub.s32 4, %v10023_v6  ;;  %v2685_v7 = vxor.u32 2147483648, %v7235_v55  ;;  %v2745_v60 = vadd.s32 %v9950_v15, %v9940_v14 }
 0x309   : > { %v2760_v31 = vsel %vm6389_vm8, 0, %v6388_v24  ;;  %vm2826_vm6 = vcmp.lt.s32.totalorder %v13983_v49, 2  ;;  %v2682_v30 = vxor.u32 2147483648, %v7237_v11  ;;  %v3629_v50 = vshrl.u32 %v3628_v51, 23 }
 0x30a   : > { %v2761_v38 = vsub.s32 32, %v2760_v31  ;;  %v2832_v12 = vsel %vm2826_vm6, %v2829_v32, %v2831_v57  ;;  %v2836_v18 = vsel %vm2826_vm6, %v2833_v61, %v2835_v36  ;;  %v2840_v53 = vsel %vm2826_vm6, %v2837_v26, %v2839_v62 }
 0x30b   : > { %v2686_v13 = vsel %vm2684_vm9, %v2685_v7, %v7237_v11  ;;  %v2841_v23 = vshll.u32 %v2801_v39, 8  ;;  %v3525_v43 = vshrl.u32 %v3524_v22, 23  ;;  %v2683_v24 = vsel %vm2681_vm10, %v7235_v55, %v2682_v30 }
 0x30c   : > { %v2763_v10 = vshrl.u32 %v2745_v60, %v2761_v38  ;;  %v2765_v4 = vsub.s32 4294967266, %v2760_v31  ;;  %v10131_v14 = vsel %vm2691_vm14, %v2775_v21, %v10023_v6  ;;  %v2687_v15 = vsel %vm2680_vm3, %v2683_v24, %v2686_v13 }
 0x30d   : > { %v2762_v49 = vshll.u32 %v10045_v5, %v2760_v31  ;;  %v10136_v62 = vmul.u32.u64.low %v2841_v23, %v2840_v53  ;;  %v10137_v51 = vmul.u32.u64.high %v2841_v23, %v2840_v53, %v10136_v62  ;;  %v2688_v7 = vsel %vm2677_vm1, nan, %v2687_v15 }
 0x30e   : > { %v2766_v22 = vadd.s32 127, %v2765_v4  ;;  %v10141_v11 = vmul.u32.u64.low %v2841_v23, %v2836_v18  ;;  %v10142_v55 = vmul.u32.u64.high %v2841_v23, %v2836_v18, %v10141_v11  ;;  %6716 = vmatmul.mubr.f32.vlgmr.msra.gmra.mrb[0].mxu1 %v2688_v7  ;;  %v2778_v6 = vsel %vm10113_vm15, 0, %v10131_v14 }
 0x30f   : > { %v2764_v39 = vor.u32 %v2763_v10, %v2762_v49  ;;  %v13990_v16 = vand.u32 2147483647, %v9499_v52  ;;  %v2914_v31 = vshll.u32 %v13889_v9, %v9578_v2  ;;  %v2915_v19 = vshrl.u32 %v13880_v37, %v9621_v35 }
 0x310   : > { %v2767_v32 = vshll.u32 %v2766_v22, 23  ;;  %v2917_v4 = vshll.u32 %v13880_v37, %v9578_v2  ;;  %v2918_v10 = vshrl.u32 %v13881_v46, %v9621_v35  ;;  %v6422_v61 = vadd.s32 4294967169, %v3629_v50 }
 0x311   : > { %v2904_v5 = vand.u32 8388607, %v13990_v16  ;;  %v6418_v36 = vadd.s32 4294967169, %v3525_v43  ;;  %vm2850_vm11 = vc.u32 %v10137_v51, %v10141_v11  ;;  %v2851_v21 = vadd.s32 1, %v10142_v55 }
 0x312   : > { %v2768_v26 = vor.u32 4788187, %v2767_v32  ;;  %v2916_v60 = vor.u32 %v2915_v19, %v2914_v31  ;;  %v2919_v38 = vor.u32 %v2918_v10, %v2917_v4  ;;  %v2771_v30 = vcvt.s32.f32 %v2764_v39 }
 0x313   : > { %v2905_v57 = vor.u32 8388608, %v2904_v5  ;;  %v2848_v18 = vmul.u32 %v2841_v23, %v2832_v12  ;;  %v2920_v53 = vshll.u32 %v13881_v46, %v9578_v2  ;;  %v2921_v13 = vshrl.u32 %v13882_v54, %v9621_v35 }
 0x314   : > { %v2769_v24 = vand.u32 2147483647, %v2768_v26  ;;  %v2852_v43 = vsel %vm2850_vm11, %v2851_v21, %v10142_v55  ;;  %vm2929_vm12 = vcmp.lt.s32.totalorder %v9618_v20, 1  ;;  %vm2931_vm3 = vcmp.lt.s32.totalorder %v9618_v20, 3 }
 0x315   : > { %v2853_v50 = vadd.s32 %v2852_v43, %v2848_v18  ;;  %v2922_v14 = vor.u32 %v2921_v13, %v2920_v53  ;;  %v2937_v15 = vsel %vm2929_vm12, %v2916_v60, %v2919_v38  ;;  %v2943_v2 = vsel %vm2931_vm3, %v9766_v41, %v9806_v17  ;;  %v10214_v53 = vld [vmem:[%s13663_s4] ss:$0 sm:$0xff] }
 0x316   : > { %v2772_v23 = vmul.f32 %v2771_v30, %v2769_v24  ;;  %v2913_v12 = vshrl.u32 %v13889_v9, %v9621_v35  ;;  %vm2930_vm1 = vcmp.lt.s32.totalorder %v9618_v20, 2  ;;  %v2945_v49 = vshll.u32 %v2905_v57, 8 }
 0x317   : > { %v2854_v62 = vadd.s32 536870912, %v2853_v50  ;;  %v2934_v7 = vsel %vm2932_vm2, %v2922_v14, 2102212464  ;;  %v2939_v22 = vsel %vm2931_vm3, %v2922_v14, %v9802_v40  ;;  %v2941_v55 = vsel %vm2929_vm12, %v2919_v38, %v2922_v14 }
 0x318   : > { %v3635_v39 = vadd.s32 1, %v6422_v61  ;;  %v2773_v41 = vxor.u32 2147483648, %v2772_v23  ;;  %v2940_v17 = vsel %vm2930_vm1, %v2937_v15, %v2939_v22  ;;  %v2944_v35 = vsel %vm2930_vm1, %v2941_v55, %v2943_v2 }
 0x319   : > { %v10188_v16 = vshrl.u32 %v2854_v62, 30  ;;  %v2933_v5 = vsel %vm2929_vm12, %v2913_v12, %v2916_v60  ;;  %v10192_v31 = vmul.u32.u64.low %v2945_v49, %v2944_v35  ;;  %v10193_v32 = vmul.u32.u64.high %v2945_v49, %v2944_v35, %v10192_v31 }
 0x31a   : > { %v2774_v40 = vsel %vm2691_vm14, %v2773_v41, %v2772_v23  ;;  %v2935_v19 = vsel %vm2931_vm3, %v2919_v38, %v2934_v7  ;;  %v10199_v4 = vmul.u32.u64.low %v2945_v49, %v2940_v17  ;;  %v10200_v10 = vmul.u32.u64.high %v2945_v49, %v2940_v17, %v10199_v4 }
 0x31b   : > { %v3340_v61 = vshrl.u32 %v13883_v0, %v10073_v59  ;;  %v3343_v57 = vshrl.u32 %v13884_v42, %v10073_v59  ;;  %v2777_v21 = vsel %vm10113_vm15, %v9487_v1, %v2774_v40  ;;  %v2856_v60 = vshll.u32 %v10188_v16, 30 }
 0x31c   : > { %vm3636_vm2 = vcmp.gt.s32.totalorder %v3635_v39, 0  ;;  %v3531_v30 = vadd.s32 1, %v6418_v36  ;;  %7238 = vcosq.f32 %v2777_v21  ;;  %v2782_v18 = vadd.s32 3, %v2778_v6 }
 0x31d   : > { %7240 = vsinq.f32 %v2777_v21  ;;  %v10219_v24 = vsub.s32 %v2853_v50, %v2856_v60  ;;  %v2936_v27 = vsel %vm2930_vm1, %v2933_v5, %v2935_v19  ;;  %v10225_v36 = vor.u32 %v10086_v56, %v10038_v44 }
 0x31e   : > { %v3448_v6 = vor.u32 %v10090_v48, %v10070_v34  ;;  %vm3452_vm14 = vcmp.lt.s32.totalorder %v10027_v63, 4  ;;  %vm2954_vm10 = vc.u32 %v10193_v32, %v10199_v4  ;;  %v10233_v43 = vor.u32 %v3340_v61, %v10079_v58  ;;  %v14007_v61 = vld [vmem:[#allocation22_spill] sm:$0xff] }
 0x31f   : > { %v3344_v50 = vor.u32 %v3343_v57, %v10094_v33  ;;  %v2859_v20 = vsub.s32 0, %v10219_v24  ;;  %v2955_v14 = vadd.s32 1, %v10200_v10  ;;  %v3637_v44 = vsel %vm3636_vm2, %v3635_v39, 0 }
 0x320   : > { %vm3532_vm0 = vcmp.gt.s32.totalorder %v3531_v30, 0  ;;  %v2783_v56 = vand.u32 3, %v2782_v18  ;;  %v2952_v15 = vmul.u32 %v2945_v49, %v2936_v27  ;;  %v10248_v33 = vsel %vm3452_vm14, %v10225_v36, 920167782 }
 0x321   : > { %v6391_v2 = vmin.u32 %v2859_v20, %v10219_v24  ;;  %v2956_v58 = vsel %vm2954_vm10, %v2955_v14, %v10200_v10  ;;  %v10252_v23 = vsel %vm3452_vm14, %v3448_v6, 1326507024  ;;  %vm3348_vm7 = vcmp.lt.s32.totalorder %v10029_v29, 4 }
 0x322   : > { %vm2795_vm15 = vcmp.lt.s32.totalorder %v9485_v25, 0  ;;  %v2957_v12 = vadd.s32 %v2956_v58, %v2952_v15  ;;  %v10259_v49 = vsel %vm3348_vm7, %v10233_v43, 920167782  ;;  %v10261_v62 = vand.u32 31, %v3637_v44 }
 0x323   : > { %v3533_v7 = vsel %vm3532_vm0, %v3531_v30, 0  ;;  %vm2781_vm8 = vweird.f32 %v9487_v1  ;;  %v2861_v22 = vclz %v6391_v2  ;;  %v10266_v55 = vsel %vm3348_vm7, %v3344_v50, 1326507024 }
 0x324   : > { %13991 = vst [vmem:[#allocation12_spill] sm:$0xff] %v10261_v62  ;;  %vm2784_vm9 = vcmp.lt.s32.totalorder %v2783_v56, 2  ;;  %vm2785_vm6 = vcmp.eq.s32.totalorder %v2783_v56, 0  ;;  %v2958_v39 = vadd.s32 536870912, %v2957_v12  ;;  %v10268_v41 = vshrl.u32 %v3637_v44, 5 }
 0x325   : > { %v6392_v5 = vadd.s32 4294967294, %v2861_v22  ;;  %v10271_v40 = vshrl.u32 %v3533_v7, 5  ;;  %v10273_v19 = vand.u32 31, %v3533_v7  ;;  %vm2788_vm11 = vcmp.eq.s32.totalorder %v2783_v56, 2 }
 0x326   : > { %v6679_v26 = vpop.f32.mrb[12].mxu0  ;;  %v7239_v31 = vpop.eup %7238  ;;  %v13993_v10 = vand.u32 2147483647, %v9485_v25  ;;  %v10281_v57 = vshrl.u32 %v2958_v39, 30  ;;  %v10284_v21 = vsub.s32 32, %v10261_v62  ;;  %v2879_v30 = vsub.s32 4, %v10188_v16 }
 0x327   : > { %v2398_v38 = vpop.f32.mrb[13].mxu0  ;;  %v10217_v13 = vadd.f32 %v10214_v53, %v6679_v26  ;;  %13992 = vst [vmem:[#allocation19_spill] sm:$0xff] %v10273_v19  ;;  %v7241_v26 = vpop.eup %7240  ;;  %v2789_v60 = vxor.u32 2147483648, %v7239_v31  ;;  %vm6393_vm3 = vcmp.lt.s32.totalorder %v6392_v5, 0  ;;  %v10297_v7 = vshll.u32 %v13883_v0, %v10261_v62 }
 0x328   : > { %v10241_v48 = vadd.f32 %v10214_v53, %v2398_v38  ;;  %vm10277_vm12 = vcmp.le.f32.partialorder %v13993_v10, 0.7853982  ;;  %13996 = vst [vmem:[#allocation9_spill] sm:$0xff] %v10284_v21  ;;  %v3651_v38 = vshll.u32 %v13882_v54, %v10261_v62  ;;  %v2786_v18 = vxor.u32 2147483648, %v7241_v26 }
 0x329   : > { %v2430_v34 = vand.u32 2147483647, %v10217_v13  ;;  %v2864_v27 = vsel %vm6393_vm3, 0, %v6392_v5  ;;  %v2960_v6 = vshll.u32 %v10281_v57, 30  ;;  %v2790_v14 = vsel %vm2788_vm11, %v2789_v60, %v7241_v26 }
 0x32a   : > { %v2429_v35 = vand.u32 2147483647, %v10241_v48  ;;  %v2865_v44 = vsub.s32 32, %v2864_v27  ;;  %v2787_v15 = vsel %vm2785_vm6, %v7239_v31, %v2786_v18  ;;  %v2869_v2 = vsub.s32 4294967266, %v2864_v27 }
 0x32b   : > { %v2446_v17 = vadd.f32 1.0, %v2430_v34  ;;  %v2849_v34 = vadd.s32 %v10141_v11, %v10137_v51  ;;  %v10293_v58 = vsub.s32 %v2957_v12, %v2960_v6  ;;  %v10300_v22 = vsub.s32 32, %v10273_v19 }
 0x32c   : > { %v2445_v20 = vadd.f32 1.0, %v2429_v35  ;;  %v2791_v39 = vsel %vm2784_vm9, %v2787_v15, %v2790_v14  ;;  %v2870_v11 = vadd.s32 127, %v2869_v2  ;;  %v3652_v5 = vshrl.u32 %v13883_v0, %v10284_v21  ;;  %v14001_v2 = vld [vmem:[#allocation17_spill] sm:$0xff] }
 0x32d   : > { %v2462_v50 = vmul.f32 30.0, %v2446_v17  ;;  %13997 = vst [vmem:[#allocation7_spill] sm:$0xff] %v10300_v22  ;;  %v2880_v17 = vsel %vm2795_vm15, %v2879_v30, %v10188_v16  ;;  %v2792_v35 = vsel %vm2781_vm8, nan, %v2791_v39  ;;  %v2867_v51 = vshrl.u32 %v2849_v34, %v2865_v44 }
 0x32e   : > { %v2963_v12 = vsub.s32 0, %v10293_v58  ;;  %v10313_v31 = vshll.u32 %v13882_v54, %v10273_v19  ;;  %v2461_v10 = vmul.f32 30.0, %v2445_v20  ;;  %6718 = vmatprep.mubr.f32.mxu1 %v2792_v35  ;;  %v10320_v1 = vshrl.u32 %v13884_v42, %v10284_v21 }
 0x32f   : > { %v10316_v56 = vmul.f32 %v2462_v50, %v10217_v13  ;;  %v2866_v16 = vshll.u32 %v10219_v24, %v2864_v27  ;;  %v2871_v26 = vshll.u32 %v2870_v11, 23  ;;  %v10326_v30 = vshll.u32 %v13883_v0, %v10273_v19 }
 0x330   : > { %v6395_v60 = vmin.u32 %v2963_v12, %v10293_v58  ;;  %v2882_v18 = vsel %vm10277_vm12, 0, %v2880_v17  ;;  %v13999_v13 = vand.u32 2147483647, %v13976_v3  ;;  %v3019_v50 = vshrl.u32 %v13880_v37, %v9581_v47 }
 0x331   : > { %13998 = vst [vmem:[#allocation32_spill] sm:$0xff] %v10316_v56  ;;  %v10336_v20 = vshrl.u32 %v13883_v0, %v10300_v22  ;;  %v10340_v24 = vshrl.u32 %v13884_v42, %v10300_v22  ;;  %v2868_v27 = vor.u32 %v2867_v51, %v2866_v16  ;;  %v2872_v14 = vor.u32 4788187, %v2871_v26 }
 0x332   : > { %v3008_v6 = vand.u32 8388607, %v13999_v13  ;;  %v3836_v44 = vand.u32 2139095040, %v10316_v56  ;;  %v10344_v15 = vmul.f32 %v2461_v10, %v10241_v48  ;;  %v2965_v34 = vclz %v6395_v60 }
 0x333   : > { %v3018_v39 = vshll.u32 %v13889_v9, %v14001_v2  ;;  %v10348_v17 = vor.u32 %v3652_v5, %v3651_v38  ;;  %v2886_v11 = vadd.s32 3, %v2882_v18  ;;  %v3022_v12 = vshrl.u32 %v13881_v46, %v9581_v47 }
 0x334   : > { %14000 = vst [vmem:[#allocation33_spill] sm:$0xff] %v10344_v15  ;;  %v3009_v51 = vor.u32 8388608, %v3008_v6  ;;  %v3017_v16 = vshrl.u32 %v13889_v9, %v9581_v47  ;;  %v3025_v48 = vshrl.u32 %v13882_v54, %v9581_v47  ;;  %v2873_v10 = vand.u32 2147483647, %v2872_v14 }
 0x335   : > { %14002 = vst [vmem:[#allocation17_spill] sm:$0xff] %v10348_v17  ;;  %v3020_v26 = vor.u32 %v3019_v50, %v3018_v39  ;;  %v2875_v60 = vcvt.s32.f32 %v2868_v27  ;;  %v6396_v13 = vadd.s32 4294967294, %v2965_v34  ;;  %v3021_v38 = vshll.u32 %v13880_v37, %v14001_v2 }
 0x336   : > { %v3837_v5 = vshrl.u32 %v3836_v44, 23  ;;  %v3732_v18 = vand.u32 2139095040, %v10344_v15  ;;  %vm2899_vm1 = vcmp.lt.s32.totalorder %v9499_v52, 0  ;;  %v2953_v6 = vadd.s32 %v10199_v4, %v10193_v32 }
 0x337   : > { %v3024_v50 = vshll.u32 %v13881_v46, %v14001_v2  ;;  %v2876_v39 = vmul.f32 %v2875_v60, %v2873_v10  ;;  %v10366_v35 = vand.u32 3, %v2886_v11  ;;  %vm6397_vm2 = vcmp.lt.s32.totalorder %v6396_v13, 0 }
 0x338   : > { %v3023_v47 = vor.u32 %v3022_v12, %v3021_v38  ;;  %v2968_v27 = vsel %vm6397_vm2, 0, %v6396_v13  ;;  %vm3033_vm10 = vcmp.lt.s32.totalorder %v9606_v45, 1  ;;  %vm3034_vm0 = vcmp.lt.s32.totalorder %v9606_v45, 2 }
 0x339   : > { %v3026_v14 = vor.u32 %v3025_v48, %v3024_v50  ;;  %v2877_v44 = vxor.u32 2147483648, %v2876_v39  ;;  %v14003_v34 = vand.u32 2147483647, %v9499_v52  ;;  %v2969_v32 = vsub.s32 32, %v2968_v27 }
 0x33a   : > { %vm3035_vm9 = vcmp.lt.s32.totalorder %v9606_v45, 3  ;;  %v3037_v4 = vsel %vm3033_vm10, %v3017_v16, %v3020_v26  ;;  %v6430_v2 = vadd.s32 4294967169, %v3837_v5  ;;  %v3733_v11 = vshrl.u32 %v3732_v18, 23  ;;  %v14006_v5 = vld [vmem:[#allocation21_spill] sm:$0xff] }
 0x33b   : > { %vm10372_vm8 = vcmp.le.f32.partialorder %v14003_v34, 0.7853982  ;;  %v2973_v12 = vsub.s32 4294967266, %v2968_v27  ;;  %v2983_v48 = vsub.s32 4, %v10281_v57  ;;  %v2878_v10 = vsel %vm2795_vm15, %v2877_v44, %v2876_v39 }
 0x33c   : > { %v2970_v60 = vshll.u32 %v10293_v58, %v2968_v27  ;;  %v2971_v13 = vshrl.u32 %v2953_v6, %v2969_v32  ;;  %v3041_v38 = vsel %vm3033_vm10, %v3020_v26, %v3023_v47  ;;  %v2881_v50 = vsel %vm10277_vm12, %v9485_v25, %v2878_v10  ;;  %v14008_v27 = vld [vmem:[#allocation16_spill] sm:$0xff] }
 0x33d   : > { %v2974_v34 = vadd.s32 127, %v2973_v12  ;;  %v3038_v16 = vsel %vm3036_vm4, %v3026_v14, 2102212464  ;;  %v3043_v18 = vsel %vm3035_vm9, %v3026_v14, %v14006_v5  ;;  %7242 = vcosq.f32 %v2881_v50 }
 0x33e   : > { %v2972_v39 = vor.u32 %v2971_v13, %v2970_v60  ;;  %v3044_v58 = vsel %vm3034_vm0, %v3041_v38, %v3043_v18  ;;  %v3045_v26 = vsel %vm3033_vm10, %v3023_v47, %v3026_v14  ;;  %7244 = vsinq.f32 %v2881_v50  ;;  %v14009_v13 = vld [vmem:[#allocation6_spill] sm:$0xff] }
 0x33f   : > { %v2975_v6 = vshll.u32 %v2974_v34, 23  ;;  %v3047_v44 = vsel %vm3035_vm9, %v14008_v27, %v14007_v61  ;;  %v3049_v32 = vshll.u32 %v3009_v51, 8  ;;  %v6426_v12 = vadd.s32 4294967169, %v3733_v11 }
 0x340   : > { %v2984_v10 = vsel %vm2899_vm1, %v2983_v48, %v10281_v57  ;;  %v3048_v60 = vsel %vm3034_vm0, %v3045_v26, %v3047_v44  ;;  %v13754_v38 = vand.u32 2147483647, %v14009_v13  ;;  %v3039_v14 = vsel %vm3035_vm9, %v3023_v47, %v3038_v16 }
 0x341   : > { %v2976_v5 = vor.u32 4788187, %v2975_v6  ;;  %v10409_v50 = vmul.u32.u64.low %v3049_v32, %v3048_v60  ;;  %v10410_v34 = vmul.u32.u64.high %v3049_v32, %v3048_v60, %v10409_v50  ;;  %v10414_v51 = vor.u32 %v10336_v20, %v10313_v31 }
 0x342   : > { %v10418_v57 = vmul.u32.u64.low %v3049_v32, %v3044_v58  ;;  %v10419_v48 = vmul.u32.u64.high %v3049_v32, %v3044_v58, %v10418_v57  ;;  %vm2889_vm4 = vcmp.eq.s32.totalorder %v10366_v35, 0  ;;  %vm2892_vm15 = vcmp.eq.s32.totalorder %v10366_v35, 2  ;;  %v14010_v58 = vld [vmem:[#allocation8_spill] sm:$0xff] }
 0x343   : > { %v2977_v18 = vand.u32 2147483647, %v2976_v5  ;;  %v2979_v47 = vcvt.s32.f32 %v2972_v39  ;;  %v2986_v16 = vsel %vm10372_vm8, 0, %v2984_v10  ;;  %vm2888_vm6 = vcmp.lt.s32.totalorder %v10366_v35, 2 }
 0x344   : > { %v3040_v31 = vsel %vm3034_vm0, %v3037_v4, %v3039_v14  ;;  %v3112_v20 = vand.u32 8388607, %v13754_v38  ;;  %v3123_v26 = vshrl.u32 %v13880_v37, %v14010_v58  ;;  %v3126_v6 = vshrl.u32 %v13881_v46, %v14010_v58  ;;  %v14011_v4 = vld [vmem:[#allocation11_spill] sm:$0xff] }
 0x345   : > { %v3843_v61 = vadd.s32 1, %v6430_v2  ;;  %v10435_v27 = vadd.s32 1, %v6426_v12  ;;  %vm2885_vm11 = vweird.f32 %v9485_v25  ;;  %v2980_v39 = vmul.f32 %v2979_v47, %v2977_v18 }
 0x346   : > { %vm3058_vm12 = vc.u32 %v10410_v34, %v10418_v57  ;;  %v3059_v45 = vadd.s32 1, %v10419_v48  ;;  %v3122_v44 = vshll.u32 %v13889_v9, %v14011_v4  ;;  %v3125_v10 = vshll.u32 %v13880_v37, %v14011_v4 }
 0x347   : > { %v3129_v60 = vshrl.u32 %v13882_v54, %v14010_v58  ;;  %v2981_v2 = vxor.u32 2147483648, %v2980_v39  ;;  %v2990_v12 = vadd.s32 3, %v2986_v16  ;;  %v3056_v5 = vmul.u32 %v3049_v32, %v3040_v31  ;;  %v7243_v50 = vpop.eup %7242 }
 0x348   : > { %v3128_v14 = vshll.u32 %v13881_v46, %v14011_v4  ;;  %v3060_v18 = vsel %vm3058_vm12, %v3059_v45, %v10419_v48  ;;  %v3113_v47 = vor.u32 8388608, %v3112_v20  ;;  %v3124_v38 = vor.u32 %v3123_v26, %v3122_v44  ;;  %v7245_v15 = vpop.eup %7244 }
 0x349   : > { %v3127_v11 = vor.u32 %v3126_v6, %v3125_v10  ;;  %v2893_v62 = vxor.u32 2147483648, %v7243_v50  ;;  %v2982_v22 = vsel %vm2899_vm1, %v2981_v2, %v2980_v39  ;;  %v3061_v19 = vadd.s32 %v3060_v18, %v3056_v5  ;;  %v14013_v10 = vld [vmem:[#allocation29_spill] sm:$0xff] }
 0x34a   : > { %vm3137_vm3 = vcmp.lt.s32.totalorder %v9816_v8, 1  ;;  %v2890_v31 = vxor.u32 2147483648, %v7245_v15  ;;  %v2985_v48 = vsel %vm10372_vm8, %v9499_v52, %v2982_v22  ;;  %v3130_v20 = vor.u32 %v3129_v60, %v3128_v14 }
 0x34b   : > { %v2894_v6 = vsel %vm2892_vm15, %v2893_v62, %v7245_v15  ;;  %7246 = vcosq.f32 %v2985_v48  ;;  %v3062_v45 = vadd.s32 536870912, %v3061_v19  ;;  %vm3660_vm1 = vcmp.lt.s32.totalorder %v10268_v41, 4 }
 0x34c   : > { %7248 = vsinq.f32 %v2985_v48  ;;  %vm3139_vm2 = vcmp.lt.s32.totalorder %v9816_v8, 3  ;;  %v3145_v44 = vsel %vm3137_vm3, %v3124_v38, %v3127_v11  ;;  %v3149_v35 = vsel %vm3137_vm3, %v3127_v11, %v3130_v20 }
 0x34d   : > { %v10466_v56 = vshrl.u32 %v3062_v45, 30  ;;  %v3147_v60 = vsel %vm3139_vm2, %v3130_v20, %v14013_v10  ;;  %vm3844_vm10 = vcmp.gt.s32.totalorder %v3843_v61, 0  ;;  %vm3138_vm0 = vcmp.lt.s32.totalorder %v9816_v8, 2 }
 0x34e   : > { %vm3740_vm8 = vcmp.gt.s32.totalorder %v10435_v27, 0  ;;  %v3153_v14 = vshll.u32 %v3113_v47, 8  ;;  %vm3556_vm9 = vcmp.lt.s32.totalorder %v10271_v40, 4  ;;  %v3121_v18 = vshrl.u32 %v13889_v9, %v14010_v58 }
 0x34f   : > { %v6682_v21 = vpop.f32.mrb[14].mxu0  ;;  %v3064_v5 = vshll.u32 %v10466_v56, 30  ;;  %v3845_v48 = vsel %vm3844_vm10, %v3843_v61, 0  ;;  %v3741_v47 = vsel %vm3740_vm8, %v10435_v27, 0  ;;  %vm3003_vm15 = vcmp.lt.s32.totalorder %v13976_v3, 0 }
 0x350   : > { %v2414_v32 = vadd.f32 %v10214_v53, %v6682_v21  ;;  %v2408_v16 = vpop.f32.mrb[15].mxu0  ;;  %v2891_v21 = vsel %vm2889_vm4, %v7243_v50, %v2890_v31  ;;  %v3148_v31 = vsel %vm3138_vm0, %v3145_v44, %v3147_v60  ;;  %vm2989_vm4 = vweird.f32 %v9499_v52 }
 0x351   : > { %v2409_v26 = vadd.f32 %v10214_v53, %v2408_v16  ;;  %v2895_v22 = vsel %vm2888_vm6, %v2891_v21, %v2894_v6  ;;  %v14012_v53 = vld [vmem:[#allocation26_spill] sm:$0xff]  ;;  %v10487_v50 = vsub.s32 %v3061_v19, %v3064_v5  ;;  %v3142_v16 = vsel %vm3140_vm13, %v3130_v20, 2102212464 }
 0x352   : > { %v2432_v39 = vand.u32 2147483647, %v2414_v32  ;;  %v3151_v62 = vsel %vm3139_vm2, %v14012_v53, %v10006_v28  ;;  %v2896_v15 = vsel %vm2885_vm11, nan, %v2895_v22  ;;  %v2991_v6 = vand.u32 3, %v2990_v12 }
 0x353   : > { %v2431_v4 = vand.u32 2147483647, %v2409_v26  ;;  %6719 = vmatmul.mubr.f32.gmra.mrb[2].mxu1 %v2896_v15  ;;  %v3152_v28 = vsel %vm3138_vm0, %v3149_v35, %v3151_v62  ;;  %v3067_v58 = vsub.s32 0, %v10487_v50  ;;  %v3141_v20 = vsel %vm3137_vm3, %v3121_v18, %v3124_v38 }
 0x354   : > { %v2448_v2 = vadd.f32 1.0, %v2432_v39  ;;  %v10496_v45 = vmul.u32.u64.low %v3153_v14, %v3152_v28  ;;  %v10497_v39 = vmul.u32.u64.high %v3153_v14, %v3152_v28, %v10496_v45  ;;  %v3143_v61 = vsel %vm3139_vm2, %v3127_v11, %v3142_v16 }
 0x355   : > { %v2447_v25 = vadd.f32 1.0, %v2431_v4  ;;  %v10506_v4 = vmul.u32.u64.low %v3153_v14, %v3148_v31  ;;  %v10507_v22 = vmul.u32.u64.high %v3153_v14, %v3148_v31, %v10506_v4  ;;  %v7247_v12 = vpop.eup %7246  ;;  %v10513_v27 = vsel %vm3660_vm1, %v10348_v17, 920167782 }
 0x356   : > { %v2464_v19 = vmul.f32 30.0, %v2448_v2  ;;  %v14014_v53 = vor.u32 %v10320_v1, %v10297_v7  ;;  %v10522_v62 = vand.u32 31, %v3845_v48  ;;  %v6399_v11 = vmin.u32 %v3067_v58, %v10487_v50  ;;  %v7249_v15 = vpop.eup %7248 }
 0x357   : > { %v2463_v21 = vmul.f32 30.0, %v2447_v25  ;;  %v10525_v44 = vand.u32 31, %v3741_v47  ;;  %vm2993_vm13 = vcmp.eq.s32.totalorder %v2991_v6, 0  ;;  %vm2996_vm6 = vcmp.eq.s32.totalorder %v2991_v6, 2 }
 0x358   : > { %v10520_v38 = vsel %vm3660_vm1, %v14014_v53, 1326507024  ;;  %14016 = vst [vmem:[#allocation22_spill] sm:$0xff] %v10522_v62  ;;  %v2997_v10 = vxor.u32 2147483648, %v7247_v12  ;;  %v10527_v60 = vmul.f32 %v2464_v19, %v2414_v32  ;;  %v2994_v35 = vxor.u32 2147483648, %v7249_v15 }
 0x359   : > { %14015 = vst [vmem:[#allocation21_spill] sm:$0xff] %v10520_v38  ;;  %14017 = vst [vmem:[#allocation16_spill] sm:$0xff] %v10525_v44  ;;  %v3069_v2 = vclz %v6399_v11  ;;  %v3144_v7 = vsel %vm3138_vm0, %v3141_v20, %v3143_v61  ;;  %v10531_v1 = vmul.f32 %v2463_v21, %v2409_v26  ;;  %v3087_v25 = vsub.s32 4, %v10466_v56 }
 0x35a   : > { %14018 = vst [vmem:[#allocation6_spill] sm:$0xff] %v10527_v60  ;;  %v2998_v5 = vsel %vm2996_vm6, %v2997_v10, %v7249_v15  ;;  %vm3162_vm11 = vc.u32 %v10497_v39, %v10506_v4  ;;  %vm2992_vm12 = vcmp.lt.s32.totalorder %v2991_v6, 2  ;;  %v2995_v28 = vsel %vm2993_vm13, %v7247_v12, %v2994_v35 }
 0x35b   : > { %14019 = vst [vmem:[#allocation8_spill] sm:$0xff] %v10531_v1  ;;  %v6400_v18 = vadd.s32 4294967294, %v3069_v2  ;;  %v3163_v16 = vadd.s32 1, %v10507_v22  ;;  %v10540_v32 = vsel %vm3556_vm9, %v10414_v51, 920167782  ;;  %v10543_v8 = vsub.s32 32, %v10522_v62 }
 0x35c   : > { %v2999_v26 = vsel %vm2992_vm12, %v2995_v28, %v2998_v5  ;;  %v3160_v31 = vmul.u32 %v3153_v14, %v3144_v7  ;;  %v4044_v45 = vand.u32 2139095040, %v10527_v60  ;;  %v3940_v58 = vand.u32 2139095040, %v10531_v1  ;;  %v14030_v60 = vld [vmem:[#allocation5_spill] sm:$0xff] }
 0x35d   : > { %14020 = vst [vmem:[#allocation11_spill] sm:$0xff] %v10543_v8  ;;  %v3000_v19 = vsel %vm2989_vm4, nan, %v2999_v26  ;;  %vm6401_vm3 = vcmp.lt.s32.totalorder %v6400_v18, 0  ;;  %v3164_v6 = vsel %vm3162_vm11, %v3163_v16, %v10507_v22  ;;  %v3088_v21 = vsel %vm3003_vm15, %v3087_v25, %v10466_v56 }
 0x35e   : > { %6721 = vmatprep.mubr.f32.mxu1 %v3000_v19  ;;  %v3072_v20 = vsel %vm6401_vm3, 0, %v6400_v18  ;;  %v3165_v61 = vadd.s32 %v3164_v6, %v3160_v31  ;;  %v14021_v14 = vor.u32 %v10340_v24, %v10326_v30  ;;  %v10561_v52 = vsub.s32 32, %v10525_v44 }
 0x35f   : > { %v14023_v22 = vand.u32 2147483647, %v13976_v3  ;;  %v3073_v11 = vsub.s32 32, %v3072_v20  ;;  %v10569_v15 = vshrl.u32 %v3845_v48, 5  ;;  %v3860_v56 = vshrl.u32 %v13883_v0, %v10543_v8 }
 0x360   : > { %v10558_v12 = vsel %vm3556_vm9, %v14021_v14, 1326507024  ;;  %14022 = vst [vmem:[#allocation26_spill] sm:$0xff] %v10561_v52  ;;  %v3057_v30 = vadd.s32 %v10418_v57, %v10410_v34  ;;  %v3077_v24 = vsub.s32 4294967266, %v3072_v20  ;;  %v10575_v10 = vshrl.u32 %v3741_v47, 5 }
 0x361   : > { %vm10565_vm2 = vcmp.le.f32.partialorder %v14023_v22, 0.7853982  ;;  %v4045_v35 = vshrl.u32 %v4044_v45, 23  ;;  %v3166_v7 = vadd.s32 536870912, %v3165_v61  ;;  %v3859_v5 = vshll.u32 %v13882_v54, %v10522_v62 }
 0x362   : > { %v3090_v2 = vsel %vm10565_vm2, 0, %v3088_v21  ;;  %v10583_v48 = vshll.u32 %v13883_v0, %v10522_v62  ;;  %v3941_v25 = vshrl.u32 %v3940_v58, 23  ;;  %v3075_v28 = vshrl.u32 %v3057_v30, %v3073_v11  ;;  %v14027_v21 = vld [vmem:[#allocation13_spill] sm:$0xff]  ;;  %v14031_v62 = vld [vmem:[#allocation23_spill] sm:$0xff] }
 0x363   : > { %v10587_v34 = vshrl.u32 %v13884_v42, %v10543_v8  ;;  %v3755_v57 = vshll.u32 %v13882_v54, %v10525_v44  ;;  %v3756_v47 = vshrl.u32 %v13883_v0, %v10561_v52  ;;  %v10595_v18 = vshrl.u32 %v13884_v42, %v10561_v52 }
 0x364   : > { %v10597_v16 = vor.u32 %v3860_v56, %v3859_v5  ;;  %v3074_v26 = vshll.u32 %v10487_v50, %v3072_v20  ;;  %v3078_v31 = vadd.s32 127, %v3077_v24  ;;  %v3094_v45 = vadd.s32 3, %v3090_v2 }
 0x365   : > { %v10602_v19 = vshll.u32 %v13883_v0, %v10525_v44  ;;  %v6438_v6 = vadd.s32 4294967169, %v4045_v35  ;;  %v3167_v58 = vshrl.u32 %v3166_v7, 30  ;;  %v13767_v14 = vand.u32 2147483647, %v14027_v21  ;;  %v14029_v7 = vld [vmem:[#allocation15_spill] sm:$0xff] }
 0x366   : > { %14026 = vst [vmem:[#allocation29_spill] sm:$0xff] %v10597_v16  ;;  %vm3868_vm10 = vcmp.lt.s32.totalorder %v10569_v15, 4  ;;  %v6434_v22 = vadd.s32 4294967169, %v3941_v25  ;;  %v3076_v11 = vor.u32 %v3075_v28, %v3074_v26  ;;  %v3079_v30 = vshll.u32 %v3078_v31, 23 }
 0x367   : > { %v10608_v5 = vor.u32 %v3756_v47, %v3755_v57  ;;  %v3168_v20 = vshll.u32 %v3167_v58, 30  ;;  %v10615_v24 = vsel %vm3868_vm10, %v10597_v16, 920167782  ;;  %v10617_v2 = vand.u32 3, %v3094_v45 }
 0x368   : > { %14028 = vst [vmem:[#allocation13_spill] sm:$0xff] %v10615_v24  ;;  %v3080_v35 = vor.u32 4788187, %v3079_v30  ;;  %v3227_v25 = vshrl.u32 %v13880_v37, %v14029_v7  ;;  %v4051_v28 = vadd.s32 1, %v6438_v6  ;;  %v3161_v57 = vadd.s32 %v10506_v4, %v10497_v39 }
 0x369   : > { %v10623_v47 = vsub.s32 %v3165_v61, %v3168_v20  ;;  %v3216_v26 = vand.u32 8388607, %v13767_v14  ;;  %v3947_v31 = vadd.s32 1, %v6434_v22  ;;  %v3083_v56 = vcvt.s32.f32 %v3076_v11 }
 0x36a   : > { %v3081_v50 = vand.u32 2147483647, %v3080_v35  ;;  %v3226_v30 = vshll.u32 %v13889_v9, %v14030_v60  ;;  %vm3107_vm0 = vcmp.lt.s32.totalorder %v14009_v13, 0  ;;  %v3225_v6 = vshrl.u32 %v13889_v9, %v14029_v7 }
 0x36b   : > { %v3171_v45 = vsub.s32 0, %v10623_v47  ;;  %v3229_v39 = vshll.u32 %v13880_v37, %v14030_v60  ;;  %v3230_v4 = vshrl.u32 %v13881_v46, %v14029_v7  ;;  %v3232_v11 = vshll.u32 %v13881_v46, %v14030_v60 }
 0x36c   : > { %v3084_v61 = vmul.f32 %v3083_v56, %v3081_v50  ;;  %v3228_v22 = vor.u32 %v3227_v25, %v3226_v30  ;;  %v3233_v20 = vshrl.u32 %v13882_v54, %v14029_v7  ;;  %vm4052_vm8 = vcmp.gt.s32.totalorder %v4051_v28, 0  ;;  %v14032_v56 = vld [vmem:[#allocation28_spill] sm:$0xff]  ;;  %v14033_v50 = vld [vmem:[#allocation25_spill] sm:$0xff]  ;;  %v14034_v30 = vld [vmem:[#allocation27_spill] sm:$0xff] }
 0x36d   : > { %v6403_v35 = vmin.u32 %v3171_v45, %v10623_v47  ;;  %v3217_v14 = vor.u32 8388608, %v3216_v26  ;;  %v3231_v1 = vor.u32 %v3230_v4, %v3229_v39  ;;  %vm3948_vm4 = vcmp.gt.s32.totalorder %v3947_v31, 0 }
 0x36e   : > { %v3085_v24 = vxor.u32 2147483648, %v3084_v61  ;;  %v3234_v16 = vor.u32 %v3233_v20, %v3232_v11  ;;  %vm3243_vm13 = vcmp.lt.s32.totalorder %v14031_v62, 3  ;;  %v3191_v44 = vsub.s32 4, %v3167_v58 }
 0x36f   : > { %v3173_v8 = vclz %v6403_v35  ;;  %vm3241_vm6 = vcmp.lt.s32.totalorder %v14031_v62, 1  ;;  %v3255_v60 = vsel %vm3243_vm13, %v14033_v50, %v14032_v56  ;;  %vm3242_vm11 = vcmp.lt.s32.totalorder %v14031_v62, 2 }
 0x370   : > { %v3086_v7 = vsel %vm3003_vm15, %v3085_v24, %v3084_v61  ;;  %v3246_v25 = vsel %vm3244_vm5, %v3234_v16, 2102212464  ;;  %v3249_v26 = vsel %vm3241_vm6, %v3228_v22, %v3231_v1  ;;  %v3251_v45 = vsel %vm3243_vm13, %v3234_v16, %v14034_v30 }
 0x371   : > { %v3089_v39 = vsel %vm10565_vm2, %v13976_v3, %v3086_v7  ;;  %v6404_v4 = vadd.s32 4294967294, %v3173_v8  ;;  %v3245_v11 = vsel %vm3241_vm6, %v3225_v6, %v3228_v22  ;;  %v3247_v20 = vsel %vm3243_vm13, %v3231_v1, %v3246_v25  ;;  %v14035_v6 = vld [vmem:[#allocation24_spill] sm:$0xff] }
 0x372   : > { %7250 = vcosq.f32 %v3089_v39  ;;  %v3253_v35 = vsel %vm3241_vm6, %v3231_v1, %v3234_v16  ;;  %v3257_v56 = vshll.u32 %v3217_v14, 8  ;;  %v3252_v24 = vsel %vm3242_vm11, %v3249_v26, %v3251_v45 }
 0x373   : > { %7252 = vsinq.f32 %v3089_v39  ;;  %vm6405_vm15 = vcmp.lt.s32.totalorder %v6404_v4, 0  ;;  %v3256_v61 = vsel %vm3242_vm11, %v3253_v35, %v3255_v60  ;;  %v10657_v30 = vsel %vm3107_vm0, %v3191_v44, %v3167_v58 }
 0x374   : > { %v3176_v50 = vsel %vm6405_vm15, 0, %v6404_v4  ;;  %v10659_v52 = vmul.u32.u64.low %v3257_v56, %v3256_v61  ;;  %v10660_v53 = vmul.u32.u64.high %v3257_v56, %v3256_v61, %v10659_v52  ;;  %v3248_v62 = vsel %vm3242_vm11, %v3245_v11, %v3247_v20 }
 0x375   : > { %v3177_v8 = vsub.s32 32, %v3176_v50  ;;  %v3181_v7 = vsub.s32 4294967266, %v3176_v50  ;;  %v13779_v22 = vand.u32 2147483647, %v14035_v6  ;;  %vm3100_vm5 = vcmp.eq.s32.totalorder %v10617_v2, 2 }
 0x376   : > { %v14036_v1 = vand.u32 2147483647, %v14009_v13  ;;  %v10670_v14 = vmul.u32.u64.low %v3257_v56, %v3252_v24  ;;  %v10671_v60 = vmul.u32.u64.high %v3257_v56, %v3252_v24, %v10670_v14  ;;  %v10675_v44 = vsel %vm4052_vm8, %v4051_v28, 0 }
 0x377   : > { %vm3097_vm3 = vcmp.eq.s32.totalorder %v10617_v2, 0  ;;  %v3178_v52 = vshll.u32 %v10623_v47, %v3176_v50  ;;  %v3179_v58 = vshrl.u32 %v3161_v57, %v3177_v8  ;;  %v3182_v25 = vadd.s32 127, %v3181_v7 }
 0x378   : > { %vm10666_vm12 = vcmp.le.f32.partialorder %v14036_v1, 0.7853982  ;;  %v10680_v26 = vsel %vm3948_vm4, %v3947_v31, 0  ;;  %vm3096_vm2 = vcmp.lt.s32.totalorder %v10617_v2, 2  ;;  %v3264_v39 = vmul.u32 %v3257_v56, %v3248_v62  ;;  %v14039_v31 = vld [vmem:[#allocation31_spill] sm:$0xff] }
 0x379   : > { %v3194_v45 = vsel %vm10666_vm12, 0, %v10657_v30  ;;  %v3331_v28 = vshrl.u32 %v13880_v37, %v10073_v59  ;;  %vm3093_vm8 = vweird.f32 %v13976_v3  ;;  %v3180_v4 = vor.u32 %v3179_v58, %v3178_v52 }
 0x37a   : > { %v3183_v11 = vshll.u32 %v3182_v25, 23  ;;  %vm3266_vm13 = vc.u32 %v10660_v53, %v10670_v14  ;;  %v3320_v57 = vand.u32 8388607, %v13779_v22  ;;  %v3267_v47 = vadd.s32 1, %v10671_v60 }
 0x37b   : > { %v3330_v20 = vshll.u32 %v13889_v9, %v14039_v31  ;;  %v3333_v35 = vshll.u32 %v13880_v37, %v14039_v31  ;;  %v3334_v56 = vshrl.u32 %v13881_v46, %v10073_v59  ;;  %v3329_v61 = vshrl.u32 %v13889_v9, %v10073_v59 }
 0x37c   : > { %v3184_v24 = vor.u32 4788187, %v3183_v11  ;;  %v3336_v50 = vshll.u32 %v13881_v46, %v14039_v31  ;;  %v3337_v30 = vshrl.u32 %v13882_v54, %v10073_v59  ;;  %v7251_v8 = vpop.eup %7250  ;;  %v3187_v7 = vcvt.s32.f32 %v3180_v4 }
 0x37d   : > { %v3268_v62 = vsel %vm3266_vm13, %v3267_v47, %v10671_v60  ;;  %v3332_v1 = vor.u32 %v3331_v28, %v3330_v20  ;;  %v3335_v52 = vor.u32 %v3334_v56, %v3333_v35  ;;  %v7253_v58 = vpop.eup %7252  ;;  %v3101_v25 = vxor.u32 2147483648, %v7251_v8 }
 0x37e   : > { %v3185_v22 = vand.u32 2147483647, %v3184_v24  ;;  %v3269_v42 = vadd.s32 %v3268_v62, %v3264_v39  ;;  %v3338_v11 = vor.u32 %v3337_v30, %v3336_v50  ;;  %vm3764_vm4 = vcmp.lt.s32.totalorder %v10575_v10, 4  ;;  %v14040_v62 = vld [vmem:[#allocation20_spill] sm:$0xff] }
 0x37f   : > { %v3098_v17 = vxor.u32 2147483648, %v7253_v58  ;;  %v3321_v38 = vor.u32 8388608, %v3320_v57  ;;  %vm3345_vm6 = vcmp.lt.s32.totalorder %v10029_v29, 1  ;;  %vm3347_vm11 = vcmp.lt.s32.totalorder %v10029_v29, 3 }
 0x380   : > { %v3102_v59 = vsel %vm3100_vm5, %v3101_v25, %v7253_v58  ;;  %v3188_v4 = vmul.f32 %v3187_v7, %v3185_v22  ;;  %v3270_v60 = vadd.s32 536870912, %v3269_v42  ;;  %v3359_v28 = vsel %vm3347_vm11, %v10233_v43, %v10266_v55 }
 0x381   : > { %v3099_v39 = vsel %vm3097_vm3, %v7251_v8, %v3098_v17  ;;  %v3353_v57 = vsel %vm3345_vm6, %v3332_v1, %v3335_v52  ;;  %v3355_v47 = vsel %vm3347_vm11, %v3338_v11, %v10259_v49  ;;  %v3357_v31 = vsel %vm3345_vm6, %v3335_v52, %v3338_v11 }
 0x382   : > { %v3103_v22 = vsel %vm3096_vm2, %v3099_v39, %v3102_v59  ;;  %v3189_v20 = vxor.u32 2147483648, %v3188_v4  ;;  %v3271_v35 = vshrl.u32 %v3270_v60, 30  ;;  %vm3346_vm15 = vcmp.lt.s32.totalorder %v10029_v29, 2  ;;  %v14042_v39 = vld [vmem:[#allocation14_spill] sm:$0xff] }
 0x383   : > { %v3104_v43 = vsel %vm3093_vm8, nan, %v3103_v22  ;;  %v3350_v55 = vsel %vm3348_vm7, %v3338_v11, 2102212464  ;;  %v3360_v17 = vsel %vm3346_vm15, %v3357_v31, %v3359_v28  ;;  %v3361_v49 = vshll.u32 %v3321_v38, 8  ;;  %v14043_v31 = vld [vmem:[#allocation30_spill] sm:$0xff] }
 0x384   : > { %6722 = vmatmul.mubr.f32.gmra.mrb[4].mxu1 %v3104_v43  ;;  %v3190_v56 = vsel %vm3107_vm0, %v3189_v20, %v3188_v4  ;;  %v3198_v2 = vadd.s32 3, %v3194_v45  ;;  %v3272_v24 = vshll.u32 %v3271_v35, 30  ;;  %v3356_v50 = vsel %vm3346_vm15, %v3353_v57, %v3355_v47 }
 0x385   : > { %v3193_v3 = vsel %vm10666_vm12, %v14009_v13, %v3190_v56  ;;  %v3349_v30 = vsel %vm3345_vm6, %v3329_v61, %v3332_v1  ;;  %v10743_v8 = vmul.u32.u64.low %v3361_v49, %v3360_v17  ;;  %v10744_v7 = vmul.u32.u64.high %v3361_v49, %v3360_v17, %v10743_v8 }
 0x386   : > { %7254 = vcosq.f32 %v3193_v3  ;;  %v10746_v38 = vsub.s32 %v3269_v42, %v3272_v24  ;;  %v3351_v45 = vsel %vm3347_vm11, %v3335_v52, %v3350_v55  ;;  %v3417_v58 = vand.u32 2147483647, %v14040_v62 }
 0x387   : > { %v14041_v25 = vor.u32 %v10587_v34, %v10583_v48  ;;  %7256 = vsinq.f32 %v3193_v3  ;;  %v10758_v61 = vmul.u32.u64.low %v3361_v49, %v3356_v50  ;;  %v10759_v1 = vmul.u32.u64.high %v3361_v49, %v3356_v50, %v10758_v61 }
 0x388   : > { %v10765_v42 = vsel %vm3764_vm4, %v10608_v5, 920167782  ;;  %v3199_v52 = vand.u32 3, %v3198_v2  ;;  %vm3211_vm7 = vcmp.lt.s32.totalorder %v14027_v21, 0  ;;  %v3275_v11 = vsub.s32 0, %v10746_v38 }
 0x389   : > { %v10756_v16 = vsel %vm3868_vm10, %v14041_v25, 1326507024  ;;  %v10770_v48 = vand.u32 31, %v10675_v44  ;;  %v10773_v34 = vand.u32 31, %v10680_v26  ;;  %v3295_v59 = vsub.s32 4, %v3271_v35 }
 0x38a   : > { %v3352_v4 = vsel %vm3346_vm15, %v3349_v30, %v3351_v45  ;;  %v6407_v60 = vmin.u32 %v3275_v11, %v10746_v38  ;;  %vm3370_vm0 = vc.u32 %v10744_v7, %v10758_v61  ;;  %v3424_v28 = vand.u32 8388607, %v3417_v58 }
 0x38b   : > { %v3435_v57 = vshrl.u32 %v13880_v37, %v14042_v39  ;;  %v3371_v47 = vadd.s32 1, %v10759_v1  ;;  %v3434_v22 = vshll.u32 %v13889_v9, %v14043_v31  ;;  %v3437_v29 = vshll.u32 %v13880_v37, %v14043_v31 }
 0x38c   : > { %v3438_v20 = vshrl.u32 %v13881_v46, %v14042_v39  ;;  %vm3200_vm5 = vcmp.lt.s32.totalorder %v3199_v52, 2  ;;  %vm3201_vm12 = vcmp.eq.s32.totalorder %v3199_v52, 0  ;;  %v3277_v43 = vclz %v6407_v60 }
 0x38d   : > { %v3368_v55 = vmul.u32 %v3361_v49, %v3352_v4  ;;  %vm3197_vm3 = vweird.f32 %v14009_v13  ;;  %vm3204_vm2 = vcmp.eq.s32.totalorder %v3199_v52, 2  ;;  %v3372_v17 = vsel %vm3370_vm0, %v3371_v47, %v10759_v1 }
 0x38e   : > { %v3436_v56 = vor.u32 %v3435_v57, %v3434_v22  ;;  %v3439_v2 = vor.u32 %v3438_v20, %v3437_v29  ;;  %v6408_v24 = vadd.s32 4294967294, %v3277_v43  ;;  %v3440_v3 = vshll.u32 %v13881_v46, %v14043_v31 }
 0x38f   : > { %v3373_v50 = vadd.s32 %v3372_v17, %v3368_v55  ;;  %v3441_v30 = vshrl.u32 %v13882_v54, %v14042_v39  ;;  %v14044_v8 = vand.u32 2147483647, %v14027_v21  ;;  %v3265_v49 = vadd.s32 %v10670_v14, %v10660_v53 }
 0x390   : > { %v3296_v25 = vsel %vm3211_vm7, %v3295_v59, %v3271_v35  ;;  %v3425_v1 = vor.u32 8388608, %v3424_v28  ;;  %v3433_v11 = vshrl.u32 %v13889_v9, %v14042_v39  ;;  %v7255_v4 = vpop.eup %7254  ;;  %vm6409_vm13 = vcmp.lt.s32.totalorder %v6408_v24, 0 }
 0x391   : > { %vm10799_vm8 = vcmp.le.f32.partialorder %v14044_v8, 0.7853982  ;;  %v3374_v60 = vadd.s32 536870912, %v3373_v50  ;;  %v3442_v57 = vor.u32 %v3441_v30, %v3440_v3  ;;  %vm3449_vm6 = vcmp.lt.s32.totalorder %v10027_v63, 1  ;;  %v7257_v47 = vpop.eup %7256 }
 0x392   : > { %v3205_v31 = vxor.u32 2147483648, %v7255_v4  ;;  %v3280_v22 = vsel %vm6409_vm13, 0, %v6408_v24  ;;  %vm3451_vm11 = vcmp.lt.s32.totalorder %v10027_v63, 3  ;;  %v3453_v53 = vsel %vm3449_vm6, %v3433_v11, %v3436_v56 }
 0x393   : > { %v3202_v14 = vxor.u32 2147483648, %v7257_v47  ;;  %v3281_v35 = vsub.s32 32, %v3280_v22  ;;  %v3285_v59 = vsub.s32 4294967266, %v3280_v22  ;;  %v3457_v28 = vsel %vm3449_vm6, %v3436_v56, %v3439_v2 }
 0x394   : > { %v3206_v39 = vsel %vm3204_vm2, %v3205_v31, %v7257_v47  ;;  %v3282_v29 = vshll.u32 %v10746_v38, %v3280_v22  ;;  %v10817_v20 = vshrl.u32 %v3374_v60, 30  ;;  %v3454_v43 = vsel %vm3452_vm14, %v3442_v57, 2102212464 }
 0x395   : > { %v3203_v55 = vsel %vm3201_vm12, %v7255_v4, %v3202_v14  ;;  %v3283_v17 = vshrl.u32 %v3265_v49, %v3281_v35  ;;  %v3286_v24 = vadd.s32 127, %v3285_v59  ;;  %v3459_v3 = vsel %vm3451_vm11, %v3442_v57, %v10248_v33 }
 0x396   : > { %v3207_v30 = vsel %vm3200_vm5, %v3203_v55, %v3206_v39  ;;  %v3376_v56 = vshll.u32 %v10817_v20, 30  ;;  %v3455_v38 = vsel %vm3451_vm11, %v3439_v2, %v3454_v43  ;;  %v3463_v8 = vsel %vm3451_vm11, %v10225_v36, %v10252_v23 }
 0x397   : > { %v3208_v49 = vsel %vm3197_vm3, nan, %v3207_v30  ;;  %v3284_v11 = vor.u32 %v3283_v17, %v3282_v29  ;;  %v3287_v4 = vshll.u32 %v3286_v24, 23  ;;  %vm3450_vm14 = vcmp.lt.s32.totalorder %v10027_v63, 2  ;;  %v14047_v63 = vld [vmem:[#allocation10_spill] sm:$0xff] }
 0x398   : > { %6724 = vmatprep.mubr.f32.mxu1 %v3208_v49  ;;  %v10836_v33 = vsub.s32 %v3373_v50, %v3376_v56  ;;  %v3460_v52 = vsel %vm3450_vm14, %v3457_v28, %v3459_v3  ;;  %v3461_v60 = vsel %vm3449_vm6, %v3439_v2, %v3442_v57  ;;  %v3465_v47 = vshll.u32 %v3425_v1, 8  ;;  %v14049_v49 = vld [vmem:[#allocation19_spill] sm:$0xff] }
 0x399   : > { %v3288_v31 = vor.u32 4788187, %v3287_v4  ;;  %v3298_v22 = vsel %vm10799_vm8, 0, %v3296_v25  ;;  %v3456_v36 = vsel %vm3450_vm14, %v3453_v53, %v3455_v38  ;;  %v3464_v23 = vsel %vm3450_vm14, %v3461_v60, %v3463_v8  ;;  %v14050_v4 = vld [vmem:[#allocation7_spill] sm:$0xff] }
 0x39a   : > { %v3291_v13 = vcvt.s32.f32 %v3284_v11  ;;  %v3379_v14 = vsub.s32 0, %v10836_v33  ;;  %v10843_v35 = vmul.u32.u64.low %v3465_v47, %v3464_v23  ;;  %v10844_v59 = vmul.u32.u64.high %v3465_v47, %v3464_v23, %v10843_v35 }
 0x39b   : > { %v3289_v39 = vand.u32 2147483647, %v3288_v31  ;;  %v10846_v50 = vmul.u32.u64.low %v3465_v47, %v3460_v52  ;;  %v10847_v29 = vmul.u32.u64.high %v3465_v47, %v3460_v52, %v10846_v50  ;;  %v3521_v2 = vand.u32 2147483647, %v14047_v63 }
 0x39c   : > { %v14048_v1 = vor.u32 %v10595_v18, %v10602_v19  ;;  %v10859_v57 = vsub.s32 32, %v10770_v48  ;;  %v10862_v53 = vshrl.u32 %v10680_v26, 5  ;;  %v6411_v28 = vmin.u32 %v3379_v14, %v10836_v33 }
 0x39d   : > { %v10867_v43 = vshll.u32 %v13882_v54, %v10770_v48  ;;  %v10870_v55 = vsub.s32 32, %v10773_v34  ;;  %v10874_v18 = vshll.u32 %v13882_v54, %v10773_v34  ;;  %v3292_v19 = vmul.f32 %v3291_v13, %v3289_v39 }
 0x39e   : > { %v10856_v25 = vsel %vm3764_vm4, %v14048_v1, 1326507024  ;;  %v3302_v17 = vadd.s32 3, %v3298_v22  ;;  %v3369_v24 = vadd.s32 %v10758_v61, %v10744_v7  ;;  %v3381_v26 = vclz %v6411_v28 }
 0x39f   : > { %v3472_v3 = vmul.u32 %v3465_v47, %v3456_v36  ;;  %v3293_v30 = vxor.u32 2147483648, %v3292_v19  ;;  %vm3315_vm15 = vcmp.lt.s32.totalorder %v14035_v6, 0  ;;  %vm3474_vm0 = vc.u32 %v10844_v59, %v10846_v50 }
 0x3a0   : > { %v3475_v56 = vadd.s32 1, %v10847_v29  ;;  %v3528_v38 = vand.u32 8388607, %v3521_v2  ;;  %v6412_v8 = vadd.s32 4294967294, %v3381_v26  ;;  %v3538_v11 = vshll.u32 %v13889_v9, %v14049_v49 }
 0x3a1   : > { %v3539_v7 = vshrl.u32 %v13880_v37, %v14050_v4  ;;  %v3541_v61 = vshll.u32 %v13880_v37, %v14049_v49  ;;  %v3294_v52 = vsel %vm3211_vm7, %v3293_v30, %v3292_v19  ;;  %v3542_v47 = vshrl.u32 %v13881_v46, %v14050_v4 }
 0x3a2   : > { %v3476_v60 = vsel %vm3474_vm0, %v3475_v56, %v10847_v29  ;;  %v3544_v31 = vshll.u32 %v13881_v46, %v14049_v49  ;;  %v3297_v22 = vsel %vm10799_vm8, %v14027_v21, %v3294_v52  ;;  %v14051_v36 = vand.u32 2147483647, %v14035_v6 }
 0x3a3   : > { %vm6413_vm12 = vcmp.lt.s32.totalorder %v6412_v8, 0  ;;  %v3477_v13 = vadd.s32 %v3476_v60, %v3472_v3  ;;  %v3540_v14 = vor.u32 %v3539_v7, %v3538_v11  ;;  %7258 = vcosq.f32 %v3297_v22 }
 0x3a4   : > { %vm10902_vm5 = vcmp.le.f32.partialorder %v14051_v36, 0.7853982  ;;  %v3384_v35 = vsel %vm6413_vm12, 0, %v6412_v8  ;;  %v3543_v39 = vor.u32 %v3542_v47, %v3541_v61  ;;  %v3545_v29 = vshrl.u32 %v13882_v54, %v14050_v4 }
 0x3a5   : > { %7260 = vsinq.f32 %v3297_v22  ;;  %v3385_v1 = vsub.s32 32, %v3384_v35  ;;  %v3389_v28 = vsub.s32 4294967266, %v3384_v35  ;;  %v3399_v45 = vsub.s32 4, %v10817_v20 }
 0x3a6   : > { %v3386_v19 = vshll.u32 %v10836_v33, %v3384_v35  ;;  %v3478_v26 = vadd.s32 536870912, %v3477_v13  ;;  %v3529_v30 = vor.u32 8388608, %v3528_v38  ;;  %v3546_v56 = vor.u32 %v3545_v29, %v3544_v31 }
 0x3a7   : > { %v3387_v49 = vshrl.u32 %v3369_v24, %v3385_v1  ;;  %v3390_v52 = vadd.s32 127, %v3389_v28  ;;  %vm3553_vm7 = vcmp.lt.s32.totalorder %v10271_v40, 1  ;;  %vm3555_vm3 = vcmp.lt.s32.totalorder %v10271_v40, 3 }
 0x3a8   : > { %v3303_v3 = vand.u32 3, %v3302_v17  ;;  %v10912_v8 = vshrl.u32 %v3478_v26, 30  ;;  %v3561_v11 = vsel %vm3553_vm7, %v3540_v14, %v3543_v39  ;;  %v3563_v7 = vsel %vm3555_vm3, %v3546_v56, %v10540_v32 }
 0x3a9   : > { %v3388_v33 = vor.u32 %v3387_v49, %v3386_v19  ;;  %v3391_v61 = vshll.u32 %v3390_v52, 23  ;;  %v3400_v24 = vsel %vm3315_vm15, %v3399_v45, %v10817_v20  ;;  %v3537_v38 = vshrl.u32 %v13889_v9, %v14050_v4 }
 0x3aa   : > { %v3480_v17 = vshll.u32 %v10912_v8, 30  ;;  %vm3554_vm2 = vcmp.lt.s32.totalorder %v10271_v40, 2  ;;  %v3558_v60 = vsel %vm3556_vm9, %v3546_v56, 2102212464  ;;  %v3565_v47 = vsel %vm3553_vm7, %v3543_v39, %v3546_v56 }
 0x3ab   : > { %v3392_v32 = vor.u32 4788187, %v3391_v61  ;;  %v3564_v31 = vsel %vm3554_vm2, %v3561_v11, %v3563_v7  ;;  %v3567_v20 = vsel %vm3555_vm3, %v10414_v51, %v10558_v12  ;;  %v3569_v4 = vshll.u32 %v3529_v30, 8 }
 0x3ac   : > { %v3402_v22 = vsel %vm10902_vm5, 0, %v3400_v24  ;;  %v10938_v36 = vsub.s32 %v3477_v13, %v3480_v17  ;;  %v3557_v35 = vsel %vm3553_vm7, %v3537_v38, %v3540_v14  ;;  %v3568_v29 = vsel %vm3554_vm2, %v3565_v47, %v3567_v20 }
 0x3ad   : > { %v3393_v1 = vand.u32 2147483647, %v3392_v32  ;;  %v3395_v28 = vcvt.s32.f32 %v3388_v33  ;;  %v10944_v45 = vmul.u32.u64.low %v3569_v4, %v3568_v29  ;;  %v10945_v19 = vmul.u32.u64.high %v3569_v4, %v3568_v29, %v10944_v45  ;;  %v7259_v26 = vpop.eup %7258 }
 0x3ae   : > { %v3483_v51 = vsub.s32 0, %v10938_v36  ;;  %v3559_v12 = vsel %vm3555_vm3, %v3543_v39, %v3558_v60  ;;  %v10950_v30 = vmul.u32.u64.low %v3569_v4, %v3564_v31  ;;  %v10951_v13 = vmul.u32.u64.high %v3569_v4, %v3564_v31, %v10950_v30  ;;  %v14054_v31 = vld [vmem:[#allocation18_spill] sm:$0xff] }
 0x3af   : > { %v7261_v56 = vpop.eup %7260  ;;  %v10956_v14 = vshrl.u32 %v13883_v0, %v10870_v55  ;;  %vm3301_vm9 = vweird.f32 %v14027_v21  ;;  %v3309_v49 = vxor.u32 2147483648, %v7259_v26  ;;  %v3396_v52 = vmul.f32 %v3395_v28, %v3393_v1 }
 0x3b0   : > { %vm3305_vm8 = vcmp.eq.s32.totalorder %v3303_v3, 0  ;;  %v3306_v11 = vxor.u32 2147483648, %v7261_v56  ;;  %vm3308_vm13 = vcmp.eq.s32.totalorder %v3303_v3, 2  ;;  %v6415_v7 = vmin.u32 %v3483_v51, %v10938_v36  ;;  %v14057_v51 = vld [vmem:[#allocation12_spill] sm:$0xff] }
 0x3b1   : > { %v3310_v33 = vsel %vm3308_vm13, %v3309_v49, %v7261_v56  ;;  %v3397_v39 = vxor.u32 2147483648, %v3396_v52  ;;  %v3406_v61 = vadd.s32 3, %v3402_v22  ;;  %v3560_v24 = vsel %vm3554_vm2, %v3557_v35, %v3559_v12 }
 0x3b2   : > { %vm3304_vm6 = vcmp.lt.s32.totalorder %v3303_v3, 2  ;;  %v3307_v38 = vsel %vm3305_vm8, %v7259_v26, %v3306_v11  ;;  %vm3419_vm11 = vcmp.lt.s32.totalorder %v14040_v62, 0  ;;  %v3485_v17 = vclz %v6415_v7 }
 0x3b3   : > { %vm3578_vm14 = vc.u32 %v10945_v19, %v10950_v30  ;;  %v3311_v60 = vsel %vm3304_vm6, %v3307_v38, %v3310_v33  ;;  %v3398_v47 = vsel %vm3315_vm15, %v3397_v39, %v3396_v52  ;;  %v3579_v32 = vadd.s32 1, %v10951_v13 }
 0x3b4   : > { %v3625_v20 = vand.u32 2147483647, %v14054_v31  ;;  %v3312_v40 = vsel %vm3301_vm9, nan, %v3311_v60  ;;  %v3401_v3 = vsel %vm10902_vm5, %v14035_v6, %v3398_v47  ;;  %v6416_v22 = vadd.s32 4294967294, %v3485_v17 }
 0x3b5   : > { %v3576_v35 = vmul.u32 %v3569_v4, %v3560_v24  ;;  %6725 = vmatmul.mubr.f32.gmra.mrb[6].mxu1 %v3312_v40  ;;  %7262 = vcosq.f32 %v3401_v3  ;;  %v10974_v29 = vand.u32 3, %v3406_v61  ;;  %v3473_v1 = vadd.s32 %v10846_v50, %v10844_v59  ;;  %v14058_v50 = vld [vmem:[#allocation9_spill] sm:$0xff] }
 0x3b6   : > { %v3580_v28 = vsel %vm3578_vm14, %v3579_v32, %v10951_v13  ;;  %7264 = vsinq.f32 %v3401_v3  ;;  %vm10981_vm15 = vcmp.le.f32.partialorder %v3417_v58, 0.7853982  ;;  %vm6417_vm0 = vcmp.lt.s32.totalorder %v6416_v22, 0 }
 0x3b7   : > { %v3503_v23 = vsub.s32 4, %v10912_v8  ;;  %v3581_v4 = vadd.s32 %v3580_v28, %v3576_v35  ;;  %v3488_v45 = vsel %vm6417_vm0, 0, %v6416_v22  ;;  %v3632_v26 = vand.u32 8388607, %v3625_v20 }
 0x3b8   : > { %v3642_v59 = vshll.u32 %v13889_v9, %v14057_v51  ;;  %v3643_v12 = vshrl.u32 %v13880_v37, %v14058_v50  ;;  %v3489_v13 = vsub.s32 32, %v3488_v45  ;;  %v3493_v56 = vsub.s32 4294967266, %v3488_v45 }
 0x3b9   : > { %v3582_v58 = vadd.s32 536870912, %v3581_v4  ;;  %v3645_v49 = vshll.u32 %v13880_v37, %v14057_v51  ;;  %v3646_v11 = vshrl.u32 %v13881_v46, %v14058_v50  ;;  %v3648_v7 = vshll.u32 %v13881_v46, %v14057_v51 }
 0x3ba   : > { %v3644_v52 = vor.u32 %v3643_v12, %v3642_v59  ;;  %v3649_v33 = vshrl.u32 %v13882_v54, %v14058_v50  ;;  %v3490_v39 = vshll.u32 %v10938_v36, %v3488_v45  ;;  %v3491_v61 = vshrl.u32 %v3473_v1, %v3489_v13 }
 0x3bb   : > { %v3494_v24 = vadd.s32 127, %v3493_v56  ;;  %v11001_v38 = vshrl.u32 %v3582_v58, 30  ;;  %v3504_v17 = vsel %vm3419_vm11, %v3503_v23, %v10912_v8  ;;  %v3647_v60 = vor.u32 %v3646_v11, %v3645_v49  ;;  %v14059_v58 = vld [vmem:[#allocation21_spill] sm:$0xff] }
 0x3bc   : > { %v3650_v47 = vor.u32 %v3649_v33, %v3648_v7  ;;  %vm3657_vm5 = vcmp.lt.s32.totalorder %v10268_v41, 1  ;;  %vm3405_vm12 = vweird.f32 %v14035_v6  ;;  %v3492_v32 = vor.u32 %v3491_v61, %v3490_v39  ;;  %v14060_v49 = vld [vmem:[#allocation17_spill] sm:$0xff] }
 0x3bd   : > { %v3495_v40 = vshll.u32 %v3494_v24, 23  ;;  %v3584_v3 = vshll.u32 %v11001_v38, 30  ;;  %vm3659_vm7 = vcmp.lt.s32.totalorder %v10268_v41, 3  ;;  %vm3408_vm3 = vcmp.lt.s32.totalorder %v10974_v29, 2 }
 0x3be   : > { %v3633_v36 = vor.u32 8388608, %v3632_v26  ;;  %v3665_v22 = vsel %vm3657_vm5, %v3644_v52, %v3647_v60  ;;  %v3667_v8 = vsel %vm3659_vm7, %v3650_v47, %v10513_v27  ;;  %vm3409_vm2 = vcmp.eq.s32.totalorder %v10974_v29, 0 }
 0x3bf   : > { %v3496_v35 = vor.u32 4788187, %v3495_v40  ;;  %v11017_v1 = vsub.s32 %v3581_v4, %v3584_v3  ;;  %vm3658_vm9 = vcmp.lt.s32.totalorder %v10268_v41, 2  ;;  %v7263_v28 = vpop.eup %7262  ;;  %vm3412_vm8 = vcmp.eq.s32.totalorder %v10974_v29, 2 }
 0x3c0   : > { %v3499_v23 = vcvt.s32.f32 %v3492_v32  ;;  %v3506_v45 = vsel %vm10981_vm15, 0, %v3504_v17  ;;  %v3668_v26 = vsel %vm3658_vm9, %v3665_v22, %v3667_v8  ;;  %v7265_v51 = vpop.eup %7264  ;;  %v3413_v59 = vxor.u32 2147483648, %v7263_v28 }
 0x3c1   : > { %v3497_v27 = vand.u32 2147483647, %v3496_v35  ;;  %v3587_v12 = vsub.s32 0, %v11017_v1  ;;  %v3669_v4 = vsel %vm3657_vm5, %v3647_v60, %v3650_v47  ;;  %v3410_v13 = vxor.u32 2147483648, %v7265_v51 }
 0x3c2   : > { %v3641_v56 = vshrl.u32 %v13889_v9, %v14058_v50  ;;  %v3671_v11 = vsel %vm3659_vm7, %v14060_v49, %v14059_v58  ;;  %v3673_v7 = vshll.u32 %v3633_v36, 8  ;;  %v3414_v33 = vsel %vm3412_vm8, %v3413_v59, %v7265_v51 }
 0x3c3   : > { %v3500_v39 = vmul.f32 %v3499_v23, %v3497_v27  ;;  %v6419_v61 = vmin.u32 %v3587_v12, %v11017_v1  ;;  %v3662_v24 = vsel %vm3660_vm1, %v3650_v47, 2102212464  ;;  %v3411_v17 = vsel %vm3409_vm2, %v7263_v28, %v3410_v13 }
 0x3c4   : > { %v3672_v32 = vsel %vm3658_vm9, %v3669_v4, %v3671_v11  ;;  %v11041_v50 = vmul.u32.u64.low %v3673_v7, %v3668_v26  ;;  %v11042_v40 = vmul.u32.u64.high %v3673_v7, %v3668_v26, %v11041_v50  ;;  %v3415_v3 = vsel %vm3408_vm3, %v3411_v17, %v3414_v33 }
 0x3c5   : > { %v3501_v36 = vxor.u32 2147483648, %v3500_v39  ;;  %v3510_v22 = vadd.s32 3, %v3506_v45  ;;  %v3589_v8 = vclz %v6419_v61  ;;  %v3416_v35 = vsel %vm3405_vm12, nan, %v3415_v3  ;;  %v14066_v3 = vld [vmem:[#allocation16_spill] sm:$0xff] }
 0x3c6   : > { %v3607_v47 = vsub.s32 4, %v11001_v38  ;;  %v3661_v28 = vsel %vm3657_vm5, %v3641_v56, %v3644_v52  ;;  %v3663_v23 = vsel %vm3659_vm7, %v3647_v60, %v3662_v24  ;;  %6727 = vmatprep.mubr.f32.mxu1 %v3416_v35  ;;  %v14061_v45 = vmov 1326507024   ;;  %v14062_v52 = vld [vmem:[#allocation33_spill] sm:$0xff] }
 0x3c7   : > { %v3502_v26 = vsel %vm3419_vm11, %v3501_v36, %v3500_v39  ;;  %v6420_v29 = vadd.s32 4294967294, %v3589_v8  ;;  %v11056_v51 = vmul.u32.u64.low %v3673_v7, %v3672_v32  ;;  %v11057_v59 = vmul.u32.u64.high %v3673_v7, %v3672_v32, %v11056_v51  ;;  %v14065_v39 = vld [vmem:[#allocation26_spill] sm:$0xff] }
 0x3c8   : > { %v11061_v6 = vshrl.u32 %v14061_v45, %v10870_v55  ;;  %v3505_v27 = vsel %vm10981_vm15, %v14040_v62, %v3502_v26  ;;  %vm3523_vm1 = vcmp.lt.s32.totalorder %v14047_v63, 0  ;;  %v3729_v60 = vand.u32 2147483647, %v14062_v52 }
 0x3c9   : > { %7266 = vcosq.f32 %v3505_v27  ;;  %vm6421_vm13 = vcmp.lt.s32.totalorder %v6420_v29, 0  ;;  %v3664_v12 = vsel %vm3658_vm9, %v3661_v28, %v3663_v23  ;;  %v3683_v4 = vadd.s32 1, %v11042_v40 }
 0x3ca   : > { %7268 = vsinq.f32 %v3505_v27  ;;  %v3511_v13 = vand.u32 3, %v3510_v22  ;;  %vm11073_vm6 = vcmp.le.f32.partialorder %v3521_v2, 0.7853982  ;;  %v3592_v21 = vsel %vm6421_vm13, 0, %v6420_v29 }
 0x3cb   : > { %v3577_v58 = vadd.s32 %v10950_v30, %v10945_v19  ;;  %v3593_v49 = vsub.s32 32, %v3592_v21  ;;  %v3597_v11 = vsub.s32 4294967266, %v3592_v21  ;;  %v3608_v41 = vsel %vm3523_vm1, %v3607_v47, %v11001_v38 }
 0x3cc   : > { %v3680_v33 = vmul.u32 %v3673_v7, %v3664_v12  ;;  %vm3682_vm11 = vc.u32 %v11057_v59, %v11041_v50  ;;  %v3736_v2 = vand.u32 8388607, %v3729_v60  ;;  %v3747_v61 = vshrl.u32 %v13880_v37, %v14065_v39 }
 0x3cd   : > { %v3594_v24 = vshll.u32 %v11017_v1, %v3592_v21  ;;  %v3595_v17 = vshrl.u32 %v3577_v58, %v3593_v49  ;;  %v3598_v19 = vadd.s32 127, %v3597_v11  ;;  %v3684_v30 = vsel %vm3682_vm11, %v3683_v4, %v11042_v40 }
 0x3ce   : > { %vm3513_vm14 = vcmp.eq.s32.totalorder %v3511_v13, 0  ;;  %v3685_v32 = vadd.s32 %v3684_v30, %v3680_v33  ;;  %v3746_v38 = vshll.u32 %v13889_v9, %v14066_v3  ;;  %v3749_v7 = vshll.u32 %v13880_v37, %v14066_v3 }
 0x3cf   : > { %v3750_v36 = vshrl.u32 %v13881_v46, %v14065_v39  ;;  %vm3512_vm15 = vcmp.lt.s32.totalorder %v3511_v13, 2  ;;  %v3596_v22 = vor.u32 %v3595_v17, %v3594_v24  ;;  %v3599_v8 = vshll.u32 %v3598_v19, 23 }
 0x3d0   : > { %v3752_v1 = vshll.u32 %v13881_v46, %v14066_v3  ;;  %v3753_v40 = vshrl.u32 %v13882_v54, %v14065_v39  ;;  %vm3509_vm0 = vweird.f32 %v14040_v62  ;;  %vm3516_vm5 = vcmp.eq.s32.totalorder %v3511_v13, 2 }
 0x3d1   : > { %v3686_v35 = vadd.s32 536870912, %v3685_v32  ;;  %v3748_v47 = vor.u32 %v3747_v61, %v3746_v38  ;;  %v3751_v28 = vor.u32 %v3750_v36, %v3749_v7  ;;  %v3600_v23 = vor.u32 4788187, %v3599_v8 }
 0x3d2   : > { %v3610_v26 = vsel %vm11073_vm6, 0, %v3608_v41  ;;  %v3745_v29 = vshrl.u32 %v13889_v9, %v14065_v39  ;;  %v3754_v51 = vor.u32 %v3753_v40, %v3752_v1  ;;  %v3737_v12 = vor.u32 8388608, %v3736_v2 }
 0x3d3   : > { %v3687_v27 = vshrl.u32 %v3686_v35, 30  ;;  %vm3761_vm12 = vcmp.lt.s32.totalorder %v10575_v10, 1  ;;  %vm3763_vm7 = vcmp.lt.s32.totalorder %v10575_v10, 3  ;;  %v7267_v4 = vpop.eup %7266  ;;  %v3601_v21 = vand.u32 2147483647, %v3600_v23 }
 0x3d4   : > { %v3603_v58 = vcvt.s32.f32 %v3596_v22  ;;  %v3773_v49 = vsel %vm3761_vm12, %v3751_v28, %v3754_v51  ;;  %v3775_v11 = vsel %vm3763_vm7, %v10608_v5, %v10856_v25  ;;  %v7269_v41 = vpop.eup %7268  ;;  %v3517_v33 = vxor.u32 2147483648, %v7267_v4 }
 0x3d5   : > { %v3688_v39 = vshll.u32 %v3687_v27, 30  ;;  %vm3762_vm3 = vcmp.lt.s32.totalorder %v10575_v10, 2  ;;  %v3769_v2 = vsel %vm3761_vm12, %v3748_v47, %v3751_v28  ;;  %v3514_v61 = vxor.u32 2147483648, %v7269_v41 }
 0x3d6   : > { %v3604_v24 = vmul.f32 %v3603_v58, %v3601_v21  ;;  %v3766_v17 = vsel %vm3764_vm4, %v3754_v51, 2102212464  ;;  %v3771_v19 = vsel %vm3763_vm7, %v3754_v51, %v10765_v42  ;;  %v3518_v30 = vsel %vm3516_vm5, %v3517_v33, %v7269_v41  ;;  %v14067_v58 = vld [vmem:[#allocation32_spill] sm:$0xff] }
 0x3d7   : > { %v3614_v5 = vadd.s32 3, %v3610_v26  ;;  %v11122_v25 = vsub.s32 %v3685_v32, %v3688_v39  ;;  %v3776_v3 = vsel %vm3762_vm3, %v3773_v49, %v3775_v11  ;;  %v3515_v38 = vsel %vm3513_vm14, %v7267_v4, %v3514_v61 }
 0x3d8   : > { %v3605_v7 = vxor.u32 2147483648, %v3604_v24  ;;  %v3765_v36 = vsel %vm3761_vm12, %v3745_v29, %v3748_v47  ;;  %v3777_v22 = vshll.u32 %v3737_v12, 8  ;;  %v3519_v8 = vsel %vm3512_vm15, %v3515_v38, %v3518_v30 }
 0x3d9   : > { %v3691_v1 = vsub.s32 0, %v11122_v25  ;;  %v3767_v42 = vsel %vm3763_vm7, %v3751_v28, %v3766_v17  ;;  %v3772_v32 = vsel %vm3762_vm3, %v3769_v2, %v3771_v19  ;;  %v3520_v40 = vsel %vm3509_vm0, nan, %v3519_v8  ;;  %v14070_v2 = vld [vmem:[#allocation11_spill] sm:$0xff] }
 0x3da   : > { %v3606_v35 = vsel %vm3523_vm1, %v3605_v7, %v3604_v24  ;;  %v11139_v23 = vmul.u32.u64.low %v3777_v22, %v3776_v3  ;;  %v11140_v26 = vmul.u32.u64.high %v3777_v22, %v3776_v3, %v11139_v23  ;;  %v11144_v13 = vshll.u32 %v13883_v0, %v10773_v34  ;;  %6728 = vmatmul.mubr.f32.gmra.mrb[8].mxu1 %v3520_v40  ;;  %v14071_v24 = vld [vmem:[#allocation22_spill] sm:$0xff] }
 0x3db   : > { %v3609_v47 = vsel %vm11073_vm6, %v14047_v63, %v3606_v35  ;;  %v6423_v28 = vmin.u32 %v3691_v1, %v11122_v25  ;;  %v3711_v29 = vsub.s32 4, %v3687_v27  ;;  %v11150_v62 = vand.u32 3, %v3614_v5 }
 0x3dc   : > { %7270 = vcosq.f32 %v3609_v47  ;;  %v11152_v51 = vmul.u32.u64.low %v3777_v22, %v3772_v32  ;;  %v11153_v12 = vmul.u32.u64.high %v3777_v22, %v3772_v32, %v11152_v51  ;;  %v3768_v21 = vsel %vm3762_vm3, %v3765_v36, %v3767_v42 }
 0x3dd   : > { %7272 = vsinq.f32 %v3609_v47  ;;  %v3693_v4 = vclz %v6423_v28  ;;  %v3833_v49 = vand.u32 2147483647, %v14067_v58  ;;  %v11161_v56 = vshll.u32 %v13883_v0, %v10770_v48 }
 0x3de   : > { %v11165_v11 = vor.u32 %v10956_v14, %v10874_v18  ;;  %v3968_v41 = vor.u32 %v11061_v6, %v11144_v13  ;;  %vm3627_vm4 = vcmp.lt.s32.totalorder %v14054_v31, 0  ;;  %vm11172_vm2 = vcmp.le.f32.partialorder %v3625_v20, 0.7853982 }
 0x3df   : > { %v6424_v33 = vadd.s32 4294967294, %v3693_v4  ;;  %v3712_v39 = vsel %vm3627_vm4, %v3711_v29, %v3687_v27  ;;  %vm3786_vm9 = vc.u32 %v11140_v26, %v11152_v51  ;;  %vm3620_vm8 = vcmp.eq.s32.totalorder %v11150_v62, 2 }
 0x3e0   : > { %v3784_v18 = vmul.u32 %v3777_v22, %v3768_v21  ;;  %v3787_v14 = vadd.s32 1, %v11153_v12  ;;  %v3851_v61 = vshrl.u32 %v13880_v37, %v14070_v2  ;;  %v3854_v20 = vshrl.u32 %v13881_v46, %v14070_v2 }
 0x3e1   : > { %vm3617_vm1 = vcmp.eq.s32.totalorder %v11150_v62, 0  ;;  %vm6425_vm13 = vcmp.lt.s32.totalorder %v6424_v33, 0  ;;  %v3840_v27 = vand.u32 8388607, %v3833_v49  ;;  %v3850_v17 = vshll.u32 %v13889_v9, %v14071_v24 }
 0x3e2   : > { %v3857_v19 = vshrl.u32 %v13882_v54, %v14070_v2  ;;  %vm3616_vm6 = vcmp.lt.s32.totalorder %v11150_v62, 2  ;;  %v3696_v30 = vsel %vm6425_vm13, 0, %v6424_v33  ;;  %v3788_v5 = vsel %vm3786_vm9, %v3787_v14, %v11153_v12 }
 0x3e3   : > { %v3853_v3 = vshll.u32 %v13880_v37, %v14071_v24  ;;  %v3856_v38 = vshll.u32 %v13881_v46, %v14071_v24  ;;  %vm3613_vm11 = vweird.f32 %v14047_v63  ;;  %v3681_v7 = vadd.s32 %v11041_v50, %v11057_v59 }
 0x3e4   : > { %v3697_v36 = vsub.s32 32, %v3696_v30  ;;  %v3701_v22 = vsub.s32 4294967266, %v3696_v30  ;;  %v3789_v8 = vadd.s32 %v3788_v5, %v3784_v18  ;;  %v3714_v1 = vsel %vm11172_vm2, 0, %v3712_v39 }
 0x3e5   : > { %v3852_v42 = vor.u32 %v3851_v61, %v3850_v17  ;;  %v3855_v32 = vor.u32 %v3854_v20, %v3853_v3  ;;  %v3858_v40 = vor.u32 %v3857_v19, %v3856_v38  ;;  %v3698_v35 = vshll.u32 %v11122_v25, %v3696_v30  ;;  %v14073_v17 = vld [vmem:[#allocation13_spill] sm:$0xff] }
 0x3e6   : > { %v3699_v23 = vshrl.u32 %v3681_v7, %v3697_v36  ;;  %v3702_v47 = vadd.s32 127, %v3701_v22  ;;  %v3790_v28 = vadd.s32 536870912, %v3789_v8  ;;  %v7271_v29 = vpop.eup %7270  ;;  %v3841_v12 = vor.u32 8388608, %v3840_v27  ;;  %v11237_v22 = vpop.f32.mrb[0].mxu1 }
 0x3e7   : > { %v3849_v4 = vshrl.u32 %v13889_v9, %v14070_v2  ;;  %vm3865_vm14 = vcmp.lt.s32.totalorder %v10569_v15, 1  ;;  %vm3867_vm15 = vcmp.lt.s32.totalorder %v10569_v15, 3  ;;  %v7273_v50 = vpop.eup %7272  ;;  %vm3972_vm0 = vcmp.lt.s32.totalorder %v10862_v53, 4  ;;  %v14072_v2 = vld [vmem:[#allocation29_spill] sm:$0xff] }
 0x3e8   : > { %v3621_v59 = vxor.u32 2147483648, %v7271_v29  ;;  %v3700_v21 = vor.u32 %v3699_v23, %v3698_v35  ;;  %v3703_v33 = vshll.u32 %v3702_v47, 23  ;;  %v11210_v39 = vshrl.u32 %v3790_v28, 30 }
 0x3e9   : > { %v3618_v25 = vxor.u32 2147483648, %v7273_v50  ;;  %v3873_v18 = vsel %vm3865_vm14, %v3852_v42, %v3855_v32  ;;  %v3877_v14 = vsel %vm3865_vm14, %v3855_v32, %v3858_v40  ;;  %v3879_v61 = vsel %vm3867_vm15, %v14072_v2, %v10756_v16 }
 0x3ea   : > { %v3622_v20 = vsel %vm3620_vm8, %v3621_v59, %v7273_v50  ;;  %v3704_v27 = vor.u32 4788187, %v3703_v33  ;;  %v3792_v24 = vshll.u32 %v11210_v39, 30  ;;  %v3875_v19 = vsel %vm3867_vm15, %v3858_v40, %v14073_v17 }
 0x3eb   : > { %v3619_v30 = vsel %vm3617_vm1, %v7271_v29, %v3618_v25  ;;  %v3707_v5 = vcvt.s32.f32 %v3700_v21  ;;  %vm3866_vm5 = vcmp.lt.s32.totalorder %v10569_v15, 2  ;;  %v3870_v3 = vsel %vm3868_vm10, %v3858_v40, 2102212464  ;;  %v11243_v40 = vpop.f32.mrb[1].mxu1 }
 0x3ec   : > { %v3623_v16 = vsel %vm3616_vm6, %v3619_v30, %v3622_v20  ;;  %v3705_v38 = vand.u32 2147483647, %v3704_v27  ;;  %v11233_v7 = vsub.s32 %v3789_v8, %v3792_v24  ;;  %v3880_v36 = vsel %vm3866_vm5, %v3877_v14, %v3879_v61 }
 0x3ed   : > { %v3624_v35 = vsel %vm3613_vm11, nan, %v3623_v16  ;;  %v3718_v23 = vadd.s32 3, %v3714_v1  ;;  %v3876_v47 = vsel %vm3866_vm5, %v3873_v18, %v3875_v19  ;;  %v3881_v28 = vshll.u32 %v3841_v12, 8  ;;  %v14074_v12 = vld [vmem:[#allocation8_spill] sm:$0xff] }
 0x3ee   : > { %v11247_v62 = vshrl.u32 %v13883_v0, %v10859_v57  ;;  %6730 = vmatprep.mubr.f32.mxu1 %v3624_v35  ;;  %v3708_v8 = vmul.f32 %v3707_v5, %v3705_v38  ;;  %v3795_v29 = vsub.s32 0, %v11233_v7  ;;  %v3869_v50 = vsel %vm3865_vm14, %v3849_v4, %v3852_v42 }
 0x3ef   : > { %v3871_v63 = vsel %vm3867_vm15, %v3855_v32, %v3870_v3  ;;  %v11254_v1 = vmul.u32.u64.low %v3881_v28, %v3880_v36  ;;  %v11255_v59 = vmul.u32.u64.high %v3881_v28, %v3880_v36, %v11254_v1  ;;  %v3937_v21 = vand.u32 2147483647, %v14074_v12 }
 0x3f0   : > { %v3709_v33 = vxor.u32 2147483648, %v3708_v8  ;;  %v6427_v25 = vmin.u32 %v3795_v29, %v11233_v7  ;;  %v11259_v18 = vmul.u32.u64.low %v3881_v28, %v3876_v47  ;;  %v11260_v14 = vmul.u32.u64.high %v3881_v28, %v3876_v47, %v11259_v18 }
 0x3f1   : > { %v11265_v2 = vshrl.u32 %v14061_v45, %v10859_v57  ;;  %v3978_v42 = vsel %vm3972_vm0, %v11165_v11, 920167782  ;;  %v3982_v32 = vsel %vm3972_vm0, %v3968_v41, 1326507024  ;;  %v11275_v4 = vand.u32 3, %v3718_v23 }
 0x3f2   : > { %v3710_v61 = vsel %vm3627_vm4, %v3709_v33, %v3708_v8  ;;  %v3797_v20 = vclz %v6427_v25  ;;  %v3872_v27 = vsel %vm3866_vm5, %v3869_v50, %v3871_v63  ;;  %v3955_v24 = vshrl.u32 %v13880_v37, %v10870_v55 }
 0x3f3   : > { %v3713_v17 = vsel %vm11172_vm2, %v14054_v31, %v3710_v61  ;;  %v3785_v6 = vadd.s32 %v11152_v51, %v11140_v26  ;;  %v3815_v13 = vsub.s32 4, %v11210_v39  ;;  %v3944_v41 = vand.u32 8388607, %v3937_v21 }
 0x3f4   : > { %7274 = vcosq.f32 %v3713_v17  ;;  %vm3731_vm10 = vcmp.lt.s32.totalorder %v14062_v52, 0  ;;  %v6428_v15 = vadd.s32 4294967294, %v3797_v20  ;;  %vm3890_vm12 = vc.u32 %v11255_v59, %v11259_v18 }
 0x3f5   : > { %v3954_v19 = vshll.u32 %v13889_v9, %v10773_v34  ;;  %7276 = vsinq.f32 %v3713_v17  ;;  %v3888_v10 = vmul.u32 %v3881_v28, %v3872_v27  ;;  %v3891_v30 = vadd.s32 1, %v11260_v14 }
 0x3f6   : > { %v3953_v26 = vshrl.u32 %v13889_v9, %v10870_v55  ;;  %vm6429_vm7 = vcmp.lt.s32.totalorder %v6428_v15, 0  ;;  %v3957_v5 = vshll.u32 %v13880_v37, %v10773_v34  ;;  %v3958_v3 = vshrl.u32 %v13881_v46, %v10870_v55 }
 0x3f7   : > { %v3956_v51 = vor.u32 %v3955_v24, %v3954_v19  ;;  %v3800_v16 = vsel %vm6429_vm7, 0, %v6428_v15  ;;  %v3892_v38 = vsel %vm3890_vm12, %v3891_v30, %v11260_v14  ;;  %v3960_v36 = vshll.u32 %v13881_v46, %v10773_v34 }
 0x3f8   : > { %v3961_v35 = vshrl.u32 %v13882_v54, %v10870_v55  ;;  %vm3724_vm3 = vcmp.eq.s32.totalorder %v11275_v4, 2  ;;  %v3801_v23 = vsub.s32 32, %v3800_v16  ;;  %v3805_v47 = vsub.s32 4294967266, %v3800_v16 }
 0x3f9   : > { %v3893_v28 = vadd.s32 %v3892_v38, %v3888_v10  ;;  %v3945_v8 = vor.u32 8388608, %v3944_v41  ;;  %v3802_v29 = vshll.u32 %v11233_v7, %v3800_v16  ;;  %v3959_v50 = vor.u32 %v3958_v3, %v3957_v5 }
 0x3fa   : > { %v3962_v63 = vor.u32 %v3961_v35, %v3960_v36  ;;  %vm3969_vm4 = vcmp.lt.s32.totalorder %v10862_v53, 1  ;;  %vm11313_vm2 = vcmp.le.f32.partialorder %v3729_v60, 0.7853982  ;;  %v3803_v34 = vshrl.u32 %v3785_v6, %v3801_v23 }
 0x3fb   : > { %v3806_v55 = vadd.s32 127, %v3805_v47  ;;  %v3894_v33 = vadd.s32 536870912, %v3893_v28  ;;  %vm3971_vm9 = vcmp.lt.s32.totalorder %v10862_v53, 3  ;;  %vm3717_vm8 = vweird.f32 %v14054_v31 }
 0x3fc   : > { %vm3970_vm1 = vcmp.lt.s32.totalorder %v10862_v53, 2  ;;  %v3974_v7 = vsel %vm3972_vm0, %v3962_v63, 2102212464  ;;  %v3977_v25 = vsel %vm3969_vm4, %v3956_v51, %v3959_v50  ;;  %v3979_v60 = vsel %vm3971_vm9, %v3962_v63, %v3978_v42 }
 0x3fd   : > { %v3804_v14 = vor.u32 %v3803_v34, %v3802_v29  ;;  %v3807_v61 = vshll.u32 %v3806_v55, 23  ;;  %v11326_v20 = vshrl.u32 %v3894_v33, 30  ;;  %v3981_v27 = vsel %vm3969_vm4, %v3959_v50, %v3962_v63 }
 0x3fe   : > { %v3816_v24 = vsel %vm3731_vm10, %v3815_v13, %v11210_v39  ;;  %v3980_v17 = vsel %vm3970_vm1, %v3977_v25, %v3979_v60  ;;  %v3983_v6 = vsel %vm3971_vm9, %v11165_v11, %v3982_v32  ;;  %v3985_v41 = vshll.u32 %v3945_v8, 8  ;;  %v7275_v42 = vpop.eup %7274 }
 0x3ff   : > { %v3808_v15 = vor.u32 4788187, %v3807_v61  ;;  %v3896_v19 = vshll.u32 %v11326_v20, 30  ;;  %v3973_v10 = vsel %vm3969_vm4, %v3953_v26, %v3956_v51  ;;  %v3975_v30 = vsel %vm3971_vm9, %v3959_v50, %v3974_v7  ;;  %v7277_v5 = vpop.eup %7276 }
 0x400   : > { %v3725_v39 = vxor.u32 2147483648, %v7275_v42  ;;  %v3984_v13 = vsel %vm3970_vm1, %v3981_v27, %v3983_v6  ;;  %v11345_v3 = vmul.u32.u64.low %v3985_v41, %v3980_v17  ;;  %v11346_v16 = vmul.u32.u64.high %v3985_v41, %v3980_v17, %v11345_v3 }
 0x401   : > { %v3722_v11 = vxor.u32 2147483648, %v7277_v5  ;;  %v3809_v32 = vand.u32 2147483647, %v3808_v15  ;;  %v3811_v38 = vcvt.s32.f32 %v3804_v14  ;;  %v11349_v36 = vsub.s32 %v3893_v28, %v3896_v19 }
 0x402   : > { %vm3721_vm13 = vcmp.eq.s32.totalorder %v11275_v4, 0  ;;  %v3726_v26 = vsel %vm3724_vm3, %v3725_v39, %v7277_v5  ;;  %v11354_v51 = vmul.u32.u64.low %v3985_v41, %v3984_v13  ;;  %v11355_v35 = vmul.u32.u64.high %v3985_v41, %v3984_v13, %v11354_v51 }
 0x403   : > { %vm3720_vm6 = vcmp.lt.s32.totalorder %v11275_v4, 2  ;;  %v3723_v23 = vsel %vm3721_vm13, %v7275_v42, %v3722_v11  ;;  %v3812_v47 = vmul.f32 %v3811_v38, %v3809_v32  ;;  %v3899_v8 = vsub.s32 0, %v11349_v36 }
 0x404   : > { %v3727_v29 = vsel %vm3720_vm6, %v3723_v23, %v3726_v26  ;;  %v3818_v50 = vsel %vm11313_vm2, 0, %v3816_v24  ;;  %v3976_v28 = vsel %vm3970_vm1, %v3973_v10, %v3975_v30  ;;  %v3995_v63 = vadd.s32 1, %v11346_v16 }
 0x405   : > { %v11365_v34 = vshrl.u32 %v10675_v44, 5  ;;  %v3728_v55 = vsel %vm3717_vm8, nan, %v3727_v29  ;;  %v3813_v4 = vxor.u32 2147483648, %v3812_v47  ;;  %v6431_v33 = vmin.u32 %v3899_v8, %v11349_v36 }
 0x406   : > { %v11372_v7 = vor.u32 %v11247_v62, %v10867_v43  ;;  %v4072_v25 = vor.u32 %v11265_v2, %v11161_v56  ;;  %6731 = vmatmul.mubr.f32.gmra.mrb[10].mxu1 %v3728_v55  ;;  %vm3994_vm11 = vc.u32 %v11355_v35, %v11345_v3  ;;  %v3822_v53 = vadd.s32 3, %v3818_v50  ;;  %v14077_v62 = vld [vmem:[#allocation6_spill] sm:$0xff] }
 0x407   : > { %v3814_v44 = vsel %vm3731_vm10, %v3813_v4, %v3812_v47  ;;  %v3901_v31 = vclz %v6431_v33  ;;  %v3992_v60 = vmul.u32 %v3985_v41, %v3976_v28  ;;  %v3996_v43 = vsel %vm3994_vm11, %v3995_v63, %v11346_v16 }
 0x408   : > { %v3817_v14 = vsel %vm11313_vm2, %v14062_v52, %v3814_v44  ;;  %v4041_v61 = vand.u32 2147483647, %v14077_v62  ;;  %vm4076_vm14 = vcmp.lt.s32.totalorder %v11365_v34, 4  ;;  %v4059_v1 = vshrl.u32 %v13880_v37, %v10859_v57 }
 0x409   : > { %7278 = vcosq.f32 %v3817_v14  ;;  %v6432_v56 = vadd.s32 4294967294, %v3901_v31  ;;  %v3997_v2 = vadd.s32 %v3996_v43, %v3992_v60  ;;  %v4082_v27 = vsel %vm4076_vm14, %v11372_v7, 920167782 }
 0x40a   : > { %v4086_v24 = vsel %vm4076_vm14, %v4072_v25, 1326507024  ;;  %7280 = vsinq.f32 %v3817_v14  ;;  %v3823_v17 = vand.u32 3, %v3822_v53  ;;  %v3889_v6 = vadd.s32 %v11259_v18, %v11255_v59 }
 0x40b   : > { %vm6433_vm15 = vcmp.lt.s32.totalorder %v6432_v56, 0  ;;  %v3998_v41 = vadd.s32 536870912, %v3997_v2  ;;  %v4048_v15 = vand.u32 8388607, %v4041_v61  ;;  %v4058_v19 = vshll.u32 %v13889_v9, %v10770_v48 }
 0x40c   : > { %v3904_v42 = vsel %vm6433_vm15, 0, %v6432_v56  ;;  %v4062_v10 = vshrl.u32 %v13881_v46, %v10859_v57  ;;  %v4061_v13 = vshll.u32 %v13880_v37, %v10770_v48  ;;  %v4064_v16 = vshll.u32 %v13881_v46, %v10770_v48 }
 0x40d   : > { %v3905_v30 = vsub.s32 32, %v3904_v42  ;;  %v3909_v5 = vsub.s32 4294967266, %v3904_v42  ;;  %v11401_v39 = vshrl.u32 %v3998_v41, 30  ;;  %v3906_v59 = vshll.u32 %v11349_v36, %v3904_v42 }
 0x40e   : > { %v4060_v18 = vor.u32 %v4059_v1, %v4058_v19  ;;  %v4065_v11 = vshrl.u32 %v13882_v54, %v10859_v57  ;;  %v4063_v51 = vor.u32 %v4062_v10, %v4061_v13  ;;  %vm3821_vm0 = vweird.f32 %v14062_v52 }
 0x40f   : > { %v3907_v32 = vshrl.u32 %v3889_v6, %v3905_v30  ;;  %v3910_v38 = vadd.s32 127, %v3909_v5  ;;  %v4000_v26 = vshll.u32 %v11401_v39, 30  ;;  %vm3824_vm5 = vcmp.lt.s32.totalorder %v3823_v17, 2 }
 0x410   : > { %vm3828_vm10 = vcmp.eq.s32.totalorder %v3823_v17, 2  ;;  %vm3835_vm12 = vcmp.lt.s32.totalorder %v14067_v58, 0  ;;  %v4066_v23 = vor.u32 %v4065_v11, %v4064_v16  ;;  %v3919_v8 = vsub.s32 4, %v11326_v20 }
 0x411   : > { %v3908_v36 = vor.u32 %v3907_v32, %v3906_v59  ;;  %v3911_v47 = vshll.u32 %v3910_v38, 23  ;;  %v11414_v48 = vsub.s32 %v3997_v2, %v4000_v26  ;;  %v4049_v29 = vor.u32 8388608, %v4048_v15 }
 0x412   : > { %vm4073_vm7 = vcmp.lt.s32.totalorder %v11365_v34, 1  ;;  %vm4074_vm3 = vcmp.lt.s32.totalorder %v11365_v34, 2  ;;  %vm4075_vm4 = vcmp.lt.s32.totalorder %v11365_v34, 3  ;;  %vm11421_vm2 = vcmp.le.f32.partialorder %v3833_v49, 0.7853982 }
 0x413   : > { %v7279_v50 = vpop.eup %7278  ;;  %v3912_v63 = vor.u32 4788187, %v3911_v47  ;;  %v4003_v55 = vsub.s32 0, %v11414_v48  ;;  %v4081_v4 = vsel %vm4073_vm7, %v4060_v18, %v4063_v51  ;;  %v4083_v33 = vsel %vm4075_vm4, %v4066_v23, %v4082_v27 }
 0x414   : > { %v7281_v25 = vpop.eup %7280  ;;  %v3829_v44 = vxor.u32 2147483648, %v7279_v50  ;;  %v4078_v53 = vsel %vm4076_vm14, %v4066_v23, 2102212464  ;;  %v4085_v49 = vsel %vm4073_vm7, %v4063_v51, %v4066_v23  ;;  %v4087_v31 = vsel %vm4075_vm4, %v11372_v7, %v4086_v24 }
 0x415   : > { %v3826_v60 = vxor.u32 2147483648, %v7281_v25  ;;  %v3913_v14 = vand.u32 2147483647, %v3912_v63  ;;  %v3915_v43 = vcvt.s32.f32 %v3908_v36  ;;  %v6435_v56 = vmin.u32 %v4003_v55, %v11414_v48 }
 0x416   : > { %vm3825_vm9 = vcmp.eq.s32.totalorder %v3823_v17, 0  ;;  %v3830_v2 = vsel %vm3828_vm10, %v3829_v44, %v7281_v25  ;;  %v4057_v27 = vshrl.u32 %v13889_v9, %v10859_v57  ;;  %v4084_v1 = vsel %vm4074_vm3, %v4081_v4, %v4083_v33  ;;  %v11453_v57 = vld [vmem:[%s13663_s4 + $0x1] ss:$0 sm:$0xff] }
 0x417   : > { %v3827_v6 = vsel %vm3825_vm9, %v7279_v50, %v3826_v60  ;;  %v3916_v41 = vmul.f32 %v3915_v43, %v3913_v14  ;;  %v4005_v42 = vclz %v6435_v56  ;;  %v4088_v7 = vsel %vm4074_vm3, %v4085_v49, %v4087_v31 }
 0x418   : > { %v3831_v24 = vsel %vm3824_vm5, %v3827_v6, %v3830_v2  ;;  %v4077_v15 = vsel %vm4073_vm7, %v4057_v27, %v4060_v18  ;;  %v4079_v19 = vsel %vm4075_vm4, %v4063_v51, %v4078_v53  ;;  %v4089_v10 = vshll.u32 %v4049_v29, 8 }
 0x419   : > { %v3832_v30 = vsel %vm3821_vm0, nan, %v3831_v24  ;;  %v3917_v5 = vxor.u32 2147483648, %v3916_v41  ;;  %v3920_v17 = vsel %vm3835_vm12, %v3919_v8, %v11326_v20  ;;  %v6436_v13 = vadd.s32 4294967294, %v4005_v42 }
 0x41a   : > { %6733 = vmatprep.mubr.f32.mxu1 %v3832_v30  ;;  %v11460_v59 = vmul.u32.u64.low %v4089_v10, %v4088_v7  ;;  %v11461_v18 = vmul.u32.u64.high %v4089_v10, %v4088_v7, %v11460_v59  ;;  %v11463_v16 = vmul.u32.u64.low %v4089_v10, %v4084_v1  ;;  %v11464_v11 = vmul.u32.u64.high %v4089_v10, %v4084_v1, %v11463_v16 }
 0x41b   : > { %v3918_v32 = vsel %vm3835_vm12, %v3917_v5, %v3916_v41  ;;  %vm6437_vm8 = vcmp.lt.s32.totalorder %v6436_v13, 0  ;;  %v4080_v52 = vsel %vm4074_vm3, %v4077_v15, %v4079_v19  ;;  %v4242_v38 = vadd.f32 %v11237_v22, %v11453_v57 }
 0x41c   : > { %v3921_v20 = vsel %vm11421_vm2, %v14067_v58, %v3918_v32  ;;  %v3922_v26 = vsel %vm11421_vm2, 0, %v3920_v17  ;;  %v4008_v51 = vsel %vm6437_vm8, 0, %v6436_v13  ;;  %v3993_v23 = vadd.s32 %v11345_v3, %v11355_v35 }
 0x41d   : > { %7282 = vcosq.f32 %v3921_v20  ;;  %v4009_v36 = vsub.s32 32, %v4008_v51  ;;  %v4013_v47 = vsub.s32 4294967266, %v4008_v51  ;;  %v4096_v34 = vmul.u32 %v4089_v10, %v4080_v52 }
 0x41e   : > { %7284 = vsinq.f32 %v3921_v20  ;;  %vm4098_vm1 = vc.u32 %v11461_v18, %v11463_v16  ;;  %v4099_v22 = vadd.s32 1, %v11464_v11  ;;  %v4010_v8 = vshll.u32 %v11414_v48, %v4008_v51 }
 0x41f   : > { %v4011_v29 = vshrl.u32 %v3993_v23, %v4009_v36  ;;  %v4014_v50 = vadd.s32 127, %v4013_v47  ;;  %v4316_v28 = vand.u32 2147483647, %v4242_v38  ;;  %v3926_v63 = vadd.s32 3, %v3922_v26 }
 0x420   : > { %v4023_v55 = vsub.s32 4, %v11401_v39  ;;  %v4100_v4 = vsel %vm4098_vm1, %v4099_v22, %v11464_v11  ;;  %vm3939_vm13 = vcmp.lt.s32.totalorder %v14074_v12, 0  ;;  %vm11496_vm6 = vcmp.le.f32.partialorder %v3937_v21, 0.7853982 }
 0x421   : > { %v4012_v3 = vor.u32 %v4011_v29, %v4010_v8  ;;  %v4015_v35 = vshll.u32 %v4014_v50, 23  ;;  %v4101_v33 = vadd.s32 %v4100_v4, %v4096_v34  ;;  %v4332_v25 = vadd.f32 1.0, %v4316_v28 }
 0x422   : > { %v3927_v31 = vand.u32 3, %v3926_v63  ;;  %v4024_v48 = vsel %vm3939_vm13, %v4023_v55, %v11401_v39  ;;  %vm3925_vm11 = vweird.f32 %v14067_v58  ;;  %v4097_v58 = vadd.s32 %v11463_v16, %v11461_v18 }
 0x423   : > { %v4016_v44 = vor.u32 4788187, %v4015_v35  ;;  %v4102_v53 = vadd.s32 536870912, %v4101_v33  ;;  %v4348_v49 = vmul.f32 30.0, %v4332_v25  ;;  %v4019_v14 = vcvt.s32.f32 %v4012_v3 }
 0x424   : > { %v4026_v42 = vsel %vm11496_vm6, 0, %v4024_v48  ;;  %vm3932_vm14 = vcmp.eq.s32.totalorder %v3927_v31, 2  ;;  %vm3928_vm15 = vcmp.lt.s32.totalorder %v3927_v31, 2  ;;  %vm3929_vm0 = vcmp.eq.s32.totalorder %v3927_v31, 0 }
 0x425   : > { %v4017_v60 = vand.u32 2147483647, %v4016_v44  ;;  %v11490_v43 = vshrl.u32 %v4102_v53, 30  ;;  %v11492_v56 = vmul.f32 %v4348_v49, %v4242_v38  ;;  %v4030_v17 = vadd.s32 3, %v4026_v42 }
 0x426   : > { %v11507_v59 = vpop.f32.mrb[2].mxu1  ;;  %vm4029_vm3 = vweird.f32 %v14074_v12 }
 0x427   : > { %v7283_v2 = vpop.eup %7282  ;;  %v4020_v1 = vmul.f32 %v4019_v14, %v4017_v60  ;;  %v4104_v6 = vshll.u32 %v11490_v43, 30  ;;  %v4486_v7 = vand.u32 2139095040, %v11492_v56  ;;  %v4483_v52 = vand.u32 2147483647, %v11492_v56  ;;  %v11513_v20 = vpop.f32.mrb[3].mxu1 }
 0x428   : > { %v7285_v41 = vpop.eup %7284  ;;  %v3933_v39 = vxor.u32 2147483648, %v7283_v2  ;;  %v4031_v36 = vand.u32 3, %v4030_v17 }
 0x429   : > { %v3930_v24 = vxor.u32 2147483648, %v7285_v41  ;;  %v4021_v15 = vxor.u32 2147483648, %v4020_v1  ;;  %v4105_v19 = vsub.s32 %v4101_v33, %v4104_v6  ;;  %v4487_v10 = vshrl.u32 %v4486_v7, 23 }
 0x42a   : > { %v3934_v21 = vsel %vm3932_vm14, %v3933_v39, %v7285_v41  ;;  %v4490_v34 = vand.u32 8388607, %v4483_v52  ;;  %vm4033_vm10 = vcmp.eq.s32.totalorder %v4031_v36, 0  ;;  %vm4036_vm12 = vcmp.eq.s32.totalorder %v4031_v36, 2 }
 0x42b   : > { %v3931_v30 = vsel %vm3929_vm0, %v7283_v2, %v3930_v24  ;;  %v4022_v5 = vsel %vm3939_vm13, %v4021_v15, %v4020_v1  ;;  %v4107_v13 = vsub.s32 0, %v4105_v19  ;;  %v6464_v38 = vadd.s32 4294967169, %v4487_v10 }
 0x42c   : > { %v3935_v11 = vsel %vm3928_vm15, %v3931_v30, %v3934_v21  ;;  %v4025_v32 = vsel %vm11496_vm6, %v14074_v12, %v4022_v5  ;;  %v4491_v28 = vor.u32 8388608, %v4490_v34  ;;  %vm4032_vm4 = vcmp.lt.s32.totalorder %v4031_v36, 2 }
 0x42d   : > { %v3936_v26 = vsel %vm3925_vm11, nan, %v3935_v11  ;;  %7286 = vcosq.f32 %v4025_v32  ;;  %v6439_v51 = vmin.u32 %v4107_v13, %v4105_v19  ;;  %v4493_v23 = vadd.s32 1, %v6464_v38 }
 0x42e   : > { %6734 = vmatmul.mubr.f32.gmra.mrb[12].mxu1 %v3936_v26  ;;  %7288 = vsinq.f32 %v4025_v32  ;;  %v4127_v5 = vsub.s32 4, %v11490_v43  ;;  %v4531_v11 = vshll.u32 %v4491_v28, 8  ;;  %vm4043_vm13 = vcmp.lt.s32.totalorder %v14077_v62, 0 }
 0x42f   : > { %v4109_v47 = vclz %v6439_v51  ;;  %vm4494_vm5 = vcmp.gt.s32.totalorder %v4493_v23, 0  ;;  %vm4042_vm6 = vcmp.le.f32.partialorder %v4041_v61, 0.7853982 }
 0x430   : > { %v4495_v8 = vsel %vm4494_vm5, %v4493_v23, 0  ;;  %vm4133_vm5 = vweird.f32 %v14077_v62 }
 0x431   : > { %v6440_v22 = vadd.s32 4294967294, %v4109_v47  ;;  %v4497_v29 = vand.u32 31, %v4495_v8  ;;  %v11522_v63 = vshrl.u32 %v4495_v8, 5 }
 0x433   : > { %vm6441_vm7 = vcmp.lt.s32.totalorder %v6440_v22, 0  ;;  %v4498_v55 = vsub.s32 32, %v4497_v29  ;;  %v4500_v35 = vshll.u32 %v13889_v9, %v4497_v29  ;;  %v4503_v33 = vshll.u32 %v13880_v37, %v4497_v29 }
 0x434   : > { %v4112_v50 = vsel %vm6441_vm7, 0, %v6440_v22  ;;  %v4506_v48 = vshll.u32 %v13881_v46, %v4497_v29  ;;  %v4509_v6 = vshll.u32 %v13882_v54, %v4497_v29  ;;  %vm4515_vm2 = vcmp.lt.s32.totalorder %v11522_v63, 1 }
 0x435   : > { %v4113_v4 = vsub.s32 32, %v4112_v50  ;;  %v4117_v3 = vsub.s32 4294967266, %v4112_v50  ;;  %v4114_v25 = vshll.u32 %v4105_v19, %v4112_v50  ;;  %v4501_v44 = vshrl.u32 %v13880_v37, %v4498_v55 }
 0x436   : > { %v4504_v53 = vshrl.u32 %v13881_v46, %v4498_v55  ;;  %v4507_v18 = vshrl.u32 %v13882_v54, %v4498_v55  ;;  %v4510_v60 = vshrl.u32 %v13883_v0, %v4498_v55  ;;  %v4512_v19 = vshll.u32 %v13883_v0, %v4497_v29 }
 0x437   : > { %v7287_v16 = vpop.eup %7286  ;;  %v4115_v49 = vshrl.u32 %v4097_v58, %v4113_v4  ;;  %v4118_v31 = vadd.s32 127, %v4117_v3  ;;  %v4502_v27 = vor.u32 %v4501_v44, %v4500_v35  ;;  %v4513_v21 = vshrl.u32 %v14061_v45, %v4498_v55 }
 0x438   : > { %v7289_v14 = vpop.eup %7288  ;;  %v4037_v2 = vxor.u32 2147483648, %v7287_v16  ;;  %v4505_v1 = vor.u32 %v4504_v53, %v4503_v33  ;;  %v4508_v7 = vor.u32 %v4507_v18, %v4506_v48  ;;  %v4511_v15 = vor.u32 %v4510_v60, %v4509_v6 }
 0x439   : > { %v4034_v41 = vxor.u32 2147483648, %v7289_v14  ;;  %v4116_v39 = vor.u32 %v4115_v49, %v4114_v25  ;;  %v4119_v42 = vshll.u32 %v4118_v31, 23  ;;  %v4514_v13 = vor.u32 %v4513_v21, %v4512_v19 }
 0x43a   : > { %v4038_v24 = vsel %vm4036_vm12, %v4037_v2, %v7289_v14  ;;  %vm4518_vm9 = vcmp.lt.s32.totalorder %v11522_v63, 4  ;;  %vm4517_vm8 = vcmp.lt.s32.totalorder %v11522_v63, 3  ;;  %v4523_v51 = vsel %vm4515_vm2, %v4502_v27, %v4505_v1 }
 0x43b   : > { %v4035_v10 = vsel %vm4033_vm10, %v7287_v16, %v4034_v41  ;;  %v4120_v30 = vor.u32 4788187, %v4119_v42  ;;  %v4123_v26 = vcvt.s32.f32 %v4116_v39  ;;  %v4524_v23 = vsel %vm4518_vm9, %v4511_v15, 920167782 }
 0x43c   : > { %v4039_v17 = vsel %vm4032_vm4, %v4035_v10, %v4038_v24  ;;  %v4527_v36 = vsel %vm4515_vm2, %v4505_v1, %v4508_v7  ;;  %vm4516_vm1 = vcmp.lt.s32.totalorder %v11522_v63, 2  ;;  %v4525_v12 = vsel %vm4517_vm8, %v4508_v7, %v4524_v23 }
 0x43d   : > { %v4040_v32 = vsel %vm4029_vm3, nan, %v4039_v17  ;;  %v4121_v38 = vand.u32 2147483647, %v4120_v30  ;;  %v4528_v34 = vsel %vm4518_vm9, %v4514_v13, 1326507024  ;;  %v4526_v22 = vsel %vm4516_vm1, %v4523_v51, %v4525_v12 }
 0x43e   : > { %6736 = vmatprep.mubr.f32.mxu1 %v4040_v32  ;;  %v4529_v8 = vsel %vm4517_vm8, %v4511_v15, %v4528_v34  ;;  %v11559_v50 = vmul.u32.u64.low %v4531_v11, %v4526_v22  ;;  %v11560_v28 = vmul.u32.u64.high %v4531_v11, %v4526_v22, %v11559_v50  ;;  %v4128_v33 = vsel %vm4043_vm13, %v4127_v5, %v11490_v43 }
 0x43f   : > { %v4124_v47 = vmul.f32 %v4123_v26, %v4121_v38  ;;  %v4530_v58 = vsel %vm4516_vm1, %v4527_v36, %v4529_v8  ;;  %v4520_v25 = vsel %vm4518_vm9, %v4508_v7, 2102212464  ;;  %v4499_v53 = vshrl.u32 %v13889_v9, %v4498_v55 }
 0x440   : > { %v11564_v4 = vmul.u32.u64.low %v4531_v11, %v4530_v58  ;;  %v11565_v3 = vmul.u32.u64.high %v4531_v11, %v4530_v58, %v11564_v4  ;;  %v4130_v18 = vsel %vm4042_vm6, 0, %v4128_v33  ;;  %v4521_v49 = vsel %vm4517_vm8, %v4505_v1, %v4520_v25 }
 0x441   : > { %v4125_v29 = vxor.u32 2147483648, %v4124_v47  ;;  %v4519_v16 = vsel %vm4515_vm2, %v4499_v53, %v4502_v27  ;;  %v4541_v61 = vadd.s32 1, %v11560_v28  ;;  %v4134_v43 = vadd.s32 3, %v4130_v18 }
 0x442   : > { %vm4540_vm11 = vc.u32 %v11565_v3, %v11559_v50  ;;  %v4522_v31 = vsel %vm4516_vm1, %v4519_v16, %v4521_v49  ;;  %v4237_v24 = vadd.f32 %v11453_v57, %v11243_v40  ;;  %v4252_v21 = vadd.f32 %v11507_v59, %v11453_v57 }
 0x443   : > { %v4126_v35 = vsel %vm4043_vm13, %v4125_v29, %v4124_v47  ;;  %v4542_v55 = vsel %vm4540_vm11, %v4541_v61, %v11560_v28  ;;  %v4538_v48 = vmul.u32 %v4531_v11, %v4522_v31  ;;  %v4135_v60 = vand.u32 3, %v4134_v43 }
 0x444   : > { %v4129_v44 = vsel %vm4042_vm6, %v14077_v62, %v4126_v35  ;;  %v4315_v19 = vand.u32 2147483647, %v4237_v24  ;;  %v4247_v30 = vadd.f32 %v11453_v57, %v11513_v20  ;;  %v4318_v17 = vand.u32 2147483647, %v4252_v21 }
 0x445   : > { %7290 = vcosq.f32 %v4129_v44  ;;  %v4543_v14 = vadd.s32 %v4542_v55, %v4538_v48  ;;  %vm4140_vm14 = vcmp.eq.s32.totalorder %v4135_v60, 2  ;;  %vm4137_vm15 = vcmp.eq.s32.totalorder %v4135_v60, 0 }
 0x446   : > { %7292 = vsinq.f32 %v4129_v44  ;;  %vm4136_vm0 = vcmp.lt.s32.totalorder %v4135_v60, 2  ;;  %v4331_v5 = vadd.f32 1.0, %v4315_v19  ;;  %v4317_v32 = vand.u32 2147483647, %v4247_v30 }
 0x447   : > { %v4544_v39 = vadd.s32 536870912, %v4543_v14  ;;  %v4334_v40 = vadd.f32 1.0, %v4318_v17  ;;  %vm4485_vm4 = vcmp.lt.s32.totalorder %v11492_v56, 0  ;;  %vm11658_vm9 = vcmp.le.f32.partialorder %v4483_v52, 0.7853982 }
 0x448   : > { %v4347_v38 = vmul.f32 30.0, %v4331_v5  ;;  %v4333_v51 = vadd.f32 1.0, %v4317_v32 }
 0x449   : > { %v11587_v15 = vshrl.u32 %v4544_v39, 30  ;;  %v4350_v36 = vmul.f32 30.0, %v4334_v40  ;;  %v4539_v39 = vadd.s32 %v11559_v50, %v11565_v3 }
 0x44a   : > { %v11594_v23 = vmul.f32 %v4347_v38, %v4237_v24  ;;  %v4349_v59 = vmul.f32 30.0, %v4333_v51 }
 0x44b   : > { %v4546_v10 = vshll.u32 %v11587_v15, 30  ;;  %v11597_v34 = vmul.f32 %v4350_v36, %v4252_v21 }
 0x44c   : > { %v4382_v12 = vand.u32 2139095040, %v11594_v23  ;;  %v11599_v22 = vmul.f32 %v4349_v59, %v4247_v30 }
 0x44d   : > { %v4547_v13 = vsub.s32 %v4543_v14, %v4546_v10  ;;  %14082 = vst [vmem:[#allocation15_spill] sm:$0xff] %v11597_v34  ;;  %v4694_v29 = vand.u32 2139095040, %v11597_v34 }
 0x44e   : > { %v4383_v8 = vshrl.u32 %v4382_v12, 23  ;;  %v4590_v4 = vand.u32 2139095040, %v11599_v22 }
 0x44f   : > { %v7291_v2 = vpop.eup %7290  ;;  %v4549_v26 = vsub.s32 0, %v4547_v13  ;;  %v4695_v33 = vshrl.u32 %v4694_v29, 23 }
 0x450   : > { %v7293_v6 = vpop.eup %7292  ;;  %v4141_v27 = vxor.u32 2147483648, %v7291_v2  ;;  %v6460_v35 = vadd.s32 4294967169, %v4383_v8  ;;  %v4591_v44 = vshrl.u32 %v4590_v4, 23 }
 0x451   : > { %v4138_v41 = vxor.u32 2147483648, %v7293_v6  ;;  %v6465_v47 = vmin.u32 %v4549_v26, %v4547_v13  ;;  %v6472_v49 = vadd.s32 4294967169, %v4695_v33 }
 0x452   : > { %v4142_v1 = vsel %vm4140_vm14, %v4141_v27, %v7293_v6  ;;  %v4389_v16 = vadd.s32 1, %v6460_v35  ;;  %v6468_v31 = vadd.s32 4294967169, %v4591_v44 }
 0x453   : > { %v4139_v42 = vsel %vm4137_vm15, %v7291_v2, %v4138_v41  ;;  %v4551_v20 = vclz %v6465_v47  ;;  %v4701_v48 = vadd.s32 1, %v6472_v49 }
 0x454   : > { %v4143_v7 = vsel %vm4136_vm0, %v4139_v42, %v4142_v1  ;;  %vm4390_vm12 = vcmp.gt.s32.totalorder %v4389_v16, 0  ;;  %v4597_v6 = vadd.s32 1, %v6468_v31 }
 0x455   : > { %v4144_v63 = vsel %vm4133_vm5, nan, %v4143_v7  ;;  %v6466_v28 = vadd.s32 4294967294, %v4551_v20  ;;  %v4391_v2 = vsel %vm4390_vm12, %v4389_v16, 0  ;;  %vm4702_vm7 = vcmp.gt.s32.totalorder %v4701_v48, 0 }
 0x456   : > { %6737 = vmatmul.mubr.f32.gmra.mrb[14].mxu1 %v4144_v63  ;;  %v11609_v42 = vand.u32 31, %v4391_v2  ;;  %v4703_v63 = vsel %vm4702_vm7, %v4701_v48, 0  ;;  %vm4598_vm3 = vcmp.gt.s32.totalorder %v4597_v6, 0  ;;  %v11629_v59 = vshrl.u32 %v4391_v2, 5 }
 0x457   : > { %v6723_v62 = vpop.f32.mrb[4].mxu1  ;;  %vm6467_vm10 = vcmp.lt.s32.totalorder %v6466_v28, 0  ;;  %v11612_v10 = vand.u32 31, %v4703_v63  ;;  %v4599_v30 = vsel %vm4598_vm3, %v4597_v6, 0  ;;  %v11650_v49 = vshrl.u32 %v4703_v63, 5 }
 0x458   : > { %v4256_v11 = vpop.f32.mrb[5].mxu1  ;;  %v4262_v58 = vadd.f32 %v6723_v62, %v11453_v57  ;;  %v4554_v18 = vsel %vm6467_vm10, 0, %v6466_v28  ;;  %v11615_v62 = vsub.s32 32, %v11609_v42  ;;  %v11619_v32 = vand.u32 31, %v4599_v30 }
 0x459   : > { %v4257_v53 = vadd.f32 %v11453_v57, %v4256_v11  ;;  %v4559_v43 = vsub.s32 4294967266, %v4554_v18  ;;  %v4555_v1 = vsub.s32 32, %v4554_v18  ;;  %v4556_v5 = vshll.u32 %v4547_v13, %v4554_v18 }
 0x45a   : > { %v4320_v25 = vand.u32 2147483647, %v4262_v58  ;;  %v11622_v38 = vsub.s32 32, %v11612_v10  ;;  %v4406_v26 = vshrl.u32 %v13883_v0, %v11615_v62  ;;  %v4409_v13 = vshrl.u32 %v14061_v45, %v11615_v62 }
 0x45b   : > { %v4319_v55 = vand.u32 2147483647, %v4257_v53  ;;  %v4560_v14 = vadd.s32 127, %v4559_v43  ;;  %v4557_v21 = vshrl.u32 %v4539_v39, %v4555_v1  ;;  %v4405_v12 = vshll.u32 %v13882_v54, %v11609_v42 }
 0x45c   : > { %v4336_v61 = vadd.f32 1.0, %v4320_v25  ;;  %v11634_v20 = vsub.s32 32, %v11619_v32  ;;  %v4408_v8 = vshll.u32 %v13883_v0, %v11609_v42  ;;  %v4718_v29 = vshrl.u32 %v13883_v0, %v11622_v38 }
 0x45d   : > { %v4335_v27 = vadd.f32 1.0, %v4319_v55  ;;  %v4561_v7 = vshll.u32 %v4560_v14, 23  ;;  %v4558_v3 = vor.u32 %v4557_v21, %v4556_v5  ;;  %v11643_v4 = vor.u32 %v4406_v26, %v4405_v12 }
 0x45e   : > { %v4352_v60 = vmul.f32 30.0, %v4336_v61  ;;  %v4410_v25 = vor.u32 %v4409_v13, %v4408_v8  ;;  %v4717_v44 = vshll.u32 %v13882_v54, %v11612_v10  ;;  %vm4414_vm2 = vcmp.lt.s32.totalorder %v11629_v59, 4 }
 0x45f   : > { %v4351_v24 = vmul.f32 30.0, %v4335_v27  ;;  %v4562_v17 = vor.u32 4788187, %v4561_v7  ;;  %v4565_v47 = vcvt.s32.f32 %v4558_v3  ;;  %v11652_v61 = vshrl.u32 %v4599_v30, 5 }
 0x460   : > { %v11605_v41 = vmul.f32 %v4352_v60, %v4262_v58  ;;  %v4721_v58 = vshrl.u32 %v14061_v45, %v11622_v38  ;;  %v4614_v43 = vshrl.u32 %v13883_v0, %v11634_v20  ;;  %v11662_v55 = vor.u32 %v4718_v29, %v4717_v44 }
 0x461   : > { %v11617_v11 = vmul.f32 %v4351_v24, %v4257_v53  ;;  %v4563_v40 = vand.u32 2147483647, %v4562_v17  ;;  %v4720_v53 = vshll.u32 %v13883_v0, %v11612_v10  ;;  %v4617_v60 = vshrl.u32 %v14061_v45, %v11634_v20 }
 0x462   : > { %14083 = vst [vmem:[#allocation5_spill] sm:$0xff] %v11605_v41  ;;  %v4902_v19 = vand.u32 2139095040, %v11605_v41  ;;  %v13783_v14 = vand.u32 2147483647, %v11594_v23  ;;  %v4613_v6 = vshll.u32 %v13882_v54, %v11619_v32  ;;  %v4420_v52 = vsel %vm4414_vm2, %v11643_v4, 920167782 }
 0x463   : > { %14084 = vst [vmem:[#allocation23_spill] sm:$0xff] %v11617_v11  ;;  %v4798_v51 = vand.u32 2139095040, %v11617_v11  ;;  %v4566_v28 = vmul.f32 %v4565_v47, %v4563_v40  ;;  %v4722_v48 = vor.u32 %v4721_v58, %v4720_v53  ;;  %v4424_v39 = vsel %vm4414_vm2, %v4410_v25, 1326507024 }
 0x464   : > { %v4903_v50 = vshrl.u32 %v4902_v19, 23  ;;  %v4616_v7 = vshll.u32 %v13883_v0, %v11619_v32  ;;  %vm4726_vm1 = vcmp.lt.s32.totalorder %v11650_v49, 4  ;;  %v11680_v63 = vor.u32 %v4614_v43, %v4613_v6 }
 0x465   : > { %v4799_v35 = vshrl.u32 %v4798_v51, 23  ;;  %v4567_v2 = vxor.u32 2147483648, %v4566_v28  ;;  %vm4622_vm13 = vcmp.lt.s32.totalorder %v11652_v61, 4  ;;  %v11689_v19 = vsel %vm4726_vm1, %v11662_v55, 920167782 }
 0x466   : > { %v6480_v36 = vadd.s32 4294967169, %v4903_v50  ;;  %v11693_v21 = vsel %vm4726_vm1, %v4722_v48, 1326507024  ;;  %v4618_v30 = vor.u32 %v4617_v60, %v4616_v7  ;;  %v4386_v5 = vand.u32 8388607, %v13783_v14 }
 0x467   : > { %v6476_v27 = vadd.s32 4294967169, %v4799_v35  ;;  %v4568_v17 = vsel %vm4485_vm4, %v4567_v2, %v4566_v28  ;;  %v4396_v26 = vshll.u32 %v13889_v9, %v11609_v42  ;;  %v4397_v51 = vshrl.u32 %v13880_v37, %v11615_v62 }
 0x468   : > { %v4909_v18 = vadd.s32 1, %v6480_v36  ;;  %v4399_v13 = vshll.u32 %v13880_v37, %v11609_v42  ;;  %v4400_v36 = vshrl.u32 %v13881_v46, %v11615_v62  ;;  %v11711_v47 = vsel %vm4622_vm13, %v11680_v63, 920167782 }
 0x469   : > { %v4805_v3 = vadd.s32 1, %v6476_v27  ;;  %v4402_v8 = vshll.u32 %v13881_v46, %v11609_v42  ;;  %v4403_v29 = vshrl.u32 %v13882_v54, %v11615_v62  ;;  %v11720_v58 = vsel %vm4622_vm13, %v4618_v30, 1326507024 }
 0x46a   : > { %vm4910_vm8 = vcmp.gt.s32.totalorder %v4909_v18, 0  ;;  %v4387_v28 = vor.u32 8388608, %v4386_v5  ;;  %v4398_v35 = vor.u32 %v4397_v51, %v4396_v26  ;;  %v4571_v25 = vsel %vm11658_vm9, %v11492_v56, %v4568_v17 }
 0x46b   : > { %v4911_v50 = vsel %vm4910_vm8, %v4909_v18, 0  ;;  %v4404_v53 = vor.u32 %v4403_v29, %v4402_v8  ;;  %vm4411_vm6 = vcmp.lt.s32.totalorder %v11629_v59, 1  ;;  %vm4806_vm11 = vcmp.gt.s32.totalorder %v4805_v3, 0  ;;  %v6044_v8 = vld [vmem:[%s13664_s5 + $0x8] sm:$0xff] }
 0x46c   : > { %v11725_v44 = vand.u32 31, %v4911_v50  ;;  %vm4413_vm14 = vcmp.lt.s32.totalorder %v11629_v59, 3  ;;  %vm4412_vm15 = vcmp.lt.s32.totalorder %v11629_v59, 2  ;;  %7294 = vcosq.f32 %v4571_v25 }
 0x46d   : > { %v4421_v43 = vsel %vm4413_vm14, %v4404_v53, %v4420_v52  ;;  %v4425_v2 = vsel %vm4413_vm14, %v11643_v4, %v4424_v39  ;;  %v11741_v6 = vshll.u32 %v4387_v28, 8  ;;  %v4807_v7 = vsel %vm4806_vm11, %v4805_v3, 0 }
 0x46e   : > { %14087 = vst [vmem:[#allocation28_spill] sm:$0xff] %v11725_v44  ;;  %v11744_v27 = vsub.s32 32, %v11725_v44  ;;  %v13782_v30 = vand.u32 2147483647, %v11599_v22  ;;  %v4416_v17 = vsel %vm4414_vm2, %v4404_v53, 2102212464  ;;  %v4395_v39 = vshrl.u32 %v13889_v9, %v11615_v62 }
 0x46f   : > { %7296 = vsinq.f32 %v4571_v25  ;;  %v6045_v62 = vld [vmem:[%s13664_s5 + $0x10] sm:$0xff]  ;;  %vm4619_vm10 = vcmp.lt.s32.totalorder %v11652_v61, 1  ;;  %vm4621_vm12 = vcmp.lt.s32.totalorder %v11652_v61, 3  ;;  %vm4620_vm7 = vcmp.lt.s32.totalorder %v11652_v61, 2 }
 0x470   : > { %14088 = vst [vmem:[#allocation25_spill] sm:$0xff] %v11744_v27  ;;  %v4415_v28 = vsel %vm4411_vm6, %v4395_v39, %v4398_v35  ;;  %v4604_v39 = vshll.u32 %v13889_v9, %v11619_v32 }
 0x476   : > { %v11817_v59 = vpop.eup %7294 }
 0x488   : > { %v6726_v33 = vpop.f32.mrb[6].mxu1 }
 0x489   : > { %v4266_v16 = vpop.f32.mrb[7].mxu1  ;;  %v11670_v1 = vadd.f32 %v6726_v33, %v11453_v57  ;;  %v4401_v33 = vor.u32 %v4400_v36, %v4399_v13  ;;  %v11762_v13 = vshrl.u32 %v4911_v50, 5  ;;  %v11764_v36 = vand.u32 31, %v4807_v7  ;;  %v6046_v50 = vld [vmem:[%s13664_s5 + $0x18] sm:$0xff] }
 0x48a   : > { %v11684_v24 = vadd.f32 %v11453_v57, %v4266_v16 }
 0x48b   : > { %v4322_v40 = vand.u32 2147483647, %v11670_v1  ;;  %v4419_v18 = vsel %vm4411_vm6, %v4398_v35, %v4401_v33  ;;  %v4423_v48 = vsel %vm4411_vm6, %v4401_v33, %v4404_v53  ;;  %14089 = vst [vmem:[#allocation27_spill] sm:$0xff] %v11762_v13  ;;  %14090 = vst [vmem:[#allocation24_spill] sm:$0xff] %v11764_v36  ;;  %v4417_v25 = vsel %vm4413_vm14, %v4401_v33, %v4416_v17 }
 0x48c   : > { %v4321_v12 = vand.u32 2147483647, %v11684_v24  ;;  %v4422_v60 = vsel %vm4412_vm15, %v4419_v18, %v4421_v43  ;;  %v4426_v52 = vsel %vm4412_vm15, %v4423_v48, %v4425_v2  ;;  %v4594_v53 = vand.u32 8388607, %v13782_v30 }
 0x48d   : > { %v4338_v42 = vadd.f32 1.0, %v4322_v40  ;;  %v11752_v40 = vmul.u32.u64.low %v11741_v6, %v4426_v52  ;;  %v11753_v26 = vmul.u32.u64.high %v11741_v6, %v4426_v52, %v11752_v40  ;;  %v11788_v18 = vshll.u32 %v13883_v0, %v11725_v44 }
 0x48e   : > { %v4337_v16 = vadd.f32 1.0, %v4321_v12  ;;  %v11758_v51 = vmul.u32.u64.low %v11741_v6, %v4422_v60  ;;  %v11759_v3 = vmul.u32.u64.high %v11741_v6, %v4422_v60, %v11758_v51  ;;  %v6043_v12 = vld [vmem:[%s13664_s5] sm:$0xff]  ;;  %v6863_v43 = vpack.c.bf16 %v6046_v50, %v6045_v62 }
 0x48f   : > { %v4354_v5 = vmul.f32 30.0, %v4338_v42  ;;  %v6859_v29 = vpack.c.bf16 %v6044_v8, %v6043_v12  ;;  %v4925_v42 = vshll.u32 %v13882_v54, %v11725_v44  ;;  %v4926_v35 = vshrl.u32 %v13883_v0, %v11744_v27 }
 0x490   : > { %v4353_v4 = vmul.f32 30.0, %v4337_v16  ;;  %v11795_v48 = vshrl.u32 %v4807_v7, 5  ;;  %v4611_v60 = vshrl.u32 %v13882_v54, %v11634_v20  ;;  %v11803_v2 = vsub.s32 32, %v11764_v36 }
 0x491   : > { %v11791_v16 = vmul.f32 %v4354_v5, %v11670_v1  ;;  %6860 = vmatprep.subr.bf16.mxu0 %v6859_v29  ;;  %6891 = vmatprep.subr.bf16.mxu1 %v6859_v29  ;;  %v4418_v1 = vsel %vm4412_vm15, %v4415_v28, %v4417_v25  ;;  %v4605_v7 = vshrl.u32 %v13880_v37, %v11634_v20  ;;  %v4595_v5 = vor.u32 8388608, %v4594_v53 }
 0x492   : > { %14092 = vst [vmem:[#allocation20_spill] sm:$0xff] %v11795_v48  ;;  %v11798_v33 = vmul.f32 %v4353_v4, %v11684_v24  ;;  %14094 = vst [vmem:[#allocation30_spill] sm:$0xff] %v11803_v2  ;;  %6862 = vmatpush3.bf16.msra.mxu0 %v6859_v29  ;;  %6899 = vmatpush3.bf16.msra.mxu1 %v6859_v29  ;;  %v4608_v24 = vshrl.u32 %v13881_v46, %v11634_v20  ;;  %v4437_v4 = vadd.s32 1, %v11759_v3 }
 0x493   : > { %14091 = vst [vmem:[#allocation31_spill] sm:$0xff] %v11791_v16  ;;  %v4929_v52 = vshrl.u32 %v14061_v45, %v11744_v27  ;;  %6864 = vmatprep.subr.bf16.mxu0 %v6863_v43  ;;  %vm4436_vm0 = vc.u32 %v11753_v26, %v11758_v51  ;;  %v4610_v17 = vshll.u32 %v13881_v46, %v11619_v32  ;;  %v5110_v40 = vand.u32 2139095040, %v11791_v16 }
 0x494   : > { %14093 = vst [vmem:[#allocation14_spill] sm:$0xff] %v11798_v33  ;;  %6892 = vmatprep.subr.bf16.mxu1 %v6863_v43  ;;  %v4607_v12 = vshll.u32 %v13880_v37, %v11619_v32  ;;  %v4821_v8 = vshll.u32 %v13882_v54, %v11764_v36  ;;  %v11829_v62 = vshll.u32 %v13883_v0, %v11764_v36  ;;  %vm4934_vm5 = vcmp.lt.s32.totalorder %v11762_v13, 4 }
 0x495   : > { %v4434_v29 = vmul.u32 %v11741_v6, %v4418_v1  ;;  %v4612_v50 = vor.u32 %v4611_v60, %v4610_v17  ;;  %v5006_v28 = vand.u32 2139095040, %v11798_v33  ;;  %v4438_v32 = vsel %vm4436_vm0, %v4437_v4, %v11759_v3  ;;  %v11844_v1 = vpop.eup %7296 }
 0x496   : > { %6866 = vmatpush3.bf16.msra.mxu0 %v6863_v43  ;;  %v4606_v25 = vor.u32 %v4605_v7, %v4604_v39  ;;  %v4609_v53 = vor.u32 %v4608_v24, %v4607_v12  ;;  %6900 = vmatpush3.bf16.msra.mxu1 %v6863_v43  ;;  %v11838_v30 = vor.u32 %v4926_v35, %v4925_v42  ;;  %v5111_v16 = vshrl.u32 %v5110_v40, 23 }
 0x497   : > { %v4822_v14 = vshrl.u32 %v13883_v0, %v11803_v2  ;;  %v4825_v6 = vshrl.u32 %v14061_v45, %v11803_v2  ;;  %v4439_v60 = vadd.s32 %v4438_v32, %v4434_v29  ;;  %v4930_v17 = vor.u32 %v4929_v52, %v11788_v18 }
 0x498   : > { %14095 = vst [vmem:[#allocation10_spill] sm:$0xff] %v11838_v30  ;;  %v4624_v3 = vsel %vm4622_vm13, %v4612_v50, 2102212464  ;;  %v4635_v7 = vshll.u32 %v4595_v5, 8  ;;  %v4603_v42 = vshrl.u32 %v13889_v9, %v11634_v20  ;;  %v5007_v43 = vshrl.u32 %v5006_v28, 23 }
 0x499   : > { %v4440_v24 = vadd.s32 536870912, %v4439_v60  ;;  %v4627_v35 = vsel %vm4619_vm10, %v4606_v25, %v4609_v53  ;;  %v4629_v4 = vsel %vm4621_vm12, %v4612_v50, %v11711_v47  ;;  %v4625_v40 = vsel %vm4621_vm12, %v4609_v53, %v4624_v3 }
 0x49a   : > { %v4623_v52 = vsel %vm4619_vm10, %v4603_v42, %v4606_v25  ;;  %v4630_v5 = vsel %vm4620_vm7, %v4627_v35, %v4629_v4  ;;  %v4631_v39 = vsel %vm4619_vm10, %v4609_v53, %v4612_v50  ;;  %v4633_v20 = vsel %vm4621_vm12, %v11680_v63, %v11720_v58 }
 0x49b   : > { %v11855_v18 = vshrl.u32 %v4440_v24, 30  ;;  %v11861_v12 = vmul.u32.u64.low %v4635_v7, %v4630_v5  ;;  %v11862_v29 = vmul.u32.u64.high %v4635_v7, %v4630_v5, %v11861_v12  ;;  %v6488_v28 = vadd.s32 4294967169, %v5111_v16 }
 0x49c   : > { %v4634_v47 = vsel %vm4620_vm7, %v4631_v39, %v4633_v20  ;;  %v13787_v25 = vand.u32 2147483647, %v11597_v34  ;;  %v11869_v3 = vor.u32 %v4822_v14, %v4821_v8  ;;  %vm4830_vm3 = vcmp.lt.s32.totalorder %v11795_v48, 4 }
 0x49d   : > { %v4442_v32 = vshll.u32 %v11855_v18, 30  ;;  %v11872_v50 = vmul.u32.u64.low %v4635_v7, %v4634_v47  ;;  %v11873_v53 = vmul.u32.u64.high %v4635_v7, %v4634_v47, %v11872_v50  ;;  %v11878_v63 = vsel %vm4934_vm5, %v11838_v30, 920167782 }
 0x49e   : > { %14096 = vst [vmem:[#allocation19_spill] sm:$0xff] %v11869_v3  ;;  %14097 = vst [vmem:[#allocation7_spill] sm:$0xff] %v11878_v63  ;;  %v4826_v58 = vor.u32 %v4825_v6, %v11829_v62  ;;  %v4626_v42 = vsel %vm4620_vm7, %v4623_v52, %v4625_v40  ;;  %v11887_v14 = vsel %vm4934_vm5, %v4930_v17, 1326507024  ;;  %v6484_v8 = vadd.s32 4294967169, %v5007_v43 }
 0x49f   : > { %v11881_v24 = vsub.s32 %v4439_v60, %v4442_v32  ;;  %14098 = vst [vmem:[#allocation18_spill] sm:$0xff] %v11887_v14  ;;  %v4645_v5 = vadd.s32 1, %v11862_v29  ;;  %v5117_v39 = vadd.s32 1, %v6488_v28  ;;  %v4698_v6 = vand.u32 8388607, %v13787_v25 }
 0x4a0   : > { %v4569_v60 = vsub.s32 4, %v11587_v15  ;;  %v4642_v52 = vmul.u32 %v4635_v7, %v4626_v42  ;;  %vm4644_vm2 = vc.u32 %v11873_v53, %v11861_v12  ;;  %v13786_v28 = vand.u32 2147483647, %v11617_v11 }
 0x4a1   : > { %v4445_v62 = vsub.s32 0, %v11881_v24  ;;  %v4646_v40 = vsel %vm4644_vm2, %v4645_v5, %v11862_v29  ;;  %v5013_v32 = vadd.s32 1, %v6484_v8  ;;  %v11910_v7 = vsel %vm4830_vm3, %v4826_v58, 1326507024 }
 0x4a2   : > { %v11906_v50 = vadd.s32 %v4646_v40, %v4642_v52  ;;  %14100 = vst [vmem:[#allocation9_spill] sm:$0xff] %v11910_v7  ;;  %vm5118_vm8 = vcmp.gt.s32.totalorder %v5117_v39, 0  ;;  %vm4381_vm13 = vcmp.lt.s32.totalorder %v11594_v23, 0  ;;  %v4570_v29 = vsel %vm4485_vm4, %v4569_v60, %v11587_v15 }
 0x4a3   : > { %v6461_v43 = vmin.u32 %v4445_v62, %v11881_v24  ;;  %v14101_v62 = vand.u32 2147483647, %v11594_v23  ;;  %v4699_v52 = vor.u32 8388608, %v4698_v6  ;;  %vm5014_vm11 = vcmp.gt.s32.totalorder %v5013_v32, 0 }
 0x4a4   : > { %v4648_v5 = vadd.s32 536870912, %v11906_v50  ;;  %v11946_v25 = vsel %vm5014_vm11, %v5013_v32, 0  ;;  %vm4723_vm12 = vcmp.lt.s32.totalorder %v11650_v49, 1 }
 0x4a5   : > { %v4447_v42 = vclz %v6461_v43  ;;  %vm11919_vm6 = vcmp.le.f32.partialorder %v14101_v62, 0.7853982  ;;  %v5119_v43 = vsel %vm5118_vm8, %v5117_v39, 0 }
 0x4a6   : > { %v11960_v63 = vshrl.u32 %v5119_v43, 5 }
 0x4a7   : > { %v6462_v58 = vadd.s32 4294967294, %v4447_v42 }
 0x4a9   : > { %vm6463_vm4 = vcmp.lt.s32.totalorder %v6462_v58, 0 }
 0x4aa   : > { %v4450_v62 = vsel %vm6463_vm4, 0, %v6462_v58  ;;  %vm4725_vm4 = vcmp.lt.s32.totalorder %v11650_v49, 3 }
 0x4ab   : > { %v4455_v39 = vsub.s32 4294967266, %v4450_v62  ;;  %v4452_v44 = vshll.u32 %v11881_v24, %v4450_v62  ;;  %v12010_v24 = vshrl.u32 %v13880_v37, %v11622_v38 }
 0x4ad   : > { %v6729_v16 = vpop.f32.mrb[8].mxu1  ;;  %v4456_v11 = vadd.s32 127, %v4455_v39 }
 0x4ae   : > { %v4282_v35 = vadd.f32 %v6729_v16, %v11453_v57  ;;  %v4276_v4 = vpop.f32.mrb[9].mxu1 }
 0x4af   : > { %v4277_v20 = vadd.f32 %v11453_v57, %v4276_v4  ;;  %v11904_v57 = vsel %vm4830_vm3, %v11869_v3, 920167782  ;;  %v4457_v30 = vshll.u32 %v4456_v11, 23  ;;  %v6052_v11 = vld [vmem:[%s13664_s5 + $0x48] sm:$0xff] }
 0x4b0   : > { %v4324_v61 = vand.u32 2147483647, %v4282_v35  ;;  %14099 = vst [vmem:[#allocation12_spill] sm:$0xff] %v11904_v57 }
 0x4b1   : > { %v4323_v17 = vand.u32 2147483647, %v4277_v20 }
 0x4b2   : > { %v4340_v47 = vadd.f32 1.0, %v4324_v61 }
 0x4b3   : > { %v4339_v16 = vadd.f32 1.0, %v4323_v17  ;;  %v11925_v17 = vand.u32 8388607, %v13786_v28  ;;  %v11937_v28 = vshrl.u32 %v4648_v5, 30 }
 0x4b4   : > { %v4356_v4 = vmul.f32 30.0, %v4340_v47  ;;  %v4465_v47 = vsub.s32 4, %v11855_v18 }
 0x4b5   : > { %v4355_v8 = vmul.f32 30.0, %v4339_v16  ;;  %14104 = vst [vmem:[#allocation21_spill] sm:$0xff] %v11925_v17  ;;  %v4572_v16 = vsel %vm11658_vm9, 0, %v4570_v29  ;;  %v6047_v29 = vld [vmem:[%s13664_s5 + $0x20] sm:$0xff]  ;;  %v4650_v33 = vshll.u32 %v11937_v28, 30 }
 0x4b6   : > { %v11927_v40 = vmul.f32 %v4356_v4, %v4282_v35  ;;  %v11940_v4 = vshll.u32 %v4699_v52, 8  ;;  %v4576_v58 = vadd.s32 3, %v4572_v16  ;;  %v6048_v52 = vld [vmem:[%s13664_s5 + $0x28] sm:$0xff]  ;;  %v4466_v32 = vsel %vm4381_vm13, %v4465_v47, %v11855_v18 }
 0x4b7   : > { %v11930_v60 = vmul.f32 %v4355_v8, %v4277_v20  ;;  %v11943_v8 = vand.u32 31, %v5119_v43  ;;  %v4451_v20 = vsub.s32 32, %v4450_v62  ;;  %v11963_v16 = vand.u32 31, %v11946_v25  ;;  %v6049_v43 = vld [vmem:[%s13664_s5 + $0x30] sm:$0xff] }
 0x4b8   : > { %14105 = vst [vmem:[#allocation17_spill] sm:$0xff] %v11927_v40  ;;  %v13794_v6 = vand.u32 2147483647, %v11927_v40  ;;  %v5318_v42 = vand.u32 2139095040, %v11927_v40  ;;  %v11989_v14 = vsub.s32 %v11906_v50, %v4650_v33  ;;  %v12006_v33 = vadd.s32 %v11861_v12, %v11873_v53 }
 0x4b9   : > { %14106 = vst [vmem:[#allocation33_spill] sm:$0xff] %v11930_v60  ;;  %v5214_v35 = vand.u32 2139095040, %v11930_v60  ;;  %v11972_v40 = vsub.s32 32, %v11943_v8  ;;  %v11976_v18 = vshll.u32 %v13882_v54, %v11943_v8  ;;  %v12014_v50 = vshrl.u32 %v13881_v46, %v11622_v38 }
 0x4ba   : > { %v5319_v31 = vshrl.u32 %v5318_v42, 23  ;;  %v5322_v5 = vand.u32 8388607, %v13794_v6  ;;  %v6867_v42 = vpack.c.bf16 %v6048_v52, %v6047_v29  ;;  %v11969_v6 = vshll.u32 %v13889_v9, %v11612_v10 }
 0x4bb   : > { %v5215_v15 = vshrl.u32 %v5214_v35, 23  ;;  %v4435_v35 = vadd.s32 %v11758_v51, %v11753_v26  ;;  %v6050_v26 = vld [vmem:[%s13664_s5 + $0x38] sm:$0xff]  ;;  %v4468_v51 = vsel %vm11919_vm6, 0, %v4466_v32  ;;  %v11986_v52 = vand.u32 3, %v4576_v58 }
 0x4bc   : > { %v6496_v60 = vadd.s32 4294967169, %v5319_v31  ;;  %6868 = vmatprep.subr.bf16.mxu0 %v6867_v42  ;;  %6893 = vmatprep.subr.bf16.mxu1 %v6867_v42  ;;  %v5323_v39 = vor.u32 8388608, %v5322_v5  ;;  %v6871_v31 = vpack.c.bf16 %v6050_v26, %v6049_v43  ;;  %v11992_v27 = vadd.s32 3, %v4468_v51 }
 0x4bd   : > { %6870 = vmatpush3.bf16.msra.mxu0 %v6867_v42  ;;  %v4453_v29 = vshrl.u32 %v4435_v35, %v4451_v20  ;;  %6901 = vmatpush3.bf16.msra.mxu1 %v6867_v42  ;;  %v11996_v5 = vshrl.u32 %v13889_v9, %v11622_v38  ;;  %v12020_v42 = vshrl.u32 %v13882_v54, %v11622_v38  ;;  %v4458_v35 = vor.u32 4788187, %v4457_v30 }
 0x4be   : > { %v5325_v47 = vadd.s32 1, %v6496_v60  ;;  %v6492_v60 = vadd.s32 4294967169, %v5215_v15  ;;  %6872 = vmatprep.subr.bf16.mxu0 %v6871_v31  ;;  %6894 = vmatprep.subr.bf16.mxu1 %v6871_v31  ;;  %v6051_v15 = vld [vmem:[%s13664_s5 + $0x40] sm:$0xff]  ;;  %v12016_v62 = vshll.u32 %v5323_v39, 8  ;;  %vm4579_vm8 = vcmp.eq.s32.totalorder %v11986_v52, 0 }
 0x4bf   : > { %v6875_v58 = vpack.c.bf16 %v6052_v11, %v6051_v15  ;;  %v4454_v32 = vor.u32 %v4453_v29, %v4452_v44  ;;  %v4459_v3 = vand.u32 2147483647, %v4458_v35  ;;  %v6053_v35 = vld [vmem:[%s13664_s5 + $0x50] sm:$0xff]  ;;  %vm4582_vm11 = vcmp.eq.s32.totalorder %v11986_v52, 2 }
 0x4c0   : > { %vm5326_vm9 = vcmp.gt.s32.totalorder %v5325_v47, 0  ;;  %v12022_v53 = vadd.s32 1, %v6492_v60 }
 0x4c1   : > { %v5327_v13 = vsel %vm5326_vm9, %v5325_v47, 0  ;;  %6874 = vmatpush3.bf16.msra.mxu0 %v6871_v31  ;;  %6902 = vmatpush3.bf16.msra.mxu1 %v6871_v31  ;;  %v4653_v47 = vsub.s32 0, %v11989_v14  ;;  %v4461_v15 = vcvt.s32.f32 %v4454_v32 }
 0x4c2   : > { %v5329_v20 = vand.u32 31, %v5327_v13  ;;  %v5328_v43 = vshrl.u32 %v5327_v13, 5  ;;  %6876 = vmatprep.subr.bf16.mxu0 %v6875_v58  ;;  %6895 = vmatprep.subr.bf16.mxu1 %v6875_v58  ;;  %vm5222_vm2 = vcmp.gt.s32.totalorder %v12022_v53, 0 }
 0x4c4   : > { %v5330_v12 = vsub.s32 32, %v5329_v20  ;;  %v5332_v26 = vshll.u32 %v13889_v9, %v5329_v20  ;;  %v5335_v51 = vshll.u32 %v13880_v37, %v5329_v20  ;;  %v5338_v39 = vshll.u32 %v13881_v46, %v5329_v20 }
 0x4c5   : > { %v5341_v29 = vshll.u32 %v13882_v54, %v5329_v20  ;;  %v5344_v13 = vshll.u32 %v13883_v0, %v5329_v20  ;;  %6878 = vmatpush3.bf16.msra.mxu0 %v6875_v58  ;;  %6903 = vmatpush3.bf16.msra.mxu1 %v6875_v58  ;;  %vm5347_vm14 = vcmp.lt.s32.totalorder %v5328_v43, 1  ;;  %vm5350_vm15 = vcmp.lt.s32.totalorder %v5328_v43, 4 }
 0x4c6   : > { %v5333_v44 = vshrl.u32 %v13880_v37, %v5330_v12  ;;  %v5336_v38 = vshrl.u32 %v13881_v46, %v5330_v12  ;;  %v5339_v31 = vshrl.u32 %v13882_v54, %v5330_v12  ;;  %v5342_v30 = vshrl.u32 %v13883_v0, %v5330_v12 }
 0x4c7   : > { %v5345_v60 = vshrl.u32 %v14061_v45, %v5330_v12  ;;  %v6469_v20 = vmin.u32 %v4653_v47, %v11989_v14  ;;  %v5331_v41 = vshrl.u32 %v13889_v9, %v5330_v12  ;;  %vm5349_vm0 = vcmp.lt.s32.totalorder %v5328_v43, 3  ;;  %v6055_v47 = vld [vmem:[%s13664_s5 + $0x60] sm:$0xff]  ;;  %v6056_v12 = vld [vmem:[%s13664_s5 + $0x68] sm:$0xff] }
 0x4c8   : > { %v5334_v11 = vor.u32 %v5333_v44, %v5332_v26  ;;  %v5337_v34 = vor.u32 %v5336_v38, %v5335_v51  ;;  %v5340_v17 = vor.u32 %v5339_v31, %v5338_v39  ;;  %v5343_v7 = vor.u32 %v5342_v30, %v5341_v29  ;;  %v6054_v39 = vld [vmem:[%s13664_s5 + $0x58] sm:$0xff] }
 0x4c9   : > { %v5346_v57 = vor.u32 %v5345_v60, %v5344_v13  ;;  %vm5348_vm10 = vcmp.lt.s32.totalorder %v5328_v43, 2  ;;  %v6879_v60 = vpack.c.bf16 %v6054_v39, %v6053_v35  ;;  %v4580_v39 = vxor.u32 2147483648, %v11844_v1 }
 0x4ca   : > { %v5352_v48 = vsel %vm5350_vm15, %v5340_v17, 2102212464  ;;  %v5355_v2 = vsel %vm5347_vm14, %v5334_v11, %v5337_v34  ;;  %v5359_v36 = vsel %vm5347_vm14, %v5337_v34, %v5340_v17  ;;  %v5356_v32 = vsel %vm5350_vm15, %v5343_v7, 920167782 }
 0x4cb   : > { %v5360_v58 = vsel %vm5350_vm15, %v5346_v57, 1326507024  ;;  %v5357_v26 = vsel %vm5349_vm0, %v5340_v17, %v5356_v32  ;;  %v4462_v57 = vmul.f32 %v4461_v15, %v4459_v3  ;;  %v5351_v44 = vsel %vm5347_vm14, %v5331_v41, %v5334_v11  ;;  %6880 = vmatprep.subr.bf16.mxu0 %v6879_v60  ;;  %6896 = vmatprep.subr.bf16.mxu1 %v6879_v60 }
 0x4cc   : > { %v5361_v51 = vsel %vm5349_vm0, %v5343_v7, %v5360_v58  ;;  %v5353_v38 = vsel %vm5349_vm0, %v5337_v34, %v5352_v48  ;;  %v5358_v31 = vsel %vm5348_vm10, %v5355_v2, %v5357_v26  ;;  %v6883_v32 = vpack.c.bf16 %v6056_v12, %v6055_v47  ;;  %v6058_v48 = vld [vmem:[%s13664_s5 + $0x78] sm:$0xff]  ;;  %6882 = vmatpush3.bf16.msra.mxu0 %v6879_v60 }
 0x4cd   : > { %v5362_v7 = vsel %vm5348_vm10, %v5359_v36, %v5361_v51  ;;  %v12059_v30 = vmul.u32.u64.low %v12016_v62, %v5358_v31  ;;  %v12060_v13 = vmul.u32.u64.high %v12016_v62, %v5358_v31, %v12059_v30  ;;  %v4711_v3 = vshll.u32 %v13880_v37, %v11612_v10  ;;  %v6057_v36 = vld [vmem:[%s13664_s5 + $0x70] sm:$0xff]  ;;  %6904 = vmatpush3.bf16.msra.mxu1 %v6879_v60 }
 0x4ce   : > { %v12055_v17 = vmul.u32.u64.low %v12016_v62, %v5362_v7  ;;  %v12056_v29 = vmul.u32.u64.high %v12016_v62, %v5362_v7, %v12055_v17  ;;  %v4714_v34 = vshll.u32 %v13881_v46, %v11612_v10  ;;  %v5354_v41 = vsel %vm5348_vm10, %v5351_v44, %v5353_v38  ;;  %6884 = vmatprep.subr.bf16.mxu0 %v6883_v32  ;;  %6897 = vmatprep.subr.bf16.mxu1 %v6883_v32 }
 0x4cf   : > { %v4463_v2 = vxor.u32 2147483648, %v4462_v57  ;;  %v12075_v15 = vand.u32 3, %v11992_v27  ;;  %v4710_v11 = vor.u32 %v12010_v24, %v11969_v6  ;;  %v4655_v58 = vclz %v6469_v20 }
 0x4d0   : > { %v12080_v10 = vor.u32 %v12014_v50, %v4711_v3  ;;  %v4716_v43 = vor.u32 %v12020_v42, %v4714_v34  ;;  %vm5372_vm7 = vc.u32 %v12056_v29, %v12059_v30  ;;  %v5373_v35 = vadd.s32 1, %v12060_v13  ;;  %6886 = vmatpush3.bf16.msra.mxu0 %v6883_v32 }
 0x4d1   : > { %v4464_v27 = vsel %vm4381_vm13, %v4463_v2, %v4462_v57  ;;  %v5370_v6 = vmul.u32 %v12016_v62, %v5354_v41  ;;  %v6887_v24 = vpack.c.bf16 %v6058_v48, %v6057_v36  ;;  %v6470_v42 = vadd.s32 4294967294, %v4655_v58  ;;  %6905 = vmatpush3.bf16.msra.mxu1 %v6883_v32 }
 0x4d2   : > { %v4467_v50 = vsel %vm11919_vm6, %v11594_v23, %v4464_v27  ;;  %v5374_v20 = vsel %vm5372_vm7, %v5373_v35, %v12060_v13  ;;  %vm4724_vm13 = vcmp.lt.s32.totalorder %v11650_v49, 2  ;;  %v12102_v61 = vsel %vm4723_vm12, %v11996_v5, %v4710_v11  ;;  %v12115_v5 = vld [vmem:[%s13663_s4 + $0x1] ss:$0 sm:$0xff] }
 0x4d3   : > { %7298 = vcosq.f32 %v4467_v50  ;;  %v5375_v62 = vadd.s32 %v5374_v20, %v5370_v6  ;;  %vm6471_vm9 = vcmp.lt.s32.totalorder %v6470_v42, 0  ;;  %v12107_v26 = vsel %vm5222_vm2, %v12022_v53, 0  ;;  %6888 = vmatprep.subr.bf16.mxu0 %v6887_v24  ;;  %6898 = vmatprep.subr.bf16.mxu1 %v6887_v24 }
 0x4d4   : > { %7300 = vsinq.f32 %v4467_v50  ;;  %v4658_v47 = vsel %vm6471_vm9, 0, %v6470_v42  ;;  %v4728_v12 = vsel %vm4726_vm1, %v4716_v43, 2102212464  ;;  %v4583_v53 = vxor.u32 2147483648, %v11817_v59  ;;  %6890 = vmatpush3.bf16.msra.mxu0 %v6887_v24 }
 0x4d5   : > { %v5376_v57 = vadd.s32 536870912, %v5375_v62  ;;  %v4659_v31 = vsub.s32 32, %v4658_v47  ;;  %vm4478_vm1 = vcmp.eq.s32.totalorder %v12075_v15, 2  ;;  %vm4578_vm6 = vcmp.lt.s32.totalorder %v11986_v52, 2  ;;  %6906 = vmatpush3.bf16.msra.mxu1 %v6887_v24 }
 0x4d6   : > { %v4663_v17 = vsub.s32 4294967266, %v4658_v47  ;;  %v4731_v13 = vsel %vm4723_vm12, %v4710_v11, %v12080_v10  ;;  %v4733_v60 = vsel %vm4725_vm4, %v4716_v43, %v11689_v19  ;;  %vm4475_vm14 = vcmp.eq.s32.totalorder %v12075_v15, 0 }
 0x4d7   : > { %v12130_v32 = vshrl.u32 %v5376_v57, 30  ;;  %v4660_v34 = vshll.u32 %v11989_v14, %v4658_v47  ;;  %v4661_v41 = vshrl.u32 %v12006_v33, %v4659_v31  ;;  %vm4474_vm15 = vcmp.lt.s32.totalorder %v12075_v15, 2 }
 0x4d8   : > { %vm4589_vm0 = vcmp.lt.s32.totalorder %v11599_v22, 0  ;;  %v4664_v48 = vadd.s32 127, %v4663_v17  ;;  %v4735_v19 = vsel %vm4723_vm12, %v12080_v10, %v4716_v43  ;;  %v4737_v2 = vsel %vm4725_vm4, %v11662_v55, %v11693_v21 }
 0x4d9   : > { %v6732_v51 = vpop.f32.mrb[10].mxu1  ;;  %14107 = vst [vmem:[#allocation26_spill] sm:$0xff] %v12130_v32  ;;  %v5378_v14 = vshll.u32 %v12130_v32, 30  ;;  %vm4471_vm10 = vweird.f32 %v11594_v23  ;;  %v4734_v11 = vsel %vm4724_vm13, %v4731_v13, %v4733_v60  ;;  %v4738_v58 = vsel %vm4724_vm13, %v4735_v19, %v4737_v2 }
 0x4da   : > { %v4292_v44 = vadd.f32 %v12115_v5, %v6732_v51  ;;  %v4286_v38 = vpop.f32.mrb[11].mxu1  ;;  %vm4575_vm7 = vweird.f32 %v11492_v56  ;;  %v4662_v43 = vor.u32 %v4661_v41, %v4660_v34  ;;  %v4665_v35 = vshll.u32 %v4664_v48, 23 }
 0x4db   : > { %v12120_v7 = vadd.f32 %v12115_v5, %v4286_v38  ;;  %v12153_v27 = vmul.u32.u64.low %v11940_v4, %v4738_v58  ;;  %v12154_v6 = vmul.u32.u64.high %v11940_v4, %v4738_v58, %v12153_v27  ;;  %v12156_v55 = vsub.s32 %v5375_v62, %v5378_v14 }
 0x4dc   : > { %v4326_v3 = vand.u32 2147483647, %v4292_v44  ;;  %v4581_v21 = vsel %vm4579_vm8, %v11817_v59, %v4580_v39  ;;  %v4584_v24 = vsel %vm4582_vm11, %v4583_v53, %v11844_v1  ;;  %v14108_v50 = vand.u32 2147483647, %v11599_v22 }
 0x4dd   : > { %v4325_v36 = vand.u32 2147483647, %v12120_v7  ;;  %v4729_v20 = vsel %vm4725_vm4, %v12080_v10, %v4728_v12  ;;  %v7299_v62 = vpop.eup %7298  ;;  %v4666_v47 = vor.u32 4788187, %v4665_v35  ;;  %v12179_v1 = vand.u32 31, %v12107_v26 }
 0x4de   : > { %v4342_v33 = vadd.f32 1.0, %v4326_v3  ;;  %vm12166_vm12 = vcmp.le.f32.partialorder %v14108_v50, 0.7853982  ;;  %v12174_v57 = vmul.u32.u64.low %v11940_v4, %v4734_v11  ;;  %v12175_v59 = vmul.u32.u64.high %v11940_v4, %v4734_v11, %v12174_v57  ;;  %v7301_v39 = vpop.eup %7300 }
 0x4df   : > { %v4341_v51 = vadd.f32 1.0, %v4325_v36  ;;  %v4479_v53 = vxor.u32 2147483648, %v7299_v62  ;;  %v4673_v31 = vsub.s32 4, %v11937_v28  ;;  %v4476_v17 = vxor.u32 2147483648, %v7301_v39 }
 0x4e0   : > { %v4358_v38 = vmul.f32 30.0, %v4342_v33  ;;  %v4667_v13 = vand.u32 2147483647, %v4666_v47  ;;  %v4669_v60 = vcvt.s32.f32 %v4662_v43  ;;  %v4730_v10 = vsel %vm4724_vm13, %v12102_v61, %v4729_v20 }
 0x4e1   : > { %v5381_v12 = vsub.s32 0, %v12156_v55  ;;  %v4480_v3 = vsel %vm4478_vm1, %v4479_v53, %v7301_v39  ;;  %v4585_v34 = vsel %vm4578_vm6, %v4581_v21, %v4584_v24  ;;  %vm4748_vm2 = vc.u32 %v12154_v6, %v12174_v57 }
 0x4e2   : > { %v4357_v41 = vmul.f32 30.0, %v4341_v51  ;;  %v4477_v36 = vsel %vm4475_vm14, %v7299_v62, %v4476_v17  ;;  %v4670_v48 = vmul.f32 %v4669_v60, %v4667_v13  ;;  %v4749_v19 = vadd.s32 1, %v12175_v59 }
 0x4e3   : > { %v12195_v49 = vmul.f32 %v4358_v38, %v4292_v44  ;;  %v4481_v61 = vsel %vm4474_vm15, %v4477_v36, %v4480_v3  ;;  %v4674_v52 = vsel %vm4589_vm0, %v4673_v31, %v11937_v28  ;;  %v4746_v2 = vmul.u32 %v11940_v4, %v4730_v10 }
 0x4e4   : > { %v12204_v14 = vsub.s32 32, %v11963_v16  ;;  %v4482_v33 = vsel %vm4471_vm10, nan, %v4481_v61  ;;  %v4671_v11 = vxor.u32 2147483648, %v4670_v48  ;;  %v4750_v58 = vsel %vm4748_vm2, %v4749_v19, %v12175_v59 }
 0x4e5   : > { %14111 = vst [vmem:[#allocation16_spill] sm:$0xff] %v12195_v49  ;;  %v6497_v44 = vmin.u32 %v5381_v12, %v12156_v55  ;;  %v12211_v15 = vsub.s32 32, %v12179_v1  ;;  %6771 = vmatprep.mubr.f32.mxu0 %v4482_v33  ;;  %v4586_v28 = vsel %vm4575_vm7, nan, %v4585_v34  ;;  %v4751_v43 = vadd.s32 %v4750_v58, %v4746_v2  ;;  %v14114_v33 = vld [vmem:[#allocation5_spill] sm:$0xff] }
 0x4e6   : > { %v5136_v4 = vshll.u32 %v13883_v0, %v11943_v8  ;;  %v12218_v35 = vmul.f32 %v4357_v41, %v12120_v7  ;;  %6772 = vmatmul.mubr.f32.vlgmr.msra.gmra.mrb[16].mxu0 %v4586_v28  ;;  %v4672_v23 = vsel %vm4589_vm0, %v4671_v11, %v4670_v48  ;;  %v4676_v27 = vsel %vm12166_vm12, 0, %v4674_v52 }
 0x4e7   : > { %v5134_v21 = vshrl.u32 %v13883_v0, %v11972_v40  ;;  %v5526_v56 = vand.u32 2139095040, %v12195_v49  ;;  %v4675_v24 = vsel %vm12166_vm12, %v11599_v22, %v4672_v23  ;;  %v4752_v50 = vadd.s32 536870912, %v4751_v43 }
 0x4e8   : > { %14112 = vst [vmem:[#allocation32_spill] sm:$0xff] %v12218_v35  ;;  %v5137_v7 = vshrl.u32 %v14061_v45, %v11972_v40  ;;  %v5029_v20 = vshll.u32 %v13882_v54, %v11963_v16  ;;  %v5030_v62 = vshrl.u32 %v13883_v0, %v12204_v14  ;;  %7302 = vcosq.f32 %v4675_v24 }
 0x4e9   : > { %v5033_v51 = vshrl.u32 %v14061_v45, %v12204_v14  ;;  %v5383_v47 = vclz %v6497_v44  ;;  %v5238_v59 = vshrl.u32 %v13883_v0, %v12211_v15  ;;  %v4680_v42 = vadd.s32 3, %v4676_v27 }
 0x4ea   : > { %v5241_v39 = vshrl.u32 %v14061_v45, %v12211_v15  ;;  %v5422_v38 = vand.u32 2139095040, %v12218_v35  ;;  %7304 = vsinq.f32 %v4675_v24  ;;  %v12243_v53 = vshrl.u32 %v4752_v50, 30 }
 0x4eb   : > { %v12246_v31 = vor.u32 %v5134_v21, %v11976_v18  ;;  %v12249_v17 = vshrl.u32 %v11946_v25, 5  ;;  %v5032_v13 = vshll.u32 %v13883_v0, %v11963_v16  ;;  %v5527_v60 = vshrl.u32 %v5526_v56, 23 }
 0x4ec   : > { %v5138_v10 = vor.u32 %v5137_v7, %v5136_v4  ;;  %v12253_v12 = vor.u32 %v5030_v62, %v5029_v20  ;;  %v5237_v3 = vshll.u32 %v13882_v54, %v12179_v1  ;;  %v5240_v34 = vshll.u32 %v13883_v0, %v12179_v1 }
 0x4ed   : > { %v5034_v41 = vor.u32 %v5033_v51, %v5032_v13  ;;  %v6498_v36 = vadd.s32 4294967294, %v5383_v47  ;;  %v12260_v18 = vshrl.u32 %v12107_v26, 5  ;;  %v4754_v25 = vshll.u32 %v12243_v53, 30  ;;  %v14118_v51 = vld [vmem:[#allocation24_spill] sm:$0xff] }
 0x4ee   : > { %v12263_v48 = vor.u32 %v5238_v59, %v5237_v3  ;;  %v5242_v19 = vor.u32 %v5241_v39, %v5240_v34  ;;  %v5423_v61 = vshrl.u32 %v5422_v38, 23  ;;  %v4681_v52 = vand.u32 3, %v4680_v42  ;;  %v14119_v59 = vld [vmem:[#allocation30_spill] sm:$0xff] }
 0x4ef   : > { %vm5142_vm8 = vcmp.lt.s32.totalorder %v11960_v63, 4  ;;  %vm5038_vm11 = vcmp.lt.s32.totalorder %v12249_v17, 4  ;;  %v6504_v2 = vadd.s32 4294967169, %v5527_v60  ;;  %v14115_v11 = vand.u32 2147483647, %v14114_v33 }
 0x4f0   : > { %14113 = vst [vmem:[#allocation11_spill] sm:$0xff] %v12263_v48  ;;  %v12274_v26 = vsel %vm5142_vm8, %v12246_v31, 920167782  ;;  %v12278_v44 = vsel %vm5142_vm8, %v5138_v10, 1326507024  ;;  %vm4679_vm13 = vweird.f32 %v11599_v22  ;;  %vm6499_vm4 = vcmp.lt.s32.totalorder %v6498_v36, 0 }
 0x4f1   : > { %v12269_v58 = vand.u32 8388607, %v14115_v11  ;;  %v12283_v28 = vsel %vm5038_vm11, %v12253_v12, 920167782  ;;  %v12288_v4 = vsel %vm5038_vm11, %v5034_v41, 1326507024  ;;  %v12291_v23 = vsub.s32 %v4751_v43, %v4754_v25 }
 0x4f2   : > { %vm5246_vm9 = vcmp.lt.s32.totalorder %v12260_v18, 4  ;;  %v7303_v27 = vpop.eup %7302  ;;  %v6500_v24 = vadd.s32 4294967169, %v5423_v61  ;;  %vm4682_vm1 = vcmp.lt.s32.totalorder %v4681_v52, 2  ;;  %v5533_v50 = vadd.s32 1, %v6504_v2 }
 0x4f3   : > { %v12296_v21 = vsel %vm5246_vm9, %v12263_v48, 920167782  ;;  %v12300_v56 = vsel %vm5246_vm9, %v5242_v19, 1326507024  ;;  %vm4683_vm6 = vcmp.eq.s32.totalorder %v4681_v52, 0  ;;  %vm4686_vm14 = vcmp.eq.s32.totalorder %v4681_v52, 2 }
 0x4f4   : > { %14116 = vst [vmem:[#allocation22_spill] sm:$0xff] %v12296_v21  ;;  %14117 = vst [vmem:[#allocation29_spill] sm:$0xff] %v12300_v56  ;;  %v4687_v7 = vxor.u32 2147483648, %v7303_v27  ;;  %v7305_v20 = vpop.eup %7304  ;;  %v12302_v62 = vsel %vm6499_vm4, 0, %v6498_v36  ;;  %v4757_v43 = vsub.s32 0, %v12291_v23  ;;  %v4812_v47 = vshll.u32 %v13889_v9, %v14118_v51 }
 0x4f5   : > { %v4816_v42 = vshrl.u32 %v13881_v46, %v14119_v59  ;;  %v4684_v39 = vxor.u32 2147483648, %v7305_v20  ;;  %v4813_v13 = vshrl.u32 %v13880_v37, %v14119_v59  ;;  %v4815_v60 = vshll.u32 %v13880_v37, %v14118_v51 }
 0x4f6   : > { %v4688_v38 = vsel %vm4686_vm14, %v4687_v7, %v7305_v20  ;;  %v5429_v10 = vadd.s32 1, %v6500_v24  ;;  %v6473_v3 = vmin.u32 %v4757_v43, %v12291_v23  ;;  %v4818_v34 = vshll.u32 %v13881_v46, %v14118_v51 }
 0x4f7   : > { %v4819_v41 = vshrl.u32 %v13882_v54, %v14119_v59  ;;  %v5387_v36 = vsub.s32 32, %v12302_v62  ;;  %v5391_v25 = vsub.s32 4294967266, %v12302_v62  ;;  %vm5534_vm15 = vcmp.gt.s32.totalorder %v5533_v50, 0 }
 0x4f8   : > { %v4685_v19 = vsel %vm4683_vm6, %v7303_v27, %v4684_v39  ;;  %v4759_v2 = vclz %v6473_v3  ;;  %v4817_v11 = vor.u32 %v4816_v42, %v4815_v60  ;;  %v5371_v7 = vadd.s32 %v12059_v30, %v12056_v29  ;;  %v14120_v29 = vld [vmem:[#allocation20_spill] sm:$0xff] }
 0x4f9   : > { %v4689_v61 = vsel %vm4682_vm1, %v4685_v19, %v4688_v38  ;;  %v4820_v24 = vor.u32 %v4819_v41, %v4818_v34  ;;  %v4811_v43 = vshrl.u32 %v13889_v9, %v14119_v59  ;;  %v4814_v51 = vor.u32 %v4813_v13, %v4812_v47  ;;  %v14126_v19 = vld [vmem:[#allocation21_spill] sm:$0xff] }
 0x4fa   : > { %v4690_v20 = vsel %vm4679_vm13, nan, %v4689_v61  ;;  %v5388_v49 = vshll.u32 %v12156_v55, %v12302_v62  ;;  %v5535_v35 = vsel %vm5534_vm15, %v5533_v50, 0  ;;  %v4747_v52 = vadd.s32 %v12174_v57, %v12154_v6  ;;  %v14121_v50 = vld [vmem:[#allocation12_spill] sm:$0xff]  ;;  %v14122_v57 = vld [vmem:[#allocation9_spill] sm:$0xff]  ;;  %v14123_v62 = vld [vmem:[#allocation19_spill] sm:$0xff] }
 0x4fb   : > { %6774 = vmatprep.mubr.f32.mxu0 %v4690_v20  ;;  %v6474_v27 = vadd.s32 4294967294, %v4759_v2  ;;  %v5389_v42 = vshrl.u32 %v5371_v7, %v5387_v36  ;;  %v5392_v39 = vadd.s32 127, %v5391_v25  ;;  %vm5430_vm0 = vcmp.gt.s32.totalorder %v5429_v10, 0  ;;  %v14128_v7 = vld [vmem:[#allocation15_spill] sm:$0xff] }
 0x4fc   : > { %vm4827_vm10 = vcmp.lt.s32.totalorder %v14120_v29, 1  ;;  %vm4828_vm12 = vcmp.lt.s32.totalorder %v14120_v29, 2  ;;  %vm4829_vm2 = vcmp.lt.s32.totalorder %v14120_v29, 3  ;;  %v12346_v59 = vshrl.u32 %v5535_v35, 5 }
 0x4fd   : > { %vm6475_vm7 = vcmp.lt.s32.totalorder %v6474_v27, 0  ;;  %v4839_v22 = vsel %vm4827_vm10, %v4817_v11, %v4820_v24  ;;  %v4835_v55 = vsel %vm4827_vm10, %v4814_v51, %v4817_v11  ;;  %v4837_v6 = vsel %vm4829_vm2, %v4820_v24, %v14121_v50 }
 0x4fe   : > { %v4762_v30 = vsel %vm6475_vm7, 0, %v6474_v27  ;;  %v4841_v47 = vsel %vm4829_vm2, %v14123_v62, %v14122_v57  ;;  %14124 = vst [vmem:[#allocation13_spill] sm:$0xff] %v12346_v59  ;;  %v12350_v34 = vand.u32 31, %v5535_v35  ;;  %v4832_v25 = vsel %vm4830_vm3, %v4820_v24, 2102212464 }
 0x4ff   : > { %v4763_v13 = vsub.s32 32, %v4762_v30  ;;  %v4767_v60 = vsub.s32 4294967266, %v4762_v30  ;;  %v4842_v3 = vsel %vm4828_vm12, %v4839_v22, %v4841_v47  ;;  %v14127_v61 = vor.u32 8388608, %v14126_v19 }
 0x500   : > { %14125 = vst [vmem:[#allocation8_spill] sm:$0xff] %v12350_v34  ;;  %vm4693_vm13 = vcmp.lt.s32.totalorder %v14128_v7, 0  ;;  %v4764_v20 = vshll.u32 %v12291_v23, %v4762_v30  ;;  %v4838_v35 = vsel %vm4828_vm12, %v4835_v55, %v4837_v6  ;;  %v5393_v22 = vshll.u32 %v5392_v39, 23 }
 0x501   : > { %v6735_v38 = vpop.f32.mrb[12].mxu1  ;;  %v4843_v2 = vshll.u32 %v14127_v61, 8  ;;  %v4765_v27 = vshrl.u32 %v4747_v52, %v4763_v13  ;;  %v4768_v50 = vadd.s32 127, %v4767_v60  ;;  %v5431_v57 = vsel %vm5430_vm0, %v5429_v10, 0 }
 0x502   : > { %v12353_v41 = vadd.f32 %v12115_v5, %v6735_v38  ;;  %v4296_v36 = vpop.f32.mrb[13].mxu1  ;;  %v4831_v19 = vsel %vm4827_vm10, %v4811_v43, %v4814_v51  ;;  %v4833_v61 = vsel %vm4829_vm2, %v4817_v11, %v4832_v25  ;;  %v12379_v10 = vor.u32 %v5389_v42, %v5388_v49 }
 0x503   : > { %v12364_v62 = vmul.u32.u64.low %v4843_v2, %v4842_v3  ;;  %v12365_v47 = vmul.u32.u64.high %v4843_v2, %v4842_v3, %v12364_v62  ;;  %v4766_v38 = vor.u32 %v4765_v27, %v4764_v20  ;;  %v4769_v24 = vshll.u32 %v4768_v50, 23 }
 0x504   : > { %v4328_v23 = vand.u32 2147483647, %v12353_v41  ;;  %v12373_v52 = vadd.f32 %v12115_v5, %v4296_v36  ;;  %v12375_v30 = vmul.u32.u64.low %v4843_v2, %v4838_v35  ;;  %v12376_v39 = vmul.u32.u64.high %v4843_v2, %v4838_v35, %v12375_v30 }
 0x505   : > { %v12382_v55 = vsub.s32 32, %v12350_v34  ;;  %v14130_v6 = vand.u32 2147483647, %v14128_v7  ;;  %v4770_v11 = vor.u32 4788187, %v4769_v24  ;;  %v4777_v51 = vsub.s32 4, %v12243_v53 }
 0x506   : > { %v5549_v13 = vshll.u32 %v13882_v54, %v12350_v34  ;;  %v12395_v60 = vshll.u32 %v13883_v0, %v12350_v34  ;;  %v12397_v49 = vshrl.u32 %v5431_v57, 5  ;;  %v4834_v42 = vsel %vm4828_vm12, %v4831_v19, %v4833_v61 }
 0x507   : > { %14129 = vst [vmem:[#allocation6_spill] sm:$0xff] %v12382_v55  ;;  %vm12386_vm3 = vcmp.le.f32.partialorder %v14130_v6, 0.7853982  ;;  %v12401_v3 = vand.u32 31, %v5431_v57  ;;  %v4771_v36 = vand.u32 2147483647, %v4770_v11  ;;  %v4773_v25 = vcvt.s32.f32 %v4766_v38 }
 0x508   : > { %vm4852_vm4 = vc.u32 %v12365_v47, %v12375_v30  ;;  %v5394_v20 = vor.u32 4788187, %v5393_v22  ;;  %v4344_v27 = vadd.f32 1.0, %v4328_v23  ;;  %v4327_v50 = vand.u32 2147483647, %v12373_v52  ;;  %v14134_v6 = vld [vmem:[#allocation25_spill] sm:$0xff] }
 0x509   : > { %14133 = vst [vmem:[#allocation5_spill] sm:$0xff] %v12401_v3  ;;  %v4853_v35 = vadd.s32 1, %v12376_v39  ;;  %v4774_v62 = vmul.f32 %v4773_v25, %v4771_v36  ;;  %v4850_v24 = vmul.u32 %v4843_v2, %v4834_v42  ;;  %v4920_v34 = vshrl.u32 %v13881_v46, %v14134_v6  ;;  %v14135_v2 = vld [vmem:[#allocation28_spill] sm:$0xff] }
 0x50a   : > { %v4923_v29 = vshrl.u32 %v13882_v54, %v14134_v6  ;;  %v5397_v57 = vcvt.s32.f32 %v12379_v10  ;;  %v4778_v38 = vsel %vm4693_vm13, %v4777_v51, %v12243_v53  ;;  %v4917_v19 = vshrl.u32 %v13880_v37, %v14134_v6 }
 0x50b   : > { %v4854_v22 = vsel %vm4852_vm4, %v4853_v35, %v12376_v39  ;;  %v4775_v61 = vxor.u32 2147483648, %v4774_v62  ;;  %v4919_v11 = vshll.u32 %v13880_v37, %v14135_v2  ;;  %v4922_v42 = vshll.u32 %v13881_v46, %v14135_v2 }
 0x50c   : > { %v4855_v23 = vadd.s32 %v4854_v22, %v4850_v24  ;;  %v5550_v10 = vshrl.u32 %v13883_v0, %v12382_v55  ;;  %v4360_v36 = vmul.f32 30.0, %v4344_v27  ;;  %v4343_v25 = vadd.f32 1.0, %v4327_v50 }
 0x50d   : > { %v4916_v53 = vshll.u32 %v13889_v9, %v14135_v2  ;;  %vm5558_vm1 = vcmp.lt.s32.totalorder %v12346_v59, 4  ;;  %v4776_v39 = vsel %vm4693_vm13, %v4775_v61, %v4774_v62  ;;  %v4921_v35 = vor.u32 %v4920_v34, %v4919_v11  ;;  %v14137_v34 = vld [vmem:[#allocation27_spill] sm:$0xff]  ;;  %v14140_v11 = vld [vmem:[#allocation10_spill] sm:$0xff] }
 0x50e   : > { %v4856_v51 = vadd.s32 536870912, %v4855_v23  ;;  %v4924_v24 = vor.u32 %v4923_v29, %v4922_v42  ;;  %v5395_v22 = vand.u32 2147483647, %v5394_v20  ;;  %v12430_v32 = vsub.s32 32, %v12401_v3 }
 0x50f   : > { %v4779_v27 = vsel %vm12386_vm3, %v14128_v7, %v4776_v39  ;;  %v4780_v50 = vsel %vm12386_vm3, 0, %v4778_v38  ;;  %v4907_v21 = vor.u32 8388608, %v12269_v58  ;;  %v4918_v62 = vor.u32 %v4917_v19, %v4916_v53  ;;  %v14139_v38 = vld [vmem:[#allocation18_spill] sm:$0xff]  ;;  %v14142_v39 = vld [vmem:[#allocation7_spill] sm:$0xff] }
 0x510   : > { %14136 = vst [vmem:[#allocation24_spill] sm:$0xff] %v12430_v32  ;;  %7306 = vcosq.f32 %v4779_v27  ;;  %v12437_v2 = vshrl.u32 %v4856_v51, 30  ;;  %v4359_v61 = vmul.f32 30.0, %v4343_v25  ;;  %vm4931_vm6 = vcmp.lt.s32.totalorder %v14137_v34, 1 }
 0x511   : > { %7308 = vsinq.f32 %v4779_v27  ;;  %vm4933_vm14 = vcmp.lt.s32.totalorder %v14137_v34, 3  ;;  %v12443_v20 = vmul.f32 %v4360_v36, %v12353_v41  ;;  %v4943_v43 = vsel %vm4931_vm6, %v4921_v35, %v4924_v24 }
 0x512   : > { %v4858_v29 = vshll.u32 %v12437_v2, 30  ;;  %v4945_v58 = vsel %vm4933_vm14, %v14140_v11, %v14139_v38  ;;  %v12452_v19 = vor.u32 %v5550_v10, %v5549_v13  ;;  %v5553_v42 = vshrl.u32 %v14061_v45, %v12382_v55 }
 0x513   : > { %14138 = vst [vmem:[#allocation30_spill] sm:$0xff] %v12443_v20  ;;  %v5445_v25 = vshll.u32 %v13882_v54, %v12401_v3  ;;  %v4784_v41 = vadd.s32 3, %v4780_v50  ;;  %vm4932_vm15 = vcmp.lt.s32.totalorder %v14137_v34, 2  ;;  %v4939_v53 = vsel %vm4931_vm6, %v4918_v62, %v4921_v35  ;;  %v14143_v50 = vld [vmem:[#allocation17_spill] sm:$0xff] }
 0x514   : > { %14141 = vst [vmem:[#allocation20_spill] sm:$0xff] %v12452_v19  ;;  %v12458_v36 = vsub.s32 %v4855_v23, %v4858_v29  ;;  %v4941_v51 = vsel %vm4933_vm14, %v4924_v24, %v14142_v39  ;;  %v5398_v13 = vmul.f32 %v5397_v57, %v5395_v22  ;;  %v5446_v10 = vshrl.u32 %v13883_v0, %v12430_v32 }
 0x515   : > { %v12470_v27 = vshll.u32 %v13883_v0, %v12401_v3  ;;  %v4946_v23 = vsel %vm4932_vm15, %v4943_v43, %v4945_v58  ;;  %vm5317_vm0 = vcmp.lt.s32.totalorder %v14143_v50, 0  ;;  %vm5454_vm10 = vcmp.lt.s32.totalorder %v12397_v49, 4 }
 0x516   : > { %v5734_v29 = vand.u32 2139095040, %v12443_v20  ;;  %v12478_v38 = vmul.f32 %v4359_v61, %v12373_v52  ;;  %v4861_v57 = vsub.s32 0, %v12458_v36  ;;  %v4947_v22 = vshll.u32 %v4907_v21, 8 }
 0x517   : > { %v5554_v11 = vor.u32 %v5553_v42, %v12395_v60  ;;  %v12485_v39 = vsel %vm5558_vm1, %v12452_v19, 920167782  ;;  %v5449_v43 = vshrl.u32 %v14061_v45, %v12430_v32  ;;  %vm4783_vm7 = vweird.f32 %v14128_v7 }
 0x518   : > { %14144 = vst [vmem:[#allocation12_spill] sm:$0xff] %v12478_v38  ;;  %14145 = vst [vmem:[#allocation9_spill] sm:$0xff] %v12485_v39  ;;  %v4942_v58 = vsel %vm4932_vm15, %v4939_v53, %v4941_v51  ;;  %v4785_v52 = vand.u32 3, %v4784_v41  ;;  %v4936_v61 = vsel %vm4934_vm5, %v4924_v24, 2102212464  ;;  %v5399_v19 = vxor.u32 2147483648, %v5398_v13 }
 0x519   : > { %v12494_v21 = vmul.u32.u64.low %v4947_v22, %v4946_v23  ;;  %v12495_v20 = vmul.u32.u64.high %v4947_v22, %v4946_v23, %v12494_v21  ;;  %v14146_v60 = vand.u32 2147483647, %v14143_v50  ;;  %v12503_v39 = vor.u32 %v5446_v10, %v5445_v25 }
 0x51a   : > { %v6477_v55 = vmin.u32 %v4861_v57, %v12458_v36  ;;  %v4915_v41 = vshrl.u32 %v13889_v9, %v14134_v6  ;;  %v7307_v53 = vpop.eup %7306  ;;  %v5735_v51 = vshrl.u32 %v5734_v29, 23  ;;  %v5630_v24 = vand.u32 2139095040, %v12478_v38 }
 0x51b   : > { %vm12499_vm12 = vcmp.le.f32.partialorder %v14146_v60, 0.7853982  ;;  %14149 = vst [vmem:[#allocation19_spill] sm:$0xff] %v12503_v39  ;;  %v12509_v23 = vmul.u32.u64.low %v4947_v22, %v4942_v58  ;;  %v12510_v21 = vmul.u32.u64.high %v4947_v22, %v4942_v58, %v12509_v23  ;;  %v7309_v60 = vpop.eup %7308  ;;  %v4791_v3 = vxor.u32 2147483648, %v7307_v53 }
 0x51c   : > { %v4863_v32 = vclz %v6477_v55  ;;  %v4935_v25 = vsel %vm4931_vm6, %v4915_v41, %v4918_v62  ;;  %v4937_v10 = vsel %vm4933_vm14, %v4921_v35, %v4936_v61  ;;  %v12519_v6 = vsel %vm5558_vm1, %v5554_v11, 1326507024 }
 0x51d   : > { %14150 = vst [vmem:[#allocation21_spill] sm:$0xff] %v12519_v6  ;;  %v5450_v29 = vor.u32 %v5449_v43, %v12470_v27  ;;  %v4788_v57 = vxor.u32 2147483648, %v7309_v60  ;;  %vm4790_vm5 = vcmp.eq.s32.totalorder %v4785_v52, 2  ;;  %vm4786_vm2 = vcmp.lt.s32.totalorder %v4785_v52, 2 }
 0x51e   : > { %vm4787_vm13 = vcmp.eq.s32.totalorder %v4785_v52, 0  ;;  %v4792_v58 = vsel %vm4790_vm5, %v4791_v3, %v7309_v60  ;;  %v6478_v38 = vadd.s32 4294967294, %v4863_v32  ;;  %v6512_v48 = vadd.s32 4294967169, %v5735_v51 }
 0x51f   : > { %v5631_v55 = vshrl.u32 %v5630_v24, 23  ;;  %v4789_v56 = vsel %vm4787_vm13, %v7307_v53, %v4788_v57  ;;  %v4938_v62 = vsel %vm4932_vm15, %v4935_v25, %v4937_v10  ;;  %v5400_v35 = vsel %vm5317_vm0, %v5399_v19, %v5398_v13  ;;  %v14152_v25 = vld [vmem:[#allocation23_spill] sm:$0xff] }
 0x520   : > { %v12529_v11 = vsel %vm5454_vm10, %v12503_v39, 920167782  ;;  %v4793_v27 = vsel %vm4786_vm2, %v4789_v56, %v4792_v58  ;;  %vm6479_vm3 = vcmp.lt.s32.totalorder %v6478_v38, 0  ;;  %vm4956_vm4 = vc.u32 %v12495_v20, %v12509_v23 }
 0x521   : > { %v4794_v3 = vsel %vm4783_vm7, nan, %v4793_v27  ;;  %v4866_v32 = vsel %vm6479_vm3, 0, %v6478_v38  ;;  %v4957_v34 = vadd.s32 1, %v12510_v21  ;;  %v4851_v19 = vadd.s32 %v12375_v30, %v12365_v47  ;;  %v14151_v47 = vld [vmem:[#allocation14_spill] sm:$0xff] }
 0x522   : > { %6775 = vmatmul.mubr.f32.gmra.mrb[18].mxu0 %v4794_v3  ;;  %v4867_v13 = vsub.s32 32, %v4866_v32  ;;  %v4871_v43 = vsub.s32 4294967266, %v4866_v32  ;;  %v4954_v52 = vmul.u32 %v4947_v22, %v4938_v62  ;;  %v5403_v56 = vsel %vm12499_vm12, %v14143_v50, %v5400_v35 }
 0x523   : > { %v5741_v61 = vadd.s32 1, %v6512_v48  ;;  %v6508_v7 = vadd.s32 4294967169, %v5631_v55  ;;  %v4958_v38 = vsel %vm4956_vm4, %v4957_v34, %v12510_v21  ;;  %v4868_v41 = vshll.u32 %v12458_v36, %v4866_v32 }
 0x524   : > { %v4869_v53 = vshrl.u32 %v4851_v19, %v4867_v13  ;;  %v4872_v51 = vadd.s32 127, %v4871_v43  ;;  %v4959_v24 = vadd.s32 %v4958_v38, %v4954_v52  ;;  %v12545_v60 = vsel %vm5454_vm10, %v5450_v29, 1326507024 }
 0x525   : > { %v13836_v30 = vand.u32 2147483647, %v14151_v47  ;;  %v5021_v22 = vshrl.u32 %v13880_v37, %v12204_v14  ;;  %v5024_v48 = vshrl.u32 %v13881_v46, %v12204_v14  ;;  %7310 = vcosq.f32 %v5403_v56 }
 0x526   : > { %vm4797_vm6 = vcmp.lt.s32.totalorder %v14152_v25, 0  ;;  %v4870_v21 = vor.u32 %v4869_v53, %v4868_v41  ;;  %v4873_v36 = vshll.u32 %v4872_v51, 23  ;;  %v4960_v10 = vadd.s32 536870912, %v4959_v24 }
 0x527   : > { %v5637_v57 = vadd.s32 1, %v6508_v7  ;;  %v5020_v58 = vshll.u32 %v13889_v9, %v11963_v16  ;;  %v5023_v29 = vshll.u32 %v13880_v37, %v11963_v16  ;;  %v5027_v55 = vshrl.u32 %v13882_v54, %v12204_v14 }
 0x528   : > { %vm5742_vm14 = vcmp.gt.s32.totalorder %v5741_v61, 0  ;;  %v14153_v62 = vand.u32 2147483647, %v14152_v25  ;;  %v4874_v27 = vor.u32 4788187, %v4873_v36  ;;  %v12565_v3 = vshrl.u32 %v4960_v10, 30 }
 0x529   : > { %v5026_v32 = vshll.u32 %v13881_v46, %v11963_v16  ;;  %v6738_v34 = vpop.f32.mrb[14].mxu1  ;;  %v4877_v19 = vcvt.s32.f32 %v4870_v21  ;;  %v5010_v13 = vand.u32 8388607, %v13836_v30  ;;  %v5022_v43 = vor.u32 %v5021_v22, %v5020_v58 }
 0x52a   : > { %vm12561_vm15 = vcmp.le.f32.partialorder %v14153_v62, 0.7853982  ;;  %v12571_v52 = vor.u32 %v5024_v48, %v5023_v29  ;;  %v4312_v7 = vadd.f32 %v12115_v5, %v6738_v34  ;;  %v4306_v38 = vpop.f32.mrb[15].mxu1  ;;  %v4875_v41 = vand.u32 2147483647, %v4874_v27 }
 0x52b   : > { %v4962_v53 = vshll.u32 %v12565_v3, 30  ;;  %v5028_v51 = vor.u32 %v5027_v55, %v5026_v32  ;;  %7312 = vsinq.f32 %v5403_v56  ;;  %vm5638_vm7 = vcmp.gt.s32.totalorder %v5637_v57, 0 }
 0x52c   : > { %v12576_v36 = vadd.f32 %v12115_v5, %v4306_v38  ;;  %v4881_v16 = vsub.s32 4, %v12437_v2  ;;  %v4330_v21 = vand.u32 2147483647, %v4312_v7  ;;  %v4878_v10 = vmul.f32 %v4877_v19, %v4875_v41 }
 0x52d   : > { %v12579_v62 = vsub.s32 %v4959_v24, %v4962_v53  ;;  %vm5035_vm5 = vcmp.lt.s32.totalorder %v12249_v17, 1  ;;  %v5743_v22 = vsel %vm5742_vm14, %v5741_v61, 0  ;;  %v5011_v48 = vor.u32 8388608, %v5010_v13 }
 0x52e   : > { %vm5037_vm2 = vcmp.lt.s32.totalorder %v12249_v17, 3  ;;  %v5043_v56 = vsel %vm5035_vm5, %v5022_v43, %v12571_v52  ;;  %v4329_v5 = vand.u32 2147483647, %v12576_v36  ;;  %v4879_v58 = vxor.u32 2147483648, %v4878_v10 }
 0x52f   : > { %v4965_v29 = vsub.s32 0, %v12579_v62  ;;  %v5045_v24 = vsel %vm5037_vm2, %v5028_v51, %v12283_v28  ;;  %v5639_v55 = vsel %vm5638_vm7, %v5637_v57, 0  ;;  %v4882_v61 = vsel %vm4797_vm6, %v4881_v16, %v12437_v2  ;;  %v12602_v34 = vpop.eup %7310 }
 0x530   : > { %v5047_v27 = vsel %vm5035_vm5, %v12571_v52, %v5028_v51  ;;  %v5049_v32 = vsel %vm5037_vm2, %v12253_v12, %v12288_v4  ;;  %14156 = vst [vmem:[#allocation15_spill] sm:$0xff] %v12602_v34  ;;  %v4346_v19 = vadd.f32 1.0, %v4330_v21  ;;  %v4880_v28 = vsel %vm4797_vm6, %v4879_v58, %v4878_v10  ;;  %v14167_v34 = vld [vmem:[#allocation31_spill] sm:$0xff] }
 0x531   : > { %v6481_v57 = vmin.u32 %v4965_v29, %v12579_v62  ;;  %vm5036_vm13 = vcmp.lt.s32.totalorder %v12249_v17, 2  ;;  %v12608_v2 = vshrl.u32 %v5743_v22, 5  ;;  %v4883_v13 = vsel %vm12561_vm15, %v14152_v25, %v4880_v28 }
 0x532   : > { %v5046_v38 = vsel %vm5036_vm13, %v5043_v56, %v5045_v24  ;;  %v5050_v12 = vsel %vm5036_vm13, %v5047_v27, %v5049_v32  ;;  %v4345_v4 = vadd.f32 1.0, %v4329_v5  ;;  %7314 = vcosq.f32 %v4883_v13 }
 0x533   : > { %14157 = vst [vmem:[#allocation25_spill] sm:$0xff] %v12608_v2  ;;  %v4967_v41 = vclz %v6481_v57  ;;  %v12617_v53 = vshll.u32 %v5011_v48, 8  ;;  %v12619_v16 = vand.u32 31, %v5743_v22  ;;  %v12621_v21 = vshrl.u32 %v5639_v55, 5 }
 0x534   : > { %v4884_v10 = vsel %vm12561_vm15, 0, %v4882_v61  ;;  %7316 = vsinq.f32 %v4883_v13  ;;  %vm4901_vm3 = vcmp.lt.s32.totalorder %v14114_v33, 0  ;;  %v4362_v58 = vmul.f32 30.0, %v4346_v19 }
 0x535   : > { %14158 = vst [vmem:[#allocation28_spill] sm:$0xff] %v12619_v16  ;;  %v6482_v56 = vadd.s32 4294967294, %v4967_v41  ;;  %v12627_v29 = vmul.u32.u64.low %v12617_v53, %v5050_v12  ;;  %v12628_v24 = vmul.u32.u64.high %v12617_v53, %v5050_v12, %v12627_v29  ;;  %v12630_v5 = vpop.eup %7312  ;;  %v5019_v22 = vshrl.u32 %v13889_v9, %v12204_v14 }
 0x536   : > { %v5040_v48 = vsel %vm5038_vm11, %v5028_v51, 2102212464  ;;  %v12637_v35 = vmul.u32.u64.low %v12617_v53, %v5046_v38  ;;  %v12638_v61 = vmul.u32.u64.high %v12617_v53, %v5046_v38, %v12637_v35  ;;  %v12641_v27 = vand.u32 31, %v5639_v55 }
 0x537   : > { %v4361_v32 = vmul.f32 30.0, %v4345_v4  ;;  %v4888_v19 = vadd.s32 3, %v4884_v10  ;;  %v14159_v28 = vand.u32 2147483647, %v14114_v33  ;;  %vm6483_vm6 = vcmp.lt.s32.totalorder %v6482_v56, 0 }
 0x538   : > { %v12650_v14 = vsub.s32 32, %v12619_v16  ;;  %v4970_v51 = vsel %vm6483_vm6, 0, %v6482_v56  ;;  %v4985_v13 = vsub.s32 4, %v12565_v3  ;;  %v5039_v38 = vsel %vm5035_vm5, %v5019_v22, %v5022_v43 }
 0x539   : > { %vm12645_vm4 = vcmp.le.f32.partialorder %v14159_v28, 0.7853982  ;;  %v12655_v55 = vmul.f32 %v4362_v58, %v4312_v7  ;;  %v4971_v12 = vsub.s32 32, %v4970_v51  ;;  %v4975_v4 = vsub.s32 4294967266, %v4970_v51 }
 0x53a   : > { %14162 = vst [vmem:[#allocation27_spill] sm:$0xff] %v12650_v14  ;;  %v5041_v41 = vsel %vm5037_vm2, %v12571_v52, %v5040_v48  ;;  %v5757_v10 = vshll.u32 %v13882_v54, %v12619_v16  ;;  %v5760_v29 = vshll.u32 %v13883_v0, %v12619_v16  ;;  %v4955_v56 = vadd.s32 %v12509_v23, %v12495_v20 }
 0x53b   : > { %14163 = vst [vmem:[#allocation18_spill] sm:$0xff] %v12655_v55  ;;  %v5061_v28 = vadd.s32 1, %v12638_v61  ;;  %v12668_v43 = vsub.s32 32, %v12641_v27  ;;  %v12671_v7 = vmul.f32 %v4361_v32, %v12576_v36  ;;  %v4976_v58 = vadd.s32 127, %v4975_v4 }
 0x53c   : > { %vm5060_vm11 = vc.u32 %v12628_v24, %v12637_v35  ;;  %v5653_v52 = vshll.u32 %v13882_v54, %v12641_v27  ;;  %vm4887_vm14 = vweird.f32 %v14152_v25  ;;  %v4889_v22 = vand.u32 3, %v4888_v19  ;;  %v7315_v23 = vpop.eup %7314 }
 0x53d   : > { %14164 = vst [vmem:[#allocation10_spill] sm:$0xff] %v12668_v43  ;;  %14165 = vst [vmem:[#allocation7_spill] sm:$0xff] %v12671_v7  ;;  %v4973_v48 = vshrl.u32 %v4955_v56, %v4971_v12  ;;  %v5042_v20 = vsel %vm5036_vm13, %v5039_v38, %v5041_v41  ;;  %v5758_v30 = vshrl.u32 %v13883_v0, %v12650_v14  ;;  %vm5766_vm15 = vcmp.lt.s32.totalorder %v12608_v2, 4 }
 0x53e   : > { %v5942_v36 = vand.u32 2139095040, %v12655_v55  ;;  %v4977_v32 = vshll.u32 %v4976_v58, 23  ;;  %v4986_v4 = vsel %vm4901_vm3, %v4985_v13, %v12565_v3  ;;  %v7317_v16 = vpop.eup %7316  ;;  %v5761_v19 = vshrl.u32 %v14061_v45, %v12650_v14 }
 0x53f   : > { %v4895_v12 = vxor.u32 2147483648, %v7315_v23  ;;  %v4972_v17 = vshll.u32 %v12579_v62, %v4970_v51  ;;  %v5062_v38 = vsel %vm5060_vm11, %v5061_v28, %v12638_v61  ;;  %v5654_v41 = vshrl.u32 %v13883_v0, %v12668_v43 }
 0x540   : > { %v5838_v56 = vand.u32 2139095040, %v12671_v7  ;;  %v4892_v58 = vxor.u32 2147483648, %v7317_v16  ;;  %v5058_v3 = vmul.u32 %v12617_v53, %v5042_v20  ;;  %vm4894_vm7 = vcmp.eq.s32.totalorder %v4889_v22, 2 }
 0x541   : > { %v4974_v13 = vor.u32 %v4973_v48, %v4972_v17  ;;  %v4978_v55 = vor.u32 4788187, %v4977_v32  ;;  %v4988_v14 = vsel %vm12645_vm4, 0, %v4986_v4  ;;  %v12702_v62 = vshrl.u32 %v14061_v45, %v12668_v43 }
 0x542   : > { %v5943_v51 = vshrl.u32 %v5942_v36, 23  ;;  %v4896_v61 = vsel %vm4894_vm7, %v4895_v12, %v7317_v16  ;;  %v5063_v28 = vadd.s32 %v5062_v38, %v5058_v3  ;;  %v12704_v6 = vor.u32 %v5758_v30, %v5757_v10 }
 0x543   : > { %v5762_v59 = vor.u32 %v5761_v19, %v5760_v29  ;;  %vm4890_vm5 = vcmp.lt.s32.totalorder %v4889_v22, 2  ;;  %vm4891_vm2 = vcmp.eq.s32.totalorder %v4889_v22, 0  ;;  %v5839_v7 = vshrl.u32 %v5838_v56, 23 }
 0x544   : > { %14166 = vst [vmem:[#allocation17_spill] sm:$0xff] %v12704_v6  ;;  %v4893_v53 = vsel %vm4891_vm2, %v7315_v23, %v4892_v58  ;;  %v4979_v20 = vand.u32 2147483647, %v4978_v55  ;;  %v4992_v48 = vadd.s32 3, %v4988_v14  ;;  %v5656_v32 = vshll.u32 %v13883_v0, %v12641_v27 }
 0x545   : > { %v4897_v4 = vsel %vm4890_vm5, %v4893_v53, %v4896_v61  ;;  %v4981_v17 = vcvt.s32.f32 %v4974_v13  ;;  %v5107_v43 = vand.u32 2147483647, %v14167_v34  ;;  %v12709_v39 = vor.u32 %v5654_v41, %v5653_v52 }
 0x546   : > { %v6520_v16 = vadd.s32 4294967169, %v5943_v51  ;;  %v4898_v30 = vsel %vm4887_vm14, nan, %v4897_v4  ;;  %v5064_v10 = vadd.s32 536870912, %v5063_v28  ;;  %v12716_v29 = vsel %vm5766_vm15, %v12704_v6, 920167782 }
 0x547   : > { %14168 = vst [vmem:[#allocation14_spill] sm:$0xff] %v12716_v29  ;;  %v5658_v14 = vor.u32 %v12702_v62, %v5656_v32  ;;  %6777 = vmatprep.mubr.f32.mxu0 %v4898_v30  ;;  %v4982_v55 = vmul.f32 %v4981_v17, %v4979_v20  ;;  %v5125_v22 = vshrl.u32 %v13880_v37, %v11972_v40  ;;  %v12723_v52 = vsel %vm5766_vm15, %v5762_v59, 1326507024 }
 0x548   : > { %14169 = vst [vmem:[#allocation23_spill] sm:$0xff] %v12723_v52  ;;  %vm5662_vm13 = vcmp.lt.s32.totalorder %v12621_v21, 4  ;;  %v6516_v25 = vadd.s32 4294967169, %v5839_v7  ;;  %v12726_v23 = vand.u32 3, %v4992_v48  ;;  %v12728_v36 = vshrl.u32 %v5064_v10, 30 }
 0x549   : > { %v4983_v19 = vxor.u32 2147483648, %v4982_v55  ;;  %v5114_v12 = vand.u32 8388607, %v5107_v43  ;;  %v5123_v38 = vshrl.u32 %v13889_v9, %v11972_v40  ;;  %v5124_v41 = vshll.u32 %v13889_v9, %v11943_v8 }
 0x54a   : > { %v5949_v56 = vadd.s32 1, %v6520_v16  ;;  %v5066_v59 = vshll.u32 %v12728_v36, 30  ;;  %v5127_v7 = vshll.u32 %v13880_v37, %v11943_v8  ;;  %v5128_v58 = vshrl.u32 %v13881_v46, %v11972_v40 }
 0x54b   : > { %v4984_v3 = vsel %vm4901_vm3, %v4983_v19, %v4982_v55  ;;  %v5126_v13 = vor.u32 %v5125_v22, %v5124_v41  ;;  %v5130_v62 = vshll.u32 %v13881_v46, %v11943_v8  ;;  %v5131_v51 = vshrl.u32 %v13882_v54, %v11972_v40 }
 0x54c   : > { %v5845_v61 = vadd.s32 1, %v6516_v25  ;;  %v4987_v53 = vsel %vm12645_vm4, %v14114_v33, %v4984_v3  ;;  %v12750_v20 = vsub.s32 %v5063_v28, %v5066_v59  ;;  %v5129_v48 = vor.u32 %v5128_v58, %v5127_v7  ;;  %v14170_v58 = vld [vmem:[#allocation33_spill] sm:$0xff] }
 0x54d   : > { %7318 = vcosq.f32 %v4987_v53  ;;  %v5115_v32 = vor.u32 8388608, %v5114_v12  ;;  %v5132_v4 = vor.u32 %v5131_v51, %v5130_v62  ;;  %vm5139_vm3 = vcmp.lt.s32.totalorder %v11960_v63, 1 }
 0x54e   : > { %7320 = vsinq.f32 %v4987_v53  ;;  %v5069_v17 = vsub.s32 0, %v12750_v20  ;;  %vm5140_vm6 = vcmp.lt.s32.totalorder %v11960_v63, 2  ;;  %vm5141_vm11 = vcmp.lt.s32.totalorder %v11960_v63, 3 }
 0x54f   : > { %v5143_v40 = vsel %vm5139_vm3, %v5123_v38, %v5126_v13  ;;  %v5144_v8 = vsel %vm5142_vm8, %v5132_v4, 2102212464  ;;  %v5147_v57 = vsel %vm5139_vm3, %v5126_v13, %v5129_v48  ;;  %v5149_v28 = vsel %vm5141_vm11, %v5132_v4, %v12274_v26 }
 0x550   : > { %v6485_v16 = vmin.u32 %v5069_v17, %v12750_v20  ;;  %v5145_v30 = vsel %vm5141_vm11, %v5129_v48, %v5144_v8  ;;  %v5150_v10 = vsel %vm5140_vm6, %v5147_v57, %v5149_v28  ;;  %v5151_v55 = vsel %vm5139_vm3, %v5129_v48, %v5132_v4 }
 0x551   : > { %v12765_v22 = vsel %vm5662_vm13, %v12709_v39, 920167782  ;;  %v12769_v25 = vsel %vm5662_vm13, %v5658_v14, 1326507024  ;;  %v5153_v19 = vsel %vm5141_vm11, %v12246_v31, %v12278_v44  ;;  %v5155_v26 = vshll.u32 %v5115_v32, 8 }
 0x552   : > { %vm5950_vm8 = vcmp.gt.s32.totalorder %v5949_v56, 0  ;;  %vm5846_vm4 = vcmp.gt.s32.totalorder %v5845_v61, 0  ;;  %vm4995_vm14 = vcmp.eq.s32.totalorder %v12726_v23, 0  ;;  %vm4998_vm7 = vcmp.eq.s32.totalorder %v12726_v23, 2 }
 0x553   : > { %v5071_v12 = vclz %v6485_v16  ;;  %vm4994_vm5 = vcmp.lt.s32.totalorder %v12726_v23, 2  ;;  %v5146_v38 = vsel %vm5140_vm6, %v5143_v40, %v5145_v30  ;;  %v5154_v14 = vsel %vm5140_vm6, %v5151_v55, %v5153_v19 }
 0x554   : > { %v12780_v41 = vmul.u32.u64.low %v5155_v26, %v5150_v10  ;;  %v12781_v59 = vmul.u32.u64.high %v5155_v26, %v5150_v10, %v12780_v41  ;;  %vm4991_vm2 = vweird.f32 %v14114_v33  ;;  %vm5005_vm3 = vcmp.lt.s32.totalorder %v14151_v47, 0 }
 0x555   : > { %v6486_v31 = vadd.s32 4294967294, %v5071_v12  ;;  %v12786_v44 = vmul.u32.u64.low %v5155_v26, %v5154_v14  ;;  %v12787_v7 = vmul.u32.u64.high %v5155_v26, %v5154_v14, %v12786_v44  ;;  %v13852_v3 = vand.u32 2147483647, %v14170_v58 }
 0x556   : > { %v12790_v13 = vsel %vm5950_vm8, %v5949_v56, 0  ;;  %v12792_v62 = vsel %vm5846_vm4, %v5845_v61, 0  ;;  %v5059_v63 = vadd.s32 %v12637_v35, %v12628_v24  ;;  %v5229_v51 = vshrl.u32 %v13880_v37, %v12211_v15 }
 0x557   : > { %vm6487_vm6 = vcmp.lt.s32.totalorder %v6486_v31, 0  ;;  %v5089_v53 = vsub.s32 4, %v12728_v36  ;;  %v5162_v48 = vmul.u32 %v5155_v26, %v5146_v38  ;;  %v5228_v32 = vshll.u32 %v13889_v9, %v12179_v1  ;;  %v7319_v4 = vpop.eup %7318 }
 0x558   : > { %v5074_v17 = vsel %vm6487_vm6, 0, %v6486_v31  ;;  %v5165_v56 = vadd.s32 1, %v12781_v59  ;;  %v5218_v61 = vand.u32 8388607, %v13852_v3  ;;  %v5232_v24 = vshrl.u32 %v13881_v46, %v12211_v15  ;;  %v7321_v35 = vpop.eup %7320 }
 0x559   : > { %v4999_v40 = vxor.u32 2147483648, %v7319_v4  ;;  %v5075_v8 = vsub.s32 32, %v5074_v17  ;;  %v5079_v57 = vsub.s32 4294967266, %v5074_v17  ;;  %v5231_v28 = vshll.u32 %v13880_v37, %v12179_v1 }
 0x55a   : > { %v4996_v16 = vxor.u32 2147483648, %v7321_v35  ;;  %v5076_v30 = vshll.u32 %v12750_v20, %v5074_v17  ;;  %vm5164_vm11 = vc.u32 %v12787_v7, %v12780_v41  ;;  %v5230_v10 = vor.u32 %v5229_v51, %v5228_v32 }
 0x55b   : > { %v5000_v55 = vsel %vm4998_vm7, %v4999_v40, %v7321_v35  ;;  %v14171_v19 = vand.u32 2147483647, %v14151_v47  ;;  %v5077_v12 = vshrl.u32 %v5059_v63, %v5075_v8  ;;  %v5080_v38 = vadd.s32 127, %v5079_v57  ;;  %v14174_v8 = vld [vmem:[#allocation29_spill] sm:$0xff] }
 0x55c   : > { %v5166_v14 = vsel %vm5164_vm11, %v5165_v56, %v12781_v59  ;;  %v4997_v20 = vsel %vm4995_vm14, %v7319_v4, %v4996_v16  ;;  %v5233_v44 = vor.u32 %v5232_v24, %v5231_v28  ;;  %v5234_v51 = vshll.u32 %v13881_v46, %v12179_v1  ;;  %v14178_v16 = vld [vmem:[#allocation22_spill] sm:$0xff] }
 0x55d   : > { %vm12815_vm8 = vcmp.le.f32.partialorder %v14171_v19, 0.7853982  ;;  %v5167_v31 = vadd.s32 %v5166_v14, %v5162_v48  ;;  %v5001_v32 = vsel %vm4994_vm5, %v4997_v20, %v5000_v55  ;;  %v5078_v17 = vor.u32 %v5077_v12, %v5076_v30 }
 0x55e   : > { %v5081_v35 = vshll.u32 %v5080_v38, 23  ;;  %v5235_v40 = vshrl.u32 %v13882_v54, %v12211_v15  ;;  %v5002_v63 = vsel %vm4991_vm2, nan, %v5001_v32  ;;  %v5090_v59 = vsel %vm5005_vm3, %v5089_v53, %v12728_v36  ;;  %v14175_v36 = vld [vmem:[#allocation11_spill] sm:$0xff] }
 0x55f   : > { %vm5109_vm4 = vcmp.lt.s32.totalorder %v14167_v34, 0  ;;  %v5168_v48 = vadd.s32 536870912, %v5167_v31  ;;  %v5219_v4 = vor.u32 8388608, %v5218_v61  ;;  %6778 = vmatmul.mubr.f32.gmra.mrb[20].mxu0 %v5002_v63  ;;  %vm5243_vm14 = vcmp.lt.s32.totalorder %v12260_v18, 1 }
 0x560   : > { %v5082_v1 = vor.u32 4788187, %v5081_v35  ;;  %v5236_v23 = vor.u32 %v5235_v40, %v5234_v51  ;;  %vm5245_vm7 = vcmp.lt.s32.totalorder %v12260_v18, 3  ;;  %v5227_v33 = vshrl.u32 %v13889_v9, %v12211_v15 }
 0x561   : > { %v5169_v56 = vshrl.u32 %v5168_v48, 30  ;;  %v5251_v24 = vsel %vm5243_vm14, %v5230_v10, %v5233_v44  ;;  %v5257_v53 = vsel %vm5245_vm7, %v14175_v36, %v14174_v8  ;;  %v5085_v57 = vcvt.s32.f32 %v5078_v17 }
 0x562   : > { %v5083_v61 = vand.u32 2147483647, %v5082_v1  ;;  %vm12846_vm5 = vcmp.le.f32.partialorder %v5107_v43, 0.7853982  ;;  %v5253_v15 = vsel %vm5245_vm7, %v5236_v23, %v14178_v16  ;;  %v5255_v30 = vsel %vm5243_vm14, %v5233_v44, %v5236_v23 }
 0x563   : > { %v5170_v55 = vshll.u32 %v5169_v56, 30  ;;  %v5193_v19 = vsub.s32 4, %v5169_v56  ;;  %vm5244_vm2 = vcmp.lt.s32.totalorder %v12260_v18, 2  ;;  %v5248_v12 = vsel %vm5246_vm9, %v5236_v23, 2102212464 }
 0x564   : > { %v5086_v38 = vmul.f32 %v5085_v57, %v5083_v61  ;;  %v5254_v43 = vsel %vm5244_vm2, %v5251_v24, %v5253_v15  ;;  %v5258_v14 = vsel %vm5244_vm2, %v5255_v30, %v5257_v53  ;;  %v5259_v20 = vshll.u32 %v5219_v4, 8 }
 0x565   : > { %v12863_v51 = vand.u32 31, %v12790_v13  ;;  %v12866_v32 = vand.u32 31, %v12792_v62  ;;  %v5092_v17 = vsel %vm12815_vm8, 0, %v5090_v59  ;;  %v12870_v35 = vsub.s32 %v5167_v31, %v5170_v55 }
 0x566   : > { %v5087_v40 = vxor.u32 2147483648, %v5086_v38  ;;  %v5247_v63 = vsel %vm5243_vm14, %v5227_v33, %v5230_v10  ;;  %v12874_v48 = vmul.u32.u64.low %v5259_v20, %v5258_v14  ;;  %v12875_v1 = vmul.u32.u64.high %v5259_v20, %v5258_v14, %v12874_v48  ;;  %v14181_v10 = vld [vmem:[#allocation26_spill] sm:$0xff] }
 0x567   : > { %14179 = vst [vmem:[#allocation31_spill] sm:$0xff] %v12863_v51  ;;  %14180 = vst [vmem:[#allocation33_spill] sm:$0xff] %v12866_v32  ;;  %v5173_v4 = vsub.s32 0, %v12870_v35  ;;  %v5249_v23 = vsel %vm5245_vm7, %v5233_v44, %v5248_v12  ;;  %v12880_v24 = vmul.u32.u64.low %v5259_v20, %v5254_v43  ;;  %v12881_v8 = vmul.u32.u64.high %v5259_v20, %v5254_v43, %v12880_v24 }
 0x568   : > { %v5088_v31 = vsel %vm5005_vm3, %v5087_v40, %v5086_v38  ;;  %v5096_v59 = vadd.s32 3, %v5092_v17  ;;  %v5194_v36 = vsel %vm5109_vm4, %v5193_v19, %v5169_v56  ;;  %v5401_v33 = vsub.s32 4, %v14181_v10 }
 0x569   : > { %v12890_v53 = vshrl.u32 %v12790_v13, 5  ;;  %v12893_v61 = vshrl.u32 %v12792_v62, 5  ;;  %v5091_v44 = vsel %vm12815_vm8, %v14151_v47, %v5088_v31  ;;  %v6489_v57 = vmin.u32 %v5173_v4, %v12870_v35 }
 0x56a   : > { %v12900_v16 = vsub.s32 32, %v12863_v51  ;;  %v12903_v15 = vsub.s32 32, %v12866_v32  ;;  %7322 = vcosq.f32 %v5091_v44  ;;  %v5250_v13 = vsel %vm5244_vm2, %v5247_v63, %v5249_v23 }
 0x56b   : > { %14182 = vst [vmem:[#allocation29_spill] sm:$0xff] %v12890_v53  ;;  %7324 = vsinq.f32 %v5091_v44  ;;  %v5175_v56 = vclz %v6489_v57  ;;  %v5196_v62 = vsel %vm12846_vm5, 0, %v5194_v36  ;;  %vm5268_vm9 = vc.u32 %v12875_v1, %v12880_v24 }
 0x56c   : > { %14183 = vst [vmem:[#allocation11_spill] sm:$0xff] %v12903_v15  ;;  %v12913_v26 = vshll.u32 %v13882_v54, %v12863_v51  ;;  %v5097_v30 = vand.u32 3, %v5096_v59  ;;  %v5269_v55 = vadd.s32 1, %v12881_v8  ;;  %v5402_v18 = vsel %vm5317_vm0, %v5401_v33, %v14181_v10  ;;  %v14184_v59 = vld [vmem:[#allocation32_spill] sm:$0xff] }
 0x56d   : > { %v12921_v19 = vshll.u32 %v13883_v0, %v12863_v51  ;;  %v12925_v12 = vshll.u32 %v13882_v54, %v12866_v32  ;;  %v6490_v38 = vadd.s32 4294967294, %v5175_v56  ;;  %v5266_v43 = vmul.u32 %v5259_v20, %v5250_v13 }
 0x56e   : > { %v12929_v14 = vshrl.u32 %v13883_v0, %v12900_v16  ;;  %v12933_v17 = vshll.u32 %v13883_v0, %v12866_v32  ;;  %v5200_v40 = vadd.s32 3, %v5196_v62  ;;  %v5270_v63 = vsel %vm5268_vm9, %v5269_v55, %v12881_v8 }
 0x56f   : > { %v12938_v48 = vshrl.u32 %v13883_v0, %v12903_v15  ;;  %vm6491_vm0 = vcmp.lt.s32.totalorder %v6490_v38, 0  ;;  %v5271_v4 = vadd.s32 %v5270_v63, %v5266_v43  ;;  %v5404_v20 = vsel %vm12499_vm12, 0, %v5402_v18 }
 0x570   : > { %v12944_v23 = vshrl.u32 %v14061_v45, %v12903_v15  ;;  %vm5098_vm3 = vcmp.lt.s32.totalorder %v5097_v30, 2  ;;  %v5178_v31 = vsel %vm6491_vm0, 0, %v6490_v38  ;;  %v13851_v36 = vand.u32 2147483647, %v14184_v59  ;;  %v14185_v38 = vld [vmem:[#allocation24_spill] sm:$0xff] }
 0x571   : > { %vm5095_vm6 = vweird.f32 %v14151_v47  ;;  %v5163_v8 = vadd.s32 %v12780_v41, %v12787_v7  ;;  %v5179_v0 = vsub.s32 32, %v5178_v31  ;;  %v5183_v10 = vsub.s32 4294967266, %v5178_v31 }
 0x572   : > { %v5272_v33 = vadd.s32 536870912, %v5271_v4  ;;  %vm5099_vm11 = vcmp.eq.s32.totalorder %v5097_v30, 0  ;;  %vm5102_vm8 = vcmp.eq.s32.totalorder %v5097_v30, 2  ;;  %v12950_v42 = vand.u32 3, %v5200_v40 }
 0x573   : > { %v5408_v44 = vadd.s32 3, %v5404_v20  ;;  %v5180_v57 = vshll.u32 %v12870_v35, %v5178_v31  ;;  %v5181_v13 = vshrl.u32 %v5163_v8, %v5179_v0  ;;  %v5184_v56 = vadd.s32 127, %v5183_v10  ;;  %v14186_v0 = vld [vmem:[#allocation5_spill] sm:$0xff] }
 0x574   : > { %v5273_v62 = vshrl.u32 %v5272_v33, 30  ;;  %v7323_v55 = vpop.eup %7322  ;;  %v5426_v18 = vand.u32 8388607, %v13851_v36  ;;  %v5437_v41 = vshrl.u32 %v13880_v37, %v14185_v38  ;;  %v5440_v7 = vshrl.u32 %v13881_v46, %v14185_v38 }
 0x575   : > { %v5443_v43 = vshrl.u32 %v13882_v54, %v14185_v38  ;;  %v7325_v40 = vpop.eup %7324  ;;  %v5103_v63 = vxor.u32 2147483648, %v7323_v55  ;;  %v5182_v20 = vor.u32 %v5181_v13, %v5180_v57  ;;  %v5185_v35 = vshll.u32 %v5184_v56, 23 }
 0x576   : > { %vm5213_vm12 = vcmp.lt.s32.totalorder %v14170_v58, 0  ;;  %v5274_v31 = vshll.u32 %v5273_v62, 30  ;;  %v5100_v8 = vxor.u32 2147483648, %v7325_v40  ;;  %v5436_v10 = vshll.u32 %v13889_v9, %v14186_v0 }
 0x577   : > { %v5439_v33 = vshll.u32 %v13880_v37, %v14186_v0  ;;  %v5442_v36 = vshll.u32 %v13881_v46, %v14186_v0  ;;  %v5104_v3 = vsel %vm5102_vm8, %v5103_v63, %v7325_v40  ;;  %v5186_v51 = vor.u32 4788187, %v5185_v35 }
 0x578   : > { %v5267_v57 = vadd.s32 %v12880_v24, %v12875_v1  ;;  %v12971_v13 = vsub.s32 %v5271_v4, %v5274_v31  ;;  %v5101_v56 = vsel %vm5099_vm11, %v7323_v55, %v5100_v8  ;;  %v5438_v53 = vor.u32 %v5437_v41, %v5436_v10 }
 0x579   : > { %v5441_v32 = vor.u32 %v5440_v7, %v5439_v33  ;;  %v5444_v15 = vor.u32 %v5443_v43, %v5442_v36  ;;  %v5105_v29 = vsel %vm5098_vm3, %v5101_v56, %v5104_v3  ;;  %v5187_v6 = vand.u32 2147483647, %v5186_v51 }
 0x57a   : > { %v5189_v52 = vcvt.s32.f32 %v5182_v20  ;;  %v5277_v2 = vsub.s32 0, %v12971_v13  ;;  %v5106_v40 = vsel %vm5095_vm6, nan, %v5105_v29  ;;  %v5297_v63 = vsub.s32 4, %v5273_v62 }
 0x57b   : > { %v12978_v35 = vand.u32 3, %v5408_v44  ;;  %v5427_v1 = vor.u32 8388608, %v5426_v18  ;;  %6780 = vmatprep.mubr.f32.mxu0 %v5106_v40  ;;  %v14187_v4 = vand.u32 2147483647, %v14170_v58  ;;  %vm5451_vm7 = vcmp.lt.s32.totalorder %v12397_v49, 1 }
 0x57c   : > { %v5190_v24 = vmul.f32 %v5189_v52, %v5187_v6  ;;  %v6493_v3 = vmin.u32 %v5277_v2, %v12971_v13  ;;  %vm5453_vm2 = vcmp.lt.s32.totalorder %v12397_v49, 3  ;;  %v5412_v47 = vxor.u32 2147483648, %v12630_v5 }
 0x57d   : > { %vm12982_vm14 = vcmp.le.f32.partialorder %v14187_v4, 0.7853982  ;;  %v5435_v29 = vshrl.u32 %v13889_v9, %v14185_v38  ;;  %v5459_v51 = vsel %vm5451_vm7, %v5438_v53, %v5441_v32  ;;  %v5461_v6 = vsel %vm5453_vm2, %v5444_v15, %v12529_v11  ;;  %v14190_v11 = vld [vmem:[#allocation19_spill] sm:$0xff] }
 0x57e   : > { %v5191_v52 = vxor.u32 2147483648, %v5190_v24  ;;  %v5279_v30 = vclz %v6493_v3  ;;  %vm5452_vm9 = vcmp.lt.s32.totalorder %v12397_v49, 2  ;;  %v5456_v2 = vsel %vm5454_vm10, %v5444_v15, 2102212464 }
 0x57f   : > { %v5298_v36 = vsel %vm5213_vm12, %v5297_v63, %v5273_v62  ;;  %v5455_v44 = vsel %vm5451_vm7, %v5435_v29, %v5438_v53  ;;  %v5462_v18 = vsel %vm5452_vm9, %v5459_v51, %v5461_v6  ;;  %v5463_v38 = vsel %vm5451_vm7, %v5441_v32, %v5444_v15  ;;  %v14191_v62 = vld [vmem:[#allocation16_spill] sm:$0xff] }
 0x580   : > { %v5192_v41 = vsel %vm5109_vm4, %v5191_v52, %v5190_v24  ;;  %v6494_v7 = vadd.s32 4294967294, %v5279_v30  ;;  %v5465_v43 = vsel %vm5453_vm2, %v14190_v11, %v12545_v60  ;;  %v5467_v20 = vshll.u32 %v5427_v1, 8  ;;  %v14192_v1 = vld [vmem:[#allocation15_spill] sm:$0xff]  ;;  %v14193_v52 = vld [vmem:[#allocation6_spill] sm:$0xff] }
 0x581   : > { %v5195_v31 = vsel %vm12846_vm5, %v14167_v34, %v5192_v41  ;;  %v5457_v53 = vsel %vm5453_vm2, %v5441_v32, %v5456_v2  ;;  %v5466_v15 = vsel %vm5452_vm9, %v5463_v38, %v5465_v43  ;;  %v5523_v8 = vand.u32 2147483647, %v14191_v62 }
 0x582   : > { %7326 = vcosq.f32 %v5195_v31  ;;  %vm6495_vm10 = vcmp.lt.s32.totalorder %v6494_v7, 0  ;;  %v13016_v0 = vmul.u32.u64.low %v5467_v20, %v5466_v15  ;;  %v13017_v10 = vmul.u32.u64.high %v5467_v20, %v5466_v15, %v13016_v0 }
 0x583   : > { %7328 = vsinq.f32 %v5195_v31  ;;  %v5282_v60 = vsel %vm6495_vm10, 0, %v6494_v7  ;;  %v13019_v33 = vmul.u32.u64.low %v5467_v20, %v5462_v18  ;;  %v13020_v56 = vmul.u32.u64.high %v5467_v20, %v5462_v18, %v13019_v33 }
 0x584   : > { %v5283_v28 = vsub.s32 32, %v5282_v60  ;;  %v5287_v40 = vsub.s32 4294967266, %v5282_v60  ;;  %vm5411_vm4 = vcmp.eq.s32.totalorder %v12978_v35, 0  ;;  %v5458_v32 = vsel %vm5452_vm9, %v5455_v44, %v5457_v53 }
 0x585   : > { %v5300_v63 = vsel %vm12982_vm14, 0, %v5298_v36  ;;  %v13029_v24 = vsel %vm5411_vm4, %v14192_v1, %v5412_v47  ;;  %vm5414_vm5 = vcmp.eq.s32.totalorder %v12978_v35, 2  ;;  %v5415_v4 = vxor.u32 2147483648, %v14192_v1 }
 0x586   : > { %vm5206_vm0 = vcmp.eq.s32.totalorder %v12950_v42, 2  ;;  %v5284_v3 = vshll.u32 %v12971_v13, %v5282_v60  ;;  %v5285_v29 = vshrl.u32 %v5267_v57, %v5283_v28  ;;  %v5288_v51 = vadd.s32 127, %v5287_v40  ;;  %v14194_v57 = vld [vmem:[#allocation8_spill] sm:$0xff] }
 0x587   : > { %vm5476_vm3 = vc.u32 %v13017_v10, %v13019_v33  ;;  %vm5203_vm6 = vcmp.eq.s32.totalorder %v12950_v42, 0  ;;  %v5474_v49 = vmul.u32 %v5467_v20, %v5458_v32  ;;  %v5477_v6 = vadd.s32 1, %v13020_v56 }
 0x588   : > { %v5530_v47 = vand.u32 8388607, %v5523_v8  ;;  %v5541_v30 = vshrl.u32 %v13880_v37, %v14193_v52  ;;  %vm5202_vm11 = vcmp.lt.s32.totalorder %v12950_v42, 2  ;;  %v5286_v2 = vor.u32 %v5285_v29, %v5284_v3 }
 0x589   : > { %v5289_v13 = vshll.u32 %v5288_v51, 23  ;;  %v5543_v36 = vshll.u32 %v13880_v37, %v14194_v57  ;;  %v5544_v44 = vshrl.u32 %v13881_v46, %v14193_v52  ;;  %vm5199_vm8 = vweird.f32 %v14167_v34  ;;  %v14195_v51 = vld [vmem:[#allocation13_spill] sm:$0xff] }
 0x58a   : > { %v5478_v18 = vsel %vm5476_vm3, %v5477_v6, %v13020_v56  ;;  %v5540_v38 = vshll.u32 %v13889_v9, %v14194_v57  ;;  %v5546_v41 = vshll.u32 %v13881_v46, %v14194_v57  ;;  %v5547_v7 = vshrl.u32 %v13882_v54, %v14193_v52 }
 0x58b   : > { %v5290_v11 = vor.u32 4788187, %v5289_v13  ;;  %v5416_v43 = vsel %vm5414_vm5, %v5415_v4, %v12630_v5  ;;  %v5479_v20 = vadd.s32 %v5478_v18, %v5474_v49  ;;  %v5545_v31 = vor.u32 %v5544_v44, %v5543_v36  ;;  %v14198_v13 = vld [vmem:[#allocation20_spill] sm:$0xff] }
 0x58c   : > { %v5304_v53 = vadd.s32 3, %v5300_v63  ;;  %vm5410_vm7 = vcmp.lt.s32.totalorder %v12978_v35, 2  ;;  %v5539_v15 = vshrl.u32 %v13889_v9, %v14193_v52  ;;  %v5542_v0 = vor.u32 %v5541_v30, %v5540_v38  ;;  %v7327_v56 = vpop.eup %7326  ;;  %v14196_v52 = vld [vmem:[#allocation9_spill] sm:$0xff]  ;;  %v14199_v35 = vld [vmem:[#allocation12_spill] sm:$0xff] }
 0x58d   : > { %v5548_v60 = vor.u32 %v5547_v7, %v5546_v41  ;;  %v5291_v28 = vand.u32 2147483647, %v5290_v11  ;;  %v5293_v40 = vcvt.s32.f32 %v5286_v2  ;;  %v5480_v32 = vadd.s32 536870912, %v5479_v20  ;;  %v7329_v3 = vpop.eup %7328  ;;  %v14197_v2 = vld [vmem:[#allocation21_spill] sm:$0xff] }
 0x58e   : > { %v5531_v1 = vor.u32 8388608, %v5530_v47  ;;  %v5207_v29 = vxor.u32 2147483648, %v7327_v56  ;;  %vm5555_vm2 = vcmp.lt.s32.totalorder %v14195_v51, 1  ;;  %vm5556_vm9 = vcmp.lt.s32.totalorder %v14195_v51, 2 }
 0x58f   : > { %vm5557_vm10 = vcmp.lt.s32.totalorder %v14195_v51, 3  ;;  %v5204_v5 = vxor.u32 2147483648, %v7329_v3  ;;  %v5294_v63 = vmul.f32 %v5293_v40, %v5291_v28  ;;  %v5481_v4 = vshrl.u32 %v5480_v32, 30  ;;  %v14200_v51 = vld [vmem:[#allocation10_spill] sm:$0xff] }
 0x590   : > { %v5567_v49 = vsel %vm5555_vm2, %v5545_v31, %v5548_v60  ;;  %v5208_v6 = vsel %vm5206_vm0, %v5207_v29, %v7329_v3  ;;  %v5563_v47 = vsel %vm5555_vm2, %v5542_v0, %v5545_v31  ;;  %v5565_v30 = vsel %vm5557_vm10, %v5548_v60, %v14196_v52 }
 0x591   : > { %v5569_v57 = vsel %vm5557_vm10, %v14198_v13, %v14197_v2  ;;  %v5205_v36 = vsel %vm5203_vm6, %v7327_v56, %v5204_v5  ;;  %v5295_v44 = vxor.u32 2147483648, %v5294_v63  ;;  %v5482_v18 = vshll.u32 %v5481_v4, 30 }
 0x592   : > { %v5560_v38 = vsel %vm5558_vm1, %v5548_v60, 2102212464  ;;  %v5209_v41 = vsel %vm5202_vm11, %v5205_v36, %v5208_v6  ;;  %v5559_v7 = vsel %vm5555_vm2, %v5539_v15, %v5542_v0  ;;  %v5570_v11 = vsel %vm5556_vm9, %v5567_v49, %v5569_v57 }
 0x593   : > { %v5571_v28 = vshll.u32 %v5531_v1, 8  ;;  %v5210_v40 = vsel %vm5199_vm8, nan, %v5209_v41  ;;  %v5296_v56 = vsel %vm5213_vm12, %v5295_v44, %v5294_v63  ;;  %v13092_v32 = vsub.s32 %v5479_v20, %v5482_v18 }
 0x594   : > { %v5566_v60 = vsel %vm5556_vm9, %v5563_v47, %v5565_v30  ;;  %6781 = vmatmul.mubr.f32.gmra.mrb[22].mxu0 %v5210_v40  ;;  %v5299_v42 = vsel %vm12982_vm14, %v14170_v58, %v5296_v56  ;;  %v5561_v15 = vsel %vm5557_vm10, %v5545_v31, %v5560_v38  ;;  %v13106_v34 = vshrl.u32 %v14061_v45, %v12900_v16 }
 0x595   : > { %v13101_v0 = vmul.u32.u64.low %v5571_v28, %v5570_v11  ;;  %v13102_v1 = vmul.u32.u64.high %v5571_v28, %v5570_v11, %v13101_v0  ;;  %7330 = vcosq.f32 %v5299_v42  ;;  %v5417_v20 = vsel %vm5410_vm7, %v13029_v24, %v5416_v43 }
 0x596   : > { %v5485_v3 = vsub.s32 0, %v13092_v32  ;;  %7332 = vsinq.f32 %v5299_v42  ;;  %v13112_v55 = vand.u32 3, %v5304_v53  ;;  %v13120_v31 = vor.u32 %v12929_v14, %v12913_v26 }
 0x597   : > { %v13114_v29 = vmul.u32.u64.low %v5571_v28, %v5566_v60  ;;  %v13115_v5 = vmul.u32.u64.high %v5571_v28, %v5566_v60, %v13114_v29  ;;  %v5562_v63 = vsel %vm5556_vm9, %v5559_v7, %v5561_v15  ;;  %v5627_v24 = vand.u32 2147483647, %v14199_v35 }
 0x598   : > { %v6501_v45 = vmin.u32 %v5485_v3, %v13092_v32  ;;  %v13128_v43 = vor.u32 %v12938_v48, %v12925_v12  ;;  %v5866_v53 = vor.u32 %v12944_v23, %v12933_v17  ;;  %vm5407_vm1 = vweird.f32 %v14143_v50 }
 0x599   : > { %vm5421_vm12 = vcmp.lt.s32.totalorder %v14184_v59, 0  ;;  %v13134_v26 = vsel %vm5407_vm1, nan, %v5417_v20  ;;  %v5505_v49 = vsub.s32 4, %v5481_v4  ;;  %vm5580_vm14 = vc.u32 %v13102_v1, %v13114_v29 }
 0x59a   : > { %v5487_v14 = vclz %v6501_v45  ;;  %vm5307_vm4 = vcmp.eq.s32.totalorder %v13112_v55, 0  ;;  %vm5310_vm5 = vcmp.eq.s32.totalorder %v13112_v55, 2  ;;  %v5578_v12 = vmul.u32 %v5571_v28, %v5562_v63 }
 0x59b   : > { %v5581_v48 = vadd.s32 1, %v13115_v5  ;;  %v5645_v6 = vshrl.u32 %v13880_v37, %v14200_v51  ;;  %vm5306_vm0 = vcmp.lt.s32.totalorder %v13112_v55, 2  ;;  %v14201_v50 = vand.u32 2147483647, %v14184_v59 }
 0x59c   : > { %v6502_v52 = vadd.s32 4294967294, %v5487_v14  ;;  %v5634_v30 = vand.u32 8388607, %v5627_v24  ;;  %v5644_v2 = vshll.u32 %v13889_v9, %v12641_v27  ;;  %v5648_v13 = vshrl.u32 %v13881_v46, %v14200_v51 }
 0x59d   : > { %vm13146_vm3 = vcmp.le.f32.partialorder %v14201_v50, 0.7853982  ;;  %vm5303_vm6 = vweird.f32 %v14170_v58  ;;  %v5582_v57 = vsel %vm5580_vm14, %v5581_v48, %v13115_v5  ;;  %v5647_v36 = vshll.u32 %v13880_v37, %v12641_v27 }
 0x59e   : > { %v5650_v44 = vshll.u32 %v13881_v46, %v12641_v27  ;;  %v5651_v18 = vshrl.u32 %v13882_v54, %v14200_v51  ;;  %v5475_v38 = vadd.s32 %v13019_v33, %v13017_v10  ;;  %vm6503_vm11 = vcmp.lt.s32.totalorder %v6502_v52, 0 }
 0x59f   : > { %v5506_v41 = vsel %vm5421_vm12, %v5505_v49, %v5481_v4  ;;  %v5583_v7 = vadd.s32 %v5582_v57, %v5578_v12  ;;  %v5490_v11 = vsel %vm6503_vm11, 0, %v6502_v52  ;;  %v5646_v28 = vor.u32 %v5645_v6, %v5644_v2  ;;  %v7331_v60 = vpop.eup %7330 }
 0x5a0   : > { %v5649_v40 = vor.u32 %v5648_v13, %v5647_v36  ;;  %v5652_v56 = vor.u32 %v5651_v18, %v5650_v44  ;;  %v5491_v42 = vsub.s32 32, %v5490_v11  ;;  %v5495_v15 = vsub.s32 4294967266, %v5490_v11  ;;  %v7333_v20 = vpop.eup %7332 }
 0x5a1   : > { %v5584_v0 = vadd.s32 536870912, %v5583_v7  ;;  %v5635_v27 = vor.u32 8388608, %v5634_v30  ;;  %v5311_v3 = vxor.u32 2147483648, %v7331_v60  ;;  %v5492_v5 = vshll.u32 %v13092_v32, %v5490_v11 }
 0x5a2   : > { %vm5659_vm8 = vcmp.lt.s32.totalorder %v12621_v21, 1  ;;  %vm5661_vm7 = vcmp.lt.s32.totalorder %v12621_v21, 3  ;;  %vm5870_vm2 = vcmp.lt.s32.totalorder %v12893_v61, 4  ;;  %v5308_v10 = vxor.u32 2147483648, %v7333_v20 }
 0x5a3   : > { %v5493_v33 = vshrl.u32 %v5475_v38, %v5491_v42  ;;  %v5496_v4 = vadd.s32 127, %v5495_v15  ;;  %v13172_v45 = vshrl.u32 %v5584_v0, 30  ;;  %v5312_v63 = vsel %vm5310_vm5, %v5311_v3, %v7333_v20 }
 0x5a4   : > { %v5667_v14 = vsel %vm5659_vm8, %v5646_v28, %v5649_v40  ;;  %v5669_v32 = vsel %vm5661_vm7, %v5652_v56, %v12765_v22  ;;  %v5671_v49 = vsel %vm5659_vm8, %v5649_v40, %v5652_v56  ;;  %v5309_v12 = vsel %vm5307_vm4, %v7331_v60, %v5308_v10 }
 0x5a5   : > { %v5494_v48 = vor.u32 %v5493_v33, %v5492_v5  ;;  %v5497_v6 = vshll.u32 %v5496_v4, 23  ;;  %v5586_v50 = vshll.u32 %v13172_v45, 30  ;;  %v5313_v52 = vsel %vm5306_vm0, %v5309_v12, %v5312_v63 }
 0x5a6   : > { %v5508_v30 = vsel %vm13146_vm3, 0, %v5506_v41  ;;  %vm5660_vm9 = vcmp.lt.s32.totalorder %v12621_v21, 2  ;;  %v5673_v22 = vsel %vm5661_vm7, %v12709_v39, %v12769_v25  ;;  %v5314_v2 = vsel %vm5303_vm6, nan, %v5313_v52 }
 0x5a7   : > { %v5498_v13 = vor.u32 4788187, %v5497_v6  ;;  %v13197_v57 = vsub.s32 %v5583_v7, %v5586_v50  ;;  %v5664_v55 = vsel %vm5662_vm13, %v5652_v56, 2102212464  ;;  %6783 = vmatprep.mubr.f32.mxu1 %v5314_v2  ;;  %v5643_v36 = vshrl.u32 %v13889_v9, %v14200_v51  ;;  %v14208_v50 = vld [vmem:[#allocation28_spill] sm:$0xff] }
 0x5a8   : > { %v5670_v44 = vsel %vm5660_vm9, %v5667_v14, %v5669_v32  ;;  %v5674_v18 = vsel %vm5660_vm9, %v5671_v49, %v5673_v22  ;;  %v5675_v39 = vshll.u32 %v5635_v27, 8  ;;  %6784 = vmatmul.mubr.f32.vlgmr.msra.gmra.mrb[16].mxu1 %v13134_v26  ;;  %v5501_v58 = vcvt.s32.f32 %v5494_v48  ;;  %v14204_v27 = vld [vmem:[#allocation30_spill] sm:$0xff] }
 0x5a9   : > { %v5499_v25 = vand.u32 2147483647, %v5498_v13  ;;  %v5512_v38 = vadd.s32 3, %v5508_v30  ;;  %v5589_v41 = vsub.s32 0, %v13197_v57  ;;  %v5663_v7 = vsel %vm5659_vm8, %v5643_v36, %v5646_v28 }
 0x5aa   : > { %v5665_v51 = vsel %vm5661_vm7, %v5649_v40, %v5664_v55  ;;  %v13213_v11 = vmul.u32.u64.low %v5675_v39, %v5674_v18  ;;  %v13214_v56 = vmul.u32.u64.high %v5675_v39, %v5674_v18, %v13213_v11  ;;  %v5970_v26 = vor.u32 %v13106_v34, %v12921_v19 }
 0x5ab   : > { %v5502_v60 = vmul.f32 %v5501_v58, %v5499_v25  ;;  %v6505_v42 = vmin.u32 %v5589_v41, %v13197_v57  ;;  %v13217_v15 = vmul.u32.u64.low %v5675_v39, %v5670_v44  ;;  %v13218_v0 = vmul.u32.u64.high %v5675_v39, %v5670_v44, %v13217_v15 }
 0x5ac   : > { %v13226_v28 = vsel %vm5870_vm2, %v13128_v43, 920167782  ;;  %v13233_v40 = vsel %vm5870_vm2, %v5866_v53, 1326507024  ;;  %v5731_v20 = vand.u32 2147483647, %v14204_v27  ;;  %v5666_v33 = vsel %vm5660_vm9, %v5663_v7, %v5665_v51 }
 0x5ad   : > { %v5503_v3 = vxor.u32 2147483648, %v5502_v60  ;;  %vm13238_vm13 = vcmp.le.f32.partialorder %v5523_v8, 0.7853982  ;;  %v5591_v10 = vclz %v6505_v42  ;;  %v13244_v4 = vand.u32 3, %v5512_v38  ;;  %v14210_v42 = vld [vmem:[#allocation23_spill] sm:$0xff] }
 0x5ae   : > { %vm5525_vm10 = vcmp.lt.s32.totalorder %v14191_v62, 0  ;;  %v5579_v17 = vadd.s32 %v13114_v29, %v13102_v1  ;;  %v5609_v23 = vsub.s32 4, %v13172_v45  ;;  %vm5684_vm1 = vc.u32 %v13214_v56, %v13217_v15  ;;  %v14207_v1 = vld [vmem:[#allocation27_spill] sm:$0xff] }
 0x5af   : > { %v5504_v53 = vsel %vm5421_vm12, %v5503_v3, %v5502_v60  ;;  %v6506_v8 = vadd.s32 4294967294, %v5591_v10  ;;  %v5685_v63 = vadd.s32 1, %v13218_v0  ;;  %v5682_v14 = vmul.u32 %v5675_v39, %v5666_v33  ;;  %v14209_v60 = vld [vmem:[#allocation25_spill] sm:$0xff] }
 0x5b0   : > { %v5507_v21 = vsel %vm13146_vm3, %v14184_v59, %v5504_v53  ;;  %v5738_v32 = vand.u32 8388607, %v5731_v20  ;;  %v5749_v29 = vshrl.u32 %v13880_v37, %v14207_v1  ;;  %v5752_v12 = vshrl.u32 %v13881_v46, %v14207_v1 }
 0x5b1   : > { %7334 = vcosq.f32 %v5507_v21  ;;  %vm6507_vm14 = vcmp.lt.s32.totalorder %v6506_v8, 0  ;;  %v5686_v49 = vsel %vm5684_vm1, %v5685_v63, %v13218_v0  ;;  %v5748_v47 = vshll.u32 %v13889_v9, %v14208_v50  ;;  %v14211_v0 = vld [vmem:[#allocation17_spill] sm:$0xff] }
 0x5b2   : > { %7336 = vsinq.f32 %v5507_v21  ;;  %v5594_v48 = vsel %vm6507_vm14, 0, %v6506_v8  ;;  %v5687_v6 = vadd.s32 %v5686_v49, %v5682_v14  ;;  %v5610_v22 = vsel %vm5525_vm10, %v5609_v23, %v13172_v45  ;;  %v14212_v23 = vld [vmem:[#allocation14_spill] sm:$0xff] }
 0x5b3   : > { %v5595_v52 = vsub.s32 32, %v5594_v48  ;;  %v5599_v30 = vsub.s32 4294967266, %v5594_v48  ;;  %v5751_v2 = vshll.u32 %v13880_v37, %v14208_v50  ;;  %v5750_v55 = vor.u32 %v5749_v29, %v5748_v47 }
 0x5b4   : > { %v5688_v13 = vadd.s32 536870912, %v5687_v6  ;;  %v5754_v36 = vshll.u32 %v13881_v46, %v14208_v50  ;;  %v5755_v44 = vshrl.u32 %v13882_v54, %v14207_v1  ;;  %v5596_v18 = vshll.u32 %v13197_v57, %v5594_v48 }
 0x5b5   : > { %v5597_v39 = vshrl.u32 %v5579_v17, %v5595_v52  ;;  %v5600_v25 = vadd.s32 127, %v5599_v30  ;;  %v5753_v58 = vor.u32 %v5752_v12, %v5751_v2  ;;  %v5612_v38 = vsel %vm13238_vm13, 0, %v5610_v22 }
 0x5b6   : > { %v13279_v45 = vshrl.u32 %v5688_v13, 30  ;;  %v5739_v41 = vor.u32 8388608, %v5738_v32  ;;  %v5756_v7 = vor.u32 %v5755_v44, %v5754_v36  ;;  %vm5514_vm12 = vcmp.lt.s32.totalorder %v13244_v4, 2 }
 0x5b7   : > { %vm5515_vm4 = vcmp.eq.s32.totalorder %v13244_v4, 0  ;;  %v5598_v51 = vor.u32 %v5597_v39, %v5596_v18  ;;  %v5601_v11 = vshll.u32 %v5600_v25, 23  ;;  %vm5765_vm5 = vcmp.lt.s32.totalorder %v14209_v60, 3 }
 0x5b8   : > { %vm5518_vm0 = vcmp.eq.s32.totalorder %v13244_v4, 2  ;;  %v5690_v57 = vshll.u32 %v13279_v45, 30  ;;  %vm5763_vm3 = vcmp.lt.s32.totalorder %v14209_v60, 1  ;;  %v5777_v3 = vsel %vm5765_vm5, %v14211_v0, %v14210_v42  ;;  %v14213_v42 = vld [vmem:[#allocation7_spill] sm:$0xff] }
 0x5b9   : > { %v5602_v10 = vor.u32 4788187, %v5601_v11  ;;  %v5616_v33 = vadd.s32 3, %v5612_v38  ;;  %v5771_v17 = vsel %vm5763_vm3, %v5750_v55, %v5753_v58  ;;  %v5773_v53 = vsel %vm5765_vm5, %v5756_v7, %v14212_v23  ;;  %v13352_v23 = vpop.f32.mrb[16].mxu0 }
 0x5ba   : > { %v13296_v8 = vsub.s32 %v5687_v6, %v5690_v57  ;;  %vm5764_vm6 = vcmp.lt.s32.totalorder %v14209_v60, 2  ;;  %v5775_v63 = vsel %vm5763_vm3, %v5753_v58, %v5756_v7  ;;  %v5779_v21 = vshll.u32 %v5739_v41, 8 }
 0x5bb   : > { %v7335_v14 = vpop.eup %7334  ;;  %v5603_v32 = vand.u32 2147483647, %v5602_v10  ;;  %v5605_v29 = vcvt.s32.f32 %v5598_v51  ;;  %v5768_v49 = vsel %vm5766_vm15, %v5756_v7, 2102212464  ;;  %v5778_v12 = vsel %vm5764_vm6, %v5775_v63, %v5777_v3 }
 0x5bc   : > { %v7337_v48 = vpop.eup %7336  ;;  %v5519_v50 = vxor.u32 2147483648, %v7335_v14  ;;  %v5693_v6 = vsub.s32 0, %v13296_v8  ;;  %v5747_v47 = vshrl.u32 %v13889_v9, %v14207_v1  ;;  %v5774_v52 = vsel %vm5764_vm6, %v5771_v17, %v5773_v53 }
 0x5bd   : > { %v5516_v30 = vxor.u32 2147483648, %v7337_v48  ;;  %v5606_v22 = vmul.f32 %v5605_v29, %v5603_v32  ;;  %v13310_v2 = vmul.u32.u64.low %v5779_v21, %v5778_v12  ;;  %v13311_v13 = vmul.u32.u64.high %v5779_v21, %v5778_v12, %v13310_v2  ;;  %v14217_v12 = vld [vmem:[#allocation33_spill] sm:$0xff] }
 0x5be   : > { %v5520_v36 = vsel %vm5518_vm0, %v5519_v50, %v7337_v48  ;;  %v6509_v44 = vmin.u32 %v5693_v6, %v13296_v8  ;;  %v5767_v18 = vsel %vm5763_vm3, %v5747_v47, %v5750_v55  ;;  %v5769_v39 = vsel %vm5765_vm5, %v5753_v58, %v5768_v49 }
 0x5bf   : > { %v5517_v1 = vsel %vm5515_vm4, %v7335_v14, %v5516_v30  ;;  %v5607_v25 = vxor.u32 2147483648, %v5606_v22  ;;  %v13322_v38 = vmul.u32.u64.low %v5779_v21, %v5774_v52  ;;  %v13323_v41 = vmul.u32.u64.high %v5779_v21, %v5774_v52, %v13322_v38  ;;  %v13360_v14 = vpop.f32.mrb[17].mxu0 }
 0x5c0   : > { %vm5511_vm15 = vweird.f32 %v14184_v59  ;;  %v5521_v7 = vsel %vm5514_vm12, %v5517_v1, %v5520_v36  ;;  %v5695_v51 = vclz %v6509_v44  ;;  %v5713_v11 = vsub.s32 4, %v13279_v45 }
 0x5c1   : > { %v5522_v55 = vsel %vm5511_vm15, nan, %v5521_v7  ;;  %v5608_v58 = vsel %vm5525_vm10, %v5607_v25, %v5606_v22  ;;  %v5770_v57 = vsel %vm5764_vm6, %v5767_v18, %v5769_v39  ;;  %v5835_v0 = vand.u32 2147483647, %v14213_v42 }
 0x5c2   : > { %6786 = vmatprep.mubr.f32.mxu1 %v5522_v55  ;;  %v5611_v59 = vsel %vm13238_vm13, %v14191_v62, %v5608_v58  ;;  %vm5629_vm11 = vcmp.lt.s32.totalorder %v14199_v35, 0  ;;  %v6510_v4 = vadd.s32 4294967294, %v5695_v51  ;;  %vm5788_vm8 = vc.u32 %v13311_v13, %v13322_v38 }
 0x5c3   : > { %7338 = vcosq.f32 %v5611_v59  ;;  %v13341_v3 = vand.u32 3, %v5616_v33  ;;  %vm13345_vm7 = vcmp.le.f32.partialorder %v5627_v24, 0.7853982  ;;  %v5789_v10 = vadd.s32 1, %v13323_v41 }
 0x5c4   : > { %7340 = vsinq.f32 %v5611_v59  ;;  %v5683_v5 = vadd.s32 %v13217_v15, %v13214_v56  ;;  %vm6511_vm9 = vcmp.lt.s32.totalorder %v6510_v4, 0  ;;  %v5786_v17 = vmul.u32 %v5779_v21, %v5770_v57  ;;  %v14216_v56 = vld [vmem:[#allocation11_spill] sm:$0xff] }
 0x5c5   : > { %v5698_v53 = vsel %vm6511_vm9, 0, %v6510_v4  ;;  %v5714_v33 = vsel %vm5629_vm11, %v5713_v11, %v13279_v45  ;;  %v5790_v24 = vsel %vm5788_vm8, %v5789_v10, %v13323_v41  ;;  %v5842_v63 = vand.u32 8388607, %v5835_v0 }
 0x5c6   : > { %v5699_v32 = vsub.s32 32, %v5698_v53  ;;  %v5703_v29 = vsub.s32 4294967266, %v5698_v53  ;;  %v5791_v49 = vadd.s32 %v5790_v24, %v5786_v17  ;;  %v5853_v15 = vshrl.u32 %v13880_v37, %v14216_v56 }
 0x5c7   : > { %v5700_v21 = vshll.u32 %v13296_v8, %v5698_v53  ;;  %v5855_v48 = vshll.u32 %v13880_v37, %v14217_v12  ;;  %v5856_v45 = vshrl.u32 %v13881_v46, %v14216_v56  ;;  %v5858_v50 = vshll.u32 %v13881_v46, %v14217_v12 }
 0x5c8   : > { %v5701_v6 = vshrl.u32 %v5683_v5, %v5699_v32  ;;  %v5704_v47 = vadd.s32 127, %v5703_v29  ;;  %v5792_v52 = vadd.s32 536870912, %v5791_v49  ;;  %v5859_v30 = vshrl.u32 %v13882_v54, %v14216_v56 }
 0x5c9   : > { %vm5618_vm13 = vcmp.lt.s32.totalorder %v13341_v3, 2  ;;  %vm5619_vm10 = vcmp.eq.s32.totalorder %v13341_v3, 0  ;;  %v5852_v8 = vshll.u32 %v13889_v9, %v14217_v12  ;;  %v5857_v22 = vor.u32 %v5856_v45, %v5855_v48 }
 0x5ca   : > { %vm5615_vm1 = vweird.f32 %v14191_v62  ;;  %v5702_v2 = vor.u32 %v5701_v6, %v5700_v21  ;;  %v5705_v36 = vshll.u32 %v5704_v47, 23  ;;  %v13378_v44 = vshrl.u32 %v5792_v52, 30  ;;  %v14218_v62 = vld [vmem:[#allocation18_spill] sm:$0xff] }
 0x5cb   : > { %v5860_v18 = vor.u32 %v5859_v30, %v5858_v50  ;;  %vm5622_vm14 = vcmp.eq.s32.totalorder %v13341_v3, 2  ;;  %v5716_v39 = vsel %vm13345_vm7, 0, %v5714_v33  ;;  %v5851_v1 = vshrl.u32 %v13889_v9, %v14216_v56 }
 0x5cc   : > { %v5854_v25 = vor.u32 %v5853_v15, %v5852_v8  ;;  %v5706_v41 = vor.u32 4788187, %v5705_v36  ;;  %v5794_v7 = vshll.u32 %v13378_v44, 30  ;;  %v5843_v51 = vor.u32 8388608, %v5842_v63 }
 0x5cd   : > { %vm5869_vm12 = vcmp.lt.s32.totalorder %v12893_v61, 3  ;;  %v7339_v11 = vpop.eup %7338  ;;  %v5709_v55 = vcvt.s32.f32 %v5702_v2  ;;  %vm5867_vm4 = vcmp.lt.s32.totalorder %v12893_v61, 1  ;;  %v5872_v58 = vsel %vm5870_vm2, %v5860_v18, 2102212464 }
 0x5ce   : > { %v5881_v57 = vsel %vm5869_vm12, %v13128_v43, %v13233_v40  ;;  %v7341_v59 = vpop.eup %7340  ;;  %v5623_v4 = vxor.u32 2147483648, %v7339_v11  ;;  %v5707_v10 = vand.u32 2147483647, %v5706_v41  ;;  %v13394_v5 = vsub.s32 %v5791_v49, %v5794_v7 }
 0x5cf   : > { %v5879_v17 = vsel %vm5867_vm4, %v5857_v22, %v5860_v18  ;;  %v5620_v53 = vxor.u32 2147483648, %v7341_v59  ;;  %vm5868_vm5 = vcmp.lt.s32.totalorder %v12893_v61, 2  ;;  %v5875_v33 = vsel %vm5867_vm4, %v5854_v25, %v5857_v22 }
 0x5d0   : > { %v5877_v24 = vsel %vm5869_vm12, %v5860_v18, %v13226_v28  ;;  %v5624_v63 = vsel %vm5622_vm14, %v5623_v4, %v7341_v59  ;;  %v5710_v32 = vmul.f32 %v5709_v55, %v5707_v10  ;;  %v5797_v43 = vsub.s32 0, %v13394_v5  ;;  %v14219_v18 = vld [vmem:[#allocation29_spill] sm:$0xff]  ;;  %v14220_v55 = vld [vmem:[#allocation31_spill] sm:$0xff] }
 0x5d1   : > { %v5871_v40 = vsel %vm5867_vm4, %v5851_v1, %v5854_v25  ;;  %v5621_v29 = vsel %vm5619_vm10, %v7339_v11, %v5620_v53  ;;  %v5873_v49 = vsel %vm5869_vm12, %v5857_v22, %v5872_v58  ;;  %v5882_v56 = vsel %vm5868_vm5, %v5879_v17, %v5881_v57 }
 0x5d2   : > { %v5883_v15 = vshll.u32 %v5843_v51, 8  ;;  %v5625_v28 = vsel %vm5618_vm13, %v5621_v29, %v5624_v63  ;;  %v5711_v21 = vxor.u32 2147483648, %v5710_v32  ;;  %v6513_v12 = vmin.u32 %v5797_v43, %v13394_v5 }
 0x5d3   : > { %v5878_v48 = vsel %vm5868_vm5, %v5875_v33, %v5877_v24  ;;  %v5626_v45 = vsel %vm5615_vm1, nan, %v5625_v28  ;;  %v5720_v50 = vadd.s32 3, %v5716_v39  ;;  %v5874_v3 = vsel %vm5868_vm5, %v5871_v40, %v5873_v49 }
 0x5d4   : > { %v13416_v6 = vmul.u32.u64.low %v5883_v15, %v5882_v56  ;;  %v13417_v47 = vmul.u32.u64.high %v5883_v15, %v5882_v56, %v13416_v6  ;;  %6787 = vmatmul.mubr.f32.gmra.mrb[18].mxu1 %v5626_v45  ;;  %v5712_v52 = vsel %vm5629_vm11, %v5711_v21, %v5710_v32  ;;  %v5799_v30 = vclz %v6513_v12 }
 0x5d5   : > { %v5715_v8 = vsel %vm13345_vm7, %v14199_v35, %v5712_v52  ;;  %v13426_v22 = vmul.u32.u64.low %v5883_v15, %v5878_v48  ;;  %v13427_v2 = vmul.u32.u64.high %v5883_v15, %v5878_v48, %v13426_v22  ;;  %v5939_v36 = vand.u32 2147483647, %v14218_v62 }
 0x5d6   : > { %vm5974_vm2 = vcmp.lt.s32.totalorder %v14219_v18, 4  ;;  %7342 = vcosq.f32 %v5715_v8  ;;  %v6514_v39 = vadd.s32 4294967294, %v5799_v30  ;;  %v13440_v60 = vand.u32 3, %v5720_v50 }
 0x5d7   : > { %v5980_v1 = vsel %vm5974_vm2, %v13120_v31, 920167782  ;;  %v5984_v61 = vsel %vm5974_vm2, %v5970_v26, 1326507024  ;;  %7344 = vsinq.f32 %v5715_v8  ;;  %v5787_v25 = vadd.s32 %v13322_v38, %v13311_v13 }
 0x5d8   : > { %vm6515_vm0 = vcmp.lt.s32.totalorder %v6514_v39, 0  ;;  %v5890_v41 = vmul.u32 %v5883_v15, %v5874_v3  ;;  %vm5892_vm3 = vc.u32 %v13417_v47, %v13426_v22  ;;  %v5893_v51 = vadd.s32 1, %v13427_v2 }
 0x5d9   : > { %v5802_v7 = vsel %vm6515_vm0, 0, %v6514_v39  ;;  %v5946_v19 = vand.u32 8388607, %v5939_v36  ;;  %v5957_v34 = vshrl.u32 %v13880_v37, %v12900_v16  ;;  %v5956_v58 = vshll.u32 %v13889_v9, %v14220_v55 }
 0x5da   : > { %v5803_v26 = vsub.s32 32, %v5802_v7  ;;  %v5807_v11 = vsub.s32 4294967266, %v5802_v7  ;;  %v5959_v13 = vshll.u32 %v13880_v37, %v14220_v55  ;;  %vm5723_vm6 = vcmp.eq.s32.totalorder %v13440_v60, 0 }
 0x5db   : > { %v5894_v38 = vsel %vm5892_vm3, %v5893_v51, %v13427_v2  ;;  %v5960_v57 = vshrl.u32 %v13881_v46, %v12900_v16  ;;  %v5962_v59 = vshll.u32 %v13881_v46, %v14220_v55  ;;  %v5963_v4 = vshrl.u32 %v13882_v54, %v12900_v16 }
 0x5dc   : > { %vm5722_vm15 = vcmp.lt.s32.totalorder %v13440_v60, 2  ;;  %v5804_v10 = vshll.u32 %v13394_v5, %v5802_v7  ;;  %v5805_v17 = vshrl.u32 %v5787_v25, %v5803_v26  ;;  %v5808_v53 = vadd.s32 127, %v5807_v11 }
 0x5dd   : > { %v5895_v37 = vadd.s32 %v5894_v38, %v5890_v41  ;;  %vm5719_vm11 = vweird.f32 %v14199_v35  ;;  %vm5726_vm8 = vcmp.eq.s32.totalorder %v13440_v60, 2  ;;  %v5958_v33 = vor.u32 %v5957_v34, %v5956_v58 }
 0x5de   : > { %v5961_v24 = vor.u32 %v5960_v57, %v5959_v13  ;;  %v5964_v63 = vor.u32 %v5963_v4, %v5962_v59  ;;  %vm5733_vm7 = vcmp.lt.s32.totalorder %v14204_v27, 0  ;;  %v5806_v46 = vor.u32 %v5805_v17, %v5804_v10 }
 0x5df   : > { %v5809_v32 = vshll.u32 %v5808_v53, 23  ;;  %v5817_v54 = vsub.s32 4, %v13378_v44  ;;  %v5896_v43 = vadd.s32 536870912, %v5895_v37  ;;  %v5947_v40 = vor.u32 8388608, %v5946_v19 }
 0x5e0   : > { %v5955_v5 = vshrl.u32 %v13889_v9, %v12900_v16  ;;  %vm5971_vm9 = vcmp.lt.s32.totalorder %v14219_v18, 1  ;;  %vm5972_vm13 = vcmp.lt.s32.totalorder %v14219_v18, 2  ;;  %v7343_v29 = vpop.eup %7342  ;;  %vm5973_vm10 = vcmp.lt.s32.totalorder %v14219_v18, 3 }
 0x5e1   : > { %v5810_v49 = vor.u32 4788187, %v5809_v32  ;;  %v13473_v56 = vshrl.u32 %v5896_v43, 30  ;;  %v5983_v15 = vsel %vm5971_vm9, %v5961_v24, %v5964_v63  ;;  %v7345_v28 = vpop.eup %7344  ;;  %v5727_v21 = vxor.u32 2147483648, %v7343_v29 }
 0x5e2   : > { %v5979_v9 = vsel %vm5971_vm9, %v5958_v33, %v5961_v24  ;;  %v5981_v16 = vsel %vm5973_vm10, %v5964_v63, %v5980_v1  ;;  %v5985_v12 = vsel %vm5973_vm10, %v13120_v31, %v5984_v61  ;;  %v5724_v48 = vxor.u32 2147483648, %v7345_v28  ;;  %v13502_v61 = vld [vmem:[%s13665_s6] ss:$0 sm:$0xff] }
 0x5e3   : > { %v5811_v45 = vand.u32 2147483647, %v5810_v49  ;;  %v5813_v50 = vcvt.s32.f32 %v5806_v46  ;;  %v5898_v6 = vshll.u32 %v13473_v56, 30  ;;  %v5728_v52 = vsel %vm5726_vm8, %v5727_v21, %v7345_v28 }
 0x5e4   : > { %v5976_v30 = vsel %vm5974_vm2, %v5964_v63, 2102212464  ;;  %v5986_v3 = vsel %vm5972_vm13, %v5983_v15, %v5985_v12  ;;  %v5987_v8 = vshll.u32 %v5947_v40, 8  ;;  %v5725_v31 = vsel %vm5723_vm6, %v7343_v29, %v5724_v48 }
 0x5e5   : > { %v5814_v2 = vmul.f32 %v5813_v50, %v5811_v45  ;;  %v5899_v39 = vsub.s32 %v5895_v37, %v5898_v6  ;;  %v5982_v1 = vsel %vm5972_vm13, %v5979_v9, %v5981_v16  ;;  %v5729_v25 = vsel %vm5722_vm15, %v5725_v31, %v5728_v52 }
 0x5e6   : > { %v5975_v41 = vsel %vm5971_vm9, %v5955_v5, %v5958_v33  ;;  %v13508_v7 = vmul.u32.u64.low %v5987_v8, %v5986_v3  ;;  %v13509_v51 = vmul.u32.u64.high %v5987_v8, %v5986_v3, %v13508_v7  ;;  %v5730_v19 = vsel %vm5719_vm11, nan, %v5729_v25 }
 0x5e7   : > { %v5815_v34 = vxor.u32 2147483648, %v5814_v2  ;;  %v5901_v26 = vsub.s32 0, %v5899_v39  ;;  %v5977_v11 = vsel %vm5973_vm10, %v5961_v24, %v5976_v30  ;;  %6789 = vmatprep.mubr.f32.mxu1 %v5730_v19  ;;  %v5818_v60 = vsel %vm5733_vm7, %v5817_v54, %v13378_v44 }
 0x5e8   : > { %v13518_v55 = vmul.u32.u64.low %v5987_v8, %v5982_v1  ;;  %v13519_v58 = vmul.u32.u64.high %v5987_v8, %v5982_v1, %v13518_v55  ;;  %v6138_v13 = vadd.f32 %v13352_v23, %v13502_v61  ;;  %vm13526_vm1 = vcmp.le.f32.partialorder %v5731_v20, 0.7853982 }
 0x5e9   : > { %v5816_v38 = vsel %vm5733_vm7, %v5815_v34, %v5814_v2  ;;  %v6517_v57 = vmin.u32 %v5901_v26, %v5899_v39  ;;  %v6133_v44 = vadd.f32 %v13502_v61, %v13360_v14  ;;  %v5978_v23 = vsel %vm5972_vm13, %v5975_v41, %v5977_v11 }
 0x5ea   : > { %v5819_v59 = vsel %vm13526_vm1, %v14204_v27, %v5816_v38  ;;  %6212 = vst [vmem:[%s13539_s29 + $0x8] sm:$0xff] %v6138_v13  ;;  %v5820_v20 = vsel %vm13526_vm1, 0, %v5818_v60  ;;  %vm5996_vm14 = vc.u32 %v13509_v51, %v13518_v55  ;;  %v5997_v14 = vadd.s32 1, %v13519_v58 }
 0x5eb   : > { %7346 = vcosq.f32 %v5819_v59  ;;  %v5903_v4 = vclz %v6517_v57  ;;  %6211 = vst [vmem:[%s13539_s29] sm:$0xff] %v6133_v44  ;;  %v5994_v18 = vmul.u32 %v5987_v8, %v5978_v23  ;;  %v5824_v17 = vadd.s32 3, %v5820_v20 }
 0x5ec   : > { %7348 = vsinq.f32 %v5819_v59  ;;  %v5998_v53 = vsel %vm5996_vm14, %v5997_v14, %v13519_v58  ;;  %v5891_v24 = vadd.s32 %v13426_v22, %v13417_v47  ;;  %vm5823_vm0 = vweird.f32 %v14204_v27 }
 0x5ed   : > { %v6518_v10 = vadd.s32 4294967294, %v5903_v4  ;;  %v5999_v37 = vadd.s32 %v5998_v53, %v5994_v18  ;;  %v5825_v54 = vand.u32 3, %v5824_v17  ;;  %v5921_v31 = vsub.s32 4, %v13473_v56 }
 0x5ee   : > { %vm13558_vm3 = vcmp.le.f32.partialorder %v5835_v0, 0.7853982  ;;  %vm5837_vm6 = vcmp.lt.s32.totalorder %v14213_v42, 0  ;;  %vm5927_vm9 = vweird.f32 %v14213_v42  ;;  %vm5941_vm13 = vcmp.lt.s32.totalorder %v14218_v62, 0 }
 0x5ef   : > { %vm6519_vm12 = vcmp.lt.s32.totalorder %v6518_v10, 0  ;;  %v6000_v32 = vadd.s32 536870912, %v5999_v37  ;;  %vm5830_vm4 = vcmp.eq.s32.totalorder %v5825_v54, 2  ;;  %vm5826_vm5 = vcmp.lt.s32.totalorder %v5825_v54, 2 }
 0x5f0   : > { %v5906_v33 = vsel %vm6519_vm12, 0, %v6518_v10  ;;  %vm5827_vm2 = vcmp.eq.s32.totalorder %v5825_v54, 0  ;;  %v5922_v7 = vsel %vm5837_vm6, %v5921_v31, %v13473_v56  ;;  %v5995_v56 = vadd.s32 %v13518_v55, %v13509_v51 }
 0x5f1   : > { %v5907_v63 = vsub.s32 32, %v5906_v33  ;;  %v5911_v46 = vsub.s32 4294967266, %v5906_v33  ;;  %v5908_v43 = vshll.u32 %v5899_v39, %v5906_v33  ;;  %v13551_v29 = vshrl.u32 %v6000_v32, 30 }
 0x5f2   : > { %v5924_v60 = vsel %vm13558_vm3, 0, %v5922_v7  ;;  %vm5940_vm10 = vcmp.le.f32.partialorder %v5939_v36, 0.7853982 }
 0x5f3   : > { %v5909_v40 = vshrl.u32 %v5891_v24, %v5907_v63  ;;  %v5912_v5 = vadd.s32 127, %v5911_v46  ;;  %v6002_v21 = vshll.u32 %v13551_v29, 30  ;;  %v5928_v38 = vadd.s32 3, %v5924_v60 }
 0x5f4   : > { %v6025_v51 = vsub.s32 4, %v13551_v29 }
 0x5f5   : > { %v7347_v49 = vpop.eup %7346  ;;  %v5910_v15 = vor.u32 %v5909_v40, %v5908_v43  ;;  %v5913_v28 = vshll.u32 %v5912_v5, 23  ;;  %v6003_v47 = vsub.s32 %v5999_v37, %v6002_v21  ;;  %v6776_v27 = vpop.f32.mrb[18].mxu0  ;;  %v5929_v4 = vand.u32 3, %v5928_v38 }
 0x5f6   : > { %v7349_v9 = vpop.eup %7348  ;;  %v5831_v16 = vxor.u32 2147483648, %v7347_v49  ;;  %v6148_v34 = vadd.f32 %v6776_v27, %v13502_v61  ;;  %v6142_v26 = vpop.f32.mrb[19].mxu0  ;;  %v6026_v40 = vsel %vm5941_vm13, %v6025_v51, %v13551_v29 }
 0x5f7   : > { %v5828_v12 = vxor.u32 2147483648, %v7349_v9  ;;  %v5914_v48 = vor.u32 4788187, %v5913_v28  ;;  %v5917_v6 = vcvt.s32.f32 %v5910_v15  ;;  %v6005_v52 = vsub.s32 0, %v6003_v47 }
 0x5f8   : > { %v5832_v22 = vsel %vm5830_vm4, %v5831_v16, %v7349_v9  ;;  %v6143_v0 = vadd.f32 %v13502_v61, %v6142_v26  ;;  %6214 = vst [vmem:[%s13539_s29 + $0x18] sm:$0xff] %v6148_v34  ;;  %vm5934_vm11 = vcmp.eq.s32.totalorder %v5929_v4, 2  ;;  %vm5931_vm8 = vcmp.eq.s32.totalorder %v5929_v4, 0 }
 0x5f9   : > { %v5829_v45 = vsel %vm5827_vm2, %v7347_v49, %v5828_v12  ;;  %v5915_v50 = vand.u32 2147483647, %v5914_v48  ;;  %v6521_v2 = vmin.u32 %v6005_v52, %v6003_v47  ;;  %vm5930_vm7 = vcmp.lt.s32.totalorder %v5929_v4, 2 }
 0x5fa   : > { %v5833_v30 = vsel %vm5826_vm5, %v5829_v45, %v5832_v22  ;;  %6213 = vst [vmem:[%s13539_s29 + $0x10] sm:$0xff] %v6143_v0  ;;  %v6028_v49 = vsel %vm5940_vm10, 0, %v6026_v40  ;;  %vm6031_vm4 = vweird.f32 %v14218_v62 }
 0x5fb   : > { %v5834_v3 = vsel %vm5823_vm0, nan, %v5833_v30  ;;  %v5918_v8 = vmul.f32 %v5917_v6, %v5915_v50  ;;  %v6007_v1 = vclz %v6521_v2  ;;  %v6032_v15 = vadd.s32 3, %v6028_v49 }
 0x5fc   : > { %6790 = vmatmul.mubr.f32.gmra.mrb[20].mxu1 %v5834_v3 }
 0x5fd   : > { %v5919_v39 = vxor.u32 2147483648, %v5918_v8  ;;  %v6522_v19 = vadd.s32 4294967294, %v6007_v1  ;;  %v6033_v28 = vand.u32 3, %v6032_v15 }
 0x5ff   : > { %v5920_v41 = vsel %vm5837_vm6, %v5919_v39, %v5918_v8  ;;  %vm6523_vm15 = vcmp.lt.s32.totalorder %v6522_v19, 0  ;;  %vm6038_vm1 = vcmp.eq.s32.totalorder %v6033_v28, 2  ;;  %vm6035_vm14 = vcmp.eq.s32.totalorder %v6033_v28, 0 }
 0x600   : > { %v5923_v11 = vsel %vm13558_vm3, %v14213_v42, %v5920_v41  ;;  %v6010_v58 = vsel %vm6523_vm15, 0, %v6522_v19  ;;  %vm6034_vm12 = vcmp.lt.s32.totalorder %v6033_v28, 2 }
 0x601   : > { %7350 = vcosq.f32 %v5923_v11  ;;  %v6011_v13 = vsub.s32 32, %v6010_v58  ;;  %v6015_v35 = vsub.s32 4294967266, %v6010_v58  ;;  %v6012_v57 = vshll.u32 %v6003_v47, %v6010_v58 }
 0x602   : > { %7352 = vsinq.f32 %v5923_v11 }
 0x603   : > { %v6013_v44 = vshrl.u32 %v5995_v56, %v6011_v13  ;;  %v6016_v59 = vadd.s32 127, %v6015_v35 }
 0x605   : > { %v6014_v23 = vor.u32 %v6013_v44, %v6012_v57  ;;  %v6017_v20 = vshll.u32 %v6016_v59, 23 }
 0x607   : > { %v6018_v14 = vor.u32 4788187, %v6017_v20  ;;  %v6021_v17 = vcvt.s32.f32 %v6014_v23 }
 0x609   : > { %v6019_v18 = vand.u32 2147483647, %v6018_v14 }
 0x60b   : > { %v7351_v10 = vpop.eup %7350  ;;  %v6022_v24 = vmul.f32 %v6021_v17, %v6019_v18 }
 0x60c   : > { %v7353_v53 = vpop.eup %7352  ;;  %v5935_v37 = vxor.u32 2147483648, %v7351_v10 }
 0x60d   : > { %v5932_v33 = vxor.u32 2147483648, %v7353_v53  ;;  %v6023_v46 = vxor.u32 2147483648, %v6022_v24 }
 0x60e   : > { %v5936_v55 = vsel %vm5934_vm11, %v5935_v37, %v7353_v53 }
 0x60f   : > { %v5933_v63 = vsel %vm5931_vm8, %v7351_v10, %v5932_v33  ;;  %v6024_v43 = vsel %vm5941_vm13, %v6023_v46, %v6022_v24 }
 0x610   : > { %v5937_v32 = vsel %vm5930_vm7, %v5933_v63, %v5936_v55  ;;  %v6027_v5 = vsel %vm5940_vm10, %v14218_v62, %v6024_v43 }
 0x611   : > { %v5938_v54 = vsel %vm5927_vm9, nan, %v5937_v32  ;;  %7354 = vcosq.f32 %v6027_v5 }
 0x612   : > { %6792 = vmatprep.mubr.f32.mxu1 %v5938_v54  ;;  %7356 = vsinq.f32 %v6027_v5 }
 0x61b   : > { %v7355_v21 = vpop.eup %7354 }
 0x61c   : > { %v7357_v42 = vpop.eup %7356  ;;  %v6039_v9 = vxor.u32 2147483648, %v7355_v21 }
 0x61d   : > { %v6036_v16 = vxor.u32 2147483648, %v7357_v42 }
 0x61e   : > { %v6040_v36 = vsel %vm6038_vm1, %v6039_v9, %v7357_v42 }
 0x61f   : > { %v6037_v29 = vsel %vm6035_vm14, %v7355_v21, %v6036_v16 }
 0x620   : > { %v6041_v12 = vsel %vm6034_vm12, %v6037_v29, %v6040_v36 }
 0x621   : > { %v6042_v48 = vsel %vm6031_vm4, nan, %v6041_v12 }
 0x622   : > { %6793 = vmatmul.mubr.f32.gmra.mrb[22].mxu1 %v6042_v48 }
 0x632   : > { %v6779_v47 = vpop.f32.mrb[20].mxu0 }
 0x633   : > { %v6158_v22 = vadd.f32 %v6779_v47, %v13502_v61  ;;  %v6152_v45 = vpop.f32.mrb[21].mxu0 }
 0x634   : > { %v6153_v50 = vadd.f32 %v13502_v61, %v6152_v45 }
 0x635   : > { %6216 = vst [vmem:[%s13539_s29 + $0x28] sm:$0xff] %v6158_v22 }
 0x636   : > { %6215 = vst [vmem:[%s13539_s29 + $0x20] sm:$0xff] %v6153_v50 }
 0x667   : > { %v6782_v6 = vpop.f32.mrb[22].mxu0 }
 0x668   : > { %v6168_v52 = vadd.f32 %v6782_v6, %v13502_v61  ;;  %v6162_v30 = vpop.f32.mrb[23].mxu0 }
 0x669   : > { %v6163_v62 = vadd.f32 %v13502_v61, %v6162_v30 }
 0x66a   : > { %6218 = vst [vmem:[%s13539_s29 + $0x38] sm:$0xff] %v6168_v52 }
 0x66b   : > { %6217 = vst [vmem:[%s13539_s29 + $0x30] sm:$0xff] %v6163_v62 }
 0x67b   : > { %v6785_v3 = vpop.f32.mrb[16].mxu1 }
 0x67c   : > { %v6178_v8 = vadd.f32 %v6785_v3, %v13502_v61  ;;  %v6172_v31 = vpop.f32.mrb[17].mxu1 }
 0x67d   : > { %v6173_v2 = vadd.f32 %v13502_v61, %v6172_v31 }
 0x67e   : > { %6220 = vst [vmem:[%s13539_s29 + $0x48] sm:$0xff] %v6178_v8 }
 0x67f   : > { %6219 = vst [vmem:[%s13539_s29 + $0x40] sm:$0xff] %v6173_v2 }
 0x6a7   : > { %v6788_v39 = vpop.f32.mrb[18].mxu1 }
 0x6a8   : > { %v6188_v1 = vadd.f32 %v6788_v39, %v13502_v61  ;;  %v6182_v25 = vpop.f32.mrb[19].mxu1 }
 0x6a9   : > { %v6183_v27 = vadd.f32 %v13502_v61, %v6182_v25 }
 0x6aa   : > { %6222 = vst [vmem:[%s13539_s29 + $0x58] sm:$0xff] %v6188_v1 }
 0x6ab   : > { %6221 = vst [vmem:[%s13539_s29 + $0x50] sm:$0xff] %v6183_v27 }
 0x6cf   : > { %v6791_v41 = vpop.f32.mrb[20].mxu1 }
 0x6d0   : > { %v6198_v7 = vadd.f32 %v6791_v41, %v13502_v61  ;;  %v6192_v19 = vpop.f32.mrb[21].mxu1 }
 0x6d1   : > { %v6193_v34 = vadd.f32 %v13502_v61, %v6192_v19 }
 0x6d2   : > { %6224 = vst [vmem:[%s13539_s29 + $0x68] sm:$0xff] %v6198_v7 }
 0x6d3   : > { %6223 = vst [vmem:[%s13539_s29 + $0x60] sm:$0xff] %v6193_v34 }
 0x6f5   : > { %v6794_v26 = vpop.f32.mrb[22].mxu1 }
 0x6f6   : > { %v6208_v11 = vadd.f32 %v6794_v26, %v13502_v61  ;;  %v6202_v0 = vpop.f32.mrb[23].mxu1 }
 0x6f7   : > { %v6203_v60 = vadd.f32 %v13502_v61, %v6202_v0 }
 0x6f8   : > { %6226 = vst [vmem:[%s13539_s29 + $0x78] sm:$0xff] %v6208_v11 }
 0x6f9   : > { %6225 = vst [vmem:[%s13539_s29 + $0x70] sm:$0xff] %v6203_v60 }
 0x6fa   : > { %7375 = shalt.err (!%p7372_p3)
}
 0x6fb   : > { %s7376_s20 = scalar_lea.hbm %s13609_s15, 2048  ;;  %s7380_s23 = scalar_lea.hbm %s13666_s7, 6144 }
 0x6fc   : > { %p7377_p4 = scmp.ne.s32.totalorder %s13609_s15, %s7376_s20  ;;  %p7381_p9 = scmp.lt.u32.totalorder %s13609_s15, %s13666_s7 }
 0x6fd   : > { %p7382_p10 = scmp.lt.u32.totalorder %s7380_s23, %s7376_s20  ;;  %p7384_p12 = scmp.lt.u32.totalorder %s7376_s20, %s13609_s15 }
 0x6fe   : > { %p7378_p7 = pnand %p7377_p4, %p7515_p5 }
 0x6ff   : > { %p7383_p11 = por %p7382_p10, %p7381_p9 }
 0x700   : > { %p7379_p8 = pneg %p7378_p7 }
 0x701   : > { %p7385_p13 = por %p7384_p12, %p7383_p11 }
 0x703   : > { %p7386_p0 = pnand %p7385_p13, %p7379_p8 }
 0x705   : > { %7389 = shalt.err (!%p7386_p0)
}
 0x706   : > { %s7435_s13 = smov 128   ;;  %s7436_s14 = smov 8  }
 0x707   : > { %7099 = dma.vmem_to_hbm [thread:$0]  (%p7515_p5), %s13611_s9, 2048, %s13609_s15, %s13618_s28, %s7435_s13, %s7435_s13, %s7436_s14  }
 0x708 PF: > { %p7105_p1 = scmp.ge.s32.totalorder %s7424_s27, 2  ;;  %s6256_s16 = sand.u32 1, %s7412_s24  }
 0x709   : > { %s6257_s17 = scalar_lea.sflag [#allocation3], %s6256_s16 }
 0x70a   : > { %p7102_p2 = pnand %p7105_p1, %p7519_p6 }
 0x70c   : > { %7407 = dma.done.wait (!%p7102_p2), %s6257_s17, 2048  }
 0x70d   : > { %7409 = vsyncadd (!%p7102_p2), %s6257_s17, 4294965248  ;;  %p17_p3 = scmp.ge.s32.totalorder %s7502_s30, 5   ;;  %s14225_s24 = smov %s7416_s25 }
 0x70e   : > { %s14226_s25 = smov %s7420_s26  ;;  %s14227_s26 = smov %s7513_s10 }
 0x70f   : > { %s14228_s27 = smov %s7502_s30  ;;  %19 = sbr.rel (!%p17_p3) target bundleno = 3 (0x3), region = 85 }
 0x716   :  { %6262 = vsyncpa [#allocation3], 1 }
 0x717   :  { %6264 = vsyncpa [#allocation3 + $0x1], 1 }

</bundles_post_ra>
